<compile_context>
chip_gen: v7x
topology: tpu7x:2x2x1
jax: 0.10.0
libtpu: 0.0.40
codegen_flags: <defaults>
</compile_context>

<pallas_src>
import jax
import jax.numpy as jnp
from jax.experimental import pallas as pl
from jax.experimental.pallas import tpu as pltpu

GEM_P = 3.0
GEM_EPS = 1e-6


def _net_head_kernel(feat_ref, w_ref, b_ref, tgt_ref, logits_ref, loss_ref):
    """GeM pool over spatial + fc_head linear + DenseCrossEntropy (per tile).

    feat_ref  : [TB, C, HW]   backbone features, NCHW order (HW on lanes)
    w_ref     : [N, C]        fc_head weight (PyTorch nn.Linear layout)
    b_ref     : [1, N]        fc_head bias
    tgt_ref   : [1, TB, N]    dense (soft) class target for this batch tile
    logits_ref: [1, TB, N]    class logits (output)
    loss_ref  : [1, 1, 128]   per-tile CE partial sum (broadcast across lanes)
    """
    # Keep the big tensor in its DMA'd dtype (bf16 stays bf16 on v6e/v7x; on
    # v5e Mosaic widens per-op). Only the spatial accumulation is forced f32.
    x = feat_ref[...]                                   # [TB, C, HW]

    # --- GeM pooling: mean over spatial of clamp(x, eps)^3, then cube root ---
    xc = jnp.maximum(x, GEM_EPS)                        # weak-typed eps keeps dtype
    x3 = (xc * xc) * xc                                 # VPU muls (no EUP pow on big tensor)
    pooled = jnp.mean(x3.astype(jnp.float32), axis=-1)  # [TB, C]  f32 spatial accumulation
    pooled = pooled ** (1.0 / GEM_P)                    # tiny transcendental on [TB, C] only

    # --- dropout is identity at inference time ---

    # --- fc_head: logits = pooled @ W^T + b (VPU broadcast-mul + lane reduce;
    #     N=4 and TB small -> not worth an MXU push/pop on this epilogue) ---
    w = w_ref[...].astype(jnp.float32)                  # [N, C]
    bias = b_ref[...].astype(jnp.float32)               # [1, N], read once
    logits = jnp.sum(pooled[:, None, :] * w[None, :, :], axis=-1) + bias  # [TB, N]
    logits_ref[0] = logits

    # --- DenseCrossEntropy partial sum for this batch tile ---
    tgt = tgt_ref[0].astype(jnp.float32)                # [TB, N]; padded rows are all-zero
    m = jnp.max(logits, axis=-1, keepdims=True)
    z = logits - m
    lse = jnp.log(jnp.sum(jnp.exp(z), axis=-1, keepdims=True))
    tile_loss = jnp.sum((lse - z) * tgt)                # sum_b sum_n (-logprobs * target)
    loss_ref[...] = jnp.full(loss_ref.shape, tile_loss, dtype=jnp.float32)


def _pick_block_b(batch, channels, hw, itemsize, target_bytes=8 << 20):
    """Batch-tile size aiming at ~8 MiB feature blocks.

    2x double-buffered 8 MiB = 16 MiB for the feat input: well under the v7x
    32 MiB scoped-VMEM default and trivial on v5e/v6e's 128 MiB, while keeping
    the ~0.35 us/grid-step overhead small even at v7x's 3.2 TB/s HBM.
    Capped so the grid has >=2 tiles: the "parallel" batch axis then shards
    across v7x's 2 TensorCores (harmless on v5e/v6e).
    """
    per_sample = max(1, channels * hw * itemsize)
    tb = max(1, min(batch, target_bytes // per_sample))
    if batch >= 2:
        tb = min(tb, pl.cdiv(batch, 2))   # guarantee >= 2 grid tiles
    return int(tb)


def net_head_forward(feat_nchw, fc_weight, fc_bias, target,
                     seg_weight=1.0, block_b=None):
    """feat_nchw: [B, C, H, W]  backbone output (PyTorch NCHW, any float dtype)
       fc_weight: [N, C]        PyTorch nn.Linear layout (NOT transposed)
       fc_bias  : [N]
       target   : [B, N]        dense class target
    """
    B, C, H, W = feat_nchw.shape
    N = fc_weight.shape[0]
    HW = H * W

    # Consume the backbone NCHW layout directly: [B, C, HW] is a pure metadata
    # reshape (no HBM pass); the GeM reduction runs over the lane (HW) axis.
    feat = feat_nchw.reshape(B, C, HW)

    if block_b is None:
        block_b = _pick_block_b(B, C, HW, feat.dtype.itemsize)
    n_tiles = pl.cdiv(B, block_b)
    B_pad = n_tiles * block_b

    tgt = target.astype(jnp.float32)
    if B_pad != B:
        # Zero-padded batch tail: zero targets contribute exactly 0 to the CE
        # partial sums; zero features clamp to eps so logits stay finite.
        feat = jnp.pad(feat, ((0, B_pad - B), (0, 0), (0, 0)))
        tgt = jnp.pad(tgt, ((0, B_pad - B), (0, 0)))

    tgt3 = tgt.reshape(n_tiles, block_b, N)
    b2 = fc_bias.reshape(1, N)

    logits3, loss_parts = pl.pallas_call(
        _net_head_kernel,
        out_shape=(
            jax.ShapeDtypeStruct((n_tiles, block_b, N), jnp.float32),
            jax.ShapeDtypeStruct((n_tiles, 1, 128), jnp.float32),
        ),
        grid=(n_tiles,),
        in_specs=[
            pl.BlockSpec((block_b, C, HW), lambda i: (i, 0, 0)),
            pl.BlockSpec((N, C), lambda i: (0, 0)),
            pl.BlockSpec((1, N), lambda i: (0, 0)),
            pl.BlockSpec((1, block_b, N), lambda i: (i, 0, 0)),
        ],
        out_specs=(
            pl.BlockSpec((1, block_b, N), lambda i: (i, 0, 0)),
            pl.BlockSpec((1, 1, 128), lambda i: (i, 0, 0)),
        ),
        compiler_params=pltpu.CompilerParams(
            dimension_semantics=("parallel",)),
    )(feat, fc_weight, b2, tgt3)

    logits = logits3.reshape(B_pad, N)[:B]
    cls_loss = jnp.sum(loss_parts[:, 0, 0]) / B       # batch mean over the TRUE B

    # TODO(synk): seg branch (UnetDecoder + SegmentationHead + BCEWithLogits)
    #             is not implementable without the smp library; this is the
    #             is_annotated.sum() == 0 path of the original forward.
    seg_loss = jnp.zeros_like(cls_loss)
    loss = cls_loss + seg_weight * seg_loss

    return {
        "loss": loss,
        "class_loss2": cls_loss,
        "seg_loss2": seg_loss,
        "class_logits": logits,
        "class_target": target.astype(jnp.float32),
    }


if __name__ == "__main__":
    # Shapes consistent with an efficientnet_b0-style backbone:
    # backbone_out = 320 channels, 8x8 final feature map, 4 classes, batch 4.
    B, C, H, W, N = 4, 320, 8, 8, 4
    key = jax.random.PRNGKey(0)
    k1, k2, k3, k4 = jax.random.split(key, 4)

    feat = jax.random.normal(k1, (B, C, H, W), dtype=jnp.float32)
    fc_w = 0.02 * jax.random.normal(k2, (N, C), dtype=jnp.float32)
    fc_b = 0.01 * jax.random.normal(k3, (N,), dtype=jnp.float32)
    tgt_idx = jax.random.randint(k4, (B,), 0, N)
    target = jax.nn.one_hot(tgt_idx, N, dtype=jnp.float32)

    # block_b=2 -> grid=(2,): exercises the pipelined batch tiling and the
    # per-tile loss accumulation path (auto-sizing would also pick 2 here).
    out = net_head_forward(feat, fc_w, fc_b, target, seg_weight=1.0, block_b=2)
    jax.block_until_ready(out["loss"])
    jax.block_until_ready(out["class_logits"])

    # quick sanity check against a pure-JAX reference
    pooled_ref = jnp.mean(jnp.maximum(feat, GEM_EPS) ** GEM_P,
                          axis=(2, 3)) ** (1.0 / GEM_P)
    logits_ref = pooled_ref @ fc_w.T + fc_b
    lp_ref = jax.nn.log_softmax(logits_ref, axis=-1)
    loss_ref = jnp.mean(jnp.sum(-lp_ref * target, axis=-1))
    assert jnp.allclose(out["class_logits"], logits_ref, atol=1e-4, rtol=1e-4)
    assert jnp.allclose(out["class_loss2"], loss_ref, atol=1e-4, rtol=1e-4)
    assert jnp.allclose(out["loss"], loss_ref, atol=1e-4, rtol=1e-4)

    # also exercise the zero-padded batch-tail path (B=3 with block_b=2)
    out2 = net_head_forward(feat[:3], fc_w, fc_b, target[:3],
                            seg_weight=1.0, block_b=2)
    jax.block_until_ready(out2["loss"])
    loss_ref3 = jnp.mean(jnp.sum(-jax.nn.log_softmax(logits_ref[:3], -1)
                                 * target[:3], axis=-1))
    assert jnp.allclose(out2["class_logits"], logits_ref[:3], atol=1e-4, rtol=1e-4)
    assert jnp.allclose(out2["class_loss2"], loss_ref3, atol=1e-4, rtol=1e-4)

    print("KERNEL_OK")
</pallas_src>

<mosaic_0001>
module attributes {stable_mosaic.version = 11 : i64} {
  func.func @_net_head_kernel(%arg0: i32, %arg1: memref<2x320x64xf32, #tpu.memory_space<vmem>>, %arg2: memref<4x320xf32, #tpu.memory_space<vmem>>, %arg3: memref<1x4xf32, #tpu.memory_space<vmem>>, %arg4: memref<1x2x4xf32, #tpu.memory_space<vmem>>, %arg5: memref<1x2x4xf32, #tpu.memory_space<vmem>>, %arg6: memref<1x1x128xf32, #tpu.memory_space<vmem>>) attributes {dimension_semantics = [#tpu.dimension_semantics<parallel>], iteration_bounds = array<i64: 2>, scalar_prefetch = 0 : i64, scratch_operands = 0 : i64, tpu.core_type = #tpu.core_type<tc>, window_params = [{transform_indices = @transform_0, window_bounds = array<i64: 2, 320, 64>}, {pipeline_mode = #tpu.pipeline_mode<synchronous>, transform_indices = @transform_1, window_bounds = array<i64: 4, 320>}, {pipeline_mode = #tpu.pipeline_mode<synchronous>, transform_indices = @transform_2, window_bounds = array<i64: 1, 4>}, {transform_indices = @transform_3, window_bounds = array<i64: 1, 2, 4>}, {transform_indices = @transform_4, window_bounds = array<i64: 1, 2, 4>}, {transform_indices = @transform_5, window_bounds = array<i64: 1, 1, 128>}]} {
    %c0 = arith.constant 0 : index
    %c0_0 = arith.constant 0 : index
    %c0_1 = arith.constant 0 : index
    %0 = vector.load %arg1[%c0, %c0_0, %c0_1] : memref<2x320x64xf32, #tpu.memory_space<vmem>>, vector<2x320x64xf32>
    %cst = arith.constant 9.99999997E-7 : f32
    %1 = vector.broadcast %cst : f32 to vector<2x320x64xf32>
    %2 = arith.maximumf %0, %1 : vector<2x320x64xf32>
    %3 = arith.mulf %2, %2 : vector<2x320x64xf32>
    %4 = arith.mulf %3, %2 : vector<2x320x64xf32>
    %cst_2 = arith.constant dense<0.000000e+00> : vector<2x320xf32>
    %5 = vector.multi_reduction <add>, %4, %cst_2 [2] : vector<2x320x64xf32> to vector<2x320xf32>
    %cst_3 = arith.constant 6.400000e+01 : f32
    %6 = vector.broadcast %cst_3 : f32 to vector<2x320xf32>
    %7 = arith.divf %5, %6 : vector<2x320xf32>
    %cst_4 = arith.constant 0.333333343 : f32
    %8 = vector.broadcast %cst_4 : f32 to vector<2x320xf32>
    %9 = math.powf %7, %8 : vector<2x320xf32>
    %c0_5 = arith.constant 0 : index
    %c0_6 = arith.constant 0 : index
    %10 = vector.load %arg2[%c0_5, %c0_6] : memref<4x320xf32, #tpu.memory_space<vmem>>, vector<4x320xf32>
    %c0_7 = arith.constant 0 : index
    %c0_8 = arith.constant 0 : index
    %11 = vector.load %arg3[%c0_7, %c0_8] : memref<1x4xf32, #tpu.memory_space<vmem>>, vector<1x4xf32>
    %12 = vector.shape_cast %9 : vector<2x320xf32> to vector<2x1x320xf32>
    %13 = vector.shape_cast %10 : vector<4x320xf32> to vector<1x4x320xf32>
    %14 = vector.broadcast %12 : vector<2x1x320xf32> to vector<2x4x320xf32>
    %15 = vector.broadcast %13 : vector<1x4x320xf32> to vector<2x4x320xf32>
    %16 = arith.mulf %14, %15 : vector<2x4x320xf32>
    %cst_9 = arith.constant dense<0.000000e+00> : vector<2x4xf32>
    %17 = vector.multi_reduction <add>, %16, %cst_9 [2] : vector<2x4x320xf32> to vector<2x4xf32>
    %18 = vector.broadcast %11 : vector<1x4xf32> to vector<2x4xf32>
    %19 = arith.addf %17, %18 : vector<2x4xf32>
    %c0_10 = arith.constant 0 : index
    %c0_11 = arith.constant 0 : index
    %c0_12 = arith.constant 0 : index
    %20 = vector.load %arg5[%c0_10, %c0_11, %c0_12] : memref<1x2x4xf32, #tpu.memory_space<vmem>>, vector<1x2x4xf32>
    %21 = vector.shape_cast %20 : vector<1x2x4xf32> to vector<2x4xf32>
    %22 = vector.shape_cast %19 : vector<2x4xf32> to vector<1x2x4xf32>
    tpu.vector_store %arg5[%c0_10, %c0_11, %c0_12], %22 {strides = array<i32>} : memref<1x2x4xf32, #tpu.memory_space<vmem>>, vector<1x2x4xf32>,
    %c0_13 = arith.constant 0 : index
    %c0_14 = arith.constant 0 : index
    %c0_15 = arith.constant 0 : index
    %23 = vector.load %arg4[%c0_13, %c0_14, %c0_15] : memref<1x2x4xf32, #tpu.memory_space<vmem>>, vector<1x2x4xf32>
    %24 = vector.shape_cast %23 : vector<1x2x4xf32> to vector<2x4xf32>
    %cst_16 = arith.constant dense<0xFF800000> : vector<2xf32>
    %25 = vector.multi_reduction <maximumf>, %19, %cst_16 [1] : vector<2x4xf32> to vector<2xf32>
    %26 = vector.shape_cast %25 : vector<2xf32> to vector<2x1xf32>
    %27 = vector.broadcast %26 : vector<2x1xf32> to vector<2x4xf32>
    %28 = arith.subf %19, %27 : vector<2x4xf32>
    %29 = math.exp %28 : vector<2x4xf32>
    %cst_17 = arith.constant dense<0.000000e+00> : vector<2xf32>
    %30 = vector.multi_reduction <add>, %29, %cst_17 [1] : vector<2x4xf32> to vector<2xf32>
    %31 = vector.shape_cast %30 : vector<2xf32> to vector<2x1xf32>
    %32 = math.log %31 : vector<2x1xf32>
    %33 = vector.broadcast %32 : vector<2x1xf32> to vector<2x4xf32>
    %34 = arith.subf %33, %28 : vector<2x4xf32>
    %35 = arith.mulf %34, %24 : vector<2x4xf32>
    %36 = vector.shape_cast %35 : vector<2x4xf32> to vector<1x2x4xf32>
    %cst_18 = arith.constant dense<0.000000e+00> : vector<1xf32>
    %37 = vector.multi_reduction <add>, %36, %cst_18 [1, 2] : vector<1x2x4xf32> to vector<1xf32>
    %38 = vector.shape_cast %37 : vector<1xf32> to vector<1x1x1xf32>
    %39 = vector.extract %38[0, 0, 0] : f32 from vector<1x1x1xf32>
    %40 = vector.broadcast %39 : f32 to vector<1x1x128xf32>
    %c0_19 = arith.constant 0 : index
    %c0_20 = arith.constant 0 : index
    %c0_21 = arith.constant 0 : index
    %41 = vector.load %arg6[%c0_19, %c0_20, %c0_21] : memref<1x1x128xf32, #tpu.memory_space<vmem>>, vector<1x1x128xf32>
    tpu.vector_store %arg6[%c0_19, %c0_20, %c0_21], %40 {strides = array<i32>} : memref<1x1x128xf32, #tpu.memory_space<vmem>>, vector<1x1x128xf32>,
    return
  }
  func.func @transform_0(%arg0: i32) -> (i32, i32, i32) {
    %c0_i32 = arith.constant 0 : i32
    %c0_i32_0 = arith.constant 0 : i32
    %c0_i32_1 = arith.constant 0 : i32
    return %arg0, %c0_i32, %c0_i32_0 : i32, i32, i32
  }
  func.func @transform_1(%arg0: i32) -> (i32, i32) {
    %c0_i32 = arith.constant 0 : i32
    %c0_i32_0 = arith.constant 0 : i32
    %c0_i32_1 = arith.constant 0 : i32
    return %c0_i32, %c0_i32_0 : i32, i32
  }
  func.func @transform_2(%arg0: i32) -> (i32, i32) {
    %c0_i32 = arith.constant 0 : i32
    %c0_i32_0 = arith.constant 0 : i32
    %c0_i32_1 = arith.constant 0 : i32
    return %c0_i32, %c0_i32_0 : i32, i32
  }
  func.func @transform_3(%arg0: i32) -> (i32, i32, i32) {
    %c0_i32 = arith.constant 0 : i32
    %c0_i32_0 = arith.constant 0 : i32
    %c0_i32_1 = arith.constant 0 : i32
    return %arg0, %c0_i32, %c0_i32_0 : i32, i32, i32
  }
  func.func @transform_4(%arg0: i32) -> (i32, i32, i32) {
    %c0_i32 = arith.constant 0 : i32
    %c0_i32_0 = arith.constant 0 : i32
    %c0_i32_1 = arith.constant 0 : i32
    return %arg0, %c0_i32, %c0_i32_0 : i32, i32, i32
  }
  func.func @transform_5(%arg0: i32) -> (i32, i32, i32) {
    %c0_i32 = arith.constant 0 : i32
    %c0_i32_0 = arith.constant 0 : i32
    %c0_i32_1 = arith.constant 0 : i32
    return %arg0, %c0_i32, %c0_i32_0 : i32, i32, i32
  }
}

</mosaic_0001>

<bundles_post_ra>
// kernel: tpu_custom_call.1
= control target key start
LH: loop header
LB: loop body
LE: loop exit
PB: predicated region body
PF: predicated region fallthrough
CT: control target
= control target key end

     0   :  { %11 = vsyncpa [#allocation3], 0  ;;  %s13211_s0 = inlined_call_operand.vmem [shape: f32[4,320,64], index: 0, kind: input, shape index: {}]   ;;  %s13212_s1 = inlined_call_operand.vmem [shape: f32[4,320], index: 1, kind: input, shape index: {}]   ;;  %s13213_s2 = inlined_call_operand.vmem [shape: f32[1,4], index: 2, kind: input, shape index: {}]   ;;  %s13214_s3 = inlined_call_operand.vmem [shape: f32[2,2,4], index: 3, kind: input, shape index: {}]   ;;  %s13215_s4 = inlined_call_operand.hbm [shape: f32[2,2,4], index: 4, kind: output, shape index: {0}]   ;;  %s13216_s5 = inlined_call_operand.hbm [shape: f32[2,1,128], index: 5, kind: output, shape index: {1}]  }
   0x1   :  { %13 = vsyncpa [#allocation3 + $0x1], 0 }
   0x2   :  { %14 = vsyncpa [#allocation5], 0 }
   0x3   :  { %16 = vsyncpa [#allocation5 + $0x1], 0  ;;  %s7583_s18 = smov 0   ;;  %s7585_s19 = smov 0  }
   0x4   :  { %s7587_s20 = smov 0   ;;  %s7589_s21 = smov 0  }
   0x5 LB: > { %s7604_s22 = sadd.s32 4294967295, %s7548_s21   ;;  %s5623_s23 = sadd.s32 4294967294, %s7548_s21   ;;  %s7548_s21 = sphi %s7589_s21, %s15198_s21   ;;  %s7544_s20 = sphi %s7587_s20, %s15197_s20   ;;  %s7540_s19 = sphi %s7585_s19, %s15196_s19   ;;  %s7536_s18 = sphi %s7583_s18, %s15195_s18  }
   0x6   : > { %s7608_s24 = sadd.s32 1, %s7548_s21   ;;  %s123_s25 = sadd.s32 1, %s7544_s20 }
   0x7   : > { %s120_s26 = ssub.s32 %s7548_s21, %s7608_s24  ;;  %p133_p0 = scmp.ne.s32.totalorder %s7544_s20, %s7540_s19 }
   0x8   : > { %p121_p1 = scmp.eq.s32.totalorder %s120_s26, 0  ;;  %p134_p2 = scmp.eq.s32.totalorder %s7604_s22, 1 }
   0x9   : > { %p139_p3 = scmp.ne.s32.totalorder %s7540_s19, %s7536_s18  ;;  %p140_p4 = scmp.eq.s32.totalorder %s5623_s23, 1 }
   0xa   : > { %s7619_s27 = scalar_select %p121_p1, %s7544_s20, %s123_s25  }
   0xb   : > { %p7621_p5 = por %p134_p2, %p133_p0  ;;  %p7625_p6 = por %p140_p4, %p139_p3 }
   0xc   : > { %p5626_p7 = scmp.ge.s32.totalorder %s7548_s21, 1  ;;  %p207_p8 = scmp.lt.s32.totalorder %s7548_s21, 3 }
   0xe   : > { %p208_p9 = pnand %p5626_p7, %p207_p8 }
  0x10   : > { %211 = sbr.rel (%p208_p9) target bundleno = 2442 (0x98a), region = 36 }
  0x17   : > { %s5628_s30 = sshll.u32 %s7604_s22, 1  ;;  %vm575_vm0 = vcmask 523264   ;;  %s13116_s16 = sand.u32 1, %s7540_s19  }
  0x18   : > { %p245_p10 = scmp.lt.s32.totalorder %s5628_s30, 3  ;;  %s5627_s17 = sshll.u32 %s13116_s16, 1 }
  0x19   : > { %s13119_s23 = scalar_lea.vmem [#allocation2], %s5627_s17  ;;  %p251_p11 = scmp.lt.s32.totalorder %s7604_s22, 1 }
  0x1a   : > { %s15200_s30 = smov (!%p245_p10, %s5628_s30), 3  ;;  %s5633_s8 = sshll.u32 %s7604_s22, 5 }
  0x1b   : > { %s5637_s6 = smul.u32 320, %s15200_s30  ;;  %s13142_s11 = scalar_lea.hbm %s13215_s4, %s5633_s8 }
  0x1c   : > { %s252_s25 = scalar_select %p251_p11, %s7604_s22, 1 }
  0x1d   : > { %s7635_s9 = scalar_lea.vmem %s13211_s0, %s5637_s6  ;;  %s5511_s12 = sshll.u32 %s13119_s23, 4  ;;  %s5512_s12 = int_to_ptr.vmem [resolvable:$true] %s5511_s12 }
  0x1e   : > { %v257_v0 = vld [vmem:[%s7635_s9 + $0x10] sm:$0xff]  ;;  %v255_v1 = vld [vmem:[%s7635_s9] sm:$0xff]  ;;  %v258_v2 = vld [vmem:[%s7635_s9 + $0x18] sm:$0xff]  ;;  %s5630_s26 = sshll.u32 %s252_s25, 1  ;;  %s5494_s13 = scalar_lea.sflag [#allocation3], %s13116_s16 }
  0x1f   : > { %v337_v3 = vmax.f32 %v257_v0, 1e-06  ;;  %v335_v4 = vmax.f32 %v255_v1, 1e-06  ;;  %v338_v5 = vmax.f32 %v258_v2, 1e-06  ;;  %s254_s7 = scalar_lea.vmem %s13214_s3, %s5630_s26 }
  0x20   : > { %v256_v6 = vld [vmem:[%s7635_s9 + $0x8] sm:$0xff]  ;;  %v259_v8 = vld [vmem:[%s7635_s9 + $0x20] sm:$0xff]  ;;  %v262_v13 = vld [vmem:[%s7635_s9 + $0x38] sm:$0xff]  ;;  %s7454_s14 = scalar_lea.vmem %s5512_s12, 32  ;;  %s7551_s15 = smov [#allocation2]  }
  0x21   : > { %v260_v7 = vld [vmem:[%s7635_s9 + $0x28] sm:$0xff]  ;;  %v417_v9 = vmul.f32 %v337_v3, %v337_v3  ;;  %v415_v10 = vmul.f32 %v335_v4, %v335_v4  ;;  %v418_v11 = vmul.f32 %v338_v5, %v338_v5  ;;  %v336_v12 = vmax.f32 %v256_v6, 1e-06  ;;  %v261_v14 = vld [vmem:[%s7635_s9 + $0x30] sm:$0xff]  ;;  %v263_v26 = vld [vmem:[%s7635_s9 + $0x40] sm:$0xff]  ;;  %p7455_p12 = scmp.ne.s32.totalorder %s5512_s12, %s7454_s14  ;;  %s7458_s17 = sshll.u32 %s7551_s15, 4  ;;  %s7459_s17 = int_to_ptr.vmem [resolvable:$false] %s7458_s17 }
  0x22   : > { %v340_v15 = vmax.f32 %v260_v7, 1e-06  ;;  %v339_v16 = vmax.f32 %v259_v8, 1e-06  ;;  %v342_v17 = vmax.f32 %v262_v13, 1e-06  ;;  %p7461_p1 = scmp.lt.s32.totalorder %s5512_s12, %s7459_s17 }
  0x23   : > { %v497_v18 = vmul.f32 %v417_v9, %v337_v3  ;;  %v495_v19 = vmul.f32 %v415_v10, %v335_v4  ;;  %v498_v20 = vmul.f32 %v418_v11, %v338_v5  ;;  %v416_v21 = vmul.f32 %v336_v12, %v336_v12  ;;  %v264_v22 = vld [vmem:[%s7635_s9 + $0x48] sm:$0xff]  ;;  %v266_v38 = vld [vmem:[%s7635_s9 + $0x58] sm:$0xff]  ;;  %v265_v39 = vld [vmem:[%s7635_s9 + $0x50] sm:$0xff]  ;;  %p7456_p13 = pnand %p7455_p12, %p7621_p5  ;;  %s7460_s25 = scalar_lea.vmem %s7459_s17, 64 }
  0x24   : > { %v420_v23 = vmul.f32 %v340_v15, %v340_v15  ;;  %v419_v24 = vmul.f32 %v339_v16, %v339_v16  ;;  %v341_v25 = vmax.f32 %v261_v14, 1e-06  ;;  %v422_v32 = vmul.f32 %v342_v17, %v342_v17  ;;  %v268_v48 = vld [vmem:[%s7635_s9 + $0x68] sm:$0xff]  ;;  %v267_v49 = vld [vmem:[%s7635_s9 + $0x60] sm:$0xff]  ;;  %v270_v58 = vld [vmem:[%s7635_s9 + $0x78] sm:$0xff]  ;;  %p7462_p2 = scmp.lt.s32.totalorder %s7460_s25, %s7454_s14 }
  0x25   : > { %v582_v27 = vsel %vm575_vm0, %v497_v18, 0.0  ;;  %v576_v28 = vsel %vm575_vm0, %v495_v19, 0.0  ;;  %v496_v29 = vmul.f32 %v416_v21, %v336_v12  ;;  %v585_v30 = vsel %vm575_vm0, %v498_v20, 0.0  ;;  %v269_v59 = vld [vmem:[%s7635_s9 + $0x70] sm:$0xff]  ;;  %v272_v4 = vld [vmem:[%s7635_s9 + $0x88] sm:$0xff]  ;;  %v271_v5 = vld [vmem:[%s7635_s9 + $0x80] sm:$0xff]  ;;  %p7457_p0 = pneg %p7456_p13 }
  0x26   : > { %583 = vadd.xlane.f32.xlu1 %v582_v27  ;;  %577 = vadd.xlane.f32.xlu0 %v576_v28  ;;  %v500_v31 = vmul.f32 %v420_v23, %v340_v15  ;;  %v344_v33 = vmax.f32 %v264_v22, 1e-06  ;;  %v499_v35 = vmul.f32 %v419_v24, %v339_v16  ;;  %v421_v36 = vmul.f32 %v341_v25, %v341_v25  ;;  %v274_v14 = vld [vmem:[%s7635_s9 + $0x98] sm:$0xff]  ;;  %v273_v15 = vld [vmem:[%s7635_s9 + $0x90] sm:$0xff]  ;;  %v276_v24 = vld [vmem:[%s7635_s9 + $0xa8] sm:$0xff]  ;;  %p7463_p3 = por %p7462_p2, %p7461_p1 }
  0x27   : > { %v579_v34 = vsel %vm575_vm0, %v496_v29, 0.0  ;;  %v343_v37 = vmax.f32 %v263_v26, 1e-06  ;;  %v502_v41 = vmul.f32 %v422_v32, %v342_v17  ;;  %v346_v43 = vmax.f32 %v266_v38, 1e-06 }
  0x28   : > { %v591_v40 = vsel %vm575_vm0, %v500_v31, 0.0  ;;  %v424_v42 = vmul.f32 %v344_v33, %v344_v33  ;;  %v588_v44 = vsel %vm575_vm0, %v499_v35, 0.0  ;;  %v501_v45 = vmul.f32 %v421_v36, %v341_v25  ;;  %v275_v25 = vld [vmem:[%s7635_s9 + $0xa0] sm:$0xff]  ;;  %v277_v35 = vld [vmem:[%s7635_s9 + $0xb0] sm:$0xff]  ;;  %p7464_p4 = pnand %p7463_p3, %p7457_p0 }
  0x29   : > { %v423_v46 = vmul.f32 %v343_v37, %v343_v37  ;;  %v345_v47 = vmax.f32 %v265_v39, 1e-06  ;;  %v597_v50 = vsel %vm575_vm0, %v502_v41, 0.0  ;;  %v426_v52 = vmul.f32 %v346_v43, %v346_v43 }
  0x2a   : > { %586 = vadd.xlane.f32.xlu1 %v585_v30  ;;  %580 = vadd.xlane.f32.xlu0 %v579_v34  ;;  %v504_v51 = vmul.f32 %v424_v42, %v344_v33  ;;  %v348_v53 = vmax.f32 %v268_v48, 1e-06  ;;  %v594_v54 = vsel %vm575_vm0, %v501_v45, 0.0  ;;  %v347_v57 = vmax.f32 %v267_v49, 1e-06  ;;  %v278_v34 = vld [vmem:[%s7635_s9 + $0xb8] sm:$0xff] }
  0x2b   : > { %v503_v55 = vmul.f32 %v423_v46, %v343_v37  ;;  %v425_v56 = vmul.f32 %v345_v47, %v345_v47  ;;  %v506_v61 = vmul.f32 %v426_v52, %v346_v43  ;;  %v350_v63 = vmax.f32 %v270_v58, 1e-06  ;;  %v279_v45 = vld [vmem:[%s7635_s9 + $0xc0] sm:$0xff] }
  0x2c   : > { %v603_v60 = vsel %vm575_vm0, %v504_v51, 0.0  ;;  %v428_v62 = vmul.f32 %v348_v53, %v348_v53  ;;  %v427_v2 = vmul.f32 %v347_v57, %v347_v57  ;;  %v349_v3 = vmax.f32 %v269_v59, 1e-06 }
  0x2d   : > { %v600_v0 = vsel %vm575_vm0, %v503_v55, 0.0  ;;  %v505_v1 = vmul.f32 %v425_v56, %v345_v47  ;;  %v609_v6 = vsel %vm575_vm0, %v506_v61, 0.0  ;;  %v430_v8 = vmul.f32 %v350_v63, %v350_v63  ;;  %v281_v55 = vld [vmem:[%s7635_s9 + $0xd0] sm:$0xff] }
  0x2e   : > { %592 = vadd.xlane.f32.xlu1 %v591_v40  ;;  %589 = vadd.xlane.f32.xlu0 %v588_v44  ;;  %v508_v7 = vmul.f32 %v428_v62, %v348_v53  ;;  %v352_v9 = vmax.f32 %v272_v4, 1e-06  ;;  %v507_v11 = vmul.f32 %v427_v2, %v347_v57  ;;  %v429_v12 = vmul.f32 %v349_v3, %v349_v3  ;;  %v280_v44 = vld [vmem:[%s7635_s9 + $0xc8] sm:$0xff] }
  0x2f   : > { %v606_v10 = vsel %vm575_vm0, %v505_v1, 0.0  ;;  %v351_v13 = vmax.f32 %v271_v5, 1e-06  ;;  %v510_v17 = vmul.f32 %v430_v8, %v350_v63  ;;  %v354_v19 = vmax.f32 %v274_v14, 1e-06  ;;  %v283_v1 = vld [vmem:[%s7635_s9 + $0xe0] sm:$0xff] }
  0x30   : > { %v615_v16 = vsel %vm575_vm0, %v508_v7, 0.0  ;;  %v432_v18 = vmul.f32 %v352_v9, %v352_v9  ;;  %v612_v20 = vsel %vm575_vm0, %v507_v11, 0.0  ;;  %v509_v21 = vmul.f32 %v429_v12, %v349_v3  ;;  %v285_v11 = vld [vmem:[%s7635_s9 + $0xf0] sm:$0xff] }
  0x31   : > { %v431_v22 = vmul.f32 %v351_v13, %v351_v13  ;;  %v353_v23 = vmax.f32 %v273_v15, 1e-06  ;;  %v621_v26 = vsel %vm575_vm0, %v510_v17, 0.0  ;;  %v434_v28 = vmul.f32 %v354_v19, %v354_v19 }
  0x32   : > { %598 = vadd.xlane.f32.xlu1 %v597_v50  ;;  %595 = vadd.xlane.f32.xlu0 %v594_v54  ;;  %v512_v27 = vmul.f32 %v432_v18, %v352_v9  ;;  %v356_v29 = vmax.f32 %v276_v24, 1e-06  ;;  %v618_v30 = vsel %vm575_vm0, %v509_v21, 0.0  ;;  %v355_v33 = vmax.f32 %v275_v25, 1e-06  ;;  %v282_v54 = vld [vmem:[%s7635_s9 + $0xd8] sm:$0xff] }
  0x33   : > { %v511_v31 = vmul.f32 %v431_v22, %v351_v13  ;;  %v433_v32 = vmul.f32 %v353_v23, %v353_v23  ;;  %v514_v37 = vmul.f32 %v434_v28, %v354_v19  ;;  %v358_v39 = vmax.f32 %v278_v34, 1e-06  ;;  %v287_v21 = vld [vmem:[%s7635_s9 + $0x100] sm:$0xff] }
  0x34   : > { %v627_v36 = vsel %vm575_vm0, %v512_v27, 0.0  ;;  %v436_v38 = vmul.f32 %v356_v29, %v356_v29  ;;  %v435_v42 = vmul.f32 %v355_v33, %v355_v33  ;;  %v357_v43 = vmax.f32 %v277_v35, 1e-06 }
  0x35   : > { %v624_v40 = vsel %vm575_vm0, %v511_v31, 0.0  ;;  %v513_v41 = vmul.f32 %v433_v32, %v353_v23  ;;  %v633_v46 = vsel %vm575_vm0, %v514_v37, 0.0  ;;  %v438_v48 = vmul.f32 %v358_v39, %v358_v39  ;;  %v289_v31 = vld [vmem:[%s7635_s9 + $0x110] sm:$0xff] }
  0x36   : > { %604 = vadd.xlane.f32.xlu1 %v603_v60  ;;  %601 = vadd.xlane.f32.xlu0 %v600_v0  ;;  %v516_v47 = vmul.f32 %v436_v38, %v356_v29  ;;  %v360_v49 = vmax.f32 %v280_v44, 1e-06  ;;  %v515_v51 = vmul.f32 %v435_v42, %v355_v33  ;;  %v437_v52 = vmul.f32 %v357_v43, %v357_v43  ;;  %v284_v0 = vld [vmem:[%s7635_s9 + $0xe8] sm:$0xff] }
  0x37   : > { %v630_v50 = vsel %vm575_vm0, %v513_v41, 0.0  ;;  %v359_v53 = vmax.f32 %v279_v45, 1e-06  ;;  %v518_v57 = vmul.f32 %v438_v48, %v358_v39  ;;  %v362_v59 = vmax.f32 %v282_v54, 1e-06  ;;  %v291_v41 = vld [vmem:[%s7635_s9 + $0x120] sm:$0xff] }
  0x38   : > { %v639_v56 = vsel %vm575_vm0, %v516_v47, 0.0  ;;  %v440_v58 = vmul.f32 %v360_v49, %v360_v49  ;;  %v636_v60 = vsel %vm575_vm0, %v515_v51, 0.0  ;;  %v517_v61 = vmul.f32 %v437_v52, %v357_v43  ;;  %v293_v51 = vld [vmem:[%s7635_s9 + $0x130] sm:$0xff] }
  0x39   : > { %v439_v62 = vmul.f32 %v359_v53, %v359_v53  ;;  %v361_v63 = vmax.f32 %v281_v55, 1e-06  ;;  %v645_v2 = vsel %vm575_vm0, %v518_v57, 0.0  ;;  %v442_v4 = vmul.f32 %v362_v59, %v362_v59 }
  0x3a   : > { %610 = vadd.xlane.f32.xlu1 %v609_v6  ;;  %607 = vadd.xlane.f32.xlu0 %v606_v10  ;;  %v520_v3 = vmul.f32 %v440_v58, %v360_v49  ;;  %v364_v5 = vmax.f32 %v284_v0, 1e-06  ;;  %v642_v6 = vsel %vm575_vm0, %v517_v61, 0.0  ;;  %v363_v9 = vmax.f32 %v283_v1, 1e-06  ;;  %v286_v10 = vld [vmem:[%s7635_s9 + $0xf8] sm:$0xff] }
  0x3b   : > { %v519_v7 = vmul.f32 %v439_v62, %v359_v53  ;;  %v441_v8 = vmul.f32 %v361_v63, %v361_v63  ;;  %v522_v13 = vmul.f32 %v442_v4, %v362_v59  ;;  %v366_v15 = vmax.f32 %v286_v10, 1e-06  ;;  %v295_v61 = vld [vmem:[%s7635_s9 + $0x140] sm:$0xff] }
  0x3c   : > { %v651_v12 = vsel %vm575_vm0, %v520_v3, 0.0  ;;  %v444_v14 = vmul.f32 %v364_v5, %v364_v5  ;;  %v443_v18 = vmul.f32 %v363_v9, %v363_v9  ;;  %v365_v19 = vmax.f32 %v285_v11, 1e-06 }
  0x3d   : > { %v521_v17 = vmul.f32 %v441_v8, %v361_v63  ;;  %v657_v22 = vsel %vm575_vm0, %v522_v13, 0.0  ;;  %v446_v24 = vmul.f32 %v366_v15, %v366_v15  ;;  %v367_v29 = vmax.f32 %v287_v21, 1e-06 }
  0x3e   : > { %616 = vadd.xlane.f32.xlu1 %v615_v16  ;;  %613 = vadd.xlane.f32.xlu0 %v612_v20  ;;  %v648_v16 = vsel %vm575_vm0, %v519_v7, 0.0  ;;  %v288_v20 = vld [vmem:[%s7635_s9 + $0x108] sm:$0xff]  ;;  %v524_v23 = vmul.f32 %v444_v14, %v364_v5  ;;  %v523_v27 = vmul.f32 %v443_v18, %v363_v9  ;;  %v445_v28 = vmul.f32 %v365_v19, %v365_v19  ;;  %v297_v7 = vld [vmem:[%s7635_s9 + $0x150] sm:$0xff] }
  0x3f   : > { %v368_v25 = vmax.f32 %v288_v20, 1e-06  ;;  %v526_v33 = vmul.f32 %v446_v24, %v366_v15  ;;  %v447_v38 = vmul.f32 %v367_v29, %v367_v29  ;;  %v369_v39 = vmax.f32 %v289_v31, 1e-06 }
  0x40   : > { %v663_v32 = vsel %vm575_vm0, %v524_v23, 0.0  ;;  %v525_v37 = vmul.f32 %v445_v28, %v365_v19  ;;  %v371_v49 = vmax.f32 %v291_v41, 1e-06  ;;  %v373_v59 = vmax.f32 %v293_v51, 1e-06 }
  0x41   : > { %v448_v34 = vmul.f32 %v368_v25, %v368_v25  ;;  %v669_v42 = vsel %vm575_vm0, %v526_v33, 0.0  ;;  %v527_v47 = vmul.f32 %v447_v38, %v367_v29  ;;  %v449_v48 = vmul.f32 %v369_v39, %v369_v39 }
  0x42   : > { %622 = vadd.xlane.f32.xlu1 %v621_v26  ;;  %619 = vadd.xlane.f32.xlu0 %v618_v30  ;;  %v654_v26 = vsel %vm575_vm0, %v521_v17, 0.0  ;;  %v290_v30 = vld [vmem:[%s7635_s9 + $0x118] sm:$0xff]  ;;  %v451_v58 = vmul.f32 %v371_v49, %v371_v49  ;;  %v453_v4 = vmul.f32 %v373_v59, %v373_v59  ;;  %v375_v5 = vmax.f32 %v295_v61, 1e-06  ;;  %v299_v17 = vld [vmem:[%s7635_s9 + $0x160] sm:$0xff] }
  0x43   : > { %v370_v35 = vmax.f32 %v290_v30, 1e-06  ;;  %v528_v43 = vmul.f32 %v448_v34, %v368_v25  ;;  %v529_v57 = vmul.f32 %v449_v48, %v369_v39  ;;  %v377_v15 = vmax.f32 %v297_v7, 1e-06 }
  0x44   : > { %v531_v3 = vmul.f32 %v451_v58, %v371_v49  ;;  %v533_v13 = vmul.f32 %v453_v4, %v373_v59  ;;  %v455_v14 = vmul.f32 %v375_v5, %v375_v5  ;;  %v379_v25 = vmax.f32 %v299_v17, 1e-06 }
  0x45   : > { %v450_v44 = vmul.f32 %v370_v35, %v370_v35  ;;  %v675_v52 = vsel %vm575_vm0, %v528_v43, 0.0  ;;  %v457_v24 = vmul.f32 %v377_v15, %v377_v15 }
  0x46   : > { %628 = vadd.xlane.f32.xlu1 %v627_v36  ;;  %625 = vadd.xlane.f32.xlu0 %v624_v40  ;;  %v660_v36 = vsel %vm575_vm0, %v523_v27, 0.0  ;;  %v292_v40 = vld [vmem:[%s7635_s9 + $0x128] sm:$0xff]  ;;  %v535_v23 = vmul.f32 %v455_v14, %v375_v5  ;;  %v301_v27 = vld [vmem:[%s7635_s9 + $0x170] sm:$0xff]  ;;  %v459_v34 = vmul.f32 %v379_v25, %v379_v25 }
  0x47   : > { %v372_v45 = vmax.f32 %v292_v40, 1e-06  ;;  %v530_v53 = vmul.f32 %v450_v44, %v370_v35  ;;  %v537_v33 = vmul.f32 %v457_v24, %v377_v15  ;;  %v381_v35 = vmax.f32 %v301_v27, 1e-06 }
  0x48   : > { %v539_v43 = vmul.f32 %v459_v34, %v379_v25 }
  0x49   : > { %v452_v54 = vmul.f32 %v372_v45, %v372_v45  ;;  %v681_v62 = vsel %vm575_vm0, %v530_v53, 0.0  ;;  %v461_v44 = vmul.f32 %v381_v35, %v381_v35 }
  0x4a   : > { %634 = vadd.xlane.f32.xlu1 %v633_v46  ;;  %631 = vadd.xlane.f32.xlu0 %v630_v50  ;;  %v666_v46 = vsel %vm575_vm0, %v525_v37, 0.0  ;;  %v294_v50 = vld [vmem:[%s7635_s9 + $0x138] sm:$0xff]  ;;  %v303_v37 = vld [vmem:[%s7635_s9 + $0x180] sm:$0xff] }
  0x4b   : > { %v374_v55 = vmax.f32 %v294_v50, 1e-06  ;;  %v532_v63 = vmul.f32 %v452_v54, %v372_v45  ;;  %v383_v45 = vmax.f32 %v303_v37, 1e-06  ;;  %v541_v53 = vmul.f32 %v461_v44, %v381_v35 }
  0x4d   : > { %v454_v0 = vmul.f32 %v374_v55, %v374_v55  ;;  %v687_v8 = vsel %vm575_vm0, %v532_v63, 0.0  ;;  %v463_v54 = vmul.f32 %v383_v45, %v383_v45 }
  0x4e   : > { %640 = vadd.xlane.f32.xlu1 %v639_v56  ;;  %637 = vadd.xlane.f32.xlu0 %v636_v60  ;;  %v672_v56 = vsel %vm575_vm0, %v527_v47, 0.0  ;;  %v296_v60 = vld [vmem:[%s7635_s9 + $0x148] sm:$0xff]  ;;  %v305_v47 = vld [vmem:[%s7635_s9 + $0x190] sm:$0xff] }
  0x4f   : > { %v376_v1 = vmax.f32 %v296_v60, 1e-06  ;;  %v534_v9 = vmul.f32 %v454_v0, %v374_v55  ;;  %v385_v55 = vmax.f32 %v305_v47, 1e-06  ;;  %v543_v63 = vmul.f32 %v463_v54, %v383_v45 }
  0x51   : > { %v456_v10 = vmul.f32 %v376_v1, %v376_v1  ;;  %v693_v18 = vsel %vm575_vm0, %v534_v9, 0.0  ;;  %v465_v0 = vmul.f32 %v385_v55, %v385_v55 }
  0x52   : > { %646 = vadd.xlane.f32.xlu1 %v645_v2  ;;  %643 = vadd.xlane.f32.xlu0 %v642_v6  ;;  %v678_v2 = vsel %vm575_vm0, %v529_v57, 0.0  ;;  %v298_v6 = vld [vmem:[%s7635_s9 + $0x158] sm:$0xff]  ;;  %v307_v57 = vld [vmem:[%s7635_s9 + $0x1a0] sm:$0xff] }
  0x53   : > { %v378_v11 = vmax.f32 %v298_v6, 1e-06  ;;  %v536_v19 = vmul.f32 %v456_v10, %v376_v1  ;;  %v387_v1 = vmax.f32 %v307_v57, 1e-06  ;;  %v545_v9 = vmul.f32 %v465_v0, %v385_v55 }
  0x55   : > { %v458_v20 = vmul.f32 %v378_v11, %v378_v11  ;;  %v699_v28 = vsel %vm575_vm0, %v536_v19, 0.0  ;;  %v467_v10 = vmul.f32 %v387_v1, %v387_v1 }
  0x56   : > { %652 = vadd.xlane.f32.xlu1 %v651_v12  ;;  %649 = vadd.xlane.f32.xlu0 %v648_v16  ;;  %v684_v12 = vsel %vm575_vm0, %v531_v3, 0.0  ;;  %v300_v16 = vld [vmem:[%s7635_s9 + $0x168] sm:$0xff]  ;;  %v309_v3 = vld [vmem:[%s7635_s9 + $0x1b0] sm:$0xff] }
  0x57   : > { %v380_v21 = vmax.f32 %v300_v16, 1e-06  ;;  %v538_v29 = vmul.f32 %v458_v20, %v378_v11  ;;  %v389_v11 = vmax.f32 %v309_v3, 1e-06  ;;  %v547_v19 = vmul.f32 %v467_v10, %v387_v1 }
  0x59   : > { %v460_v30 = vmul.f32 %v380_v21, %v380_v21  ;;  %v705_v38 = vsel %vm575_vm0, %v538_v29, 0.0  ;;  %v469_v20 = vmul.f32 %v389_v11, %v389_v11 }
  0x5a   : > { %658 = vadd.xlane.f32.xlu1 %v657_v22  ;;  %655 = vadd.xlane.f32.xlu0 %v654_v26  ;;  %v690_v22 = vsel %vm575_vm0, %v533_v13, 0.0  ;;  %v302_v26 = vld [vmem:[%s7635_s9 + $0x178] sm:$0xff]  ;;  %v311_v13 = vld [vmem:[%s7635_s9 + $0x1c0] sm:$0xff] }
  0x5b   : > { %v382_v31 = vmax.f32 %v302_v26, 1e-06  ;;  %v540_v39 = vmul.f32 %v460_v30, %v380_v21  ;;  %v391_v21 = vmax.f32 %v311_v13, 1e-06  ;;  %v549_v29 = vmul.f32 %v469_v20, %v389_v11 }
  0x5d   : > { %v462_v40 = vmul.f32 %v382_v31, %v382_v31  ;;  %v711_v48 = vsel %vm575_vm0, %v540_v39, 0.0  ;;  %v471_v30 = vmul.f32 %v391_v21, %v391_v21 }
  0x5e   : > { %664 = vadd.xlane.f32.xlu1 %v663_v32  ;;  %661 = vadd.xlane.f32.xlu0 %v660_v36  ;;  %v696_v32 = vsel %vm575_vm0, %v535_v23, 0.0  ;;  %v304_v36 = vld [vmem:[%s7635_s9 + $0x188] sm:$0xff]  ;;  %v313_v23 = vld [vmem:[%s7635_s9 + $0x1d0] sm:$0xff] }
  0x5f   : > { %v384_v41 = vmax.f32 %v304_v36, 1e-06  ;;  %v542_v49 = vmul.f32 %v462_v40, %v382_v31  ;;  %v393_v31 = vmax.f32 %v313_v23, 1e-06  ;;  %v551_v39 = vmul.f32 %v471_v30, %v391_v21 }
  0x61   : > { %v464_v50 = vmul.f32 %v384_v41, %v384_v41  ;;  %v717_v58 = vsel %vm575_vm0, %v542_v49, 0.0  ;;  %v473_v40 = vmul.f32 %v393_v31, %v393_v31 }
  0x62   : > { %670 = vadd.xlane.f32.xlu1 %v669_v42  ;;  %667 = vadd.xlane.f32.xlu0 %v666_v46  ;;  %v702_v42 = vsel %vm575_vm0, %v537_v33, 0.0  ;;  %v306_v46 = vld [vmem:[%s7635_s9 + $0x198] sm:$0xff]  ;;  %v315_v33 = vld [vmem:[%s7635_s9 + $0x1e0] sm:$0xff] }
  0x63   : > { %v386_v51 = vmax.f32 %v306_v46, 1e-06  ;;  %v544_v59 = vmul.f32 %v464_v50, %v384_v41  ;;  %v395_v41 = vmax.f32 %v315_v33, 1e-06  ;;  %v553_v49 = vmul.f32 %v473_v40, %v393_v31 }
  0x65   : > { %v466_v60 = vmul.f32 %v386_v51, %v386_v51  ;;  %v723_v4 = vsel %vm575_vm0, %v544_v59, 0.0  ;;  %v475_v50 = vmul.f32 %v395_v41, %v395_v41 }
  0x66   : > { %676 = vadd.xlane.f32.xlu1 %v675_v52  ;;  %673 = vadd.xlane.f32.xlu0 %v672_v56  ;;  %v708_v52 = vsel %vm575_vm0, %v539_v43, 0.0  ;;  %v308_v56 = vld [vmem:[%s7635_s9 + $0x1a8] sm:$0xff]  ;;  %v317_v43 = vld [vmem:[%s7635_s9 + $0x1f0] sm:$0xff] }
  0x67   : > { %v388_v61 = vmax.f32 %v308_v56, 1e-06  ;;  %v546_v5 = vmul.f32 %v466_v60, %v386_v51  ;;  %v397_v51 = vmax.f32 %v317_v43, 1e-06  ;;  %v555_v59 = vmul.f32 %v475_v50, %v395_v41 }
  0x69   : > { %v468_v6 = vmul.f32 %v388_v61, %v388_v61  ;;  %v729_v14 = vsel %vm575_vm0, %v546_v5, 0.0  ;;  %v477_v60 = vmul.f32 %v397_v51, %v397_v51 }
  0x6a   : > { %682 = vadd.xlane.f32.xlu1 %v681_v62  ;;  %679 = vadd.xlane.f32.xlu0 %v678_v2  ;;  %v714_v62 = vsel %vm575_vm0, %v541_v53, 0.0  ;;  %v310_v2 = vld [vmem:[%s7635_s9 + $0x1b8] sm:$0xff]  ;;  %v319_v53 = vld [vmem:[%s7635_s9 + $0x200] sm:$0xff] }
  0x6b   : > { %v390_v7 = vmax.f32 %v310_v2, 1e-06  ;;  %v548_v15 = vmul.f32 %v468_v6, %v388_v61  ;;  %v399_v61 = vmax.f32 %v319_v53, 1e-06  ;;  %v557_v5 = vmul.f32 %v477_v60, %v397_v51 }
  0x6d   : > { %v470_v16 = vmul.f32 %v390_v7, %v390_v7  ;;  %v735_v24 = vsel %vm575_vm0, %v548_v15, 0.0  ;;  %v479_v6 = vmul.f32 %v399_v61, %v399_v61 }
  0x6e   : > { %688 = vadd.xlane.f32.xlu1 %v687_v8  ;;  %685 = vadd.xlane.f32.xlu0 %v684_v12  ;;  %v720_v8 = vsel %vm575_vm0, %v543_v63, 0.0  ;;  %v312_v12 = vld [vmem:[%s7635_s9 + $0x1c8] sm:$0xff]  ;;  %v321_v63 = vld [vmem:[%s7635_s9 + $0x210] sm:$0xff] }
  0x6f   : > { %v392_v17 = vmax.f32 %v312_v12, 1e-06  ;;  %v550_v25 = vmul.f32 %v470_v16, %v390_v7  ;;  %v401_v7 = vmax.f32 %v321_v63, 1e-06  ;;  %v559_v15 = vmul.f32 %v479_v6, %v399_v61 }
  0x71   : > { %v472_v26 = vmul.f32 %v392_v17, %v392_v17  ;;  %v741_v34 = vsel %vm575_vm0, %v550_v25, 0.0  ;;  %v481_v16 = vmul.f32 %v401_v7, %v401_v7 }
  0x72   : > { %694 = vadd.xlane.f32.xlu1 %v693_v18  ;;  %691 = vadd.xlane.f32.xlu0 %v690_v22  ;;  %v726_v18 = vsel %vm575_vm0, %v545_v9, 0.0  ;;  %v314_v22 = vld [vmem:[%s7635_s9 + $0x1d8] sm:$0xff]  ;;  %v323_v9 = vld [vmem:[%s7635_s9 + $0x220] sm:$0xff] }
  0x73   : > { %v394_v27 = vmax.f32 %v314_v22, 1e-06  ;;  %v552_v35 = vmul.f32 %v472_v26, %v392_v17  ;;  %v403_v17 = vmax.f32 %v323_v9, 1e-06  ;;  %v561_v25 = vmul.f32 %v481_v16, %v401_v7 }
  0x75   : > { %v474_v36 = vmul.f32 %v394_v27, %v394_v27  ;;  %v747_v44 = vsel %vm575_vm0, %v552_v35, 0.0  ;;  %v483_v26 = vmul.f32 %v403_v17, %v403_v17 }
  0x76   : > { %700 = vadd.xlane.f32.xlu1 %v699_v28  ;;  %697 = vadd.xlane.f32.xlu0 %v696_v32  ;;  %v732_v28 = vsel %vm575_vm0, %v547_v19, 0.0  ;;  %v316_v32 = vld [vmem:[%s7635_s9 + $0x1e8] sm:$0xff]  ;;  %v325_v19 = vld [vmem:[%s7635_s9 + $0x230] sm:$0xff] }
  0x77   : > { %v396_v37 = vmax.f32 %v316_v32, 1e-06  ;;  %v554_v45 = vmul.f32 %v474_v36, %v394_v27  ;;  %v405_v27 = vmax.f32 %v325_v19, 1e-06  ;;  %v563_v35 = vmul.f32 %v483_v26, %v403_v17 }
  0x78   : > { %v13217_v26 = vlaneseq }
  0x79   : > { %v476_v46 = vmul.f32 %v396_v37, %v396_v37  ;;  %v753_v54 = vsel %vm575_vm0, %v554_v45, 0.0  ;;  %v485_v36 = vmul.f32 %v405_v27, %v405_v27 }
  0x7a   : > { %706 = vadd.xlane.f32.xlu1 %v705_v38  ;;  %703 = vadd.xlane.f32.xlu0 %v702_v42  ;;  %v738_v38 = vsel %vm575_vm0, %v549_v29, 0.0  ;;  %v318_v42 = vld [vmem:[%s7635_s9 + $0x1f8] sm:$0xff]  ;;  %v327_v29 = vld [vmem:[%s7635_s9 + $0x240] sm:$0xff] }
  0x7b   : > { %v398_v47 = vmax.f32 %v318_v42, 1e-06  ;;  %v556_v55 = vmul.f32 %v476_v46, %v396_v37  ;;  %v407_v37 = vmax.f32 %v327_v29, 1e-06  ;;  %v565_v45 = vmul.f32 %v485_v36, %v405_v27 }
  0x7c   : > { %v7822_v29 = vshrl.u32 %v13217_v26, 7 }
  0x7d   : > { %v478_v56 = vmul.f32 %v398_v47, %v398_v47  ;;  %v759_v0 = vsel %vm575_vm0, %v556_v55, 0.0  ;;  %v487_v46 = vmul.f32 %v407_v37, %v407_v37 }
  0x7e   : > { %712 = vadd.xlane.f32.xlu1 %v711_v48  ;;  %709 = vadd.xlane.f32.xlu0 %v708_v52  ;;  %v744_v48 = vsel %vm575_vm0, %v551_v39, 0.0  ;;  %v320_v52 = vld [vmem:[%s7635_s9 + $0x208] sm:$0xff]  ;;  %v329_v39 = vld [vmem:[%s7635_s9 + $0x250] sm:$0xff]  ;;  %13616 = vst [vmem:[#allocation8_spill] sm:$0xff] %v7822_v29 }
  0x7f   : > { %v400_v57 = vmax.f32 %v320_v52, 1e-06  ;;  %v558_v1 = vmul.f32 %v478_v56, %v398_v47  ;;  %v409_v47 = vmax.f32 %v329_v39, 1e-06  ;;  %v567_v55 = vmul.f32 %v487_v46, %v407_v37 }
  0x81   : > { %v480_v2 = vmul.f32 %v400_v57, %v400_v57  ;;  %v765_v10 = vsel %vm575_vm0, %v558_v1, 0.0  ;;  %v489_v56 = vmul.f32 %v409_v47, %v409_v47 }
  0x82   : > { %718 = vadd.xlane.f32.xlu1 %v717_v58  ;;  %715 = vadd.xlane.f32.xlu0 %v714_v62  ;;  %v750_v58 = vsel %vm575_vm0, %v553_v49, 0.0  ;;  %v322_v62 = vld [vmem:[%s7635_s9 + $0x218] sm:$0xff]  ;;  %v331_v49 = vld [vmem:[%s7635_s9 + $0x260] sm:$0xff] }
  0x83   : > { %v402_v3 = vmax.f32 %v322_v62, 1e-06  ;;  %v560_v11 = vmul.f32 %v480_v2, %v400_v57  ;;  %v411_v57 = vmax.f32 %v331_v49, 1e-06  ;;  %v792_v2 = vsel %vm575_vm0, %v567_v55, 0.0 }
  0x85   : > { %v482_v12 = vmul.f32 %v402_v3, %v402_v3  ;;  %v771_v20 = vsel %vm575_vm0, %v560_v11, 0.0 }
  0x86   : > { %724 = vadd.xlane.f32.xlu1 %v723_v4  ;;  %721 = vadd.xlane.f32.xlu0 %v720_v8  ;;  %v756_v4 = vsel %vm575_vm0, %v555_v59, 0.0  ;;  %v324_v8 = vld [vmem:[%s7635_s9 + $0x228] sm:$0xff]  ;;  %v333_v59 = vld [vmem:[%s7635_s9 + $0x270] sm:$0xff] }
  0x87   : > { %v404_v13 = vmax.f32 %v324_v8, 1e-06  ;;  %v562_v21 = vmul.f32 %v482_v12, %v402_v3  ;;  %v569_v3 = vmul.f32 %v489_v56, %v409_v47 }
  0x89   : > { %v484_v22 = vmul.f32 %v404_v13, %v404_v13  ;;  %v777_v30 = vsel %vm575_vm0, %v562_v21, 0.0 }
  0x8a   : > { %730 = vadd.xlane.f32.xlu1 %v729_v14  ;;  %727 = vadd.xlane.f32.xlu0 %v726_v18  ;;  %v762_v14 = vsel %vm575_vm0, %v557_v5, 0.0  ;;  %v326_v18 = vld [vmem:[%s7635_s9 + $0x238] sm:$0xff]  ;;  %v413_v5 = vmax.f32 %v333_v59, 1e-06 }
  0x8b   : > { %v406_v23 = vmax.f32 %v326_v18, 1e-06  ;;  %v564_v31 = vmul.f32 %v484_v22, %v404_v13 }
  0x8c   : > { %v493_v13 = vmul.f32 %v413_v5, %v413_v5 }
  0x8d   : > { %v486_v32 = vmul.f32 %v406_v23, %v406_v23  ;;  %v783_v40 = vsel %vm575_vm0, %v564_v31, 0.0 }
  0x8e   : > { %736 = vadd.xlane.f32.xlu1 %v735_v24  ;;  %733 = vadd.xlane.f32.xlu0 %v732_v28  ;;  %v768_v24 = vsel %vm575_vm0, %v559_v15, 0.0  ;;  %v328_v28 = vld [vmem:[%s7635_s9 + $0x248] sm:$0xff]  ;;  %v573_v19 = vmul.f32 %v493_v13, %v413_v5 }
  0x8f   : > { %v408_v33 = vmax.f32 %v328_v28, 1e-06  ;;  %v566_v41 = vmul.f32 %v486_v32, %v406_v23  ;;  %v7829_v32 = vsub.s32 0, %v7822_v29 }
  0x90   : > { %v810_v23 = vsel %vm575_vm0, %v573_v19, 0.0 }
  0x91   : > { %v488_v42 = vmul.f32 %v408_v33, %v408_v33  ;;  %v789_v50 = vsel %vm575_vm0, %v566_v41, 0.0  ;;  %13617 = vst [vmem:[#allocation9_spill] sm:$0xff] %v7829_v32 }
  0x92   : > { %742 = vadd.xlane.f32.xlu1 %v741_v34  ;;  %739 = vadd.xlane.f32.xlu0 %v738_v38  ;;  %v774_v34 = vsel %vm575_vm0, %v561_v25, 0.0  ;;  %v330_v38 = vld [vmem:[%s7635_s9 + $0x258] sm:$0xff] }
  0x93   : > { %v410_v43 = vmax.f32 %v330_v38, 1e-06  ;;  %v568_v51 = vmul.f32 %v488_v42, %v408_v33  ;;  %v7834_v33 = vld [vmem:[%s13212_s1] sm:$0xff] }
  0x94   : > { %v986_v36 = vrot.slane %v7834_v33, %v7829_v32 }
  0x95   : > { %v490_v52 = vmul.f32 %v410_v43, %v410_v43  ;;  %v795_v60 = vsel %vm575_vm0, %v568_v51, 0.0  ;;  %v7872_v51 = vcombine.high %v7834_v33, %v7834_v33 }
  0x96   : > { %748 = vadd.xlane.f32.xlu1 %v747_v44  ;;  %745 = vadd.xlane.f32.xlu0 %v744_v48  ;;  %v780_v44 = vsel %vm575_vm0, %v563_v35, 0.0  ;;  %v332_v48 = vld [vmem:[%s7635_s9 + $0x268] sm:$0xff] }
  0x97   : > { %v412_v53 = vmax.f32 %v332_v48, 1e-06  ;;  %v570_v61 = vmul.f32 %v490_v52, %v410_v43 }
  0x99   : > { %v492_v62 = vmul.f32 %v412_v53, %v412_v53  ;;  %v801_v6 = vsel %vm575_vm0, %v570_v61, 0.0 }
  0x9a   : > { %754 = vadd.xlane.f32.xlu1 %v753_v54  ;;  %751 = vadd.xlane.f32.xlu0 %v750_v58  ;;  %v786_v54 = vsel %vm575_vm0, %v565_v45, 0.0  ;;  %v334_v58 = vld [vmem:[%s7635_s9 + $0x278] sm:$0xff] }
  0x9b   : > { %v414_v63 = vmax.f32 %v334_v58, 1e-06  ;;  %v572_v11 = vmul.f32 %v492_v62, %v412_v53 }
  0x9d   : > { %v494_v7 = vmul.f32 %v414_v63, %v414_v63  ;;  %v807_v16 = vsel %vm575_vm0, %v572_v11, 0.0 }
  0x9e   : > { %760 = vadd.xlane.f32.xlu1 %v759_v0  ;;  %757 = vadd.xlane.f32.xlu0 %v756_v4  ;;  %v491_v4 = vmul.f32 %v411_v57, %v411_v57 }
  0x9f   : > { %v574_v18 = vmul.f32 %v494_v7, %v414_v63  ;;  %v7926_v7 = vld [vmem:[%s13212_s1 + $0x8] sm:$0xf] }
  0xa0   : > { %v571_v12 = vmul.f32 %v491_v4, %v411_v57 }
  0xa1   : > { %v813_v22 = vsel %vm575_vm0, %v574_v18, 0.0 }
  0xa2   : > { %766 = vadd.xlane.f32.xlu1 %v765_v10  ;;  %763 = vadd.xlane.f32.xlu0 %v762_v14  ;;  %v798_v10 = vsel %vm575_vm0, %v569_v3, 0.0  ;;  %v804_v17 = vsel %vm575_vm0, %v571_v12, 0.0  ;;  %v1120_v12 = vrot.slane %v7926_v7, %v7829_v32 }
  0xa6   : > { %772 = vadd.xlane.f32.xlu1 %v771_v20  ;;  %769 = vadd.xlane.f32.xlu0 %v768_v24 }
  0xaa   : > { %778 = vadd.xlane.f32.xlu1 %v777_v30  ;;  %775 = vadd.xlane.f32.xlu0 %v774_v34 }
  0xae   : > { %784 = vadd.xlane.f32.xlu1 %v783_v40  ;;  %781 = vadd.xlane.f32.xlu0 %v780_v44 }
  0xb2   : > { %790 = vadd.xlane.f32.xlu1 %v789_v50  ;;  %787 = vadd.xlane.f32.xlu0 %v786_v54  ;;  %v7880_v54 = vrot.slane %v7872_v51, %v7829_v32 }
  0xb3   : > { %v7790_v0 = vpop.xlane.xlu1 %583  ;;  %v7792_v1 = vpop.xlane.xlu0 %577 }
  0xb6   : > { %796 = vadd.xlane.f32.xlu1 %v795_v60  ;;  %793 = vadd.xlane.f32.xlu0 %v792_v2 }
  0xb7   : > { %v7796_v8 = vpop.xlane.xlu1 %586  ;;  %v7798_v9 = vpop.xlane.xlu0 %580 }
  0xba   : > { %802 = vadd.xlane.f32.xlu1 %v801_v6  ;;  %799 = vadd.xlane.f32.xlu0 %v798_v10 }
  0xbb   : > { %v7801_v14 = vpop.xlane.xlu1 %592  ;;  %v7803_v15 = vpop.xlane.xlu0 %589 }
  0xbe   : > { %808 = vadd.xlane.f32.xlu1 %v807_v16  ;;  %805 = vadd.xlane.f32.xlu0 %v804_v17 }
  0xbf   : > { %v7807_v20 = vpop.xlane.xlu1 %598  ;;  %v7809_v21 = vpop.xlane.xlu0 %595 }
  0xc2   : > { %814 = vadd.xlane.f32.xlu1 %v813_v22  ;;  %811 = vadd.xlane.f32.xlu0 %v810_v23  ;;  %v7950_v23 = vsub.s32 1, %v7822_v29 }
  0xc3   : > { %v7813_v24 = vpop.xlane.xlu1 %604  ;;  %v7815_v25 = vpop.xlane.xlu0 %601 }
  0xc4   : > { %13634 = vst [vmem:[#allocation26_spill] sm:$0xff] %v7950_v23  ;;  %v1155_v32 = vrot.slane %v7834_v33, %v7950_v23 }
  0xc7   : > { %v7817_v27 = vpop.xlane.xlu1 %610  ;;  %v7819_v28 = vpop.xlane.xlu0 %607 }
  0xcb   : > { %v7824_v30 = vpop.xlane.xlu1 %616  ;;  %v7826_v31 = vpop.xlane.xlu0 %613 }
  0xcf   : > { %v7836_v34 = vpop.xlane.xlu1 %622  ;;  %v7838_v35 = vpop.xlane.xlu0 %619 }
  0xd3   : > { %992 = vbcast.lane.b32.xlu1 %v986_v36, 264  ;;  %v7842_v37 = vpop.xlane.xlu1 %628  ;;  %v7844_v38 = vpop.xlane.xlu0 %625 }
  0xd7   : > { %996 = vbcast.lane.b32.xlu1 %v986_v36, 272  ;;  %v7846_v39 = vpop.xlane.xlu1 %634  ;;  %v7848_v40 = vpop.xlane.xlu0 %631 }
  0xd8   : > { %988 = vbcast.lane.b32.xlu0 %v986_v36, 256 }
  0xdb   : > { %1000 = vbcast.lane.b32.xlu1 %v986_v36, 280  ;;  %v7850_v41 = vpop.xlane.xlu1 %640  ;;  %v7852_v42 = vpop.xlane.xlu0 %637 }
  0xdc   : > { %1004 = vbcast.lane.b32.xlu0 %v986_v36, 288 }
  0xdf   : > { %1008 = vbcast.lane.b32.xlu1 %v986_v36, 296  ;;  %v7854_v43 = vpop.xlane.xlu1 %646  ;;  %v7856_v44 = vpop.xlane.xlu0 %643 }
  0xe0   : > { %1012 = vbcast.lane.b32.xlu0 %v986_v36, 304 }
  0xe3   : > { %1016 = vbcast.lane.b32.xlu1 %v986_v36, 312  ;;  %v7858_v45 = vpop.xlane.xlu1 %652  ;;  %v7860_v46 = vpop.xlane.xlu0 %649 }
  0xe4   : > { %1020 = vbcast.lane.b32.xlu0 %v986_v36, 320 }
  0xe7   : > { %1024 = vbcast.lane.b32.xlu1 %v986_v36, 328  ;;  %v7862_v47 = vpop.xlane.xlu1 %658  ;;  %v7864_v48 = vpop.xlane.xlu0 %655 }
  0xe8   : > { %1028 = vbcast.lane.b32.xlu0 %v986_v36, 336 }
  0xeb   : > { %1032 = vbcast.lane.b32.xlu1 %v986_v36, 344  ;;  %v7866_v49 = vpop.xlane.xlu1 %664  ;;  %v7868_v50 = vpop.xlane.xlu0 %661 }
  0xec   : > { %1036 = vbcast.lane.b32.xlu0 %v986_v36, 352 }
  0xef   : > { %1040 = vbcast.lane.b32.xlu1 %v986_v36, 360  ;;  %v7874_v52 = vpop.xlane.xlu1 %670  ;;  %v7876_v53 = vpop.xlane.xlu0 %667 }
  0xf0   : > { %13618 = vst [vmem:[#allocation10_spill] sm:$0xff] %v7874_v52  ;;  %13619 = vst [vmem:[#allocation11_spill] sm:$0xff] %v7876_v53  ;;  %1044 = vbcast.lane.b32.xlu0 %v986_v36, 368 }
  0xf3   : > { %1048 = vbcast.lane.b32.xlu1 %v986_v36, 376  ;;  %v7882_v55 = vpop.xlane.xlu1 %676  ;;  %v7884_v56 = vpop.xlane.xlu0 %673 }
  0xf4   : > { %1055 = vbcast.lane.b32.xlu0 %v7880_v54, 256 }
  0xf7   : > { %1059 = vbcast.lane.b32.xlu1 %v7880_v54, 264  ;;  %v7888_v57 = vpop.xlane.xlu1 %682  ;;  %v7890_v58 = vpop.xlane.xlu0 %679 }
  0xf8   : > { %1063 = vbcast.lane.b32.xlu0 %v7880_v54, 272 }
  0xfb   : > { %1067 = vbcast.lane.b32.xlu1 %v7880_v54, 280  ;;  %v7894_v59 = vpop.xlane.xlu1 %688  ;;  %v7896_v60 = vpop.xlane.xlu0 %685 }
  0xfc   : > { %1071 = vbcast.lane.b32.xlu0 %v7880_v54, 288 }
  0xff   : > { %1075 = vbcast.lane.b32.xlu1 %v7880_v54, 296  ;;  %v7900_v61 = vpop.xlane.xlu1 %694  ;;  %v7902_v62 = vpop.xlane.xlu0 %691 }
 0x100   : > { %1079 = vbcast.lane.b32.xlu0 %v7880_v54, 304 }
 0x103   : > { %1083 = vbcast.lane.b32.xlu1 %v7880_v54, 312  ;;  %v7906_v63 = vpop.xlane.xlu1 %700  ;;  %v7908_v2 = vpop.xlane.xlu0 %697 }
 0x104   : > { %13620 = vst [vmem:[#allocation12_spill] sm:$0xff] %v7906_v63  ;;  %13621 = vst [vmem:[#allocation13_spill] sm:$0xff] %v7908_v2  ;;  %1087 = vbcast.lane.b32.xlu0 %v7880_v54, 320 }
 0x107   : > { %1091 = vbcast.lane.b32.xlu1 %v7880_v54, 328  ;;  %v7912_v3 = vpop.xlane.xlu1 %706  ;;  %v7914_v4 = vpop.xlane.xlu0 %703 }
 0x108   : > { %13622 = vst [vmem:[#allocation14_spill] sm:$0xff] %v7912_v3  ;;  %13623 = vst [vmem:[#allocation15_spill] sm:$0xff] %v7914_v4  ;;  %1095 = vbcast.lane.b32.xlu0 %v7880_v54, 336 }
 0x10b   : > { %1099 = vbcast.lane.b32.xlu1 %v7880_v54, 344  ;;  %v7918_v5 = vpop.xlane.xlu1 %712  ;;  %v7920_v6 = vpop.xlane.xlu0 %709 }
 0x10c   : > { %13624 = vst [vmem:[#allocation16_spill] sm:$0xff] %v7918_v5  ;;  %13625 = vst [vmem:[#allocation17_spill] sm:$0xff] %v7920_v6  ;;  %1103 = vbcast.lane.b32.xlu0 %v7880_v54, 352 }
 0x10f   : > { %1107 = vbcast.lane.b32.xlu1 %v7880_v54, 360  ;;  %v7929_v10 = vpop.xlane.xlu1 %718  ;;  %v7931_v11 = vpop.xlane.xlu0 %715 }
 0x110   : > { %13626 = vst [vmem:[#allocation18_spill] sm:$0xff] %v7929_v10  ;;  %13627 = vst [vmem:[#allocation19_spill] sm:$0xff] %v7931_v11  ;;  %1111 = vbcast.lane.b32.xlu0 %v7880_v54, 368  ;;  %v1289_v10 = vrot.slane %v7926_v7, %v7950_v23 }
 0x113   : > { %1115 = vbcast.lane.b32.xlu1 %v7880_v54, 376  ;;  %v7937_v13 = vpop.xlane.xlu1 %724  ;;  %v7939_v16 = vpop.xlane.xlu0 %721 }
 0x114   : > { %13628 = vst [vmem:[#allocation20_spill] sm:$0xff] %v7937_v13  ;;  %13629 = vst [vmem:[#allocation21_spill] sm:$0xff] %v7939_v16  ;;  %1122 = vbcast.lane.b32.xlu0 %v1120_v12, 256 }
 0x117   : > { %1126 = vbcast.lane.b32.xlu1 %v1120_v12, 264  ;;  %v7941_v17 = vpop.xlane.xlu1 %730  ;;  %v7943_v18 = vpop.xlane.xlu0 %727 }
 0x118   : > { %13630 = vst [vmem:[#allocation22_spill] sm:$0xff] %v7941_v17  ;;  %13631 = vst [vmem:[#allocation23_spill] sm:$0xff] %v7943_v18  ;;  %1130 = vbcast.lane.b32.xlu0 %v1120_v12, 272 }
 0x11b   : > { %1134 = vbcast.lane.b32.xlu1 %v1120_v12, 280  ;;  %v7945_v19 = vpop.xlane.xlu1 %736  ;;  %v7947_v22 = vpop.xlane.xlu0 %733 }
 0x11c   : > { %13632 = vst [vmem:[#allocation24_spill] sm:$0xff] %v7945_v19  ;;  %13633 = vst [vmem:[#allocation25_spill] sm:$0xff] %v7947_v22  ;;  %1138 = vbcast.lane.b32.xlu0 %v1120_v12, 288 }
 0x11f   : > { %1142 = vbcast.lane.b32.xlu1 %v1120_v12, 296  ;;  %v7952_v36 = vpop.xlane.xlu1 %742  ;;  %v7954_v26 = vpop.xlane.xlu0 %739 }
 0x120   : > { %13635 = vst [vmem:[#allocation27_spill] sm:$0xff] %v7952_v36  ;;  %13636 = vst [vmem:[#allocation28_spill] sm:$0xff] %v7954_v26  ;;  %1146 = vbcast.lane.b32.xlu0 %v1120_v12, 304 }
 0x123   : > { %1150 = vbcast.lane.b32.xlu1 %v1120_v12, 312  ;;  %v7958_v18 = vpop.xlane.xlu1 %748  ;;  %v7960_v17 = vpop.xlane.xlu0 %745 }
 0x124   : > { %13637 = vst [vmem:[#allocation29_spill] sm:$0xff] %v7958_v18  ;;  %13638 = vst [vmem:[#allocation30_spill] sm:$0xff] %v7960_v17  ;;  %1157 = vbcast.lane.b32.xlu0 %v1155_v32, 256 }
 0x127   : > { %1161 = vbcast.lane.b32.xlu1 %v1155_v32, 264  ;;  %v7962_v22 = vpop.xlane.xlu1 %754  ;;  %v7964_v19 = vpop.xlane.xlu0 %751 }
 0x128   : > { %13639 = vst [vmem:[#allocation31_spill] sm:$0xff] %v7962_v22  ;;  %13640 = vst [vmem:[#allocation32_spill] sm:$0xff] %v7964_v19  ;;  %1165 = vbcast.lane.b32.xlu0 %v1155_v32, 272 }
 0x12b   : > { %1169 = vbcast.lane.b32.xlu1 %v1155_v32, 280  ;;  %v7966_v36 = vpop.xlane.xlu1 %760  ;;  %v7968_v26 = vpop.xlane.xlu0 %757 }
 0x12c   : > { %13641 = vst [vmem:[#allocation33_spill] sm:$0xff] %v7966_v36  ;;  %13642 = vst [vmem:[#allocation34_spill] sm:$0xff] %v7968_v26  ;;  %1173 = vbcast.lane.b32.xlu0 %v1155_v32, 288 }
 0x12f   : > { %1177 = vbcast.lane.b32.xlu1 %v1155_v32, 296  ;;  %v7970_v16 = vpop.xlane.xlu1 %766  ;;  %v7972_v12 = vpop.xlane.xlu0 %763 }
 0x130   : > { %13643 = vst [vmem:[#allocation35_spill] sm:$0xff] %v7970_v16  ;;  %13644 = vst [vmem:[#allocation36_spill] sm:$0xff] %v7972_v12  ;;  %1181 = vbcast.lane.b32.xlu0 %v1155_v32, 304 }
 0x133   : > { %1185 = vbcast.lane.b32.xlu1 %v1155_v32, 312  ;;  %v7974_v17 = vpop.xlane.xlu1 %772  ;;  %v7976_v18 = vpop.xlane.xlu0 %769 }
 0x134   : > { %13645 = vst [vmem:[#allocation37_spill] sm:$0xff] %v7974_v17  ;;  %13646 = vst [vmem:[#allocation38_spill] sm:$0xff] %v7976_v18  ;;  %1189 = vbcast.lane.b32.xlu0 %v1155_v32, 320  ;;  %v7992_v18 = vrot.slane %v7872_v51, %v7950_v23 }
 0x137   : > { %1193 = vbcast.lane.b32.xlu1 %v1155_v32, 328  ;;  %v7978_v19 = vpop.xlane.xlu1 %778  ;;  %v7980_v22 = vpop.xlane.xlu0 %775 }
 0x138   : > { %13647 = vst [vmem:[#allocation39_spill] sm:$0xff] %v7978_v19  ;;  %13648 = vst [vmem:[#allocation40_spill] sm:$0xff] %v7980_v22  ;;  %1197 = vbcast.lane.b32.xlu0 %v1155_v32, 336 }
 0x13b   : > { %1201 = vbcast.lane.b32.xlu1 %v1155_v32, 344  ;;  %v7982_v26 = vpop.xlane.xlu1 %784  ;;  %v7984_v36 = vpop.xlane.xlu0 %781 }
 0x13c   : > { %13649 = vst [vmem:[#allocation41_spill] sm:$0xff] %v7982_v26  ;;  %13650 = vst [vmem:[#allocation42_spill] sm:$0xff] %v7984_v36  ;;  %1205 = vbcast.lane.b32.xlu0 %v1155_v32, 352 }
 0x13f   : > { %1209 = vbcast.lane.b32.xlu1 %v1155_v32, 360  ;;  %v7986_v12 = vpop.xlane.xlu1 %790  ;;  %v7988_v16 = vpop.xlane.xlu0 %787 }
 0x140   : > { %13651 = vst [vmem:[#allocation43_spill] sm:$0xff] %v7986_v12  ;;  %13652 = vst [vmem:[#allocation44_spill] sm:$0xff] %v7988_v16  ;;  %1213 = vbcast.lane.b32.xlu0 %v1155_v32, 368 }
 0x143   : > { %1217 = vbcast.lane.b32.xlu1 %v1155_v32, 376  ;;  %v7994_v19 = vpop.xlane.xlu1 %796  ;;  %v7996_v22 = vpop.xlane.xlu0 %793 }
 0x144   : > { %13653 = vst [vmem:[#allocation45_spill] sm:$0xff] %v7994_v19  ;;  %13654 = vst [vmem:[#allocation46_spill] sm:$0xff] %v7996_v22  ;;  %1224 = vbcast.lane.b32.xlu0 %v7992_v18, 256 }
 0x147   : > { %1228 = vbcast.lane.b32.xlu1 %v7992_v18, 264  ;;  %v8000_v36 = vpop.xlane.xlu1 %802  ;;  %v8002_v26 = vpop.xlane.xlu0 %799 }
 0x148   : > { %13655 = vst [vmem:[#allocation47_spill] sm:$0xff] %v8000_v36  ;;  %13656 = vst [vmem:[#allocation48_spill] sm:$0xff] %v8002_v26  ;;  %1232 = vbcast.lane.b32.xlu0 %v7992_v18, 272 }
 0x14b   : > { %1236 = vbcast.lane.b32.xlu1 %v7992_v18, 280  ;;  %v8006_v16 = vpop.xlane.xlu1 %808  ;;  %v8008_v12 = vpop.xlane.xlu0 %805 }
 0x14c   : > { %13657 = vst [vmem:[#allocation49_spill] sm:$0xff] %v8006_v16  ;;  %13658 = vst [vmem:[#allocation50_spill] sm:$0xff] %v8008_v12  ;;  %1240 = vbcast.lane.b32.xlu0 %v7992_v18, 288 }
 0x14f   : > { %1244 = vbcast.lane.b32.xlu1 %v7992_v18, 296  ;;  %v8012_v32 = vpop.xlane.xlu1 %814  ;;  %v8014_v22 = vpop.xlane.xlu0 %811 }
 0x150   : > { %13659 = vst [vmem:[#allocation51_spill] sm:$0xff] %v8012_v32  ;;  %13660 = vst [vmem:[#allocation52_spill] sm:$0xff] %v8014_v22  ;;  %1248 = vbcast.lane.b32.xlu0 %v7992_v18, 304 }
 0x153   : > { %1252 = vbcast.lane.b32.xlu1 %v7992_v18, 312  ;;  %v8018_v26 = vpop.permute.xlu1 %992  ;;  %v8020_v36 = vpop.permute.xlu0 %988 }
 0x154   : > { %13661 = vst [vmem:[#allocation53_spill] sm:$0xff] %v8018_v26  ;;  %13662 = vst [vmem:[#allocation54_spill] sm:$0xff] %v8020_v36  ;;  %1256 = vbcast.lane.b32.xlu0 %v7992_v18, 320 }
 0x157   : > { %1260 = vbcast.lane.b32.xlu1 %v7992_v18, 328  ;;  %v8024_v12 = vpop.permute.xlu1 %996  ;;  %v8026_v16 = vpop.permute.xlu0 %1004 }
 0x158   : > { %13663 = vst [vmem:[#allocation55_spill] sm:$0xff] %v8024_v12  ;;  %13664 = vst [vmem:[#allocation56_spill] sm:$0xff] %v8026_v16  ;;  %1264 = vbcast.lane.b32.xlu0 %v7992_v18, 336 }
 0x15b   : > { %1268 = vbcast.lane.b32.xlu1 %v7992_v18, 344  ;;  %v8030_v22 = vpop.permute.xlu1 %1000  ;;  %v8032_v32 = vpop.permute.xlu0 %1012 }
 0x15c   : > { %13665 = vst [vmem:[#allocation57_spill] sm:$0xff] %v8030_v22  ;;  %13666 = vst [vmem:[#allocation58_spill] sm:$0xff] %v8032_v32  ;;  %1272 = vbcast.lane.b32.xlu0 %v7992_v18, 352 }
 0x15f   : > { %1276 = vbcast.lane.b32.xlu1 %v7992_v18, 360  ;;  %v8036_v19 = vpop.permute.xlu1 %1008  ;;  %v8038_v17 = vpop.permute.xlu0 %1020 }
 0x160   : > { %13667 = vst [vmem:[#allocation59_spill] sm:$0xff] %v8036_v19  ;;  %13668 = vst [vmem:[#allocation60_spill] sm:$0xff] %v8038_v17  ;;  %1280 = vbcast.lane.b32.xlu0 %v7992_v18, 368 }
 0x163   : > { %1284 = vbcast.lane.b32.xlu1 %v7992_v18, 376  ;;  %v8042_v13 = vpop.permute.xlu1 %1016  ;;  %v8044_v11 = vpop.permute.xlu0 %1028 }
 0x164   : > { %13669 = vst [vmem:[#allocation61_spill] sm:$0xff] %v8042_v13  ;;  %13670 = vst [vmem:[#allocation62_spill] sm:$0xff] %v8044_v11  ;;  %1291 = vbcast.lane.b32.xlu0 %v1289_v10, 256 }
 0x167   : > { %v8048_v6 = vpop.permute.xlu1 %1024  ;;  %v8050_v5 = vpop.permute.xlu0 %1036  ;;  %1295 = vbcast.lane.b32.xlu1 %v1289_v10, 264 }
 0x168   : > { %13671 = vst [vmem:[#allocation63_spill] sm:$0xff] %v8048_v6  ;;  %13672 = vst [vmem:[#allocation64_spill] sm:$0xff] %v8050_v5  ;;  %1299 = vbcast.lane.b32.xlu0 %v1289_v10, 272 }
 0x16b   : > { %v8052_v3 = vpop.permute.xlu1 %1032  ;;  %v8054_v4 = vpop.permute.xlu0 %1044  ;;  %1303 = vbcast.lane.b32.xlu1 %v1289_v10, 280 }
 0x16c   : > { %13673 = vst [vmem:[#allocation65_spill] sm:$0xff] %v8052_v3  ;;  %13674 = vst [vmem:[#allocation66_spill] sm:$0xff] %v8054_v4  ;;  %1307 = vbcast.lane.b32.xlu0 %v1289_v10, 288 }
 0x16f   : > { %v8056_v2 = vpop.permute.xlu1 %1040  ;;  %v8058_v63 = vpop.permute.xlu0 %1055  ;;  %1311 = vbcast.lane.b32.xlu1 %v1289_v10, 296 }
 0x170   : > { %13675 = vst [vmem:[#allocation67_spill] sm:$0xff] %v8056_v2  ;;  %13676 = vst [vmem:[#allocation68_spill] sm:$0xff] %v8058_v63  ;;  %1315 = vbcast.lane.b32.xlu0 %v1289_v10, 304 }
 0x173   : > { %v8060_v11 = vpop.permute.xlu1 %1048  ;;  %v8062_v23 = vpop.permute.xlu0 %1063  ;;  %1319 = vbcast.lane.b32.xlu1 %v1289_v10, 312 }
 0x174   : > { %13677 = vst [vmem:[#allocation69_spill] sm:$0xff] %v8060_v11  ;;  %13678 = vst [vmem:[#allocation70_spill] sm:$0xff] %v8062_v23 }
 0x177   : > { %v8064_v5 = vpop.permute.xlu1 %1059  ;;  %v8066_v6 = vpop.permute.xlu0 %1071 }
 0x178   : > { %13679 = vst [vmem:[#allocation71_spill] sm:$0xff] %v8064_v5  ;;  %13680 = vst [vmem:[#allocation72_spill] sm:$0xff] %v8066_v6 }
 0x17b   : > { %v8068_v3 = vpop.permute.xlu1 %1067  ;;  %v8070_v4 = vpop.permute.xlu0 %1079 }
 0x17c   : > { %13681 = vst [vmem:[#allocation73_spill] sm:$0xff] %v8068_v3  ;;  %13682 = vst [vmem:[#allocation74_spill] sm:$0xff] %v8070_v4  ;;  %v8089_v3 = vsub.s32 2, %v7822_v29 }
 0x17f   : > { %v8072_v13 = vpop.permute.xlu1 %1075  ;;  %v8074_v2 = vpop.permute.xlu0 %1087 }
 0x180   : > { %13683 = vst [vmem:[#allocation75_spill] sm:$0xff] %v8072_v13  ;;  %13684 = vst [vmem:[#allocation76_spill] sm:$0xff] %v8074_v2 }
 0x183   : > { %v8076_v63 = vpop.permute.xlu1 %1083  ;;  %v8078_v17 = vpop.permute.xlu0 %1095 }
 0x184   : > { %13685 = vst [vmem:[#allocation77_spill] sm:$0xff] %v8076_v63  ;;  %13686 = vst [vmem:[#allocation78_spill] sm:$0xff] %v8078_v17  ;;  %v1324_v63 = vrot.slane %v7834_v33, %v8089_v3 }
 0x186   : > { %1326 = vbcast.lane.b32.xlu0 %v1324_v63, 256  ;;  %1330 = vbcast.lane.b32.xlu1 %v1324_v63, 264 }
 0x187   : > { %v8080_v11 = vpop.permute.xlu1 %1091  ;;  %v8082_v23 = vpop.permute.xlu0 %1103 }
 0x188   : > { %13687 = vst [vmem:[#allocation79_spill] sm:$0xff] %v8080_v11  ;;  %13688 = vst [vmem:[#allocation80_spill] sm:$0xff] %v8082_v23 }
 0x18a   : > { %1334 = vbcast.lane.b32.xlu0 %v1324_v63, 272  ;;  %1338 = vbcast.lane.b32.xlu1 %v1324_v63, 280 }
 0x18b   : > { %v8084_v10 = vpop.permute.xlu1 %1099  ;;  %v8086_v5 = vpop.permute.xlu0 %1111 }
 0x18c   : > { %13689 = vst [vmem:[#allocation81_spill] sm:$0xff] %v8084_v10  ;;  %13690 = vst [vmem:[#allocation82_spill] sm:$0xff] %v8086_v5 }
 0x18e   : > { %1342 = vbcast.lane.b32.xlu0 %v1324_v63, 288  ;;  %1346 = vbcast.lane.b32.xlu1 %v1324_v63, 296 }
 0x18f   : > { %v8091_v4 = vpop.permute.xlu1 %1107  ;;  %v8093_v13 = vpop.permute.xlu0 %1122 }
 0x190   : > { %13691 = vst [vmem:[#allocation83_spill] sm:$0xff] %v8091_v4  ;;  %13692 = vst [vmem:[#allocation84_spill] sm:$0xff] %v8093_v13 }
 0x192   : > { %1350 = vbcast.lane.b32.xlu0 %v1324_v63, 304  ;;  %1354 = vbcast.lane.b32.xlu1 %v1324_v63, 312 }
 0x193   : > { %v8097_v17 = vpop.permute.xlu1 %1115  ;;  %v8099_v11 = vpop.permute.xlu0 %1130 }
 0x194   : > { %13693 = vst [vmem:[#allocation85_spill] sm:$0xff] %v8097_v17  ;;  %13694 = vst [vmem:[#allocation86_spill] sm:$0xff] %v8099_v11 }
 0x196   : > { %1358 = vbcast.lane.b32.xlu0 %v1324_v63, 320  ;;  %1362 = vbcast.lane.b32.xlu1 %v1324_v63, 328 }
 0x197   : > { %v8101_v10 = vpop.permute.xlu1 %1126  ;;  %v8103_v5 = vpop.permute.xlu0 %1138 }
 0x198   : > { %13695 = vst [vmem:[#allocation87_spill] sm:$0xff] %v8101_v10  ;;  %13696 = vst [vmem:[#allocation88_spill] sm:$0xff] %v8103_v5 }
 0x19a   : > { %1366 = vbcast.lane.b32.xlu0 %v1324_v63, 336  ;;  %1370 = vbcast.lane.b32.xlu1 %v1324_v63, 344 }
 0x19b   : > { %v8105_v4 = vpop.permute.xlu1 %1134  ;;  %v8107_v13 = vpop.permute.xlu0 %1146 }
 0x19c   : > { %13697 = vst [vmem:[#allocation89_spill] sm:$0xff] %v8105_v4  ;;  %13698 = vst [vmem:[#allocation90_spill] sm:$0xff] %v8107_v13 }
 0x19e   : > { %1374 = vbcast.lane.b32.xlu0 %v1324_v63, 352  ;;  %1378 = vbcast.lane.b32.xlu1 %v1324_v63, 360 }
 0x19f   : > { %v8109_v23 = vpop.permute.xlu1 %1142  ;;  %v8111_v2 = vpop.permute.xlu0 %1157 }
 0x1a0   : > { %13699 = vst [vmem:[#allocation91_spill] sm:$0xff] %v8109_v23  ;;  %13700 = vst [vmem:[#allocation92_spill] sm:$0xff] %v8111_v2  ;;  %v8127_v2 = vrot.slane %v7872_v51, %v8089_v3 }
 0x1a2   : > { %1382 = vbcast.lane.b32.xlu0 %v1324_v63, 368  ;;  %1386 = vbcast.lane.b32.xlu1 %v1324_v63, 376 }
 0x1a3   : > { %v8113_v11 = vpop.permute.xlu1 %1150  ;;  %v8115_v17 = vpop.permute.xlu0 %1165 }
 0x1a4   : > { %13701 = vst [vmem:[#allocation93_spill] sm:$0xff] %v8113_v11  ;;  %13702 = vst [vmem:[#allocation94_spill] sm:$0xff] %v8115_v17 }
 0x1a6   : > { %1393 = vbcast.lane.b32.xlu0 %v8127_v2, 256  ;;  %1397 = vbcast.lane.b32.xlu1 %v8127_v2, 264 }
 0x1a7   : > { %v8117_v5 = vpop.permute.xlu1 %1161  ;;  %v8119_v10 = vpop.permute.xlu0 %1173 }
 0x1a8   : > { %13703 = vst [vmem:[#allocation95_spill] sm:$0xff] %v8117_v5  ;;  %13704 = vst [vmem:[#allocation96_spill] sm:$0xff] %v8119_v10 }
 0x1aa   : > { %1401 = vbcast.lane.b32.xlu0 %v8127_v2, 272  ;;  %1405 = vbcast.lane.b32.xlu1 %v8127_v2, 280 }
 0x1ab   : > { %v8121_v13 = vpop.permute.xlu1 %1169  ;;  %v8123_v4 = vpop.permute.xlu0 %1181 }
 0x1ac   : > { %13705 = vst [vmem:[#allocation97_spill] sm:$0xff] %v8121_v13  ;;  %13706 = vst [vmem:[#allocation98_spill] sm:$0xff] %v8123_v4 }
 0x1ae   : > { %1409 = vbcast.lane.b32.xlu0 %v8127_v2, 288  ;;  %1413 = vbcast.lane.b32.xlu1 %v8127_v2, 296 }
 0x1af   : > { %v8129_v11 = vpop.permute.xlu1 %1177  ;;  %v8131_v17 = vpop.permute.xlu0 %1189 }
 0x1b0   : > { %13707 = vst [vmem:[#allocation99_spill] sm:$0xff] %v8129_v11  ;;  %13708 = vst [vmem:[#allocation100_spill] sm:$0xff] %v8131_v17 }
 0x1b2   : > { %1417 = vbcast.lane.b32.xlu0 %v8127_v2, 304  ;;  %1421 = vbcast.lane.b32.xlu1 %v8127_v2, 312 }
 0x1b3   : > { %v8135_v10 = vpop.permute.xlu1 %1185  ;;  %v8137_v5 = vpop.permute.xlu0 %1197 }
 0x1b4   : > { %13709 = vst [vmem:[#allocation101_spill] sm:$0xff] %v8135_v10  ;;  %13710 = vst [vmem:[#allocation102_spill] sm:$0xff] %v8137_v5 }
 0x1b6   : > { %1425 = vbcast.lane.b32.xlu0 %v8127_v2, 320  ;;  %1429 = vbcast.lane.b32.xlu1 %v8127_v2, 328 }
 0x1b7   : > { %v8141_v4 = vpop.permute.xlu1 %1193  ;;  %v8143_v13 = vpop.permute.xlu0 %1205 }
 0x1b8   : > { %13711 = vst [vmem:[#allocation103_spill] sm:$0xff] %v8141_v4  ;;  %13712 = vst [vmem:[#allocation104_spill] sm:$0xff] %v8143_v13 }
 0x1ba   : > { %1433 = vbcast.lane.b32.xlu0 %v8127_v2, 336  ;;  %1437 = vbcast.lane.b32.xlu1 %v8127_v2, 344 }
 0x1bb   : > { %v8147_v63 = vpop.permute.xlu1 %1201  ;;  %v8149_v17 = vpop.permute.xlu0 %1213 }
 0x1bc   : > { %13713 = vst [vmem:[#allocation105_spill] sm:$0xff] %v8147_v63  ;;  %13714 = vst [vmem:[#allocation106_spill] sm:$0xff] %v8149_v17 }
 0x1be   : > { %1441 = vbcast.lane.b32.xlu0 %v8127_v2, 352  ;;  %1445 = vbcast.lane.b32.xlu1 %v8127_v2, 360 }
 0x1bf   : > { %v8153_v5 = vpop.permute.xlu1 %1209  ;;  %v8155_v10 = vpop.permute.xlu0 %1224 }
 0x1c0   : > { %13715 = vst [vmem:[#allocation107_spill] sm:$0xff] %v8153_v5  ;;  %13716 = vst [vmem:[#allocation108_spill] sm:$0xff] %v8155_v10 }
 0x1c2   : > { %1449 = vbcast.lane.b32.xlu0 %v8127_v2, 368  ;;  %1453 = vbcast.lane.b32.xlu1 %v8127_v2, 376 }
 0x1c3   : > { %v8159_v13 = vpop.permute.xlu1 %1217  ;;  %v8161_v4 = vpop.permute.xlu0 %1232 }
 0x1c4   : > { %13717 = vst [vmem:[#allocation109_spill] sm:$0xff] %v8159_v13  ;;  %13718 = vst [vmem:[#allocation110_spill] sm:$0xff] %v8161_v4 }
 0x1c7   : > { %v8165_v17 = vpop.permute.xlu1 %1228  ;;  %v8167_v63 = vpop.permute.xlu0 %1240 }
 0x1c8   : > { %13719 = vst [vmem:[#allocation111_spill] sm:$0xff] %v8165_v17  ;;  %13720 = vst [vmem:[#allocation112_spill] sm:$0xff] %v8167_v63 }
 0x1cb   : > { %v8171_v10 = vpop.permute.xlu1 %1236  ;;  %v8175_v13 = vpop.permute.xlu0 %1248 }
 0x1cc   : > { %13721 = vst [vmem:[#allocation113_spill] sm:$0xff] %v8171_v10  ;;  %13722 = vst [vmem:[#allocation114_spill] sm:$0xff] %v8175_v13 }
 0x1cf   : > { %v8177_v4 = vpop.permute.xlu1 %1244  ;;  %v8181_v11 = vpop.permute.xlu0 %1256 }
 0x1d0   : > { %13723 = vst [vmem:[#allocation115_spill] sm:$0xff] %v8177_v4  ;;  %13725 = vst [vmem:[#allocation117_spill] sm:$0xff] %v8181_v11  ;;  %v1458_v11 = vrot.slane %v7926_v7, %v8089_v3 }
 0x1d2   : > { %1460 = vbcast.lane.b32.xlu0 %v1458_v11, 256  ;;  %1464 = vbcast.lane.b32.xlu1 %v1458_v11, 264 }
 0x1d3   : > { %v8179_v5 = vpop.permute.xlu1 %1252  ;;  %v8185_v63 = vpop.permute.xlu0 %1264 }
 0x1d4   : > { %13724 = vst [vmem:[#allocation116_spill] sm:$0xff] %v8179_v5  ;;  %13727 = vst [vmem:[#allocation119_spill] sm:$0xff] %v8185_v63 }
 0x1d6   : > { %1468 = vbcast.lane.b32.xlu0 %v1458_v11, 272  ;;  %1472 = vbcast.lane.b32.xlu1 %v1458_v11, 280 }
 0x1d7   : > { %v8183_v17 = vpop.permute.xlu1 %1260  ;;  %v8189_v6 = vpop.permute.xlu0 %1272 }
 0x1d8   : > { %13726 = vst [vmem:[#allocation118_spill] sm:$0xff] %v8183_v17  ;;  %13729 = vst [vmem:[#allocation121_spill] sm:$0xff] %v8189_v6  ;;  %v8377_v6 = vmul.f32 0.015625, %v7815_v25  ;;  %v8395_v25 = vmul.f32 0.015625, %v7819_v28 }
 0x1da   : > { %1476 = vbcast.lane.b32.xlu0 %v1458_v11, 288  ;;  %1480 = vbcast.lane.b32.xlu1 %v1458_v11, 296 }
 0x1db   : > { %v8187_v23 = vpop.permute.xlu1 %1268  ;;  %v8193_v19 = vpop.permute.xlu0 %1280 }
 0x1dc   : > { %13728 = vst [vmem:[#allocation120_spill] sm:$0xff] %v8187_v23  ;;  %13731 = vst [vmem:[#allocation123_spill] sm:$0xff] %v8193_v19 }
 0x1de   : > { %1484 = vbcast.lane.b32.xlu0 %v1458_v11, 304  ;;  %1488 = vbcast.lane.b32.xlu1 %v1458_v11, 312 }
 0x1df   : > { %v8191_v10 = vpop.permute.xlu1 %1276  ;;  %v8197_v13 = vpop.permute.xlu0 %1291 }
 0x1e0   : > { %13730 = vst [vmem:[#allocation122_spill] sm:$0xff] %v8191_v10  ;;  %13733 = vst [vmem:[#allocation125_spill] sm:$0xff] %v8197_v13  ;;  %v1492_v13 = vsub.s32 3, %v7822_v29 }
 0x1e2   : > { %v1493_v3 = vrot.slane %v7834_v33, %v1492_v13 }
 0x1e3   : > { %v8195_v32 = vpop.permute.xlu1 %1284  ;;  %v8203_v63 = vpop.permute.xlu0 %1299 }
 0x1e4   : > { %13732 = vst [vmem:[#allocation124_spill] sm:$0xff] %v8195_v32  ;;  %13735 = vst [vmem:[#allocation127_spill] sm:$0xff] %v8203_v63  ;;  %1495 = vbcast.lane.b32.xlu0 %v1493_v3, 256  ;;  %1499 = vbcast.lane.b32.xlu1 %v1493_v3, 264 }
 0x1e7   : > { %v8199_v4 = vpop.permute.xlu1 %1295  ;;  %v8207_v10 = vpop.permute.xlu0 %1307 }
 0x1e8   : > { %13734 = vst [vmem:[#allocation126_spill] sm:$0xff] %v8199_v4  ;;  %13737 = vst [vmem:[#allocation129_spill] sm:$0xff] %v8207_v10  ;;  %1503 = vbcast.lane.b32.xlu0 %v1493_v3, 272  ;;  %1507 = vbcast.lane.b32.xlu1 %v1493_v3, 280  ;;  %v8372_v10 = vmul.f32 0.015625, %v7813_v24  ;;  %v8388_v24 = vmul.f32 0.015625, %v7817_v27 }
 0x1e9   : > { %v8403_v27 = vand.u32 2147483647, %v8377_v6 }
 0x1ea   : > { %v8392_v22 = vand.u32 2147483647, %v8372_v10  ;;  %v8414_v28 = vand.u32 2147483647, %v8388_v24 }
 0x1eb   : > { %v8205_v23 = vpop.permute.xlu1 %1303  ;;  %v8213_v4 = vpop.permute.xlu0 %1315  ;;  %13782 = vst [vmem:[#allocation174_spill] sm:$0xff] %v8403_v27 }
 0x1ec   : > { %13736 = vst [vmem:[#allocation128_spill] sm:$0xff] %v8205_v23  ;;  %13739 = vst [vmem:[#allocation131_spill] sm:$0xff] %v8213_v4  ;;  %1511 = vbcast.lane.b32.xlu0 %v1493_v3, 288  ;;  %1515 = vbcast.lane.b32.xlu1 %v1493_v3, 296  ;;  %v8365_v4 = vmul.f32 0.015625, %v7809_v21 }
 0x1ed   : > { %13781 = vst [vmem:[#allocation173_spill] sm:$0xff] %v8392_v22  ;;  %13785 = vst [vmem:[#allocation177_spill] sm:$0xff] %v8414_v28 }
 0x1ee   : > { %v8385_v5 = vand.u32 2147483647, %v8365_v4 }
 0x1ef   : > { %v8209_v19 = vpop.permute.xlu1 %1311 }
 0x1f0   : > { %13738 = vst [vmem:[#allocation130_spill] sm:$0xff] %v8209_v19  ;;  %1519 = vbcast.lane.b32.xlu0 %v1493_v3, 304  ;;  %1523 = vbcast.lane.b32.xlu1 %v1493_v3, 312 }
 0x1f3   : > { %v8215_v32 = vpop.permute.xlu1 %1319 }
 0x1f4   : > { %13740 = vst [vmem:[#allocation132_spill] sm:$0xff] %v8215_v32  ;;  %1527 = vbcast.lane.b32.xlu0 %v1493_v3, 320  ;;  %1531 = vbcast.lane.b32.xlu1 %v1493_v3, 328 }
 0x1f8   : > { %v8217_v23 = vpop.permute.xlu0 %1326  ;;  %v8219_v63 = vpop.permute.xlu1 %1330  ;;  %1535 = vbcast.lane.b32.xlu0 %v1493_v3, 336  ;;  %1539 = vbcast.lane.b32.xlu1 %v1493_v3, 344 }
 0x1f9   : > { %13741 = vst [vmem:[#allocation133_spill] sm:$0xff] %v8217_v23  ;;  %13742 = vst [vmem:[#allocation134_spill] sm:$0xff] %v8219_v63 }
 0x1fc   : > { %v8221_v19 = vpop.permute.xlu0 %1334  ;;  %v8223_v29 = vpop.permute.xlu1 %1338  ;;  %1543 = vbcast.lane.b32.xlu0 %v1493_v3, 352  ;;  %1547 = vbcast.lane.b32.xlu1 %v1493_v3, 360 }
 0x1fd   : > { %13743 = vst [vmem:[#allocation135_spill] sm:$0xff] %v8221_v19  ;;  %13744 = vst [vmem:[#allocation136_spill] sm:$0xff] %v8223_v29  ;;  %v8238_v29 = vrot.slane %v7872_v51, %v1492_v13 }
 0x1ff   : > { %13751 = vst [vmem:[#allocation143_spill] sm:$0xff] %v8238_v29 }
 0x200   : > { %v8225_v33 = vpop.permute.xlu0 %1342  ;;  %v8227_v11 = vpop.permute.xlu1 %1346  ;;  %1551 = vbcast.lane.b32.xlu0 %v1493_v3, 368  ;;  %1555 = vbcast.lane.b32.xlu1 %v1493_v3, 376 }
 0x201   : > { %13745 = vst [vmem:[#allocation137_spill] sm:$0xff] %v8225_v33  ;;  %13746 = vst [vmem:[#allocation138_spill] sm:$0xff] %v8227_v11 }
 0x204   : > { %v8229_v23 = vpop.permute.xlu0 %1350  ;;  %v8231_v63 = vpop.permute.xlu1 %1354  ;;  %1562 = vbcast.lane.b32.xlu0 %v8238_v29, 256  ;;  %1566 = vbcast.lane.b32.xlu1 %v8238_v29, 264 }
 0x205   : > { %13747 = vst [vmem:[#allocation139_spill] sm:$0xff] %v8229_v23  ;;  %13748 = vst [vmem:[#allocation140_spill] sm:$0xff] %v8231_v63 }
 0x208   : > { %v8233_v32 = vpop.permute.xlu0 %1358  ;;  %v8235_v19 = vpop.permute.xlu1 %1362  ;;  %1570 = vbcast.lane.b32.xlu0 %v8238_v29, 272  ;;  %1574 = vbcast.lane.b32.xlu1 %v8238_v29, 280 }
 0x209   : > { %13749 = vst [vmem:[#allocation141_spill] sm:$0xff] %v8233_v32  ;;  %13750 = vst [vmem:[#allocation142_spill] sm:$0xff] %v8235_v19 }
 0x20c   : > { %v8242_v11 = vpop.permute.xlu0 %1366  ;;  %v8244_v23 = vpop.permute.xlu1 %1370  ;;  %1578 = vbcast.lane.b32.xlu0 %v8238_v29, 288  ;;  %1582 = vbcast.lane.b32.xlu1 %v8238_v29, 296 }
 0x20d   : > { %13752 = vst [vmem:[#allocation144_spill] sm:$0xff] %v8242_v11  ;;  %13753 = vst [vmem:[#allocation145_spill] sm:$0xff] %v8244_v23 }
 0x210   : > { %v8248_v32 = vpop.permute.xlu0 %1374  ;;  %v8250_v19 = vpop.permute.xlu1 %1378  ;;  %1586 = vbcast.lane.b32.xlu0 %v8238_v29, 304  ;;  %1590 = vbcast.lane.b32.xlu1 %v8238_v29, 312 }
 0x211   : > { %13754 = vst [vmem:[#allocation146_spill] sm:$0xff] %v8248_v32  ;;  %13755 = vst [vmem:[#allocation147_spill] sm:$0xff] %v8250_v19 }
 0x214   : > { %v8256_v51 = vpop.permute.xlu0 %1382  ;;  %v8258_v3 = vpop.permute.xlu1 %1386  ;;  %1594 = vbcast.lane.b32.xlu0 %v8238_v29, 320  ;;  %1598 = vbcast.lane.b32.xlu1 %v8238_v29, 328 }
 0x215   : > { %13756 = vst [vmem:[#allocation148_spill] sm:$0xff] %v8256_v51  ;;  %13757 = vst [vmem:[#allocation149_spill] sm:$0xff] %v8258_v3 }
 0x218   : > { %v8262_v23 = vpop.permute.xlu0 %1393  ;;  %v8264_v32 = vpop.permute.xlu1 %1397  ;;  %1602 = vbcast.lane.b32.xlu0 %v8238_v29, 336  ;;  %1606 = vbcast.lane.b32.xlu1 %v8238_v29, 344 }
 0x219   : > { %13758 = vst [vmem:[#allocation150_spill] sm:$0xff] %v8262_v23  ;;  %13759 = vst [vmem:[#allocation151_spill] sm:$0xff] %v8264_v32  ;;  %v1627_v23 = vrot.slane %v7926_v7, %v1492_v13  ;;  %v7550_v7 = vmov 0  }
 0x21a   : > { %7125 = vset.pattern.permute.xlu0 %v7550_v7  ;;  %7126 = vset.pattern.permute.xlu1 %v7550_v7  ;;  %v8305_v7 = vmul.f32 0.015625, %v7792_v1  ;;  %v8323_v1 = vmul.f32 0.015625, %v7796_v8 }
 0x21c   : > { %1610 = vbcast.lane.b32.xlu0 %v8238_v29, 352  ;;  %1614 = vbcast.lane.b32.xlu1 %v8238_v29, 360  ;;  %v8270_v19 = vpop.permute.xlu0 %1401  ;;  %v8272_v51 = vpop.permute.xlu1 %1405  ;;  %vm5639_vm4 = vcmp.lt.f32.partialorder %v8305_v7, 0.0  ;;  %vm5638_vm7 = vcmp.eq.f32.partialorder %v8305_v7, 0.0 }
 0x21d   : > { %13760 = vst [vmem:[#allocation152_spill] sm:$0xff] %v8270_v19  ;;  %13761 = vst [vmem:[#allocation153_spill] sm:$0xff] %v8272_v51 }
 0x220   : > { %1618 = vbcast.lane.b32.xlu0 %v8238_v29, 368  ;;  %1622 = vbcast.lane.b32.xlu1 %v8238_v29, 376  ;;  %v8277_v3 = vpop.permute.xlu0 %1409  ;;  %v8279_v32 = vpop.permute.xlu1 %1413 }
 0x221   : > { %13762 = vst [vmem:[#allocation154_spill] sm:$0xff] %v8277_v3  ;;  %13763 = vst [vmem:[#allocation155_spill] sm:$0xff] %v8279_v32  ;;  %v8351_v3 = vmul.f32 0.015625, %v7807_v20 }
 0x223   : > { %v8369_v20 = vand.u32 2147483647, %v8351_v3 }
 0x224   : > { %1629 = vbcast.lane.b32.xlu0 %v1627_v23, 256  ;;  %1633 = vbcast.lane.b32.xlu1 %v1627_v23, 264  ;;  %v8281_v11 = vpop.permute.xlu0 %1417  ;;  %v8283_v63 = vpop.permute.xlu1 %1421 }
 0x225   : > { %13764 = vst [vmem:[#allocation156_spill] sm:$0xff] %v8281_v11  ;;  %13765 = vst [vmem:[#allocation157_spill] sm:$0xff] %v8283_v63  ;;  %v8330_v63 = vmul.f32 0.015625, %v7801_v14 }
 0x226   : > { %13778 = vst [vmem:[#allocation170_spill] sm:$0xff] %v8369_v20 }
 0x227   : > { %v8348_v14 = vand.u32 2147483647, %v8330_v63 }
 0x228   : > { %1637 = vbcast.lane.b32.xlu0 %v1627_v23, 272  ;;  %1641 = vbcast.lane.b32.xlu1 %v1627_v23, 280  ;;  %v8285_v51 = vpop.permute.xlu0 %1425  ;;  %v8287_v19 = vpop.permute.xlu1 %1429 }
 0x229   : > { %13766 = vst [vmem:[#allocation158_spill] sm:$0xff] %v8285_v51  ;;  %13767 = vst [vmem:[#allocation159_spill] sm:$0xff] %v8287_v19  ;;  %v8298_v51 = vmul.f32 0.015625, %v7790_v0 }
 0x22b   : > { %vm5675_vm13 = vcmp.lt.f32.partialorder %v8298_v51, 0.0  ;;  %vm5674_vm0 = vcmp.eq.f32.partialorder %v8298_v51, 0.0 }
 0x22c   : > { %1645 = vbcast.lane.b32.xlu0 %v1627_v23, 288  ;;  %1649 = vbcast.lane.b32.xlu1 %v1627_v23, 296  ;;  %v8291_v13 = vpop.permute.xlu0 %1433  ;;  %v8293_v11 = vpop.permute.xlu1 %1437 }
 0x22d   : > { %13768 = vst [vmem:[#allocation160_spill] sm:$0xff] %v8291_v13  ;;  %13769 = vst [vmem:[#allocation161_spill] sm:$0xff] %v8293_v11  ;;  %v8310_v11 = vand.u32 2147483647, %v8298_v51  ;;  %v8313_v13 = vand.u32 2147483647, %v8305_v7 }
 0x22f   : > { %7128 = vlog2.f32 %v8310_v11  ;;  %vm5648_vm1 = vweird.f32 %v8313_v13  ;;  %vm5650_vm2 = vcmp.eq.f32.partialorder %v8313_v13, 0.0  ;;  %vm5684_vm5 = vweird.f32 %v8310_v11 }
 0x230   : > { %1653 = vbcast.lane.b32.xlu0 %v1627_v23, 304  ;;  %1657 = vbcast.lane.b32.xlu1 %v1627_v23, 312  ;;  %v8300_v19 = vpop.permute.xlu0 %1441  ;;  %v8302_v23 = vpop.permute.xlu1 %1445  ;;  %7130 = vlog2.f32 %v8313_v13  ;;  %vm5641_vm9 = vcmp.eq.f32.partialorder %v8313_v13, inf  ;;  %vm5686_vm10 = vcmp.eq.f32.partialorder %v8310_v11, 0.0  ;;  %v13854_v13 = vand.u32 2147483648, %v8298_v51 }
 0x231   : > { %13770 = vst [vmem:[#allocation162_spill] sm:$0xff] %v8300_v19  ;;  %13771 = vst [vmem:[#allocation163_spill] sm:$0xff] %v8302_v23  ;;  %v8326_v19 = vmul.f32 0.015625, %v7798_v9  ;;  %v8345_v9 = vmul.f32 0.015625, %v7803_v15 }
 0x233   : > { %v8342_v8 = vand.u32 2147483647, %v8326_v19  ;;  %v8362_v15 = vand.u32 2147483647, %v8345_v9  ;;  %vm5657_vm8 = vcmp.lt.f32.partialorder %v8326_v19, 0.0  ;;  %vm5656_vm12 = vcmp.eq.f32.partialorder %v8326_v19, 0.0 }
 0x234   : > { %1660 = vbcast.lane.b32.xlu0 %v7880_v54, 256  ;;  %1664 = vbcast.lane.b32.xlu1 %v7880_v54, 264  ;;  %v8317_v0 = vpop.permute.xlu0 %1449  ;;  %v8319_v23 = vpop.permute.xlu1 %1453 }
 0x235   : > { %13772 = vst [vmem:[#allocation164_spill] sm:$0xff] %v8317_v0  ;;  %13773 = vst [vmem:[#allocation165_spill] sm:$0xff] %v8319_v23  ;;  %v8335_v0 = vand.u32 2147483647, %v8323_v1  ;;  %vm5666_vm3 = vweird.f32 %v8342_v8  ;;  %vm5668_vm6 = vcmp.eq.f32.partialorder %v8342_v8, 0.0  ;;  %vm5720_vm11 = vweird.f32 %v8362_v15 }
 0x236   : > { %vm5722_vm14 = vcmp.eq.f32.partialorder %v8362_v15, 0.0 }
 0x237   : > { %7132 = vlog2.f32 %v8335_v0  ;;  %vm5702_vm15 = vweird.f32 %v8335_v0 }
 0x238   : > { %1668 = vbcast.lane.b32.xlu0 %v7880_v54, 272  ;;  %1672 = vbcast.lane.b32.xlu1 %v7880_v54, 280  ;;  %7134 = vlog2.f32 %v8342_v8 }
 0x239   : > { %v7129_v33 = vpop.eup %7128  ;;  %7136 = vlog2.f32 %v8348_v14 }
 0x23a   : > { %7138 = vlog2.f32 %v8362_v15 }
 0x23b   : > { %7140 = vlog2.f32 %v8369_v20 }
 0x23c   : > { %1676 = vbcast.lane.b32.xlu0 %v7880_v54, 288  ;;  %1680 = vbcast.lane.b32.xlu1 %v7880_v54, 296 }
 0x240   : > { %1684 = vbcast.lane.b32.xlu0 %v7880_v54, 304  ;;  %1688 = vbcast.lane.b32.xlu1 %v7880_v54, 312 }
 0x244   : > { %1692 = vbcast.lane.b32.xlu0 %v7880_v54, 320  ;;  %1696 = vbcast.lane.b32.xlu1 %v7880_v54, 328  ;;  %v8337_v23 = vpop.permute.xlu0 %1460  ;;  %v8339_v32 = vpop.permute.xlu1 %1464 }
 0x245   : > { %13774 = vst [vmem:[#allocation166_spill] sm:$0xff] %v8337_v23  ;;  %13775 = vst [vmem:[#allocation167_spill] sm:$0xff] %v8339_v32 }
 0x248   : > { %1700 = vbcast.lane.b32.xlu0 %v7880_v54, 336  ;;  %1704 = vbcast.lane.b32.xlu1 %v7880_v54, 344  ;;  %v8356_v23 = vpop.permute.xlu0 %1468  ;;  %v8358_v32 = vpop.permute.xlu1 %1472 }
 0x249   : > { %13776 = vst [vmem:[#allocation168_spill] sm:$0xff] %v8356_v23  ;;  %13777 = vst [vmem:[#allocation169_spill] sm:$0xff] %v8358_v32  ;;  %v7131_v32 = vpop.eup %7130  ;;  %v5681_v23 = vmul.f32 0.33333334, %v7129_v33 }
 0x24a   : > { %v5645_v33 = vmul.f32 0.33333334, %v7131_v32 }
 0x24b   : > { %7142 = vpow2.f32 %v5681_v23 }
 0x24c   : > { %1708 = vbcast.lane.b32.xlu0 %v7880_v54, 352  ;;  %1712 = vbcast.lane.b32.xlu1 %v7880_v54, 360  ;;  %v8379_v17 = vpop.permute.xlu0 %1476  ;;  %v8381_v21 = vpop.permute.xlu1 %1480  ;;  %7144 = vlog2.f32 %v8385_v5 }
 0x24d   : > { %13779 = vst [vmem:[#allocation171_spill] sm:$0xff] %v8379_v17  ;;  %13780 = vst [vmem:[#allocation172_spill] sm:$0xff] %v8381_v21  ;;  %v8400_v21 = vmul.f32 0.015625, %v7824_v30  ;;  %v8406_v17 = vmul.f32 0.015625, %v7826_v31  ;;  %7146 = vlog2.f32 %v8392_v22  ;;  %v8418_v30 = vand.u32 2147483647, %v8395_v25 }
 0x24e   : > { %7148 = vpow2.f32 %v5645_v33  ;;  %v8438_v33 = vmul.f32 0.015625, %v7838_v35  ;;  %v8449_v35 = vmul.f32 0.015625, %v7842_v37 }
 0x24f   : > { %13786 = vst [vmem:[#allocation178_spill] sm:$0xff] %v8418_v30  ;;  %v8423_v32 = vand.u32 2147483647, %v8400_v21  ;;  %7150 = vlog2.f32 %v8403_v27 }
 0x250   : > { %1716 = vbcast.lane.b32.xlu0 %v7880_v54, 368  ;;  %1720 = vbcast.lane.b32.xlu1 %v7880_v54, 376  ;;  %v8408_v16 = vpop.permute.xlu0 %1484  ;;  %v8410_v12 = vpop.permute.xlu1 %1488  ;;  %7152 = vlog2.f32 %v8414_v28  ;;  %13792 = vst [vmem:[#allocation184_spill] sm:$0xff] %v8449_v35  ;;  %v8456_v28 = vand.u32 2147483647, %v8438_v33 }
 0x251   : > { %13783 = vst [vmem:[#allocation175_spill] sm:$0xff] %v8408_v16  ;;  %13784 = vst [vmem:[#allocation176_spill] sm:$0xff] %v8410_v12  ;;  %v7133_v54 = vpop.eup %7132  ;;  %v8427_v12 = vand.u32 2147483647, %v8406_v17  ;;  %v8430_v16 = vmul.f32 0.015625, %v7836_v34  ;;  %7154 = vlog2.f32 %v8418_v30 }
 0x252   : > { %v7135_v31 = vpop.eup %7134  ;;  %13787 = vst [vmem:[#allocation179_spill] sm:$0xff] %v8423_v32  ;;  %v5699_v22 = vmul.f32 0.33333334, %v7133_v54  ;;  %7156 = vlog2.f32 %v8423_v32  ;;  %13795 = vst [vmem:[#allocation187_spill] sm:$0xff] %v8456_v28 }
 0x253   : > { %v7137_v23 = vpop.eup %7136  ;;  %13788 = vst [vmem:[#allocation180_spill] sm:$0xff] %v8427_v12  ;;  %v5663_v29 = vmul.f32 0.33333334, %v7135_v31  ;;  %7158 = vlog2.f32 %v8427_v12  ;;  %v8446_v54 = vand.u32 2147483647, %v8430_v16 }
 0x254   : > { %1723 = vbcast.lane.b32.xlu0 %v7992_v18, 256  ;;  %1727 = vbcast.lane.b32.xlu1 %v7992_v18, 264  ;;  %v7139_v20 = vpop.eup %7138  ;;  %v5735_v34 = vmul.f32 0.33333334, %v7137_v23  ;;  %7160 = vpow2.f32 %v5699_v22  ;;  %v8459_v23 = vmul.f32 0.015625, %v7844_v38  ;;  %v8470_v38 = vmul.f32 0.015625, %v7846_v39 }
 0x255   : > { %13791 = vst [vmem:[#allocation183_spill] sm:$0xff] %v8446_v54  ;;  %7162 = vpow2.f32 %v5663_v29  ;;  %v5717_v12 = vmul.f32 0.33333334, %v7139_v20  ;;  %v8467_v22 = vand.u32 2147483647, %v8449_v35 }
 0x256   : > { %v8432_v36 = vpop.permute.xlu0 %1495  ;;  %v8434_v26 = vpop.permute.xlu1 %1499  ;;  %13796 = vst [vmem:[#allocation188_spill] sm:$0xff] %v8459_v23  ;;  %7164 = vpow2.f32 %v5735_v34  ;;  %13798 = vst [vmem:[#allocation190_spill] sm:$0xff] %v8470_v38  ;;  %v8478_v53 = vand.u32 2147483647, %v8459_v23 }
 0x257   : > { %13789 = vst [vmem:[#allocation181_spill] sm:$0xff] %v8432_v36  ;;  %13790 = vst [vmem:[#allocation182_spill] sm:$0xff] %v8434_v26  ;;  %v7141_v36 = vpop.eup %7140  ;;  %7166 = vlog2.f32 %v8446_v54 }
 0x258   : > { %1731 = vbcast.lane.b32.xlu0 %v7992_v18, 272  ;;  %1735 = vbcast.lane.b32.xlu1 %v7992_v18, 280  ;;  %v8461_v32 = vpop.eup %7142  ;;  %13797 = vst [vmem:[#allocation189_spill] sm:$0xff] %v8467_v22  ;;  %7168 = vlog2.f32 %v8456_v28  ;;  %13801 = vst [vmem:[#allocation193_spill] sm:$0xff] %v8478_v53 }
 0x259   : > { %v7145_v37 = vpop.eup %7144  ;;  %7170 = vpow2.f32 %v5717_v12  ;;  %v8502_v12 = vmul.f32 0.015625, %v7850_v41 }
 0x25a   : > { %v8451_v31 = vpop.permute.xlu0 %1503  ;;  %v8453_v26 = vpop.permute.xlu1 %1507  ;;  %v5753_v34 = vmul.f32 0.33333334, %v7145_v37 }
 0x25b   : > { %13793 = vst [vmem:[#allocation185_spill] sm:$0xff] %v8451_v31  ;;  %13794 = vst [vmem:[#allocation186_spill] sm:$0xff] %v8453_v26  ;;  %v5771_v31 = vmul.f32 0.33333334, %v7141_v36  ;;  %v7147_v30 = vpop.eup %7146 }
 0x25c   : > { %1739 = vbcast.lane.b32.xlu0 %v7992_v18, 288  ;;  %1743 = vbcast.lane.b32.xlu1 %v7992_v18, 296  ;;  %v7149_v20 = vpop.eup %7148  ;;  %v5807_v39 = vmul.f32 0.33333334, %v7147_v30  ;;  %13806 = vst [vmem:[#allocation198_spill] sm:$0xff] %v8502_v12 }
 0x25d   : > { %v7151_v36 = vpop.eup %7150  ;;  %7172 = vpow2.f32 %v5771_v31  ;;  %v8510_v31 = vmul.f32 0.015625, %v7852_v42 }
 0x25e   : > { %v8472_v26 = vpop.permute.xlu0 %1511  ;;  %v8474_v29 = vpop.permute.xlu1 %1515  ;;  %7174 = vlog2.f32 %v8467_v22  ;;  %v5789_v37 = vmul.f32 0.33333334, %v7151_v36  ;;  %v8494_v22 = vmul.f32 0.015625, %v7848_v40  ;;  %v13813_v40 = vand.u32 2147483648, %v8305_v7 }
 0x25f   : > { %13799 = vst [vmem:[#allocation191_spill] sm:$0xff] %v8472_v26  ;;  %13800 = vst [vmem:[#allocation192_spill] sm:$0xff] %v8474_v29  ;;  %v7153_v35 = vpop.eup %7152  ;;  %v8484_v29 = vand.u32 2147483647, %v8470_v38  ;;  %7176 = vlog2.f32 %v8478_v53 }
 0x260   : > { %1747 = vbcast.lane.b32.xlu0 %v7992_v18, 304  ;;  %1751 = vbcast.lane.b32.xlu1 %v7992_v18, 312  ;;  %v7155_v54 = vpop.eup %7154  ;;  %7178 = vpow2.f32 %v5753_v34  ;;  %v5843_v30 = vmul.f32 0.33333334, %v7153_v35  ;;  %13805 = vst [vmem:[#allocation197_spill] sm:$0xff] %v8494_v22  ;;  %13807 = vst [vmem:[#allocation199_spill] sm:$0xff] %v8510_v31 }
 0x261   : > { %13802 = vst [vmem:[#allocation194_spill] sm:$0xff] %v8484_v29  ;;  %v7157_v28 = vpop.eup %7156  ;;  %7180 = vpow2.f32 %v5807_v39  ;;  %v5825_v36 = vmul.f32 0.33333334, %v7155_v54  ;;  %v8523_v42 = vand.u32 2147483647, %v8494_v22 }
 0x262   : > { %v8486_v26 = vpop.permute.xlu0 %1519  ;;  %v8488_v23 = vpop.permute.xlu1 %1523  ;;  %v5879_v35 = vmul.f32 0.33333334, %v7157_v28  ;;  %7182 = vlog2.f32 %v8484_v29  ;;  %v5647_v28 = vor.u32 %v7149_v20, %v13813_v40  ;;  %v8577_v29 = vmul.f32 0.015625, %v7860_v46 }
 0x263   : > { %13803 = vst [vmem:[#allocation195_spill] sm:$0xff] %v8486_v26  ;;  %13804 = vst [vmem:[#allocation196_spill] sm:$0xff] %v8488_v23  ;;  %v7159_v27 = vpop.eup %7158  ;;  %7184 = vpow2.f32 %v5789_v37  ;;  %v8533_v37 = vmul.f32 0.015625, %v7854_v43 }
 0x264   : > { %1755 = vbcast.lane.b32.xlu0 %v7992_v18, 320  ;;  %1759 = vbcast.lane.b32.xlu1 %v7992_v18, 328  ;;  %v8498_v26 = vpop.eup %7160  ;;  %v5861_v53 = vmul.f32 0.33333334, %v7159_v27  ;;  %7186 = vpow2.f32 %v5843_v30  ;;  %13810 = vst [vmem:[#allocation202_spill] sm:$0xff] %v8523_v42  ;;  %13821 = vst [vmem:[#allocation212_spill] sm:$0xff] %v8577_v29 }
 0x265   : > { %v8505_v34 = vpop.eup %7162  ;;  %7188 = vpow2.f32 %v5825_v36  ;;  %v8530_v27 = vand.u32 2147483647, %v8502_v12  ;;  %13812 = vst [vmem:[#allocation204_spill] sm:$0xff] %v8533_v37 }
 0x266   : > { %v8512_v38 = vpop.permute.xlu0 %1527  ;;  %v8514_v23 = vpop.permute.xlu1 %1531  ;;  %7190 = vpow2.f32 %v5879_v35 }
 0x267   : > { %13808 = vst [vmem:[#allocation200_spill] sm:$0xff] %v8512_v38  ;;  %13809 = vst [vmem:[#allocation201_spill] sm:$0xff] %v8514_v23  ;;  %v8516_v54 = vpop.eup %7164  ;;  %v8540_v23 = vand.u32 2147483647, %v8510_v31  ;;  %v8543_v38 = vmul.f32 0.015625, %v7856_v44  ;;  %7192 = vpow2.f32 %v5861_v53  ;;  %v8567_v44 = vmul.f32 0.015625, %v7858_v45 }
 0x268   : > { %v7167_v52 = vpop.eup %7166  ;;  %1763 = vbcast.lane.b32.xlu0 %v7992_v18, 336  ;;  %1767 = vbcast.lane.b32.xlu1 %v7992_v18, 344  ;;  %13811 = vst [vmem:[#allocation203_spill] sm:$0xff] %v8530_v27  ;;  %7194 = vlog2.f32 %v8523_v42  ;;  %v5649_v53 = vsel %vm5648_vm1, %v8305_v7, %v5647_v28  ;;  %vm5659_vm1 = vcmp.eq.f32.partialorder %v8342_v8, inf }
 0x269   : > { %v7169_v41 = vpop.eup %7168  ;;  %13814 = vst [vmem:[#allocation205_spill] sm:$0xff] %v8540_v23  ;;  %13815 = vst [vmem:[#allocation206_spill] sm:$0xff] %v8543_v38  ;;  %v5915_v20 = vmul.f32 0.33333334, %v7167_v52  ;;  %7196 = vlog2.f32 %v8530_v27  ;;  %v8564_v52 = vand.u32 2147483647, %v8533_v37 }
 0x26a   : > { %v8535_v30 = vpop.eup %7170  ;;  %v8546_v36 = vpop.permute.xlu0 %1535  ;;  %v5897_v31 = vmul.f32 0.33333334, %v7169_v41  ;;  %13819 = vst [vmem:[#allocation210_spill] sm:$0xff] %v8567_v44  ;;  %7198 = vlog2.f32 %v8540_v23  ;;  %v8574_v35 = vand.u32 2147483647, %v8543_v38  ;;  %v13824_v37 = vand.u32 2147483648, %v8298_v51 }
 0x26b   : > { %13816 = vst [vmem:[#allocation207_spill] sm:$0xff] %v8546_v36  ;;  %v8548_v39 = vpop.permute.xlu1 %1539  ;;  %v8550_v43 = vpop.eup %7172  ;;  %13818 = vst [vmem:[#allocation209_spill] sm:$0xff] %v8564_v52  ;;  %v13825_v38 = vand.u32 2147483648, %v8326_v19  ;;  %7200 = vpow2.f32 %v5915_v20 }
 0x26c   : > { %13817 = vst [vmem:[#allocation208_spill] sm:$0xff] %v8548_v39  ;;  %v7175_v40 = vpop.eup %7174  ;;  %1771 = vbcast.lane.b32.xlu0 %v7992_v18, 352  ;;  %1775 = vbcast.lane.b32.xlu1 %v7992_v18, 360  ;;  %13820 = vst [vmem:[#allocation211_spill] sm:$0xff] %v8574_v35  ;;  %v5683_v27 = vor.u32 %v8461_v32, %v13824_v37  ;;  %7202 = vpow2.f32 %v5897_v31  ;;  %v8605_v32 = vand.u32 2147483647, %v8567_v44 }
 0x26d   : > { %v7177_v12 = vpop.eup %7176  ;;  %v5665_v46 = vor.u32 %v8505_v34, %v13825_v38  ;;  %v5951_v23 = vmul.f32 0.33333334, %v7175_v40  ;;  %7204 = vlog2.f32 %v8564_v52  ;;  %v8608_v38 = vmul.f32 0.015625, %v7882_v55 }
 0x26e   : > { %v8570_v41 = vpop.eup %7178  ;;  %v8583_v45 = vpop.permute.xlu0 %1543  ;;  %v5933_v28 = vmul.f32 0.33333334, %v7177_v12  ;;  %13827 = vst [vmem:[#allocation216_spill] sm:$0xff] %v8605_v32  ;;  %7206 = vlog2.f32 %v8574_v35  ;;  %v8621_v34 = vand.u32 2147483647, %v8577_v29  ;;  %v8624_v55 = vmul.f32 0.015625, %v7884_v56 }
 0x26f   : > { %13822 = vst [vmem:[#allocation213_spill] sm:$0xff] %v8583_v45  ;;  %v8585_v39 = vpop.permute.xlu1 %1547  ;;  %v8587_v36 = vpop.eup %7180  ;;  %v8597_v45 = vmul.f32 0.015625, %v7862_v47  ;;  %v13828_v47 = vand.u32 2147483648, %v8305_v7  ;;  %7208 = vpow2.f32 %v5951_v23  ;;  %v5667_v31 = vsel %vm5666_vm3, %v8326_v19, %v5665_v46 }
 0x270   : > { %13823 = vst [vmem:[#allocation214_spill] sm:$0xff] %v8585_v39  ;;  %v7183_v42 = vpop.eup %7182  ;;  %1779 = vbcast.lane.b32.xlu0 %v7992_v18, 368  ;;  %1783 = vbcast.lane.b32.xlu1 %v7992_v18, 376  ;;  %13829 = vst [vmem:[#allocation217_spill] sm:$0xff] %v8621_v34  ;;  %7210 = vpow2.f32 %v5933_v28  ;;  %v8660_v46 = vmul.f32 0.015625, %v7894_v59  ;;  %v13845_v7 = vand.u32 2147483648, %v8323_v1 }
 0x271   : > { %13826 = vst [vmem:[#allocation215_spill] sm:$0xff] %v8597_v45  ;;  %v8601_v39 = vpop.eup %7184  ;;  %v5652_v12 = vsel %vm5650_vm2, %v13828_v47, %v5649_v53  ;;  %v5987_v53 = vmul.f32 0.33333334, %v7183_v42  ;;  %v8634_v47 = vmul.f32 0.015625, %v7888_v57  ;;  %v8643_v22 = vand.u32 2147483647, %v8597_v45 }
 0x272   : > { %v8616_v18 = vpop.eup %7186  ;;  %v8627_v37 = vpop.permute.xlu0 %1551  ;;  %v5653_v57 = vsel %vm5639_vm4, nan, %v5652_v12  ;;  %7212 = vlog2.f32 %v8605_v32  ;;  %v8657_v42 = vand.u32 2147483647, %v8608_v38  ;;  %13834 = vst [vmem:[#allocation222_spill] sm:$0xff] %v8660_v46  ;;  %v8668_v12 = vand.u32 2147483647, %v8624_v55 }
 0x273   : > { %13830 = vst [vmem:[#allocation218_spill] sm:$0xff] %v8627_v37  ;;  %v8629_v20 = vpop.permute.xlu1 %1555  ;;  %v8631_v40 = vpop.eup %7188  ;;  %13832 = vst [vmem:[#allocation220_spill] sm:$0xff] %v8643_v22  ;;  %7214 = vlog2.f32 %v8621_v34  ;;  %v8671_v37 = vmul.f32 0.015625, %v7896_v60  ;;  %v13837_v45 = vand.u32 2147483648, %v8326_v19  ;;  %v8683_v52 = vand.u32 2147483647, %v8634_v47 }
 0x274   : > { %13831 = vst [vmem:[#allocation219_spill] sm:$0xff] %v8629_v20  ;;  %v8640_v56 = vpop.eup %7190  ;;  %v8646_v20 = vmul.f32 0.015625, %v7890_v58  ;;  %1786 = vbcast.lane.b32.xlu0 %v8127_v2, 256  ;;  %1790 = vbcast.lane.b32.xlu1 %v8127_v2, 264  ;;  %13833 = vst [vmem:[#allocation221_spill] sm:$0xff] %v8657_v42  ;;  %v5685_v58 = vsel %vm5684_vm5, %v8298_v51, %v5683_v27  ;;  %7216 = vpow2.f32 %v5987_v53  ;;  %v8686_v34 = vmul.f32 0.015625, %v7900_v61 }
 0x275   : > { %v8653_v23 = vpop.eup %7192  ;;  %13835 = vst [vmem:[#allocation223_spill] sm:$0xff] %v8668_v12  ;;  %13836 = vst [vmem:[#allocation224_spill] sm:$0xff] %v8671_v37  ;;  %v5670_v59 = vsel %vm5668_vm6, %v13837_v45, %v5667_v31  ;;  %v5654_v60 = vsel %vm5638_vm7, 0.0, %v5653_v57  ;;  %v13842_v31 = vand.u32 2147483648, %v8345_v9  ;;  %7218 = vlog2.f32 %v8643_v22 }
 0x276   : > { %v7195_v28 = vpop.eup %7194  ;;  %v8678_v32 = vpop.permute.xlu0 %1562  ;;  %13840 = vst [vmem:[#allocation227_spill] sm:$0xff] %v8683_v52  ;;  %13841 = vst [vmem:[#allocation228_spill] sm:$0xff] %v8686_v34  ;;  %v8696_v53 = vand.u32 2147483647, %v8646_v20  ;;  %v13846_v57 = vand.u32 2147483648, %v8330_v63  ;;  %7220 = vlog2.f32 %v8657_v42  ;;  %vm5711_vm2 = vcmp.lt.f32.partialorder %v8345_v9, 0.0 }
 0x277   : > { %13838 = vst [vmem:[#allocation225_spill] sm:$0xff] %v8678_v32  ;;  %v8680_v44 = vpop.permute.xlu1 %1566  ;;  %v7197_v27 = vpop.eup %7196  ;;  %v5719_v32 = vor.u32 %v8535_v30, %v13842_v31  ;;  %v5701_v30 = vor.u32 %v8498_v26, %v13845_v7  ;;  %7222 = vlog2.f32 %v8668_v12  ;;  %v8724_v26 = vand.u32 2147483647, %v8671_v37 }
 0x278   : > { %13839 = vst [vmem:[#allocation226_spill] sm:$0xff] %v8680_v44  ;;  %v7199_v45 = vpop.eup %7198  ;;  %13843 = vst [vmem:[#allocation229_spill] sm:$0xff] %v8696_v53  ;;  %v8699_v44 = vmul.f32 0.015625, %v7902_v62  ;;  %1794 = vbcast.lane.b32.xlu0 %v8127_v2, 272  ;;  %1798 = vbcast.lane.b32.xlu1 %v8127_v2, 280  ;;  %v8712_v31 = vor.u32 %v8516_v54, %v13846_v57  ;;  %v5671_v54 = vsel %vm5657_vm8, nan, %v5670_v59  ;;  %7224 = vlog2.f32 %v8683_v52 }
 0x279   : > { %v8704_v61 = vpop.eup %7200  ;;  %v8716_v62 = vand.u32 2147483647, %v8660_v46  ;;  %13848 = vst [vmem:[#allocation232_spill] sm:$0xff] %v8724_v26  ;;  %v8730_v7 = vsel %vm5641_vm9, inf, %v5654_v60  ;;  %vm5704_vm3 = vcmp.eq.f32.partialorder %v8335_v0, 0.0  ;;  %v13852_v35 = vand.u32 2147483648, %v8351_v3 }
 0x27a   : > { %13844 = vst [vmem:[#allocation230_spill] sm:$0xff] %v8699_v44  ;;  %v8720_v22 = vpop.eup %7202  ;;  %13849 = vst [vmem:[#allocation233_spill] sm:$0xff] %v8730_v7  ;;  %v8733_v57 = vpop.permute.xlu0 %1570  ;;  %v8744_v59 = vand.u32 2147483647, %v8686_v34  ;;  %vm5677_vm4 = vcmp.eq.f32.partialorder %v8310_v11, inf  ;;  %v5688_v60 = vsel %vm5686_vm10, %v13854_v13, %v5685_v58  ;;  %7226 = vlog2.f32 %v8696_v53 }
 0x27b   : > { %13847 = vst [vmem:[#allocation231_spill] sm:$0xff] %v8716_v62  ;;  %13850 = vst [vmem:[#allocation234_spill] sm:$0xff] %v8733_v57  ;;  %v8735_v42 = vpop.permute.xlu1 %1574  ;;  %v7205_v29 = vpop.eup %7204  ;;  %v8740_v12 = vor.u32 %v8550_v43, %v13852_v35  ;;  %v8758_v43 = vand.u32 2147483647, %v8699_v44  ;;  %vm5710_vm5 = vcmp.eq.f32.partialorder %v8345_v9, 0.0  ;;  %v5721_v35 = vsel %vm5720_vm11, %v8345_v9, %v5719_v32 }
 0x27c   : > { %13851 = vst [vmem:[#allocation235_spill] sm:$0xff] %v8735_v42  ;;  %13853 = vst [vmem:[#allocation236_spill] sm:$0xff] %v8744_v59  ;;  %v8751_v57 = vpop.eup %7206  ;;  %v8754_v42 = vmul.f32 0.015625, %v7864_v48  ;;  %vm5756_vm6 = vweird.f32 %v8385_v5  ;;  %1802 = vbcast.lane.b32.xlu0 %v8127_v2, 288  ;;  %1806 = vbcast.lane.b32.xlu1 %v8127_v2, 296  ;;  %v8770_v13 = vmul.f32 0.015625, %v7866_v49  ;;  %7228 = vlog2.f32 %v8716_v62 }
 0x27d   : > { %13856 = vst [vmem:[#allocation238_spill] sm:$0xff] %v8758_v43  ;;  %v8767_v58 = vpop.eup %7208  ;;  %v5969_v48 = vmul.f32 0.33333334, %v7195_v28  ;;  %v5672_v52 = vsel %vm5656_vm12, 0.0, %v5671_v54  ;;  %vm5693_vm7 = vcmp.lt.f32.partialorder %v8323_v1, 0.0  ;;  %v13859_v53 = vand.u32 2147483648, %v8365_v4 }
 0x27e   : > { %13855 = vst [vmem:[#allocation237_spill] sm:$0xff] %v8754_v42  ;;  %13857 = vst [vmem:[#allocation239_spill] sm:$0xff] %v8767_v58  ;;  %v8776_v32 = vpop.eup %7210  ;;  %v6023_v44 = vmul.f32 0.33333334, %v7197_v27  ;;  %7230 = vlog2.f32 %v8724_v26  ;;  %v5689_v49 = vsel %vm5675_vm13, nan, %v5688_v60  ;;  %vm5738_vm8 = vweird.f32 %v8348_v14  ;;  %v8785_v28 = vpop.permute.xlu0 %1578 }
 0x27f   : > { %13858 = vst [vmem:[#allocation240_spill] sm:$0xff] %v8770_v13  ;;  %v5755_v7 = vor.u32 %v8570_v41, %v13859_v53  ;;  %13860 = vst [vmem:[#allocation241_spill] sm:$0xff] %v8785_v28  ;;  %v8787_v19 = vpop.permute.xlu1 %1582  ;;  %v8789_v54 = vpop.eup %7212  ;;  %v6005_v62 = vmul.f32 0.33333334, %v7199_v45  ;;  %v8792_v58 = vmul.f32 0.015625, %v7868_v50  ;;  %7232 = vlog2.f32 %v8744_v59  ;;  %v13863_v45 = vld [vmem:[#allocation10_spill] sm:$0xff] }
 0x280   : > { %13861 = vst [vmem:[#allocation242_spill] sm:$0xff] %v8787_v19  ;;  %vm5713_vm9 = vcmp.eq.f32.partialorder %v8362_v15, inf  ;;  %v13862_v41 = vand.u32 2147483648, %v8345_v9  ;;  %vm5758_vm10 = vcmp.eq.f32.partialorder %v8385_v5, 0.0  ;;  %v8801_v53 = vpop.eup %7214  ;;  %v8804_v60 = vand.u32 2147483647, %v8754_v42 }
 0x281   : > { %v8807_v19 = vmul.f32 0.015625, %v13863_v45  ;;  %7234 = vlog2.f32 %v8758_v43  ;;  %vm5692_vm11 = vcmp.eq.f32.partialorder %v8323_v1, 0.0  ;;  %v5703_v50 = vsel %vm5702_vm15, %v8323_v1, %v5701_v30  ;;  %v13865_v28 = vld [vmem:[#allocation174_spill] sm:$0xff]  ;;  %1810 = vbcast.lane.b32.xlu0 %v8127_v2, 304  ;;  %1814 = vbcast.lane.b32.xlu1 %v8127_v2, 312  ;;  %v13868_v45 = vld [vmem:[#allocation11_spill] sm:$0xff] }
 0x282   : > { %v5724_v27 = vsel %vm5722_vm14, %v13862_v41, %v5721_v35  ;;  %vm5792_vm12 = vweird.f32 %v13865_v28  ;;  %v8817_v35 = vpop.eup %7216  ;;  %7236 = vpow2.f32 %v5969_v48  ;;  %v8820_v41 = vand.u32 2147483647, %v8770_v13 }
 0x283   : > { %13864 = vst [vmem:[#allocation10_spill] sm:$0xff] %v8807_v19  ;;  %13866 = vst [vmem:[#allocation174_spill] sm:$0xff] %v8817_v35  ;;  %v8823_v59 = vmul.f32 0.015625, %v13868_v45  ;;  %v5690_v43 = vsel %vm5674_vm0, 0.0, %v5689_v49  ;;  %vm5740_vm13 = vcmp.eq.f32.partialorder %v8348_v14, 0.0  ;;  %v8828_v30 = vpop.eup %7218  ;;  %7238 = vpow2.f32 %v6023_v44  ;;  %v8837_v45 = vpop.permute.xlu0 %1586 }
 0x284   : > { %13867 = vst [vmem:[#allocation243_spill] sm:$0xff] %v8820_v41  ;;  %v6059_v26 = vmul.f32 0.33333334, %v7205_v29  ;;  %v8832_v42 = vsel %vm5659_vm1, inf, %v5672_v52  ;;  %v5725_v48 = vsel %vm5711_vm2, nan, %v5724_v27  ;;  %vm5747_vm14 = vcmp.lt.f32.partialorder %v8365_v4, 0.0  ;;  %v8839_v13 = vpop.permute.xlu1 %1590  ;;  %v7221_v51 = vpop.eup %7220 }
 0x285   : > { %13869 = vst [vmem:[#allocation11_spill] sm:$0xff] %v8823_v59  ;;  %13870 = vst [vmem:[#allocation244_spill] sm:$0xff] %v8832_v42  ;;  %v13873_v49 = vand.u32 2147483648, %v8372_v10  ;;  %7240 = vpow2.f32 %v6005_v62  ;;  %v8847_v8 = vand.u32 2147483647, %v8792_v58  ;;  %vm5695_vm15 = vcmp.eq.f32.partialorder %v8335_v0, inf  ;;  %v7223_v52 = vpop.eup %7222 }
 0x286   : > { %13871 = vst [vmem:[#allocation245_spill] sm:$0xff] %v8837_v45  ;;  %13872 = vst [vmem:[#allocation246_spill] sm:$0xff] %v8839_v13  ;;  %v13874_v29 = vand.u32 2147483648, %v8323_v1  ;;  %vm5794_vm0 = vcmp.eq.f32.partialorder %v13865_v28, 0.0  ;;  %v13875_v27 = vand.u32 2147483648, %v8377_v6  ;;  %7242 = vlog2.f32 %v8804_v60  ;;  %1818 = vbcast.lane.b32.xlu0 %v8127_v2, 320 }
 0x287   : > { %v8844_v35 = vor.u32 %v8587_v36, %v13873_v49  ;;  %v8860_v36 = vand.u32 2147483647, %v8807_v19  ;;  %v8864_v62 = vsel %vm5677_vm4, inf, %v5690_v43  ;;  %vm5729_vm1 = vcmp.lt.f32.partialorder %v8330_v63, 0.0  ;;  %1822 = vbcast.lane.b32.xlu1 %v8127_v2, 328  ;;  %v8887_v9 = vpop.permute.xlu0 %1594 }
 0x288   : > { %v5706_v44 = vsel %vm5704_vm3, %v13874_v29, %v5703_v50  ;;  %v5791_v13 = vor.u32 %v8601_v39, %v13875_v27  ;;  %13877 = vst [vmem:[#allocation248_spill] sm:$0xff] %v8864_v62  ;;  %v7225_v50 = vpop.eup %7224  ;;  %7244 = vlog2.f32 %v8820_v41  ;;  %v8871_v39 = vand.u32 2147483647, %v8823_v59  ;;  %13879 = vst [vmem:[#allocation249_spill] sm:$0xff] %v8887_v9 }
 0x289   : > { %13876 = vst [vmem:[#allocation247_spill] sm:$0xff] %v8860_v36  ;;  %v5726_v49 = vsel %vm5710_vm5, 0.0, %v5725_v48  ;;  %vm5746_vm2 = vcmp.eq.f32.partialorder %v8365_v4, 0.0  ;;  %v5757_v11 = vsel %vm5756_vm6, %v8365_v4, %v5755_v7  ;;  %v7227_v43 = vpop.eup %7226  ;;  %v13878_v29 = vand.u32 2147483648, %v8388_v24  ;;  %v8889_v48 = vpop.permute.xlu1 %1598 }
 0x28a   : > { %7246 = vpow2.f32 %v6059_v26  ;;  %v6239_v45 = vmul.f32 0.33333334, %v7221_v51  ;;  %v5707_v19 = vsel %vm5693_vm7, nan, %v5706_v44  ;;  %vm5783_vm3 = vcmp.lt.f32.partialorder %v8377_v6, 0.0  ;;  %13880 = vst [vmem:[#allocation250_spill] sm:$0xff] %v8889_v48  ;;  %v7229_v41 = vpop.eup %7228  ;;  %1826 = vbcast.lane.b32.xlu0 %v8127_v2, 336 }
 0x28b   : > { %v8882_v27 = vor.u32 %v8616_v18, %v13878_v29  ;;  %v13881_v7 = vand.u32 2147483648, %v8395_v25  ;;  %7248 = vlog2.f32 %v8847_v8  ;;  %v6221_v18 = vmul.f32 0.33333334, %v7223_v52  ;;  %v7231_v51 = vpop.eup %7230  ;;  %1830 = vbcast.lane.b32.xlu1 %v8127_v2, 344 }
 0x28c   : > { %vm5728_vm4 = vcmp.eq.f32.partialorder %v8330_v63, 0.0  ;;  %v5739_v26 = vsel %vm5738_vm8, %v8330_v63, %v8712_v31  ;;  %7250 = vlog2.f32 %v8860_v36  ;;  %v6275_v44 = vmul.f32 0.33333334, %v7225_v50  ;;  %v7233_v31 = vpop.eup %7232 }
 0x28d   : > { %v8894_v59 = vor.u32 %v8631_v40, %v13881_v7  ;;  %v8905_v29 = vsel %vm5713_vm9, inf, %v5726_v49  ;;  %vm5749_vm5 = vcmp.eq.f32.partialorder %v8385_v5, inf  ;;  %v13883_v40 = vand.u32 2147483648, %v8365_v4  ;;  %v7235_v49 = vpop.eup %7234  ;;  %v8933_v9 = vpop.permute.xlu1 %1606 }
 0x28e   : > { %13882 = vst [vmem:[#allocation251_spill] sm:$0xff] %v8905_v29  ;;  %7252 = vlog2.f32 %v8871_v39  ;;  %v6257_v7 = vmul.f32 0.33333334, %v7227_v43  ;;  %v5708_v15 = vsel %vm5692_vm11, 0.0, %v5707_v19  ;;  %vm5782_vm6 = vcmp.eq.f32.partialorder %v8377_v6, 0.0  ;;  %v8931_v19 = vpop.permute.xlu0 %1602  ;;  %13887 = vst [vmem:[#allocation253_spill] sm:$0xff] %v8933_v9 }
 0x28f   : > { %v5760_v52 = vsel %vm5758_vm10, %v13883_v40, %v5757_v11  ;;  %v5793_v50 = vsel %vm5792_vm12, %v8377_v6, %v5791_v13  ;;  %v13884_v11 = vand.u32 2147483648, %v8400_v21  ;;  %7254 = vpow2.f32 %v6239_v45  ;;  %13886 = vst [vmem:[#allocation252_spill] sm:$0xff] %v8931_v19  ;;  %v8935_v13 = vpop.eup %7236  ;;  %1834 = vbcast.lane.b32.xlu0 %v8127_v2, 352  ;;  %1838 = vbcast.lane.b32.xlu1 %v8127_v2, 360 }
 0x290   : > { %v6311_v48 = vmul.f32 0.33333334, %v7229_v41  ;;  %vm5731_vm7 = vcmp.eq.f32.partialorder %v8348_v14, inf  ;;  %v13885_v43 = vand.u32 2147483648, %v8330_v63  ;;  %v13888_v36 = vand.u32 2147483648, %v8406_v17 }
 0x291   : > { %v8924_v40 = vor.u32 %v8640_v56, %v13884_v11  ;;  %7256 = vpow2.f32 %v6221_v18  ;;  %v6293_v41 = vmul.f32 0.33333334, %v7231_v51  ;;  %v5761_v45 = vsel %vm5747_vm14, nan, %v5760_v52  ;;  %v8944_v11 = vpop.eup %7238  ;;  %v8972_v19 = vpop.permute.xlu1 %1614 }
 0x292   : > { %v5742_v1 = vsel %vm5740_vm13, %v13885_v43, %v5739_v26  ;;  %v8940_v56 = vor.u32 %v8653_v23, %v13888_v36  ;;  %7258 = vpow2.f32 %v6275_v44  ;;  %v6347_v26 = vmul.f32 0.33333334, %v7233_v31  ;;  %v8957_v36 = vpop.eup %7240  ;;  %13894 = vst [vmem:[#allocation255_spill] sm:$0xff] %v8972_v19 }
 0x293   : > { %v8948_v43 = vsel %vm5695_vm15, inf, %v5708_v15  ;;  %vm5785_vm8 = vcmp.eq.f32.partialorder %v13865_v28, inf  ;;  %v13890_v9 = vand.u32 2147483648, %v8377_v6  ;;  %v13891_v18 = vand.u32 2147483648, %v8430_v16  ;;  %v7243_v52 = vpop.eup %7242  ;;  %v13892_v15 = vld [vmem:[#allocation170_spill] sm:$0xff]  ;;  %1842 = vbcast.lane.b32.xlu0 %v8127_v2, 368 }
 0x294   : > { %13889 = vst [vmem:[#allocation254_spill] sm:$0xff] %v8948_v43  ;;  %7260 = vpow2.f32 %v6257_v7  ;;  %v6329_v0 = vmul.f32 0.33333334, %v7235_v49  ;;  %v5743_v44 = vsel %vm5729_vm1, nan, %v5742_v1  ;;  %v6041_v31 = vmul.f32 0.33333334, %v8751_v57 }
 0x295   : > { %v5796_v23 = vsel %vm5794_vm0, %v13890_v9, %v5793_v50  ;;  %v8962_v51 = vor.u32 %v8704_v61, %v13891_v18  ;;  %7262 = vpow2.f32 %v6311_v48  ;;  %v5762_v9 = vsel %vm5746_vm2, 0.0, %v5761_v45  ;;  %v8970_v50 = vpop.permute.xlu0 %1610  ;;  %v7245_v61 = vpop.eup %7244  ;;  %1846 = vbcast.lane.b32.xlu1 %v8127_v2, 376 }
 0x296   : > { %vm5774_vm9 = vweird.f32 %v13892_v15  ;;  %13893 = vst [vmem:[#allocation170_spill] sm:$0xff] %v8970_v50  ;;  %v6095_v7 = vmul.f32 0.33333334, %v8789_v54  ;;  %7264 = vpow2.f32 %v6293_v41  ;;  %v5797_v49 = vsel %vm5783_vm3, nan, %v5796_v23  ;;  %v8979_v48 = vpop.eup %7246 }
 0x297   : > { %v5775_v57 = vsel %vm5774_vm9, %v8351_v3, %v8740_v12  ;;  %v13895_v4 = vand.u32 2147483648, %v8438_v33  ;;  %v6077_v45 = vmul.f32 0.33333334, %v8801_v53  ;;  %7266 = vpow2.f32 %v6347_v26  ;;  %v7249_v41 = vpop.eup %7248 }
 0x298   : > { %v5744_v54 = vsel %vm5728_vm4, 0.0, %v5743_v44  ;;  %v6131_v12 = vmul.f32 0.33333334, %v8828_v30  ;;  %7268 = vpow2.f32 %v6329_v0  ;;  %v8994_v23 = vsel %vm5749_vm5, inf, %v5762_v9  ;;  %v9004_v30 = vpop.permute.xlu1 %1622 }
 0x299   : > { %v8984_v1 = vor.u32 %v8720_v22, %v13895_v4  ;;  %13896 = vst [vmem:[#allocation256_spill] sm:$0xff] %v8994_v23  ;;  %vm5776_vm10 = vcmp.eq.f32.partialorder %v13892_v15, 0.0  ;;  %v7251_v22 = vpop.eup %7250  ;;  %7270 = vpow2.f32 %v6041_v31  ;;  %v5798_v63 = vsel %vm5782_vm6, 0.0, %v5797_v49  ;;  %v9002_v26 = vpop.permute.xlu0 %1618  ;;  %13899 = vst [vmem:[#allocation258_spill] sm:$0xff] %v9004_v30  ;;  %v13901_v49 = vld [vmem:[#allocation143_spill] sm:$0xff] }
 0x29a   : > { %vm5764_vm11 = vcmp.eq.f32.partialorder %v8351_v3, 0.0  ;;  %v13897_v53 = vand.u32 2147483648, %v8351_v3  ;;  %13898 = vst [vmem:[#allocation257_spill] sm:$0xff] %v9002_v26  ;;  %v7253_v18 = vpop.eup %7252  ;;  %7272 = vpow2.f32 %v6095_v7  ;;  %v6113_v5 = vmul.f32 0.33333334, %v7243_v52  ;;  %1849 = vbcast.lane.b32.xlu0 %v13901_v49, 256 }
 0x29b   : > { %v9009_v44 = vsel %vm5731_vm7, inf, %v5744_v54  ;;  %v7255_v6 = vpop.eup %7254  ;;  %7274 = vpow2.f32 %v6077_v45  ;;  %v6167_v31 = vmul.f32 0.33333334, %v7245_v61  ;;  %vm5765_vm12 = vcmp.lt.f32.partialorder %v8351_v3, 0.0  ;;  %1853 = vbcast.lane.b32.xlu1 %v13901_v49, 264  ;;  %v13903_v45 = vld [vmem:[#allocation178_spill] sm:$0xff] }
 0x29c   : > { %v5778_v2 = vsel %vm5776_vm10, %v13897_v53, %v5775_v57  ;;  %13900 = vst [vmem:[#allocation259_spill] sm:$0xff] %v9009_v44  ;;  %v7257_v57 = vpop.eup %7256  ;;  %7276 = vpow2.f32 %v6131_v12  ;;  %v6149_v52 = vmul.f32 0.33333334, %v7249_v41  ;;  %v9017_v7 = vsel %vm5785_vm8, inf, %v5798_v63  ;;  %v9024_v9 = vpop.permute.xlu1 %1633 }
 0x29d   : > { %13902 = vst [vmem:[#allocation143_spill] sm:$0xff] %v9017_v7  ;;  %v5779_v14 = vsel %vm5765_vm12, nan, %v5778_v2  ;;  %v7259_v4 = vpop.eup %7258  ;;  %v6203_v54 = vmul.f32 0.33333334, %v7251_v22  ;;  %vm5767_vm13 = vcmp.eq.f32.partialorder %v13892_v15, inf  ;;  %vm5828_vm14 = vweird.f32 %v13903_v45  ;;  %v9022_v53 = vpop.permute.xlu0 %1629  ;;  %13905 = vst [vmem:[#allocation260_spill] sm:$0xff] %v9024_v9 }
 0x29e   : > { %13904 = vst [vmem:[#allocation178_spill] sm:$0xff] %v9022_v53  ;;  %v7261_v0 = vpop.eup %7260  ;;  %7278 = vpow2.f32 %v6113_v5  ;;  %vm5818_vm15 = vcmp.eq.f32.partialorder %v8395_v25, 0.0  ;;  %v5829_v28 = vsel %vm5828_vm14, %v8395_v25, %v8894_v59  ;;  %v6185_v22 = vmul.f32 0.33333334, %v7253_v18  ;;  %1857 = vbcast.lane.b32.xlu0 %v13901_v49, 272  ;;  %v13910_v9 = vld [vmem:[#allocation230_spill] sm:$0xff] }
 0x29f   : > { %v7263_v12 = vpop.eup %7262  ;;  %7280 = vpow2.f32 %v6167_v31  ;;  %v5780_v2 = vsel %vm5764_vm11, 0.0, %v5779_v14  ;;  %1861 = vbcast.lane.b32.xlu1 %v13901_v49, 280  ;;  %vm5819_vm0 = vcmp.lt.f32.partialorder %v8395_v25, 0.0  ;;  %vm5830_vm1 = vcmp.eq.f32.partialorder %v13903_v45, 0.0  ;;  %v13912_v18 = vld [vmem:[#allocation173_spill] sm:$0xff] }
 0x2a0   : > { %v7265_v5 = vpop.eup %7264  ;;  %7282 = vpow2.f32 %v6149_v52  ;;  %vm5821_vm2 = vcmp.eq.f32.partialorder %v13903_v45, inf  ;;  %v13906_v3 = vand.u32 2147483648, %v8395_v25  ;;  %v9044_v63 = vpop.permute.xlu1 %1641  ;;  %v13909_v41 = vand.u32 2147483648, %v8608_v38  ;;  %v13944_v45 = vld [vmem:[#allocation62_spill] sm:$0xff] }
 0x2a1   : > { %v7267_v59 = vpop.eup %7266  ;;  %7284 = vpow2.f32 %v6203_v54  ;;  %v9042_v14 = vpop.permute.xlu0 %1637  ;;  %13908 = vst [vmem:[#allocation262_spill] sm:$0xff] %v9044_v63  ;;  %v9053_v54 = vsel %vm5767_vm13, inf, %v5780_v2  ;;  %vm5810_vm3 = vweird.f32 %v13912_v18  ;;  %v13914_v63 = vand.u32 2147483648, %v8634_v47 }
 0x2a2   : > { %v5832_v31 = vsel %vm5830_vm1, %v13906_v3, %v5829_v28  ;;  %13907 = vst [vmem:[#allocation261_spill] sm:$0xff] %v9042_v14  ;;  %v7269_v52 = vpop.eup %7268  ;;  %v9048_v61 = vor.u32 %v7255_v6, %v13909_v41  ;;  %13911 = vst [vmem:[#allocation263_spill] sm:$0xff] %v9053_v54  ;;  %7286 = vpow2.f32 %v6185_v22  ;;  %v13913_v28 = vand.u32 2147483648, %v8624_v55  ;;  %1865 = vbcast.lane.b32.xlu0 %v13901_v49, 288 }
 0x2a3   : > { %v9056_v30 = vpop.eup %7270  ;;  %v9064_v14 = vor.u32 %v7259_v4, %v13914_v63  ;;  %v5811_v6 = vsel %vm5810_vm3, %v8372_v10, %v8844_v35  ;;  %1869 = vbcast.lane.b32.xlu1 %v13901_v49, 296  ;;  %v13915_v41 = vand.u32 2147483648, %v8646_v20  ;;  %v13918_v4 = vand.u32 2147483648, %v8671_v37 }
 0x2a4   : > { %v9060_v3 = vor.u32 %v7257_v57, %v13913_v28  ;;  %v9070_v15 = vpop.eup %7272  ;;  %v13916_v57 = vand.u32 2147483648, %v8660_v46  ;;  %v5833_v35 = vsel %vm5819_vm0, nan, %v5832_v31  ;;  %v13919_v53 = vand.u32 2147483648, %v8686_v34  ;;  %v13926_v31 = vld [vmem:[#allocation53_spill] sm:$0xff] }
 0x2a5   : > { %v9074_v22 = vor.u32 %v7261_v0, %v13915_v41  ;;  %v9082_v63 = vor.u32 %v7265_v5, %v13918_v4  ;;  %v9086_v28 = vpop.eup %7274  ;;  %v13921_v0 = vand.u32 2147483648, %v13910_v9  ;;  %vm5812_vm4 = vcmp.eq.f32.partialorder %v13912_v18, 0.0  ;;  %v9100_v5 = vpop.permute.xlu1 %1649 }
 0x2a6   : > { %v9078_v2 = vor.u32 %v7263_v12, %v13916_v57  ;;  %v9090_v26 = vor.u32 %v7267_v59, %v13919_v53  ;;  %v13923_v12 = vld [vmem:[#allocation180_spill] sm:$0xff]  ;;  %v9098_v57 = vpop.permute.xlu0 %1645  ;;  %13925 = vst [vmem:[#allocation266_spill] sm:$0xff] %v9100_v5  ;;  %v9102_v4 = vpop.eup %7276  ;;  %v9106_v19 = vmul.f32 %v8832_v42, %v13926_v31  ;;  %v13927_v53 = vld [vmem:[#allocation54_spill] sm:$0xff]  ;;  %v13928_v59 = vld [vmem:[#allocation233_spill] sm:$0xff]  ;;  %v5834_v31 = vsel %vm5818_vm15, 0.0, %v5833_v35  ;;  %1873 = vbcast.lane.b32.xlu0 %v13901_v49, 304 }
 0x2a7   : > { %v9094_v41 = vor.u32 %v7269_v52, %v13921_v0  ;;  %vm5864_vm5 = vweird.f32 %v13923_v12  ;;  %13924 = vst [vmem:[#allocation180_spill] sm:$0xff] %v9098_v57  ;;  %v9110_v50 = vmul.f32 %v13928_v59, %v13927_v53  ;;  %v13929_v52 = vand.u32 2147483648, %v8372_v10  ;;  %v13931_v5 = vld [vmem:[#allocation56_spill] sm:$0xff]  ;;  %v13932_v42 = vld [vmem:[#allocation177_spill] sm:$0xff]  ;;  %1877 = vbcast.lane.b32.xlu1 %v13901_v49, 312  ;;  %v13935_v53 = vld [vmem:[#allocation59_spill] sm:$0xff] }
 0x2a8   : > { %13917 = vst [vmem:[#allocation173_spill] sm:$0xff] %v9078_v2  ;;  %13920 = vst [vmem:[#allocation264_spill] sm:$0xff] %v9090_v26  ;;  %v5865_v34 = vsel %vm5864_vm5, %v8406_v17, %v8940_v56  ;;  %v13930_v26 = vld [vmem:[#allocation55_spill] sm:$0xff]  ;;  %v9122_v9 = vmul.f32 %v8905_v29, %v13931_v5  ;;  %vm5846_vm6 = vweird.f32 %v13932_v42  ;;  %v13933_v56 = vld [vmem:[#allocation57_spill] sm:$0xff]  ;;  %vm5801_vm7 = vcmp.lt.f32.partialorder %v8372_v10, 0.0 }
 0x2a9   : > { %13922 = vst [vmem:[#allocation265_spill] sm:$0xff] %v9094_v41  ;;  %v5814_v0 = vsel %vm5812_vm4, %v13929_v52, %v5811_v6  ;;  %v9118_v57 = vmul.f32 %v8864_v62, %v13930_v26  ;;  %v9129_v6 = vpop.eup %7278  ;;  %v9133_v52 = vmul.f32 %v8948_v43, %v13933_v56  ;;  %vm5866_vm8 = vcmp.eq.f32.partialorder %v13923_v12, 0.0  ;;  %v13934_v5 = vld [vmem:[#allocation58_spill] sm:$0xff]  ;;  %v9153_v41 = vpop.permute.xlu1 %1657 }
 0x2aa   : > { %v5847_v25 = vsel %vm5846_vm6, %v8388_v24, %v8882_v27  ;;  %v9139_v35 = vpop.eup %7280  ;;  %v9143_v26 = vmul.f32 %v8994_v23, %v13934_v5  ;;  %v9147_v29 = vmul.f32 %v9009_v44, %v13935_v53  ;;  %v5815_v62 = vsel %vm5801_vm7, nan, %v5814_v0  ;;  %v9151_v59 = vpop.permute.xlu0 %1653  ;;  %13938 = vst [vmem:[#allocation267_spill] sm:$0xff] %v9153_v41  ;;  %v13939_v27 = vld [vmem:[#allocation60_spill] sm:$0xff]  ;;  %v13940_v5 = vld [vmem:[#allocation61_spill] sm:$0xff]  ;;  %1881 = vbcast.lane.b32.xlu0 %v13901_v49, 320 }
 0x2ab   : > { %v13936_v56 = vand.u32 2147483648, %v8406_v17  ;;  %13937 = vst [vmem:[#allocation177_spill] sm:$0xff] %v9151_v59  ;;  %v9155_v46 = vpop.eup %7282  ;;  %v9159_v2 = vmul.f32 %v9017_v7, %v13939_v27  ;;  %v9163_v23 = vmul.f32 %v9053_v54, %v13940_v5  ;;  %v9167_v0 = vsel %vm5821_vm2, inf, %v5834_v31  ;;  %v13943_v59 = vld [vmem:[#allocation187_spill] sm:$0xff]  ;;  %1885 = vbcast.lane.b32.xlu1 %v13901_v49, 328 }
 0x2ac   : > { %13941 = vst [vmem:[#allocation268_spill] sm:$0xff] %v9167_v0  ;;  %vm5848_vm9 = vcmp.eq.f32.partialorder %v13932_v42, 0.0  ;;  %vm5800_vm10 = vcmp.eq.f32.partialorder %v8372_v10, 0.0  ;;  %vm5855_vm11 = vcmp.lt.f32.partialorder %v8406_v17, 0.0  ;;  %vm5900_vm12 = vweird.f32 %v13943_v59 }
 0x2ad   : > { %v5868_v43 = vsel %vm5866_vm8, %v13936_v56, %v5865_v34  ;;  %v9170_v34 = vpop.eup %7284  ;;  %v13942_v56 = vand.u32 2147483648, %v8388_v24  ;;  %v9181_v31 = vmul.f32 %v9167_v0, %v13944_v45  ;;  %v5816_v5 = vsel %vm5800_vm10, 0.0, %v5815_v62  ;;  %v9193_v44 = vpop.permute.xlu1 %1664 }
 0x2ae   : > { %v5869_v27 = vsel %vm5855_vm11, nan, %v5868_v43  ;;  %v5901_v10 = vsel %vm5900_vm12, %v8438_v33, %v8984_v1  ;;  %v9185_v53 = vpop.eup %7286  ;;  %vm5803_vm13 = vcmp.eq.f32.partialorder %v13912_v18, inf  ;;  %vm5837_vm14 = vcmp.lt.f32.partialorder %v8388_v24, 0.0  ;;  %v9191_v54 = vpop.permute.xlu0 %1660  ;;  %1889 = vbcast.lane.b32.xlu0 %v13901_v49, 336 }
 0x2af   : > { %v5850_v41 = vsel %vm5848_vm9, %v13942_v56, %v5847_v25  ;;  %v13945_v25 = vld [vmem:[#allocation179_spill] sm:$0xff]  ;;  %v13946_v56 = vld [vmem:[#allocation188_spill] sm:$0xff]  ;;  %13947 = vst [vmem:[#allocation187_spill] sm:$0xff] %v9191_v54  ;;  %vm5854_vm0 = vcmp.eq.f32.partialorder %v8406_v17, 0.0  ;;  %vm5902_vm1 = vcmp.eq.f32.partialorder %v13943_v59, 0.0  ;;  %v9199_v1 = vsel %vm5803_vm13, inf, %v5816_v5 }
 0x2b0   : > { %vm5882_vm15 = vweird.f32 %v13945_v25  ;;  %v5932_v7 = vand.u32 2147483648, %v13946_v56  ;;  %13948 = vst [vmem:[#allocation179_spill] sm:$0xff] %v9193_v44  ;;  %v5851_v62 = vsel %vm5837_vm14, nan, %v5850_v41  ;;  %13949 = vst [vmem:[#allocation188_spill] sm:$0xff] %v9199_v1  ;;  %v5870_v18 = vsel %vm5854_vm0, 0.0, %v5869_v27  ;;  %1893 = vbcast.lane.b32.xlu1 %v13901_v49, 344 }
 0x2b1   : > { %v5883_v43 = vsel %vm5882_vm15, %v8400_v21, %v8924_v40  ;;  %v13950_v45 = vand.u32 2147483648, %v8438_v33  ;;  %v13951_v44 = vld [vmem:[#allocation63_spill] sm:$0xff]  ;;  %vm5857_vm2 = vcmp.eq.f32.partialorder %v13923_v12, inf  ;;  %vm5836_vm3 = vcmp.eq.f32.partialorder %v8388_v24, 0.0  ;;  %v13957_v12 = vld [vmem:[#allocation193_spill] sm:$0xff] }
 0x2b2   : > { %v5935_v37 = vor.u32 %v8776_v32, %v5932_v7  ;;  %v9208_v17 = vmul.f32 %v9199_v1, %v13951_v44  ;;  %vm5884_vm4 = vcmp.eq.f32.partialorder %v13945_v25, 0.0  ;;  %v5852_v40 = vsel %vm5836_vm3, 0.0, %v5851_v62  ;;  %v13953_v5 = vld [vmem:[#allocation183_spill] sm:$0xff]  ;;  %v9217_v27 = vpop.permute.xlu0 %1668  ;;  %v13958_v62 = vld [vmem:[#allocation64_spill] sm:$0xff]  ;;  %1897 = vbcast.lane.b32.xlu0 %v13901_v49, 352 }
 0x2b3   : > { %v5904_v0 = vsel %vm5902_vm1, %v13950_v45, %v5901_v10  ;;  %vm5891_vm5 = vcmp.lt.f32.partialorder %v8438_v33, 0.0  ;;  %v13952_v41 = vand.u32 2147483648, %v8400_v21  ;;  %vm5918_vm6 = vweird.f32 %v13953_v5  ;;  %13954 = vst [vmem:[#allocation183_spill] sm:$0xff] %v9217_v27  ;;  %v9219_v45 = vpop.permute.xlu1 %1672 }
 0x2b4   : > { %13955 = vst [vmem:[#allocation269_spill] sm:$0xff] %v9219_v45  ;;  %v9221_v10 = vsel %vm5857_vm2, inf, %v5870_v18  ;;  %v5905_v54 = vsel %vm5891_vm5, nan, %v5904_v0  ;;  %vm5936_vm7 = vweird.f32 %v13957_v12  ;;  %v5919_v24 = vsel %vm5918_vm6, %v8430_v16, %v8962_v51  ;;  %1901 = vbcast.lane.b32.xlu1 %v13901_v49, 360  ;;  %v13961_v45 = vld [vmem:[#allocation197_spill] sm:$0xff] }
 0x2b5   : > { %v5886_v32 = vsel %vm5884_vm4, %v13952_v41, %v5883_v43  ;;  %13956 = vst [vmem:[#allocation270_spill] sm:$0xff] %v9221_v10  ;;  %v9228_v44 = vmul.f32 %v9221_v10, %v13958_v62  ;;  %vm5839_vm8 = vcmp.eq.f32.partialorder %v13932_v42, inf  ;;  %vm5873_vm9 = vcmp.lt.f32.partialorder %v8400_v21, 0.0  ;;  %v13965_v10 = vld [vmem:[#allocation65_spill] sm:$0xff] }
 0x2b6   : > { %v5937_v43 = vsel %vm5936_vm7, %v13946_v56, %v5935_v37  ;;  %v9235_v0 = vsel %vm5839_vm8, inf, %v5852_v40  ;;  %vm5890_vm10 = vcmp.eq.f32.partialorder %v8438_v33, 0.0  ;;  %v5887_v18 = vsel %vm5873_vm9, nan, %v5886_v32  ;;  %v9243_v37 = vpop.permute.xlu0 %1676  ;;  %v13964_v40 = vld [vmem:[#allocation184_spill] sm:$0xff]  ;;  %1905 = vbcast.lane.b32.xlu0 %v13901_v49, 368 }
 0x2b7   : > { %13959 = vst [vmem:[#allocation193_spill] sm:$0xff] %v9235_v0  ;;  %vm5920_vm11 = vcmp.eq.f32.partialorder %v13953_v5, 0.0  ;;  %v5906_v51 = vsel %vm5890_vm10, 0.0, %v5905_v54  ;;  %vm5938_vm12 = vcmp.eq.f32.partialorder %v13957_v12, 0.0  ;;  %v13960_v42 = vand.u32 2147483648, %v8430_v16  ;;  %13962 = vst [vmem:[#allocation197_spill] sm:$0xff] %v9243_v37  ;;  %v9245_v62 = vpop.permute.xlu1 %1680 }
 0x2b8   : > { %v5968_v27 = vand.u32 2147483648, %v13961_v45  ;;  %13963 = vst [vmem:[#allocation271_spill] sm:$0xff] %v9245_v62  ;;  %vm5893_vm13 = vcmp.eq.f32.partialorder %v13943_v59, inf  ;;  %vm5872_vm14 = vcmp.eq.f32.partialorder %v8400_v21, 0.0  ;;  %v5940_v33 = vsel %vm5938_vm12, %v5932_v7, %v5937_v43  ;;  %1909 = vbcast.lane.b32.xlu1 %v13901_v49, 376  ;;  %v13967_v7 = vld [vmem:[#allocation239_spill] sm:$0xff] }
 0x2b9   : > { %v5922_v41 = vsel %vm5920_vm11, %v13960_v42, %v5919_v24  ;;  %v5950_v32 = vand.u32 2147483648, %v13964_v40  ;;  %v9252_v54 = vmul.f32 %v9235_v0, %v13965_v10  ;;  %v5888_v1 = vsel %vm5872_vm14, 0.0, %v5887_v18  ;;  %v13968_v43 = vld [vmem:[#allocation66_spill] sm:$0xff]  ;;  %v13969_v37 = vld [vmem:[#allocation199_spill] sm:$0xff] }
 0x2ba   : > { %vm5909_vm15 = vcmp.lt.f32.partialorder %v8430_v16, 0.0  ;;  %v5971_v24 = vor.u32 %v8935_v13, %v5968_v27  ;;  %v9258_v42 = vsel %vm5893_vm13, inf, %v5906_v51  ;;  %vm5927_vm0 = vcmp.lt.f32.partialorder %v13946_v56, 0.0  ;;  %v9268_v10 = vpop.permute.xlu0 %1684  ;;  %v13972_v51 = vld [vmem:[#allocation202_spill] sm:$0xff]  ;;  %2776 = vperm.xlu0 %7125, %v9110_v50  }
 0x2bb   : > { %13966 = vst [vmem:[#allocation184_spill] sm:$0xff] %v9258_v42  ;;  %v5923_v21 = vsel %vm5909_vm15, nan, %v5922_v41  ;;  %v5953_v59 = vor.u32 %v13967_v7, %v5950_v32  ;;  %v9264_v62 = vmul.f32 %v9258_v42, %v13968_v43  ;;  %vm5875_vm1 = vcmp.eq.f32.partialorder %v13945_v25, inf  ;;  %13970 = vst [vmem:[#allocation239_spill] sm:$0xff] %v9268_v10  ;;  %v9270_v0 = vpop.permute.xlu1 %1688  ;;  %v13973_v43 = vld [vmem:[#allocation189_spill] sm:$0xff]  ;;  %v13981_v10 = vld [vmem:[#allocation174_spill] sm:$0xff] }
 0x2bc   : > { %v5941_v18 = vsel %vm5927_vm0, nan, %v5940_v33  ;;  %v6004_v13 = vand.u32 2147483648, %v13969_v37  ;;  %13971 = vst [vmem:[#allocation199_spill] sm:$0xff] %v9270_v0  ;;  %v9272_v49 = vsel %vm5875_vm1, inf, %v5888_v1  ;;  %vm5926_vm2 = vcmp.eq.f32.partialorder %v13946_v56, 0.0  ;;  %2779 = vperm.xlu1 %7126, %v9106_v19   ;;  %v13974_v33 = vld [vmem:[#allocation67_spill] sm:$0xff] }
 0x2bd   : > { %vm5908_vm3 = vcmp.eq.f32.partialorder %v8430_v16, 0.0  ;;  %vm5972_vm4 = vweird.f32 %v13972_v51  ;;  %vm5954_vm5 = vweird.f32 %v13973_v43  ;;  %v9284_v1 = vmul.f32 %v9272_v49, %v13974_v33 }
 0x2be   : > { %v5924_v41 = vsel %vm5908_vm3, 0.0, %v5923_v21  ;;  %v5973_v7 = vsel %vm5972_vm4, %v13961_v45, %v5971_v24  ;;  %v6007_v25 = vor.u32 %v8957_v36, %v6004_v13  ;;  %vm5929_vm6 = vcmp.eq.f32.partialorder %v13957_v12, inf  ;;  %v13975_v36 = vld [vmem:[#allocation190_spill] sm:$0xff]  ;;  %v9292_v50 = vpop.permute.xlu0 %1692  ;;  %v13979_v12 = vld [vmem:[#allocation205_spill] sm:$0xff]  ;;  %2785 = vperm.xlu0 %7125, %v9133_v52  }
 0x2bf   : > { %v5942_v16 = vsel %vm5926_vm2, 0.0, %v5941_v18  ;;  %v5955_v56 = vsel %vm5954_vm5, %v13964_v40, %v5953_v59  ;;  %vm5911_vm7 = vcmp.eq.f32.partialorder %v13953_v5, inf  ;;  %vm5962_vm8 = vcmp.eq.f32.partialorder %v13961_v45, 0.0  ;;  %13976 = vst [vmem:[#allocation202_spill] sm:$0xff] %v9292_v50  ;;  %v9294_v19 = vpop.permute.xlu1 %1696  ;;  %v13982_v50 = vld [vmem:[#allocation68_spill] sm:$0xff]  ;;  %v13984_v52 = vld [vmem:[#allocation206_spill] sm:$0xff] }
 0x2c0   : > { %vm5974_vm9 = vcmp.eq.f32.partialorder %v13972_v51, 0.0  ;;  %v5986_v24 = vand.u32 2147483648, %v13975_v36  ;;  %13977 = vst [vmem:[#allocation189_spill] sm:$0xff] %v9294_v19  ;;  %v9296_v21 = vsel %vm5911_vm7, inf, %v5924_v41  ;;  %vm5956_vm10 = vcmp.eq.f32.partialorder %v13973_v43, 0.0  ;;  %2782 = vperm.xlu1 %7126, %v9118_v57  }
 0x2c1   : > { %13978 = vst [vmem:[#allocation190_spill] sm:$0xff] %v9296_v21  ;;  %v5976_v0 = vsel %vm5974_vm9, %v5968_v27, %v5973_v7  ;;  %vm6008_vm11 = vweird.f32 %v13979_v12  ;;  %v9300_v59 = vsel %vm5929_vm6, inf, %v5942_v16  ;;  %v5958_v5 = vsel %vm5956_vm10, %v5950_v32, %v5955_v56  ;;  %v13983_v27 = vld [vmem:[#allocation69_spill] sm:$0xff] }
 0x2c2   : > { %13980 = vst [vmem:[#allocation205_spill] sm:$0xff] %v9300_v59  ;;  %v6009_v18 = vsel %vm6008_vm11, %v13969_v37, %v6007_v25  ;;  %v5989_v33 = vor.u32 %v13981_v10, %v5986_v24  ;;  %v9308_v41 = vmul.f32 %v9300_v59, %v13982_v50  ;;  %v9312_v7 = vmul.f32 %v9296_v21, %v13983_v27  ;;  %v9319_v57 = vpop.permute.xlu0 %1700  ;;  %v13987_v50 = vld [vmem:[#allocation194_spill] sm:$0xff] }
 0x2c3   : > { %vm5963_vm12 = vcmp.lt.f32.partialorder %v13961_v45, 0.0  ;;  %vm5965_vm13 = vcmp.eq.f32.partialorder %v13972_v51, inf  ;;  %vm5945_vm14 = vcmp.lt.f32.partialorder %v13964_v40, 0.0  ;;  %vm6010_vm15 = vcmp.eq.f32.partialorder %v13979_v12, 0.0  ;;  %13985 = vst [vmem:[#allocation174_spill] sm:$0xff] %v9319_v57  ;;  %v9321_v25 = vpop.permute.xlu1 %1704  ;;  %2791 = vperm.xlu0 %7125, %v9147_v29  }
 0x2c4   : > { %v5977_v32 = vsel %vm5963_vm12, nan, %v5976_v0  ;;  %v6040_v10 = vand.u32 2147483648, %v13984_v52  ;;  %13986 = vst [vmem:[#allocation68_spill] sm:$0xff] %v9321_v25  ;;  %vm5944_vm0 = vcmp.eq.f32.partialorder %v13964_v40, 0.0  ;;  %v5959_v16 = vsel %vm5945_vm14, nan, %v5958_v5  ;;  %2788 = vperm.xlu1 %7126, %v9122_v9   ;;  %v13988_v40 = vld [vmem:[#allocation198_spill] sm:$0xff] }
 0x2c5   : > { %v6012_v56 = vsel %vm6010_vm15, %v6004_v13, %v6009_v18  ;;  %vm5990_vm1 = vweird.f32 %v13987_v50  ;;  %vm5947_vm2 = vcmp.eq.f32.partialorder %v13973_v43, inf  ;;  %vm5998_vm3 = vcmp.eq.f32.partialorder %v13969_v37, 0.0 }
 0x2c6   : > { %v5991_v0 = vsel %vm5990_vm1, %v13975_v36, %v5989_v33  ;;  %v6043_v19 = vor.u32 %v9056_v30, %v6040_v10  ;;  %v5978_v25 = vsel %vm5962_vm8, 0.0, %v5977_v32  ;;  %vm5999_vm4 = vcmp.lt.f32.partialorder %v13969_v37, 0.0  ;;  %v9338_v30 = vpop.permute.xlu0 %1708  ;;  %v13991_v33 = vld [vmem:[#allocation211_spill] sm:$0xff]  ;;  %v13992_v32 = vld [vmem:[#allocation212_spill] sm:$0xff] }
 0x2c7   : > { %vm6001_vm5 = vcmp.eq.f32.partialorder %v13979_v12, inf  ;;  %v6022_v13 = vand.u32 2147483648, %v13988_v40  ;;  %v5960_v5 = vsel %vm5944_vm0, 0.0, %v5959_v16  ;;  %v6013_v18 = vsel %vm5999_vm4, nan, %v6012_v56  ;;  %13989 = vst [vmem:[#allocation206_spill] sm:$0xff] %v9338_v30  ;;  %v9340_v29 = vpop.permute.xlu1 %1712  ;;  %2797 = vperm.xlu0 %7125, %v9163_v23   ;;  %v13997_v23 = vld [vmem:[#allocation204_spill] sm:$0xff] }
 0x2c8   : > { %vm5980_vm6 = vcmp.eq.f32.partialorder %v13975_v36, 0.0  ;;  %vm5992_vm7 = vcmp.eq.f32.partialorder %v13987_v50, 0.0  ;;  %13990 = vst [vmem:[#allocation194_spill] sm:$0xff] %v9340_v29  ;;  %vm6044_vm9 = vweird.f32 %v13991_v33  ;;  %v6076_v57 = vand.u32 2147483648, %v13992_v32  ;;  %2794 = vperm.xlu1 %7126, %v9143_v26  }
 0x2c9   : > { %v5994_v9 = vsel %vm5992_vm7, %v5986_v24, %v5991_v0  ;;  %v6025_v45 = vor.u32 %v8944_v11, %v6022_v13  ;;  %v9347_v27 = vsel %vm5965_vm13, inf, %v5978_v25  ;;  %vm5981_vm8 = vcmp.lt.f32.partialorder %v13975_v36, 0.0  ;;  %v13994_v24 = vld [vmem:[#allocation70_spill] sm:$0xff]  ;;  %v14007_v36 = vld [vmem:[#allocation209_spill] sm:$0xff] }
 0x2ca   : > { %13993 = vst [vmem:[#allocation198_spill] sm:$0xff] %v9347_v27  ;;  %vm5983_vm10 = vcmp.eq.f32.partialorder %v13987_v50, inf  ;;  %v6045_v16 = vsel %vm6044_vm9, %v13984_v52, %v6043_v19  ;;  %v9356_v56 = vmul.f32 %v9347_v27, %v13994_v24  ;;  %v9360_v11 = vsel %vm5947_vm2, inf, %v5960_v5  ;;  %v13996_v19 = vld [vmem:[#allocation203_spill] sm:$0xff]  ;;  %v9368_v29 = vpop.permute.xlu0 %1716 }
 0x2cb   : > { %13995 = vst [vmem:[#allocation211_spill] sm:$0xff] %v9360_v11  ;;  %v6014_v51 = vsel %vm5998_vm3, 0.0, %v6013_v18  ;;  %v6079_v25 = vor.u32 %v9086_v28, %v6076_v57  ;;  %v5995_v0 = vsel %vm5981_vm8, nan, %v5994_v9  ;;  %vm6046_vm11 = vcmp.eq.f32.partialorder %v13991_v33, 0.0  ;;  %13998 = vst [vmem:[#allocation212_spill] sm:$0xff] %v9368_v29  ;;  %v9370_v24 = vpop.permute.xlu1 %1720  ;;  %v14000_v5 = vld [vmem:[#allocation71_spill] sm:$0xff]  ;;  %2803 = vperm.xlu0 %7125, %v9208_v17  }
 0x2cc   : > { %vm6026_vm12 = vweird.f32 %v13996_v19  ;;  %v6058_v26 = vand.u32 2147483648, %v13997_v23  ;;  %13999 = vst [vmem:[#allocation70_spill] sm:$0xff] %v9370_v24  ;;  %vm6034_vm13 = vcmp.eq.f32.partialorder %v13984_v52, 0.0  ;;  %vm6035_vm14 = vcmp.lt.f32.partialorder %v13984_v52, 0.0  ;;  %v14001_v18 = vld [vmem:[#allocation217_spill] sm:$0xff]  ;;  %2800 = vperm.xlu1 %7126, %v9159_v2  }
 0x2cd   : > { %v6048_v43 = vsel %vm6046_vm11, %v6040_v10, %v6045_v16  ;;  %v6027_v37 = vsel %vm6026_vm12, %v13988_v40, %v6025_v45  ;;  %v9377_v28 = vmul.f32 %v9360_v11, %v14000_v5  ;;  %vm6037_vm15 = vcmp.eq.f32.partialorder %v13991_v33, inf  ;;  %v14003_v16 = vld [vmem:[#allocation72_spill] sm:$0xff]  ;;  %v14004_v17 = vld [vmem:[#allocation237_spill] sm:$0xff] }
 0x2ce   : > { %vm6080_vm0 = vweird.f32 %v14001_v18  ;;  %v6061_v9 = vor.u32 %v8979_v48, %v6058_v26  ;;  %v9386_v24 = vsel %vm6001_vm5, inf, %v6014_v51  ;;  %v5996_v10 = vsel %vm5980_vm6, 0.0, %v5995_v0  ;;  %v9397_v2 = vpop.permute.xlu0 %1723 }
 0x2cf   : > { %14002 = vst [vmem:[#allocation203_spill] sm:$0xff] %v9386_v24  ;;  %vm6028_vm1 = vcmp.eq.f32.partialorder %v13996_v19, 0.0  ;;  %v6081_v45 = vsel %vm6080_vm0, %v13992_v32, %v6079_v25  ;;  %v9394_v5 = vmul.f32 %v9386_v24, %v14003_v16  ;;  %v6049_v48 = vsel %vm6035_vm14, nan, %v6048_v43  ;;  %14005 = vst [vmem:[#allocation204_spill] sm:$0xff] %v9397_v2  ;;  %v9399_v12 = vpop.permute.xlu1 %1727  ;;  %2809 = vperm.xlu0 %7125, %v9252_v54   ;;  %v14009_v43 = vld [vmem:[#allocation73_spill] sm:$0xff] }
 0x2d0   : > { %v6030_v29 = vsel %vm6028_vm1, %v6022_v13, %v6027_v37  ;;  %v6112_v30 = vand.u32 2147483648, %v14004_v17  ;;  %14006 = vst [vmem:[#allocation71_spill] sm:$0xff] %v9399_v12  ;;  %vm6016_vm2 = vcmp.eq.f32.partialorder %v13988_v40, 0.0  ;;  %vm6017_vm3 = vcmp.lt.f32.partialorder %v13988_v40, 0.0  ;;  %2806 = vperm.xlu1 %7126, %v9181_v31  }
 0x2d1   : > { %vm6082_vm4 = vcmp.eq.f32.partialorder %v14001_v18, 0.0  ;;  %vm6062_vm5 = vweird.f32 %v14007_v36  ;;  %v9407_v51 = vsel %vm5983_vm10, inf, %v5996_v10  ;;  %v6050_v16 = vsel %vm6034_vm13, 0.0, %v6049_v48 }
 0x2d2   : > { %14008 = vst [vmem:[#allocation217_spill] sm:$0xff] %v9407_v51  ;;  %v6084_v25 = vsel %vm6082_vm4, %v6076_v57, %v6081_v45  ;;  %v6063_v13 = vsel %vm6062_vm5, %v13997_v23, %v6061_v9  ;;  %v6115_v0 = vor.u32 %v9129_v6, %v6112_v30  ;;  %v9415_v37 = vmul.f32 %v9407_v51, %v14009_v43  ;;  %v14010_v6 = vld [vmem:[#allocation210_spill] sm:$0xff]  ;;  %v9424_v57 = vpop.permute.xlu0 %1731 }
 0x2d3   : > { %vm6019_vm6 = vcmp.eq.f32.partialorder %v13996_v19, inf  ;;  %v6031_v50 = vsel %vm6017_vm3, nan, %v6030_v29  ;;  %vm6070_vm7 = vcmp.eq.f32.partialorder %v13992_v32, 0.0  ;;  %vm6071_vm9 = vcmp.lt.f32.partialorder %v13992_v32, 0.0  ;;  %14011 = vst [vmem:[#allocation72_spill] sm:$0xff] %v9424_v57  ;;  %v9426_v31 = vpop.permute.xlu1 %1735  ;;  %2815 = vperm.xlu0 %7125, %v9284_v1   ;;  %v14014_v43 = vld [vmem:[#allocation74_spill] sm:$0xff] }
 0x2d4   : > { %vm6064_vm8 = vcmp.eq.f32.partialorder %v14007_v36, 0.0  ;;  %v6094_v54 = vand.u32 2147483648, %v14010_v6  ;;  %14012 = vst [vmem:[#allocation237_spill] sm:$0xff] %v9426_v31  ;;  %vm6073_vm10 = vcmp.eq.f32.partialorder %v14001_v18, inf  ;;  %v6085_v9 = vsel %vm6071_vm9, nan, %v6084_v25  ;;  %2812 = vperm.xlu1 %7126, %v9228_v44   ;;  %v14019_v32 = vld [vmem:[#allocation75_spill] sm:$0xff] }
 0x2d5   : > { %v6066_v52 = vsel %vm6064_vm8, %v6058_v26, %v6063_v13  ;;  %vm6116_vm11 = vweird.f32 %v8804_v60  ;;  %v9432_v29 = vsel %vm6037_vm15, inf, %v6050_v16  ;;  %v6032_v10 = vsel %vm6016_vm2, 0.0, %v6031_v50  ;;  %v14129_v31 = vld [vmem:[#allocation263_spill] sm:$0xff]  ;;  %v14140_v57 = vld [vmem:[#allocation193_spill] sm:$0xff] }
 0x2d6   : > { %14013 = vst [vmem:[#allocation209_spill] sm:$0xff] %v9432_v29  ;;  %v6117_v45 = vsel %vm6116_vm11, %v14004_v17, %v6115_v0  ;;  %v6097_v48 = vor.u32 %v9070_v15, %v6094_v54  ;;  %v9442_v26 = vmul.f32 %v9432_v29, %v14014_v43  ;;  %vm6052_vm12 = vcmp.eq.f32.partialorder %v13997_v23, 0.0  ;;  %v9451_v1 = vpop.permute.xlu0 %1739  ;;  %v14018_v0 = vld [vmem:[#allocation216_spill] sm:$0xff]  ;;  %v14025_v43 = vld [vmem:[#allocation11_spill] sm:$0xff] }
 0x2d7   : > { %vm6053_vm13 = vcmp.lt.f32.partialorder %v13997_v23, 0.0  ;;  %vm6055_vm14 = vcmp.eq.f32.partialorder %v14007_v36, inf  ;;  %v6086_v40 = vsel %vm6070_vm7, 0.0, %v6085_v9  ;;  %vm6118_vm15 = vcmp.eq.f32.partialorder %v8804_v60, 0.0  ;;  %14015 = vst [vmem:[#allocation73_spill] sm:$0xff] %v9451_v1  ;;  %v9453_v44 = vpop.permute.xlu1 %1743  ;;  %2821 = vperm.xlu0 %7125, %v9312_v7   ;;  %v14127_v1 = vld [vmem:[#allocation256_spill] sm:$0xff] }
 0x2d8   : > { %v6067_v33 = vsel %vm6053_vm13, nan, %v6066_v52  ;;  %v6148_v15 = vand.u32 2147483648, %v8792_v58  ;;  %14016 = vst [vmem:[#allocation210_spill] sm:$0xff] %v9453_v44  ;;  %v9457_v25 = vsel %vm6019_vm6, inf, %v6032_v10  ;;  %vm6106_vm0 = vcmp.eq.f32.partialorder %v14004_v17, 0.0  ;;  %2818 = vperm.xlu1 %7126, %v9264_v62   ;;  %v14021_v52 = vld [vmem:[#allocation215_spill] sm:$0xff] }
 0x2d9   : > { %14017 = vst [vmem:[#allocation74_spill] sm:$0xff] %v9457_v25  ;;  %v6120_v13 = vsel %vm6118_vm15, %v6112_v30, %v6117_v45  ;;  %vm6098_vm1 = vweird.f32 %v14018_v0  ;;  %v9463_v16 = vmul.f32 %v9457_v25, %v14019_v32  ;;  %vm6107_vm2 = vcmp.lt.f32.partialorder %v14004_v17, 0.0  ;;  %v14022_v45 = vld [vmem:[#allocation76_spill] sm:$0xff]  ;;  %v14123_v44 = vld [vmem:[#allocation259_spill] sm:$0xff] }
 0x2da   : > { %v6099_v50 = vsel %vm6098_vm1, %v14010_v6, %v6097_v48  ;;  %v6151_v9 = vor.u32 %v9155_v46, %v6148_v15  ;;  %v9472_v19 = vsel %vm6073_vm10, inf, %v6086_v40  ;;  %v6068_v30 = vsel %vm6052_vm12, 0.0, %v6067_v33  ;;  %v9484_v62 = vpop.permute.xlu0 %1747 }
 0x2db   : > { %14020 = vst [vmem:[#allocation216_spill] sm:$0xff] %v9472_v19  ;;  %vm6109_vm3 = vcmp.eq.f32.partialorder %v8804_v60, inf  ;;  %v6130_v10 = vand.u32 2147483648, %v14021_v52  ;;  %v9480_v48 = vmul.f32 %v9472_v19, %v14022_v45  ;;  %v6121_v46 = vsel %vm6107_vm2, nan, %v6120_v13  ;;  %14023 = vst [vmem:[#allocation75_spill] sm:$0xff] %v9484_v62  ;;  %v9486_v7 = vpop.permute.xlu1 %1751  ;;  %2827 = vperm.xlu0 %7125, %v9377_v28   ;;  %v14036_v60 = vld [vmem:[#allocation243_spill] sm:$0xff] }
 0x2dc   : > { %vm6088_vm4 = vcmp.eq.f32.partialorder %v14010_v6, 0.0  ;;  %vm6100_vm5 = vcmp.eq.f32.partialorder %v14018_v0, 0.0  ;;  %14024 = vst [vmem:[#allocation215_spill] sm:$0xff] %v9486_v7  ;;  %vm6152_vm6 = vweird.f32 %v8847_v8  ;;  %v6184_v40 = vand.u32 2147483648, %v14025_v43  ;;  %2824 = vperm.xlu1 %7126, %v9308_v41   ;;  %v14121_v62 = vld [vmem:[#allocation251_spill] sm:$0xff] }
 0x2dd   : > { %v6102_v18 = vsel %vm6100_vm5, %v6094_v54, %v6099_v50  ;;  %v6133_v23 = vor.u32 %v9102_v4, %v6130_v10  ;;  %v9493_v33 = vsel %vm6055_vm14, inf, %v6068_v30  ;;  %vm6089_vm7 = vcmp.lt.f32.partialorder %v14010_v6, 0.0  ;;  %v14027_v54 = vld [vmem:[#allocation77_spill] sm:$0xff]  ;;  %v14028_v30 = vld [vmem:[#allocation220_spill] sm:$0xff] }
 0x2de   : > { %14026 = vst [vmem:[#allocation76_spill] sm:$0xff] %v9493_v33  ;;  %vm6091_vm9 = vcmp.eq.f32.partialorder %v14018_v0, inf  ;;  %v6153_v13 = vsel %vm6152_vm6, %v8792_v58, %v6151_v9  ;;  %v2158_v32 = vmul.f32 %v9493_v33, %v14027_v54  ;;  %vm6142_vm8 = vcmp.eq.f32.partialorder %v8792_v58, 0.0  ;;  %v14029_v9 = vld [vmem:[#allocation240_spill] sm:$0xff]  ;;  %v9509_v28 = vpop.permute.xlu0 %1755 }
 0x2df   : > { %vm6154_vm10 = vcmp.eq.f32.partialorder %v8847_v8, 0.0  ;;  %v6187_v4 = vor.u32 %v9185_v53, %v6184_v40  ;;  %v6122_v36 = vsel %vm6106_vm0, 0.0, %v6121_v46  ;;  %v6103_v50 = vsel %vm6089_vm7, nan, %v6102_v18  ;;  %14030 = vst [vmem:[#allocation11_spill] sm:$0xff] %v9509_v28  ;;  %v9511_v41 = vpop.permute.xlu1 %1759  ;;  %2833 = vperm.xlu0 %7125, %v9415_v37  }
 0x2e0   : > { %vm6134_vm11 = vweird.f32 %v14028_v30  ;;  %v6166_v45 = vand.u32 2147483648, %v14029_v9  ;;  %14031 = vst [vmem:[#allocation77_spill] sm:$0xff] %v9511_v41  ;;  %vm6143_vm12 = vcmp.lt.f32.partialorder %v8792_v58, 0.0  ;;  %vm6145_vm13 = vcmp.eq.f32.partialorder %v8847_v8, inf  ;;  %2830 = vperm.xlu1 %7126, %v9356_v56  }
 0x2e1   : > { %v6156_v54 = vsel %vm6154_vm10, %v6148_v15, %v6153_v13  ;;  %v6135_v7 = vsel %vm6134_vm11, %v14021_v52, %v6133_v23  ;;  %vm6124_vm14 = vcmp.eq.f32.partialorder %v14021_v52, 0.0  ;;  %vm6125_vm15 = vcmp.lt.f32.partialorder %v14021_v52, 0.0  ;;  %v14037_v13 = vld [vmem:[#allocation10_spill] sm:$0xff] }
 0x2e2   : > { %vm6188_vm0 = vweird.f32 %v8871_v39  ;;  %v6169_v53 = vor.u32 %v9139_v35, %v6166_v45  ;;  %v9524_v17 = vsel %vm6109_vm3, inf, %v6122_v36  ;;  %v6104_v15 = vsel %vm6088_vm4, 0.0, %v6103_v50  ;;  %v14033_v35 = vld [vmem:[#allocation223_spill] sm:$0xff]  ;;  %v9532_v37 = vpop.permute.xlu0 %1763 }
 0x2e3   : > { %14032 = vst [vmem:[#allocation220_spill] sm:$0xff] %v9524_v17  ;;  %vm6136_vm1 = vcmp.eq.f32.partialorder %v14028_v30, 0.0  ;;  %v6189_v46 = vsel %vm6188_vm0, %v14025_v43, %v6187_v4  ;;  %v6157_v18 = vsel %vm6143_vm12, nan, %v6156_v54  ;;  %vm6127_vm2 = vcmp.eq.f32.partialorder %v14028_v30, inf  ;;  %14034 = vst [vmem:[#allocation240_spill] sm:$0xff] %v9532_v37  ;;  %v9534_v56 = vpop.permute.xlu1 %1767  ;;  %v14038_v4 = vld [vmem:[#allocation78_spill] sm:$0xff]  ;;  %2839 = vperm.xlu0 %7125, %v9463_v16  }
 0x2e4   : > { %v6138_v23 = vsel %vm6136_vm1, %v6130_v10, %v6135_v7  ;;  %vm6224_vm5 = vweird.f32 %v14033_v35  ;;  %14035 = vst [vmem:[#allocation223_spill] sm:$0xff] %v9534_v56  ;;  %vm6190_vm3 = vcmp.eq.f32.partialorder %v8871_v39, 0.0  ;;  %vm6170_vm6 = vweird.f32 %v14036_v60  ;;  %2836 = vperm.xlu1 %7126, %v9394_v5  }
 0x2e5   : > { %v6225_v6 = vsel %vm6224_vm5, %v8624_v55, %v9060_v3  ;;  %v6202_v36 = vand.u32 2147483648, %v14037_v13  ;;  %v9543_v50 = vmul.f32 %v9524_v17, %v14038_v4  ;;  %v9547_v10 = vsel %vm6091_vm9, inf, %v6104_v15 }
 0x2e6   : > { %14039 = vst [vmem:[#allocation243_spill] sm:$0xff] %v9547_v10  ;;  %v6192_v7 = vsel %vm6190_vm3, %v6184_v40, %v6189_v46  ;;  %v6171_v54 = vsel %vm6170_vm6, %v14029_v9, %v6169_v53  ;;  %v6158_v3 = vsel %vm6142_vm8, 0.0, %v6157_v18  ;;  %v6139_v56 = vsel %vm6125_vm15, nan, %v6138_v23  ;;  %v9563_v5 = vpop.permute.xlu0 %1771  ;;  %v14043_v40 = vld [vmem:[#allocation79_spill] sm:$0xff] }
 0x2e7   : > { %vm6226_vm4 = vcmp.eq.f32.partialorder %v14033_v35, 0.0  ;;  %v6205_v4 = vor.u32 %v9170_v34, %v6202_v36  ;;  %vm6178_vm7 = vcmp.eq.f32.partialorder %v14025_v43, 0.0  ;;  %vm6179_vm9 = vcmp.lt.f32.partialorder %v14025_v43, 0.0  ;;  %14041 = vst [vmem:[#allocation10_spill] sm:$0xff] %v9563_v5  ;;  %v9565_v58 = vpop.permute.xlu1 %1775  ;;  %v14045_v23 = vld [vmem:[#allocation247_spill] sm:$0xff]  ;;  %2845 = vperm.xlu0 %7125, %v2158_v32  }
 0x2e8   : > { %vm6172_vm10 = vcmp.eq.f32.partialorder %v14036_v60, 0.0  ;;  %v14040_v0 = vand.u32 2147483648, %v8624_v55  ;;  %14042 = vst [vmem:[#allocation78_spill] sm:$0xff] %v9565_v58  ;;  %v2160_v53 = vmul.f32 %v9547_v10, %v14043_v40  ;;  %vm6181_vm8 = vcmp.eq.f32.partialorder %v8871_v39, inf  ;;  %2842 = vperm.xlu1 %7126, %v9442_v26   ;;  %v14052_v40 = vld [vmem:[#allocation81_spill] sm:$0xff]  ;;  %v14085_v5 = vld [vmem:[#allocation87_spill] sm:$0xff] }
 0x2e9   : > { %v6193_v15 = vsel %vm6179_vm9, nan, %v6192_v7  ;;  %v6174_v34 = vsel %vm6172_vm10, %v6166_v45, %v6171_v54  ;;  %v9572_v46 = vsel %vm6145_vm13, inf, %v6158_v3  ;;  %v6140_v18 = vsel %vm6124_vm14, 0.0, %v6139_v56  ;;  %v14050_v54 = vld [vmem:[#allocation229_spill] sm:$0xff] }
 0x2ea   : > { %v6228_v16 = vsel %vm6226_vm4, %v14040_v0, %v6225_v6  ;;  %14044 = vst [vmem:[#allocation79_spill] sm:$0xff] %v9572_v46  ;;  %vm6215_vm11 = vcmp.lt.f32.partialorder %v8624_v55, 0.0  ;;  %vm6206_vm12 = vweird.f32 %v14045_v23  ;;  %v14046_v6 = vld [vmem:[#allocation80_spill] sm:$0xff]  ;;  %vm6161_vm15 = vcmp.lt.f32.partialorder %v14029_v9, 0.0  ;;  %v9587_v56 = vpop.permute.xlu0 %1779 }
 0x2eb   : > { %v2163_v0 = vmul.f32 %v9572_v46, %v14046_v6  ;;  %v6229_v45 = vsel %vm6215_vm11, nan, %v6228_v16  ;;  %v6207_v8 = vsel %vm6206_vm12, %v14037_v13, %v6205_v4  ;;  %v6194_v7 = vsel %vm6178_vm7, 0.0, %v6193_v15  ;;  %14047 = vst [vmem:[#allocation247_spill] sm:$0xff] %v9587_v56  ;;  %v9589_v32 = vpop.permute.xlu1 %1783  ;;  %v14051_v16 = vld [vmem:[#allocation221_spill] sm:$0xff]  ;;  %2851 = vperm.xlu0 %7125, %v2160_v53  }
 0x2ec   : > { %vm6160_vm13 = vcmp.eq.f32.partialorder %v14029_v9, 0.0  ;;  %vm6163_vm14 = vcmp.eq.f32.partialorder %v14036_v60, inf  ;;  %v6175_v52 = vsel %vm6161_vm15, nan, %v6174_v34  ;;  %14048 = vst [vmem:[#allocation80_spill] sm:$0xff] %v9589_v32  ;;  %v9593_v26 = vsel %vm6127_vm2, inf, %v6140_v18  ;;  %2848 = vperm.xlu1 %7126, %v9480_v48   ;;  %v14054_v34 = vld [vmem:[#allocation82_spill] sm:$0xff] }
 0x2ed   : > { %14049 = vst [vmem:[#allocation272_spill] sm:$0xff] %v9593_v26  ;;  %vm6214_vm0 = vcmp.eq.f32.partialorder %v8624_v55, 0.0  ;;  %vm6208_vm1 = vcmp.eq.f32.partialorder %v14045_v23, 0.0  ;;  %vm6260_vm5 = vweird.f32 %v14050_v54  ;;  %vm6242_vm3 = vweird.f32 %v14051_v16  ;;  %v14073_v32 = vld [vmem:[#allocation85_spill] sm:$0xff] }
 0x2ee   : > { %v6230_v43 = vsel %vm6214_vm0, 0.0, %v6229_v45  ;;  %v6210_v3 = vsel %vm6208_vm1, %v6202_v36, %v6207_v8  ;;  %v6261_v4 = vsel %vm6260_vm5, %v8646_v20, %v9074_v22  ;;  %v2162_v30 = vmul.f32 %v9593_v26, %v14052_v40  ;;  %v9617_v48 = vpop.permute.xlu0 %1786 }
 0x2ef   : > { %v9606_v55 = vsel %vm6181_vm8, inf, %v6194_v7  ;;  %v6176_v15 = vsel %vm6160_vm13, 0.0, %v6175_v52  ;;  %v6243_v36 = vsel %vm6242_vm3, %v8608_v38, %v9048_v61  ;;  %vm6217_vm2 = vcmp.eq.f32.partialorder %v14033_v35, inf  ;;  %14055 = vst [vmem:[#allocation221_spill] sm:$0xff] %v9617_v48  ;;  %v9619_v39 = vpop.permute.xlu1 %1790  ;;  %v14060_v35 = vld [vmem:[#allocation84_spill] sm:$0xff]  ;;  %v14062_v52 = vld [vmem:[#allocation227_spill] sm:$0xff] }
 0x2f0   : > { %14053 = vst [vmem:[#allocation229_spill] sm:$0xff] %v9606_v55  ;;  %v2165_v22 = vmul.f32 %v9606_v55, %v14054_v34  ;;  %vm6197_vm6 = vcmp.lt.f32.partialorder %v14037_v13, 0.0  ;;  %vm6262_vm4 = vcmp.eq.f32.partialorder %v14050_v54, 0.0  ;;  %14056 = vst [vmem:[#allocation81_spill] sm:$0xff] %v9619_v39  ;;  %v9621_v53 = vsel %vm6217_vm2, inf, %v6230_v43  ;;  %2857 = vperm.xlu0 %7125, %v2162_v30   ;;  %2854 = vperm.xlu1 %7126, %v9543_v50   ;;  %v14063_v43 = vld [vmem:[#allocation83_spill] sm:$0xff] }
 0x2f1   : > { %14057 = vst [vmem:[#allocation82_spill] sm:$0xff] %v9621_v53  ;;  %v6211_v9 = vsel %vm6197_vm6, nan, %v6210_v3  ;;  %v14058_v18 = vand.u32 2147483648, %v8646_v20  ;;  %vm6244_vm7 = vcmp.eq.f32.partialorder %v14051_v16, 0.0  ;;  %v9628_v61 = vsel %vm6163_vm14, inf, %v6176_v15  ;;  %v14135_v39 = vld [vmem:[#allocation188_spill] sm:$0xff] }
 0x2f2   : > { %14059 = vst [vmem:[#allocation273_spill] sm:$0xff] %v9628_v61  ;;  %v9632_v45 = vmul.f32 %v9621_v53, %v14060_v35  ;;  %v14061_v8 = vand.u32 2147483648, %v8608_v38  ;;  %vm6278_vm9 = vweird.f32 %v14062_v52  ;;  %v2164_v3 = vmul.f32 %v9628_v61, %v14063_v43  ;;  %v9646_v15 = vpop.permute.xlu0 %1794 }
 0x2f3   : > { %v6264_v6 = vsel %vm6262_vm4, %v14058_v18, %v6261_v4  ;;  %vm6196_vm10 = vcmp.eq.f32.partialorder %v14037_v13, 0.0  ;;  %vm6251_vm8 = vcmp.lt.f32.partialorder %v8646_v20, 0.0  ;;  %v6279_v60 = vsel %vm6278_vm9, %v8634_v47, %v9064_v14  ;;  %14064 = vst [vmem:[#allocation227_spill] sm:$0xff] %v9646_v15  ;;  %v9648_v30 = vpop.permute.xlu1 %1798  ;;  %v14067_v14 = vld [vmem:[#allocation224_spill] sm:$0xff]  ;;  %v14069_v18 = vld [vmem:[#allocation231_spill] sm:$0xff] }
 0x2f4   : > { %v6246_v7 = vsel %vm6244_vm7, %v14061_v8, %v6243_v36  ;;  %vm6199_vm11 = vcmp.eq.f32.partialorder %v14045_v23, inf  ;;  %v6212_v4 = vsel %vm6196_vm10, 0.0, %v6211_v9  ;;  %v6265_v40 = vsel %vm6251_vm8, nan, %v6264_v6  ;;  %14065 = vst [vmem:[#allocation83_spill] sm:$0xff] %v9648_v30  ;;  %v14066_v36 = vld [vmem:[#allocation232_spill] sm:$0xff]  ;;  %2863 = vperm.xlu0 %7125, %v2164_v3   ;;  %2860 = vperm.xlu1 %7126, %v2163_v0   ;;  %v14071_v8 = vld [vmem:[#allocation173_spill] sm:$0xff] }
 0x2f5   : > { %vm6233_vm12 = vcmp.lt.f32.partialorder %v8608_v38, 0.0  ;;  %vm6250_vm15 = vcmp.eq.f32.partialorder %v8646_v20, 0.0  ;;  %vm6296_vm13 = vweird.f32 %v14066_v36  ;;  %vm6280_vm14 = vcmp.eq.f32.partialorder %v14062_v52, 0.0  ;;  %v14126_v30 = vld [vmem:[#allocation98_spill] sm:$0xff] }
 0x2f6   : > { %v6247_v50 = vsel %vm6233_vm12, nan, %v6246_v7  ;;  %vm6253_vm0 = vcmp.eq.f32.partialorder %v14050_v54, inf  ;;  %v6297_v13 = vsel %vm6296_vm13, %v14067_v14, %v9082_v63  ;;  %v14068_v34 = vand.u32 2147483648, %v8634_v47  ;;  %v14072_v7 = vld [vmem:[#allocation222_spill] sm:$0xff]  ;;  %v9670_v3 = vpop.permute.xlu0 %1802 }
 0x2f7   : > { %vm6314_vm1 = vweird.f32 %v14069_v18  ;;  %v9661_v20 = vsel %vm6199_vm11, inf, %v6212_v4  ;;  %v6266_v6 = vsel %vm6250_vm15, 0.0, %v6265_v40  ;;  %vm6232_vm5 = vcmp.eq.f32.partialorder %v8608_v38, 0.0  ;;  %14074 = vst [vmem:[#allocation224_spill] sm:$0xff] %v9670_v3  ;;  %v9672_v0 = vpop.permute.xlu1 %1806  ;;  %v14091_v54 = vld [vmem:[#allocation86_spill] sm:$0xff] }
 0x2f8   : > { %v6282_v9 = vsel %vm6280_vm14, %v14068_v34, %v6279_v60  ;;  %14070 = vst [vmem:[#allocation232_spill] sm:$0xff] %v9661_v20  ;;  %v6315_v43 = vsel %vm6314_vm1, %v14072_v7, %v14071_v8  ;;  %v2166_v63 = vmul.f32 %v9661_v20, %v14073_v32  ;;  %v6248_v58 = vsel %vm6232_vm5, 0.0, %v6247_v50  ;;  %14075 = vst [vmem:[#allocation231_spill] sm:$0xff] %v9672_v0  ;;  %v14077_v32 = vld [vmem:[#allocation238_spill] sm:$0xff]  ;;  %v14079_v50 = vld [vmem:[#allocation236_spill] sm:$0xff] }
 0x2f9   : > { %vm6298_vm3 = vcmp.eq.f32.partialorder %v14066_v36, 0.0  ;;  %vm6269_vm2 = vcmp.lt.f32.partialorder %v8634_v47, 0.0  ;;  %vm6235_vm6 = vcmp.eq.f32.partialorder %v14051_v16, inf  ;;  %v14076_v23 = vand.u32 2147483648, %v14067_v14  ;;  %2866 = vperm.xlu1 %7126, %v2165_v22   ;;  %v14081_v16 = vld [vmem:[#allocation265_spill] sm:$0xff]  ;;  %v14083_v8 = vld [vmem:[#allocation264_spill] sm:$0xff] }
 0x2fa   : > { %v6283_v60 = vsel %vm6269_vm2, nan, %v6282_v9  ;;  %vm6316_vm4 = vcmp.eq.f32.partialorder %v14069_v18, 0.0  ;;  %vm6287_vm7 = vcmp.lt.f32.partialorder %v14067_v14, 0.0  ;;  %vm6332_vm9 = vweird.f32 %v14077_v32  ;;  %2869 = vperm.xlu0 %7125, %v2166_v63   ;;  %v14120_v0 = vld [vmem:[#allocation96_spill] sm:$0xff] }
 0x2fb   : > { %v6300_v38 = vsel %vm6298_vm3, %v14076_v23, %v6297_v13  ;;  %v14078_v4 = vand.u32 2147483648, %v14072_v7  ;;  %vm6350_vm10 = vweird.f32 %v14079_v50  ;;  %v9683_v34 = vsel %vm6235_vm6, inf, %v6248_v58  ;;  %v14082_v13 = vld [vmem:[#allocation230_spill] sm:$0xff]  ;;  %v14084_v23 = vld [vmem:[#allocation228_spill] sm:$0xff]  ;;  %v9695_v22 = vpop.permute.xlu1 %1814 }
 0x2fc   : > { %14080 = vst [vmem:[#allocation173_spill] sm:$0xff] %v9683_v34  ;;  %vm6268_vm8 = vcmp.eq.f32.partialorder %v8634_v47, 0.0  ;;  %v6333_v9 = vsel %vm6332_vm9, %v14082_v13, %v14081_v16  ;;  %v6351_v56 = vsel %vm6350_vm10, %v14084_v23, %v14083_v8  ;;  %v2168_v37 = vmul.f32 %v9683_v34, %v14085_v5  ;;  %14087 = vst [vmem:[#allocation85_spill] sm:$0xff] %v9695_v22 }
 0x2fd   : > { %v6318_v40 = vsel %vm6316_vm4, %v14078_v4, %v6315_v43  ;;  %v6301_v41 = vsel %vm6287_vm7, nan, %v6300_v38  ;;  %v6284_v28 = vsel %vm6268_vm8, 0.0, %v6283_v60  ;;  %vm6305_vm11 = vcmp.lt.f32.partialorder %v14072_v7, 0.0  ;;  %v9693_v43 = vpop.permute.xlu0 %1810  ;;  %2872 = vperm.xlu1 %7126, %v9632_v45  }
 0x2fe   : > { %14086 = vst [vmem:[#allocation222_spill] sm:$0xff] %v9693_v43  ;;  %v9699_v47 = vsel %vm6253_vm0, inf, %v6266_v6  ;;  %vm6334_vm12 = vcmp.eq.f32.partialorder %v14077_v32, 0.0  ;;  %v6319_v58 = vsel %vm6305_vm11, nan, %v6318_v40  ;;  %vm6352_vm15 = vcmp.eq.f32.partialorder %v14079_v50, 0.0  ;;  %2875 = vperm.xlu0 %7125, %v2168_v37   ;;  %v14117_v43 = vld [vmem:[#allocation254_spill] sm:$0xff] }
 0x2ff   : > { %14088 = vst [vmem:[#allocation238_spill] sm:$0xff] %v9699_v47  ;;  %vm6286_vm13 = vcmp.eq.f32.partialorder %v14067_v14, 0.0  ;;  %vm6271_vm14 = vcmp.eq.f32.partialorder %v14062_v52, inf  ;;  %v14089_v63 = vand.u32 2147483648, %v14082_v13  ;;  %v14090_v60 = vand.u32 2147483648, %v14084_v23  ;;  %v14093_v14 = vld [vmem:[#allocation89_spill] sm:$0xff]  ;;  %v9721_v37 = vpop.permute.xlu1 %1822 }
 0x300   : > { %v2169_v6 = vmul.f32 %v9699_v47, %v14091_v54  ;;  %v6302_v16 = vsel %vm6286_vm13, 0.0, %v6301_v41  ;;  %v9712_v40 = vsel %vm6271_vm14, inf, %v6284_v28  ;;  %vm6304_vm0 = vcmp.eq.f32.partialorder %v14072_v7, 0.0  ;;  %14095 = vst [vmem:[#allocation230_spill] sm:$0xff] %v9721_v37  ;;  %v14098_v7 = vld [vmem:[#allocation88_spill] sm:$0xff]  ;;  %v14114_v37 = vld [vmem:[#allocation94_spill] sm:$0xff] }
 0x301   : > { %v6336_v38 = vsel %vm6334_vm12, %v14089_v63, %v6333_v9  ;;  %v6354_v4 = vsel %vm6352_vm15, %v14090_v60, %v6351_v56  ;;  %14092 = vst [vmem:[#allocation236_spill] sm:$0xff] %v9712_v40  ;;  %v2170_v52 = vmul.f32 %v9712_v40, %v14093_v14  ;;  %vm6323_vm1 = vcmp.lt.f32.partialorder %v14082_v13, 0.0  ;;  %v9719_v56 = vpop.permute.xlu0 %1818 }
 0x302   : > { %v6320_v9 = vsel %vm6304_vm0, 0.0, %v6319_v58  ;;  %vm6341_vm5 = vcmp.lt.f32.partialorder %v14084_v23, 0.0  ;;  %14094 = vst [vmem:[#allocation265_spill] sm:$0xff] %v9719_v56  ;;  %v6337_v45 = vsel %vm6323_vm1, nan, %v6336_v38  ;;  %vm6289_vm3 = vcmp.eq.f32.partialorder %v14066_v36, inf  ;;  %2878 = vperm.xlu1 %7126, %v2169_v6   ;;  %v14099_v38 = vld [vmem:[#allocation91_spill] sm:$0xff] }
 0x303   : > { %v6355_v8 = vsel %vm6341_vm5, nan, %v6354_v4  ;;  %vm6307_vm2 = vcmp.eq.f32.partialorder %v14069_v18, inf  ;;  %2881 = vperm.xlu0 %7125, %v2170_v52   ;;  %v9725_v28 = vsel %vm6289_vm3, inf, %v6302_v16  ;;  %vm6322_vm6 = vcmp.eq.f32.partialorder %v14082_v13, 0.0  ;;  %v9737_v18 = vpop.permute.xlu1 %1830  ;;  %v14104_v6 = vld [vmem:[#allocation90_spill] sm:$0xff]  ;;  %v14105_v52 = vld [vmem:[#allocation93_spill] sm:$0xff] }
 0x304   : > { %14096 = vst [vmem:[#allocation264_spill] sm:$0xff] %v9725_v28  ;;  %v9728_v41 = vsel %vm6307_vm2, inf, %v6320_v9  ;;  %vm6340_vm4 = vcmp.eq.f32.partialorder %v14084_v23, 0.0  ;;  %v2171_v58 = vmul.f32 %v9725_v28, %v14098_v7  ;;  %v6338_v63 = vsel %vm6322_vm6, 0.0, %v6337_v45  ;;  %14101 = vst [vmem:[#allocation275_spill] sm:$0xff] %v9737_v18  ;;  %v14115_v56 = vld [vmem:[#allocation248_spill] sm:$0xff] }
 0x305   : > { %14097 = vst [vmem:[#allocation228_spill] sm:$0xff] %v9728_v41  ;;  %v2172_v60 = vmul.f32 %v9728_v41, %v14099_v38  ;;  %v6356_v36 = vsel %vm6340_vm4, 0.0, %v6355_v8  ;;  %v9735_v4 = vpop.permute.xlu0 %1826  ;;  %vm6325_vm7 = vcmp.eq.f32.partialorder %v14077_v32, inf  ;;  %vm6343_vm9 = vcmp.eq.f32.partialorder %v14079_v50, inf  ;;  %v14108_v32 = vld [vmem:[#allocation92_spill] sm:$0xff]  ;;  %v14109_v50 = vld [vmem:[#allocation233_spill] sm:$0xff] }
 0x306   : > { %14100 = vst [vmem:[#allocation274_spill] sm:$0xff] %v9735_v4  ;;  %2884 = vperm.xlu1 %7126, %v2171_v58   ;;  %v9741_v13 = vsel %vm6325_vm7, inf, %v6338_v63  ;;  %v9743_v23 = vsel %vm6343_vm9, inf, %v6356_v36  ;;  %v14110_v58 = vld [vmem:[#allocation95_spill] sm:$0xff]  ;;  %v14111_v63 = vld [vmem:[#allocation244_spill] sm:$0xff]  ;;  %v2177_v22 = vmul.f32 %v14115_v56, %v14114_v37  ;;  %v2179_v3 = vmul.f32 %v14121_v62, %v14120_v0 }
 0x307   : > { %2887 = vperm.xlu0 %7125, %v2172_v60   ;;  %14102 = vst [vmem:[#allocation276_spill] sm:$0xff] %v9741_v13  ;;  %14103 = vst [vmem:[#allocation277_spill] sm:$0xff] %v9743_v23  ;;  %v2173_v16 = vmul.f32 %v9741_v13, %v14104_v6  ;;  %v2174_v9 = vmul.f32 %v9743_v23, %v14105_v52  ;;  %v9751_v8 = vpop.permute.xlu1 %1838  ;;  %v2175_v60 = vmul.f32 %v14109_v50, %v14108_v32  ;;  %v14132_v0 = vld [vmem:[#allocation100_spill] sm:$0xff]  ;;  %v14144_v37 = vld [vmem:[#allocation107_spill] sm:$0xff] }
 0x308   : > { %14107 = vst [vmem:[#allocation279_spill] sm:$0xff] %v9751_v8  ;;  %v2176_v18 = vmul.f32 %v14111_v63, %v14110_v58  ;;  %v2181_v15 = vmul.f32 %v14127_v1, %v14126_v30  ;;  %v14138_v30 = vld [vmem:[#allocation268_spill] sm:$0xff]  ;;  %v14240_v52 = vld [vmem:[#allocation17_spill] sm:$0xff]  ;;  %v14241_v6 = vld [vmem:[#allocation154_spill] sm:$0xff] }
 0x309   : > { %v9749_v45 = vpop.permute.xlu0 %1834 }
 0x30a   : > { %14106 = vst [vmem:[#allocation278_spill] sm:$0xff] %v9749_v45  ;;  %2890 = vperm.xlu1 %7126, %v2173_v16   ;;  %v14116_v45 = vld [vmem:[#allocation97_spill] sm:$0xff] }
 0x30b   : > { %2893 = vperm.xlu0 %7125, %v2174_v9   ;;  %v9759_v4 = vpop.permute.xlu1 %1846  ;;  %v2178_v8 = vmul.f32 %v14117_v43, %v14116_v45 }
 0x30c   : > { %14113 = vst [vmem:[#allocation244_spill] sm:$0xff] %v9759_v4 }
 0x30d   : > { %v9757_v36 = vpop.permute.xlu0 %1842 }
 0x30e   : > { %14112 = vst [vmem:[#allocation233_spill] sm:$0xff] %v9757_v36  ;;  %2896 = vperm.xlu1 %7126, %v2175_v60   ;;  %v14122_v36 = vld [vmem:[#allocation99_spill] sm:$0xff] }
 0x30f   : > { %2899 = vperm.xlu0 %7125, %v2176_v18   ;;  %v9767_v16 = vpop.permute.xlu1 %1853  ;;  %v2180_v4 = vmul.f32 %v14123_v44, %v14122_v36  ;;  %v14133_v36 = vld [vmem:[#allocation143_spill] sm:$0xff] }
 0x310   : > { %14119 = vst [vmem:[#allocation254_spill] sm:$0xff] %v9767_v16  ;;  %v2183_v45 = vmul.f32 %v14133_v36, %v14132_v0 }
 0x311   : > { %v9765_v9 = vpop.permute.xlu0 %1849 }
 0x312   : > { %14118 = vst [vmem:[#allocation248_spill] sm:$0xff] %v9765_v9  ;;  %2902 = vperm.xlu1 %7126, %v2177_v22   ;;  %v14128_v9 = vld [vmem:[#allocation101_spill] sm:$0xff] }
 0x313   : > { %2905 = vperm.xlu0 %7125, %v2178_v8   ;;  %v9773_v18 = vpop.permute.xlu1 %1861  ;;  %v2182_v16 = vmul.f32 %v14129_v31, %v14128_v9  ;;  %v14139_v9 = vld [vmem:[#allocation105_spill] sm:$0xff] }
 0x314   : > { %14124 = vst [vmem:[#allocation251_spill] sm:$0xff] %v9773_v18  ;;  %v14134_v18 = vld [vmem:[#allocation103_spill] sm:$0xff] }
 0x315   : > { %v9775_v60 = vpop.permute.xlu0 %1857 }
 0x316   : > { %14125 = vst [vmem:[#allocation259_spill] sm:$0xff] %v9775_v60  ;;  %2908 = vperm.xlu1 %7126, %v2179_v3   ;;  %v2184_v60 = vmul.f32 %v14135_v39, %v14134_v18  ;;  %v2188_v18 = vmul.f32 %v9272_v49, %v14144_v37  ;;  %v14151_v37 = vld [vmem:[#allocation111_spill] sm:$0xff] }
 0x317   : > { %2911 = vperm.xlu0 %7125, %v2180_v4   ;;  %v9781_v8 = vpop.permute.xlu1 %1869  ;;  %v14137_v4 = vld [vmem:[#allocation102_spill] sm:$0xff] }
 0x318   : > { %14130 = vst [vmem:[#allocation256_spill] sm:$0xff] %v9781_v8  ;;  %v2185_v48 = vmul.f32 %v14138_v30, %v14137_v4  ;;  %v2186_v8 = vmul.f32 %v14140_v57, %v14139_v9  ;;  %v14147_v4 = vld [vmem:[#allocation106_spill] sm:$0xff]  ;;  %v14148_v9 = vld [vmem:[#allocation109_spill] sm:$0xff] }
 0x319   : > { %v9783_v22 = vpop.permute.xlu0 %1865 }
 0x31a   : > { %2914 = vperm.xlu1 %7126, %v2181_v15   ;;  %14131 = vst [vmem:[#allocation263_spill] sm:$0xff] %v9783_v22  ;;  %v14142_v15 = vld [vmem:[#allocation104_spill] sm:$0xff]  ;;  %v14143_v22 = vld [vmem:[#allocation270_spill] sm:$0xff] }
 0x31b   : > { %2917 = vperm.xlu0 %7125, %v2182_v16   ;;  %v9789_v3 = vpop.permute.xlu1 %1877  ;;  %v2187_v0 = vmul.f32 %v14143_v22, %v14142_v15 }
 0x31c   : > { %14136 = vst [vmem:[#allocation143_spill] sm:$0xff] %v9789_v3  ;;  %v2189_v3 = vmul.f32 %v9258_v42, %v14147_v4 }
 0x31d   : > { %v9795_v16 = vpop.permute.xlu0 %1873 }
 0x31e   : > { %2920 = vperm.xlu1 %7126, %v2183_v45   ;;  %14141 = vst [vmem:[#allocation188_spill] sm:$0xff] %v9795_v16  ;;  %v2190_v16 = vmul.f32 %v9296_v21, %v14148_v9 }
 0x31f   : > { %2923 = vperm.xlu0 %7125, %v2184_v60   ;;  %v9801_v60 = vpop.permute.xlu1 %1885 }
 0x320   : > { %14145 = vst [vmem:[#allocation268_spill] sm:$0xff] %v9801_v60  ;;  %v2192_v60 = vmul.f32 %v9360_v11, %v14151_v37  ;;  %v14158_v37 = vld [vmem:[#allocation115_spill] sm:$0xff] }
 0x321   : > { %v9803_v45 = vpop.permute.xlu0 %1881 }
 0x322   : > { %2926 = vperm.xlu1 %7126, %v2185_v48   ;;  %14146 = vst [vmem:[#allocation193_spill] sm:$0xff] %v9803_v45  ;;  %v14154_v45 = vld [vmem:[#allocation113_spill] sm:$0xff] }
 0x323   : > { %2929 = vperm.xlu0 %7125, %v2186_v8   ;;  %v9809_v48 = vpop.permute.xlu1 %1893  ;;  %v14150_v8 = vld [vmem:[#allocation108_spill] sm:$0xff]  ;;  %v2194_v9 = vmul.f32 %v9407_v51, %v14154_v45 }
 0x324   : > { %14149 = vst [vmem:[#allocation270_spill] sm:$0xff] %v9809_v48  ;;  %v2191_v15 = vmul.f32 %v9300_v59, %v14150_v8  ;;  %v14157_v8 = vld [vmem:[#allocation112_spill] sm:$0xff] }
 0x325   : > { %v2195_v48 = vmul.f32 %v9386_v24, %v14157_v8  ;;  %v14161_v45 = vld [vmem:[#allocation116_spill] sm:$0xff] }
 0x326   : > { %2932 = vperm.xlu1 %7126, %v2187_v0   ;;  %v14153_v0 = vld [vmem:[#allocation110_spill] sm:$0xff] }
 0x327   : > { %2935 = vperm.xlu0 %7125, %v2188_v18   ;;  %v9815_v18 = vpop.permute.xlu0 %1889  ;;  %v2193_v4 = vmul.f32 %v9347_v27, %v14153_v0 }
 0x328   : > { %14152 = vst [vmem:[#allocation108_spill] sm:$0xff] %v9815_v18  ;;  %v2196_v18 = vmul.f32 %v9457_v25, %v14158_v37 }
 0x32a   : > { %2938 = vperm.xlu1 %7126, %v2189_v3  }
 0x32b   : > { %2941 = vperm.xlu0 %7125, %v2190_v16   ;;  %v9821_v16 = vpop.permute.xlu1 %1901  ;;  %v9823_v3 = vpop.permute.xlu0 %1897 }
 0x32c   : > { %14155 = vst [vmem:[#allocation111_spill] sm:$0xff] %v9821_v16  ;;  %14156 = vst [vmem:[#allocation110_spill] sm:$0xff] %v9823_v3  ;;  %v2198_v16 = vmul.f32 %v9493_v33, %v14161_v45  ;;  %v14164_v3 = vld [vmem:[#allocation118_spill] sm:$0xff]  ;;  %v14168_v45 = vld [vmem:[#allocation120_spill] sm:$0xff] }
 0x32d   : > { %v2200_v37 = vmul.f32 %v9547_v10, %v14164_v3 }
 0x32e   : > { %2944 = vperm.xlu1 %7126, %v2191_v15  }
 0x32f   : > { %2947 = vperm.xlu0 %7125, %v2192_v60   ;;  %v9829_v15 = vpop.permute.xlu1 %1909  ;;  %v14160_v60 = vld [vmem:[#allocation114_spill] sm:$0xff] }
 0x330   : > { %14159 = vst [vmem:[#allocation113_spill] sm:$0xff] %v9829_v15  ;;  %v2197_v0 = vmul.f32 %v9432_v29, %v14160_v60  ;;  %v14167_v60 = vld [vmem:[#allocation119_spill] sm:$0xff] }
 0x331   : > { %v2201_v15 = vmul.f32 %v9524_v17, %v14167_v60  ;;  %v14175_v60 = vld [vmem:[#allocation123_spill] sm:$0xff] }
 0x332   : > { %2950 = vperm.xlu1 %7126, %v2193_v4   ;;  %v14163_v4 = vld [vmem:[#allocation117_spill] sm:$0xff] }
 0x333   : > { %2953 = vperm.xlu0 %7125, %v2194_v9   ;;  %v9835_v9 = vpop.permute.xlu0 %1905  ;;  %v2199_v8 = vmul.f32 %v9472_v19, %v14163_v4  ;;  %v14171_v4 = vld [vmem:[#allocation121_spill] sm:$0xff] }
 0x334   : > { %14162 = vst [vmem:[#allocation112_spill] sm:$0xff] %v9835_v9  ;;  %v2202_v9 = vmul.f32 %v9593_v26, %v14168_v45  ;;  %v2203_v3 = vmul.f32 %v9572_v46, %v14171_v4  ;;  %v2205_v45 = vmul.f32 %v9606_v55, %v14175_v60  ;;  %v14179_v4 = vld [vmem:[#allocation125_spill] sm:$0xff]  ;;  %v14183_v60 = vld [vmem:[#allocation127_spill] sm:$0xff] }
 0x336   : > { %2956 = vperm.xlu1 %7126, %v2195_v48  }
 0x337   : > { %2959 = vperm.xlu0 %7125, %v2196_v18  }
 0x339   : > { %v9841_v18 = vpop.permute.xlu0 %2776 }
 0x33a   : > { %2962 = vperm.xlu1 %7126, %v2197_v0   ;;  %14165 = vst [vmem:[#allocation115_spill] sm:$0xff] %v9841_v18  ;;  %v14172_v18 = vld [vmem:[#allocation122_spill] sm:$0xff] }
 0x33b   : > { %2965 = vperm.xlu0 %7125, %v2198_v16   ;;  %v9843_v48 = vpop.permute.xlu1 %2779 }
 0x33c   : > { %14166 = vst [vmem:[#allocation114_spill] sm:$0xff] %v9843_v48  ;;  %v2204_v48 = vmul.f32 %v9628_v61, %v14172_v18  ;;  %v2207_v18 = vmul.f32 %v9621_v53, %v14179_v4  ;;  %v14187_v4 = vld [vmem:[#allocation129_spill] sm:$0xff] }
 0x33d   : > { %v9849_v16 = vpop.permute.xlu0 %2785 }
 0x33e   : > { %2968 = vperm.xlu1 %7126, %v2199_v8   ;;  %14169 = vst [vmem:[#allocation116_spill] sm:$0xff] %v9849_v16  ;;  %v14176_v16 = vld [vmem:[#allocation124_spill] sm:$0xff] }
 0x33f   : > { %2971 = vperm.xlu0 %7125, %v2200_v37   ;;  %v9851_v0 = vpop.permute.xlu1 %2782 }
 0x340   : > { %14170 = vst [vmem:[#allocation117_spill] sm:$0xff] %v9851_v0  ;;  %v2206_v0 = vmul.f32 %v9661_v20, %v14176_v16  ;;  %v2209_v16 = vmul.f32 %v9699_v47, %v14183_v60  ;;  %v14191_v60 = vld [vmem:[#allocation131_spill] sm:$0xff] }
 0x342   : > { %2974 = vperm.xlu1 %7126, %v2201_v15   ;;  %v9857_v37 = vpop.permute.xlu0 %2791 }
 0x343   : > { %2977 = vperm.xlu0 %7125, %v2202_v9   ;;  %14173 = vst [vmem:[#allocation118_spill] sm:$0xff] %v9857_v37  ;;  %v9859_v8 = vpop.permute.xlu1 %2788  ;;  %v14180_v37 = vld [vmem:[#allocation126_spill] sm:$0xff] }
 0x344   : > { %14174 = vst [vmem:[#allocation119_spill] sm:$0xff] %v9859_v8  ;;  %v2208_v8 = vmul.f32 %v9683_v34, %v14180_v37  ;;  %v2211_v37 = vmul.f32 %v9725_v28, %v14187_v4  ;;  %v14195_v4 = vld [vmem:[#allocation133_spill] sm:$0xff] }
 0x346   : > { %2980 = vperm.xlu1 %7126, %v2203_v3   ;;  %v9865_v9 = vpop.permute.xlu0 %2797 }
 0x347   : > { %2983 = vperm.xlu0 %7125, %v2204_v48   ;;  %14177 = vst [vmem:[#allocation120_spill] sm:$0xff] %v9865_v9  ;;  %v9867_v15 = vpop.permute.xlu1 %2794  ;;  %v14184_v9 = vld [vmem:[#allocation128_spill] sm:$0xff] }
 0x348   : > { %14178 = vst [vmem:[#allocation121_spill] sm:$0xff] %v9867_v15  ;;  %v2210_v15 = vmul.f32 %v9712_v40, %v14184_v9  ;;  %v2213_v9 = vmul.f32 %v9741_v13, %v14191_v60  ;;  %v14199_v60 = vld [vmem:[#allocation135_spill] sm:$0xff] }
 0x34a   : > { %2986 = vperm.xlu1 %7126, %v2205_v45   ;;  %v9873_v48 = vpop.permute.xlu0 %2803 }
 0x34b   : > { %2989 = vperm.xlu0 %7125, %v2206_v0   ;;  %14181 = vst [vmem:[#allocation122_spill] sm:$0xff] %v9873_v48  ;;  %v9875_v3 = vpop.permute.xlu1 %2800  ;;  %v14188_v48 = vld [vmem:[#allocation130_spill] sm:$0xff] }
 0x34c   : > { %14182 = vst [vmem:[#allocation123_spill] sm:$0xff] %v9875_v3  ;;  %v2212_v3 = vmul.f32 %v9728_v41, %v14188_v48  ;;  %v2215_v48 = vmul.f32 %v14109_v50, %v14195_v4  ;;  %v14203_v4 = vld [vmem:[#allocation137_spill] sm:$0xff] }
 0x34e   : > { %2992 = vperm.xlu1 %7126, %v2207_v18   ;;  %v9881_v0 = vpop.permute.xlu0 %2809 }
 0x34f   : > { %2995 = vperm.xlu0 %7125, %v2208_v8   ;;  %14185 = vst [vmem:[#allocation124_spill] sm:$0xff] %v9881_v0  ;;  %v9883_v45 = vpop.permute.xlu1 %2806  ;;  %v14192_v0 = vld [vmem:[#allocation132_spill] sm:$0xff] }
 0x350   : > { %14186 = vst [vmem:[#allocation280_spill] sm:$0xff] %v9883_v45  ;;  %v2214_v45 = vmul.f32 %v9743_v23, %v14192_v0  ;;  %v2217_v0 = vmul.f32 %v14115_v56, %v14199_v60  ;;  %v14207_v60 = vld [vmem:[#allocation139_spill] sm:$0xff] }
 0x352   : > { %2998 = vperm.xlu1 %7126, %v2209_v16   ;;  %v9889_v8 = vpop.permute.xlu0 %2815 }
 0x353   : > { %3001 = vperm.xlu0 %7125, %v2210_v15   ;;  %14189 = vst [vmem:[#allocation281_spill] sm:$0xff] %v9889_v8  ;;  %v9891_v18 = vpop.permute.xlu1 %2812  ;;  %v14196_v8 = vld [vmem:[#allocation134_spill] sm:$0xff] }
 0x354   : > { %14190 = vst [vmem:[#allocation282_spill] sm:$0xff] %v9891_v18  ;;  %v2216_v18 = vmul.f32 %v14111_v63, %v14196_v8  ;;  %v2219_v8 = vmul.f32 %v14121_v62, %v14203_v4  ;;  %v14211_v4 = vld [vmem:[#allocation141_spill] sm:$0xff] }
 0x356   : > { %3004 = vperm.xlu1 %7126, %v2211_v37   ;;  %v9897_v15 = vpop.permute.xlu0 %2821 }
 0x357   : > { %3007 = vperm.xlu0 %7125, %v2212_v3   ;;  %14193 = vst [vmem:[#allocation283_spill] sm:$0xff] %v9897_v15  ;;  %v9899_v16 = vpop.permute.xlu1 %2818  ;;  %v14200_v15 = vld [vmem:[#allocation136_spill] sm:$0xff] }
 0x358   : > { %14194 = vst [vmem:[#allocation284_spill] sm:$0xff] %v9899_v16  ;;  %v2218_v16 = vmul.f32 %v14117_v43, %v14200_v15  ;;  %v2221_v15 = vmul.f32 %v14127_v1, %v14207_v60  ;;  %v14215_v60 = vld [vmem:[#allocation144_spill] sm:$0xff] }
 0x35a   : > { %3010 = vperm.xlu1 %7126, %v2213_v9   ;;  %v9905_v3 = vpop.permute.xlu0 %2827 }
 0x35b   : > { %3013 = vperm.xlu0 %7125, %v2214_v45   ;;  %14197 = vst [vmem:[#allocation285_spill] sm:$0xff] %v9905_v3  ;;  %v9907_v37 = vpop.permute.xlu1 %2824  ;;  %v14204_v3 = vld [vmem:[#allocation138_spill] sm:$0xff] }
 0x35c   : > { %14198 = vst [vmem:[#allocation286_spill] sm:$0xff] %v9907_v37  ;;  %v2220_v37 = vmul.f32 %v14123_v44, %v14204_v3  ;;  %v2223_v3 = vmul.f32 %v14133_v36, %v14211_v4  ;;  %v14219_v4 = vld [vmem:[#allocation146_spill] sm:$0xff] }
 0x35e   : > { %3016 = vperm.xlu1 %7126, %v2215_v48   ;;  %v9913_v45 = vpop.permute.xlu0 %2833 }
 0x35f   : > { %3019 = vperm.xlu0 %7125, %v2216_v18   ;;  %14201 = vst [vmem:[#allocation287_spill] sm:$0xff] %v9913_v45  ;;  %v9915_v9 = vpop.permute.xlu1 %2830  ;;  %v14208_v45 = vld [vmem:[#allocation140_spill] sm:$0xff] }
 0x360   : > { %14202 = vst [vmem:[#allocation288_spill] sm:$0xff] %v9915_v9  ;;  %v2222_v9 = vmul.f32 %v14129_v31, %v14208_v45  ;;  %v2225_v45 = vmul.f32 %v14138_v30, %v14215_v60  ;;  %v14223_v60 = vld [vmem:[#allocation12_spill] sm:$0xff] }
 0x361   : > { %v9958_v12 = vmul.f32 0.015625, %v14223_v60 }
 0x362   : > { %3022 = vperm.xlu1 %7126, %v2217_v0   ;;  %v9921_v18 = vpop.permute.xlu0 %2839 }
 0x363   : > { %3025 = vperm.xlu0 %7125, %v2218_v16   ;;  %14205 = vst [vmem:[#allocation289_spill] sm:$0xff] %v9921_v18  ;;  %v9923_v48 = vpop.permute.xlu1 %2836  ;;  %v14212_v18 = vld [vmem:[#allocation142_spill] sm:$0xff]  ;;  %vm6377_vm15 = vcmp.lt.f32.partialorder %v9958_v12, 0.0  ;;  %vm6376_vm0 = vcmp.eq.f32.partialorder %v9958_v12, 0.0 }
 0x364   : > { %14206 = vst [vmem:[#allocation290_spill] sm:$0xff] %v9923_v48  ;;  %v2224_v48 = vmul.f32 %v14135_v39, %v14212_v18  ;;  %v2227_v18 = vmul.f32 %v14143_v22, %v14219_v4 }
 0x366   : > { %3028 = vperm.xlu1 %7126, %v2219_v8   ;;  %v9929_v16 = vpop.permute.xlu0 %2845 }
 0x367   : > { %3031 = vperm.xlu0 %7125, %v2220_v37   ;;  %14209 = vst [vmem:[#allocation291_spill] sm:$0xff] %v9929_v16  ;;  %v9931_v0 = vpop.permute.xlu1 %2842  ;;  %v14216_v16 = vld [vmem:[#allocation145_spill] sm:$0xff] }
 0x368   : > { %14210 = vst [vmem:[#allocation292_spill] sm:$0xff] %v9931_v0  ;;  %v2226_v0 = vmul.f32 %v14140_v57, %v14216_v16 }
 0x36a   : > { %3034 = vperm.xlu1 %7126, %v2221_v15   ;;  %v9937_v37 = vpop.permute.xlu0 %2851 }
 0x36b   : > { %3037 = vperm.xlu0 %7125, %v2222_v9   ;;  %14213 = vst [vmem:[#allocation293_spill] sm:$0xff] %v9937_v37  ;;  %v9939_v8 = vpop.permute.xlu1 %2848  ;;  %v14220_v37 = vld [vmem:[#allocation147_spill] sm:$0xff] }
 0x36c   : > { %14214 = vst [vmem:[#allocation294_spill] sm:$0xff] %v9939_v8  ;;  %v2228_v8 = vmul.f32 %v9272_v49, %v14220_v37 }
 0x36e   : > { %3040 = vperm.xlu1 %7126, %v2223_v3  }
 0x36f   : > { %3043 = vperm.xlu0 %7125, %v2224_v48   ;;  %v9945_v9 = vpop.permute.xlu0 %2857  ;;  %v9947_v15 = vpop.permute.xlu1 %2854 }
 0x370   : > { %14217 = vst [vmem:[#allocation295_spill] sm:$0xff] %v9945_v9  ;;  %14218 = vst [vmem:[#allocation296_spill] sm:$0xff] %v9947_v15  ;;  %v14224_v9 = vld [vmem:[#allocation13_spill] sm:$0xff] }
 0x371   : > { %v9961_v16 = vmul.f32 0.015625, %v14224_v9  ;;  %v14226_v15 = vld [vmem:[#allocation149_spill] sm:$0xff]  ;;  %v14230_v9 = vld [vmem:[#allocation151_spill] sm:$0xff] }
 0x372   : > { %3046 = vperm.xlu1 %7126, %v2225_v45   ;;  %v2230_v4 = vmul.f32 %v9296_v21, %v14226_v15 }
 0x373   : > { %3049 = vperm.xlu0 %7125, %v2226_v0   ;;  %v9953_v48 = vpop.permute.xlu0 %2863  ;;  %v9955_v3 = vpop.permute.xlu1 %2860  ;;  %v14225_v0 = vld [vmem:[#allocation148_spill] sm:$0xff]  ;;  %v9975_v60 = vand.u32 2147483647, %v9961_v16  ;;  %vm6359_vm13 = vcmp.lt.f32.partialorder %v9961_v16, 0.0  ;;  %vm6358_vm1 = vcmp.eq.f32.partialorder %v9961_v16, 0.0 }
 0x374   : > { %14221 = vst [vmem:[#allocation297_spill] sm:$0xff] %v9953_v48  ;;  %14222 = vst [vmem:[#allocation298_spill] sm:$0xff] %v9955_v3  ;;  %v2229_v45 = vmul.f32 %v9258_v42, %v14225_v0  ;;  %v9972_v48 = vand.u32 2147483647, %v9958_v12  ;;  %v2232_v3 = vmul.f32 %v9360_v11, %v14230_v9  ;;  %v14236_v9 = vld [vmem:[#allocation14_spill] sm:$0xff] }
 0x375   : > { %v9995_v32 = vmul.f32 0.015625, %v14236_v9  ;;  %v14242_v9 = vld [vmem:[#allocation155_spill] sm:$0xff]  ;;  %vm6368_vm8 = vweird.f32 %v9975_v60  ;;  %vm6370_vm12 = vcmp.eq.f32.partialorder %v9975_v60, 0.0  ;;  %vm6361_vm2 = vcmp.eq.f32.partialorder %v9975_v60, inf }
 0x376   : > { %3052 = vperm.xlu1 %7126, %v2227_v18   ;;  %v14229_v18 = vld [vmem:[#allocation150_spill] sm:$0xff]  ;;  %7288 = vlog2.f32 %v9972_v48  ;;  %v2236_v38 = vmul.f32 %v9457_v25, %v14242_v9  ;;  %vm6386_vm10 = vweird.f32 %v9972_v48  ;;  %vm6388_vm11 = vcmp.eq.f32.partialorder %v9972_v48, 0.0 }
 0x377   : > { %3055 = vperm.xlu0 %7125, %v2228_v8   ;;  %v2231_v8 = vmul.f32 %v9300_v59, %v14229_v18  ;;  %7290 = vlog2.f32 %v9975_v60  ;;  %v14235_v18 = vld [vmem:[#allocation153_spill] sm:$0xff]  ;;  %vm6379_vm3 = vcmp.eq.f32.partialorder %v9972_v48, inf }
 0x378   : > { %v9969_v37 = vpop.permute.xlu1 %2866  ;;  %v2234_v58 = vmul.f32 %v9407_v51, %v14235_v18  ;;  %v2235_v18 = vmul.f32 %v9386_v24, %v14241_v6 }
 0x379   : > { %v9967_v2 = vpop.permute.xlu0 %2869  ;;  %14228 = vst [vmem:[#allocation13_spill] sm:$0xff] %v9969_v37  ;;  %v14234_v37 = vld [vmem:[#allocation152_spill] sm:$0xff] }
 0x37a   : > { %14227 = vst [vmem:[#allocation12_spill] sm:$0xff] %v9967_v2  ;;  %3058 = vperm.xlu1 %7126, %v2229_v45   ;;  %v2233_v2 = vmul.f32 %v9347_v27, %v14234_v37  ;;  %v10008_v37 = vmul.f32 0.015625, %v14240_v52  ;;  %v14247_v52 = vld [vmem:[#allocation19_spill] sm:$0xff] }
 0x37b   : > { %3061 = vperm.xlu0 %7125, %v2230_v4   ;;  %v14233_v4 = vld [vmem:[#allocation15_spill] sm:$0xff]  ;;  %v10028_v14 = vmul.f32 0.015625, %v14247_v52 }
 0x37c   : > { %v9983_v15 = vpop.permute.xlu1 %2872  ;;  %v9988_v45 = vmul.f32 0.015625, %v14233_v4  ;;  %v10032_v9 = vand.u32 2147483647, %v10008_v37  ;;  %vm6431_vm9 = vcmp.lt.f32.partialorder %v10008_v37, 0.0 }
 0x37d   : > { %v9981_v0 = vpop.permute.xlu0 %2875  ;;  %14232 = vst [vmem:[#allocation151_spill] sm:$0xff] %v9983_v15 }
 0x37e   : > { %14231 = vst [vmem:[#allocation150_spill] sm:$0xff] %v9981_v0  ;;  %3064 = vperm.xlu1 %7126, %v2231_v8   ;;  %v10005_v4 = vand.u32 2147483647, %v9988_v45  ;;  %vm6440_vm6 = vweird.f32 %v10032_v9  ;;  %vm6395_vm4 = vcmp.lt.f32.partialorder %v9988_v45, 0.0  ;;  %vm6394_vm7 = vcmp.eq.f32.partialorder %v9988_v45, 0.0 }
 0x37f   : > { %3067 = vperm.xlu0 %7125, %v2232_v3   ;;  %v14239_v3 = vld [vmem:[#allocation16_spill] sm:$0xff] }
 0x380   : > { %v10002_v8 = vmul.f32 0.015625, %v14239_v3  ;;  %v7289_v6 = vpop.eup %7288  ;;  %7292 = vlog2.f32 %v10005_v4  ;;  %vm6404_vm14 = vweird.f32 %v10005_v4  ;;  %vm6406_vm5 = vcmp.eq.f32.partialorder %v10005_v4, 0.0 }
 0x381   : > { %v9999_v15 = vpop.permute.xlu1 %2878  ;;  %v7291_v5 = vpop.eup %7290 }
 0x382   : > { %v9997_v0 = vpop.permute.xlu0 %2881  ;;  %14238 = vst [vmem:[#allocation152_spill] sm:$0xff] %v9999_v15  ;;  %3070 = vperm.xlu1 %7126, %v2233_v2   ;;  %v14243_v15 = vld [vmem:[#allocation18_spill] sm:$0xff]  ;;  %v10025_v7 = vand.u32 2147483647, %v10002_v8  ;;  %v6365_v24 = vmul.f32 0.33333334, %v7291_v5 }
 0x383   : > { %14237 = vst [vmem:[#allocation15_spill] sm:$0xff] %v9997_v0  ;;  %3073 = vperm.xlu0 %7125, %v2234_v58   ;;  %v10015_v0 = vand.u32 2147483647, %v9995_v32  ;;  %v10018_v3 = vmul.f32 0.015625, %v14243_v15  ;;  %v14248_v15 = vld [vmem:[#allocation156_spill] sm:$0xff] }
 0x384   : > { %14246 = vst [vmem:[#allocation16_spill] sm:$0xff] %v10025_v7  ;;  %v2237_v54 = vmul.f32 %v9432_v29, %v14248_v15  ;;  %v10051_v15 = vand.u32 2147483647, %v10028_v14  ;;  %v14254_v29 = vld [vmem:[#allocation21_spill] sm:$0xff] }
 0x385   : > { %v10022_v2 = vpop.permute.xlu1 %2884  ;;  %7294 = vlog2.f32 %v10015_v0  ;;  %v10040_v52 = vand.u32 2147483647, %v10018_v3 }
 0x386   : > { %v10020_v58 = vpop.permute.xlu0 %2887  ;;  %14245 = vst [vmem:[#allocation14_spill] sm:$0xff] %v10022_v2  ;;  %3076 = vperm.xlu1 %7126, %v2235_v18   ;;  %7296 = vlog2.f32 %v10025_v7  ;;  %v14258_v7 = vld [vmem:[#allocation22_spill] sm:$0xff] }
 0x387   : > { %14244 = vst [vmem:[#allocation153_spill] sm:$0xff] %v10020_v58  ;;  %3079 = vperm.xlu0 %7125, %v2236_v38   ;;  %v14249_v58 = vld [vmem:[#allocation157_spill] sm:$0xff]  ;;  %14250 = vst [vmem:[#allocation17_spill] sm:$0xff] %v10040_v52  ;;  %v14251_v38 = vld [vmem:[#allocation20_spill] sm:$0xff]  ;;  %7298 = vlog2.f32 %v10032_v9 }
 0x388   : > { %v2238_v2 = vmul.f32 %v9493_v33, %v14249_v58  ;;  %v10043_v18 = vmul.f32 0.015625, %v14251_v38  ;;  %v10054_v58 = vmul.f32 0.015625, %v14254_v29  ;;  %v6383_v33 = vmul.f32 0.33333334, %v7289_v6  ;;  %v14255_v38 = vld [vmem:[#allocation158_spill] sm:$0xff] }
 0x389   : > { %v10047_v25 = vpop.permute.xlu1 %2890  ;;  %v2239_v51 = vmul.f32 %v9472_v19, %v14255_v38  ;;  %7300 = vlog2.f32 %v10040_v52  ;;  %v10066_v29 = vmul.f32 0.015625, %v14258_v7  ;;  %v14263_v38 = vld [vmem:[#allocation160_spill] sm:$0xff] }
 0x38a   : > { %v10045_v35 = vpop.permute.xlu0 %2893  ;;  %14253 = vst [vmem:[#allocation155_spill] sm:$0xff] %v10047_v25  ;;  %3082 = vperm.xlu1 %7126, %v2237_v54   ;;  %v10063_v27 = vand.u32 2147483647, %v10043_v18  ;;  %7302 = vlog2.f32 %v10051_v15  ;;  %v10074_v5 = vand.u32 2147483647, %v10054_v58  ;;  %v2241_v7 = vmul.f32 %v9524_v17, %v14263_v38  ;;  %v14271_v17 = vld [vmem:[#allocation163_spill] sm:$0xff] }
 0x38b   : > { %14252 = vst [vmem:[#allocation154_spill] sm:$0xff] %v10045_v35  ;;  %3085 = vperm.xlu0 %7125, %v2238_v2   ;;  %v14256_v35 = vld [vmem:[#allocation159_spill] sm:$0xff]  ;;  %7304 = vpow2.f32 %v6383_v33 }
 0x38c   : > { %v2240_v25 = vmul.f32 %v9547_v10, %v14256_v35  ;;  %14257 = vst [vmem:[#allocation18_spill] sm:$0xff] %v10063_v27  ;;  %14261 = vst [vmem:[#allocation157_spill] sm:$0xff] %v10074_v5  ;;  %7306 = vpow2.f32 %v6365_v24  ;;  %v14262_v35 = vld [vmem:[#allocation23_spill] sm:$0xff]  ;;  %v14264_v10 = vld [vmem:[#allocation161_spill] sm:$0xff] }
 0x38d   : > { %v10070_v54 = vpop.permute.xlu1 %2896  ;;  %v10077_v6 = vmul.f32 0.015625, %v14262_v35  ;;  %7308 = vlog2.f32 %v10063_v27  ;;  %v14270_v27 = vld [vmem:[#allocation162_spill] sm:$0xff] }
 0x38e   : > { %v10068_v2 = vpop.permute.xlu0 %2899  ;;  %14260 = vst [vmem:[#allocation156_spill] sm:$0xff] %v10070_v54  ;;  %3088 = vperm.xlu1 %7126, %v2239_v51   ;;  %v10085_v54 = vand.u32 2147483647, %v10066_v29  ;;  %v7293_v51 = vpop.eup %7292  ;;  %7310 = vlog2.f32 %v10074_v5  ;;  %v14276_v5 = vld [vmem:[#allocation164_spill] sm:$0xff] }
 0x38f   : > { %14259 = vst [vmem:[#allocation19_spill] sm:$0xff] %v10068_v2  ;;  %3091 = vperm.xlu0 %7125, %v2240_v25   ;;  %v2242_v2 = vmul.f32 %v9593_v26, %v14264_v10  ;;  %v7295_v24 = vpop.eup %7294  ;;  %v10093_v35 = vand.u32 2147483647, %v10077_v6  ;;  %v14269_v10 = vld [vmem:[#allocation24_spill] sm:$0xff]  ;;  %v2243_v26 = vmul.f32 %v9572_v46, %v14270_v27 }
 0x390   : > { %14265 = vst [vmem:[#allocation20_spill] sm:$0xff] %v10085_v54  ;;  %v7297_v33 = vpop.eup %7296  ;;  %v10096_v38 = vmul.f32 0.015625, %v14269_v10  ;;  %7312 = vlog2.f32 %v10085_v54  ;;  %v6419_v10 = vmul.f32 0.33333334, %v7295_v24  ;;  %v2245_v24 = vmul.f32 %v9606_v55, %v14276_v5  ;;  %v14282_v5 = vld [vmem:[#allocation166_spill] sm:$0xff] }
 0x391   : > { %v10089_v25 = vpop.permute.xlu1 %2902  ;;  %14268 = vst [vmem:[#allocation159_spill] sm:$0xff] %v10093_v35  ;;  %7314 = vlog2.f32 %v10093_v35 }
 0x392   : > { %v10087_v19 = vpop.permute.xlu0 %2905  ;;  %14267 = vst [vmem:[#allocation158_spill] sm:$0xff] %v10089_v25  ;;  %3094 = vperm.xlu1 %7126, %v2241_v7   ;;  %v6401_v25 = vmul.f32 0.33333334, %v7293_v51  ;;  %v7299_v7 = vpop.eup %7298  ;;  %v6455_v51 = vmul.f32 0.33333334, %v7297_v33 }
 0x393   : > { %14266 = vst [vmem:[#allocation21_spill] sm:$0xff] %v10087_v19  ;;  %3097 = vperm.xlu0 %7125, %v2242_v2   ;;  %v2244_v19 = vmul.f32 %v9628_v61, %v14271_v17  ;;  %v7301_v59 = vpop.eup %7300  ;;  %v14274_v61 = vld [vmem:[#allocation25_spill] sm:$0xff]  ;;  %v6437_v33 = vmul.f32 0.33333334, %v7299_v7  ;;  %v14278_v17 = vld [vmem:[#allocation27_spill] sm:$0xff] }
 0x394   : > { %v10112_v54 = vmul.f32 0.015625, %v14274_v61  ;;  %7316 = vpow2.f32 %v6401_v25  ;;  %v10124_v61 = vmul.f32 0.015625, %v14278_v17  ;;  %v6491_v55 = vmul.f32 0.33333334, %v7301_v59 }
 0x395   : > { %v10105_v2 = vpop.permute.xlu1 %2908  ;;  %7318 = vpow2.f32 %v6419_v10  ;;  %v2247_v59 = vmul.f32 %v9621_v53, %v14282_v5  ;;  %v14289_v5 = vand.u32 2147483648, %v9958_v12 }
 0x396   : > { %v10103_v52 = vpop.permute.xlu0 %2911  ;;  %14273 = vst [vmem:[#allocation23_spill] sm:$0xff] %v10105_v2  ;;  %3100 = vperm.xlu1 %7126, %v2243_v26   ;;  %v10116_v2 = vand.u32 2147483647, %v10096_v38  ;;  %7320 = vpow2.f32 %v6455_v51 }
 0x397   : > { %14272 = vst [vmem:[#allocation22_spill] sm:$0xff] %v10103_v52  ;;  %3103 = vperm.xlu0 %7125, %v2244_v19   ;;  %v7303_v52 = vpop.eup %7302  ;;  %v14277_v19 = vld [vmem:[#allocation165_spill] sm:$0xff] }
 0x398   : > { %14275 = vst [vmem:[#allocation160_spill] sm:$0xff] %v10116_v2  ;;  %v2246_v26 = vmul.f32 %v9661_v20, %v14277_v19  ;;  %v7305_v11 = vpop.eup %7304  ;;  %v6473_v17 = vmul.f32 0.33333334, %v7303_v52  ;;  %v10135_v19 = vand.u32 2147483647, %v10112_v54  ;;  %7322 = vlog2.f32 %v10116_v2 }
 0x399   : > { %v10129_v35 = vpop.permute.xlu1 %2914  ;;  %v7307_v21 = vpop.eup %7306  ;;  %7324 = vpow2.f32 %v6437_v33  ;;  %v10147_v52 = vand.u32 2147483647, %v10124_v61  ;;  %v6385_v53 = vor.u32 %v7305_v11, %v14289_v5 }
 0x39a   : > { %v10127_v46 = vpop.permute.xlu0 %2917  ;;  %14280 = vst [vmem:[#allocation24_spill] sm:$0xff] %v10129_v35  ;;  %3106 = vperm.xlu1 %7126, %v2245_v24   ;;  %v7309_v25 = vpop.eup %7308  ;;  %v14283_v35 = vld [vmem:[#allocation167_spill] sm:$0xff]  ;;  %7326 = vpow2.f32 %v6491_v55  ;;  %v14294_v55 = vld [vmem:[#allocation168_spill] sm:$0xff] }
 0x39b   : > { %14279 = vst [vmem:[#allocation161_spill] sm:$0xff] %v10127_v46  ;;  %3109 = vperm.xlu0 %7125, %v2246_v26   ;;  %v7311_v27 = vpop.eup %7310  ;;  %v14281_v46 = vld [vmem:[#allocation28_spill] sm:$0xff]  ;;  %v2248_v24 = vmul.f32 %v9683_v34, %v14283_v35  ;;  %14284 = vst [vmem:[#allocation162_spill] sm:$0xff] %v10147_v52  ;;  %v14285_v26 = vld [vmem:[#allocation29_spill] sm:$0xff]  ;;  %v6527_v35 = vmul.f32 0.33333334, %v7309_v25  ;;  %7328 = vpow2.f32 %v6473_v17  ;;  %v2249_v5 = vmul.f32 %v9699_v47, %v14294_v55 }
 0x39c   : > { %v10139_v10 = vmul.f32 0.015625, %v14281_v46  ;;  %v10150_v7 = vmul.f32 0.015625, %v14285_v26  ;;  %v7313_v51 = vpop.eup %7312  ;;  %v14290_v26 = vand.u32 2147483648, %v9961_v16  ;;  %v6509_v20 = vmul.f32 0.33333334, %v7311_v27  ;;  %v14295_v25 = vld [vmem:[#allocation169_spill] sm:$0xff] }
 0x39d   : > { %v10155_v46 = vpop.permute.xlu1 %2920  ;;  %7330 = vlog2.f32 %v10135_v19  ;;  %v6563_v33 = vmul.f32 0.33333334, %v7313_v51 }
 0x39e   : > { %14286 = vst [vmem:[#allocation163_spill] sm:$0xff] %v10150_v7  ;;  %v10153_v2 = vpop.permute.xlu0 %2923  ;;  %14288 = vst [vmem:[#allocation164_spill] sm:$0xff] %v10155_v46  ;;  %3112 = vperm.xlu1 %7126, %v2247_v59   ;;  %v6367_v34 = vor.u32 %v7307_v21, %v14290_v26  ;;  %v10168_v11 = vand.u32 2147483647, %v10139_v10  ;;  %v2250_v59 = vmul.f32 %v9712_v40, %v14295_v25  ;;  %7332 = vlog2.f32 %v10147_v52  ;;  %v7315_v26 = vpop.eup %7314  ;;  %v14299_v46 = vld [vmem:[#allocation31_spill] sm:$0xff] }
 0x39f   : > { %14287 = vst [vmem:[#allocation25_spill] sm:$0xff] %v10153_v2  ;;  %3115 = vperm.xlu0 %7125, %v2248_v24   ;;  %v14291_v2 = vld [vmem:[#allocation30_spill] sm:$0xff]  ;;  %7334 = vpow2.f32 %v6527_v35  ;;  %v10187_v24 = vmul.f32 0.015625, %v14299_v46  ;;  %v6387_v21 = vsel %vm6386_vm10, %v9958_v12, %v6385_v53  ;;  %v7317_v25 = vpop.eup %7316  ;;  %v14304_v53 = vld [vmem:[#allocation33_spill] sm:$0xff]  ;;  %v6545_v52 = vmul.f32 0.33333334, %v7315_v26 }
 0x3a0   : > { %v10164_v42 = vmul.f32 0.015625, %v14291_v2  ;;  %14293 = vst [vmem:[#allocation27_spill] sm:$0xff] %v10168_v11  ;;  %v10178_v2 = vand.u32 2147483647, %v10150_v7  ;;  %7336 = vpow2.f32 %v6509_v20  ;;  %v6369_v35 = vsel %vm6368_vm8, %v9961_v16, %v6367_v34  ;;  %v7319_v51 = vpop.eup %7318  ;;  %v14307_v20 = vld [vmem:[#allocation172_spill] sm:$0xff] }
 0x3a1   : > { %v10184_v17 = vpop.permute.xlu1 %2926  ;;  %14300 = vst [vmem:[#allocation31_spill] sm:$0xff] %v10187_v24  ;;  %7338 = vlog2.f32 %v10168_v11  ;;  %v10204_v46 = vmul.f32 0.015625, %v14304_v53  ;;  %v2252_v7 = vmul.f32 %v9728_v41, %v14307_v20  ;;  %v14312_v26 = vand.u32 2147483648, %v9958_v12 }
 0x3a2   : > { %14292 = vst [vmem:[#allocation165_spill] sm:$0xff] %v10164_v42  ;;  %14296 = vst [vmem:[#allocation28_spill] sm:$0xff] %v10178_v2  ;;  %v10182_v27 = vpop.permute.xlu0 %2929  ;;  %3118 = vperm.xlu1 %7126, %v2249_v5   ;;  %7340 = vlog2.f32 %v10178_v2  ;;  %v14337_v12 = vand.u32 2147483648, %v9988_v45  ;;  %vm6397_vm10 = vcmp.eq.f32.partialorder %v10005_v4, inf  ;;  %vm6430_vm8 = vcmp.eq.f32.partialorder %v10008_v37, 0.0 }
 0x3a3   : > { %14297 = vst [vmem:[#allocation29_spill] sm:$0xff] %v10182_v27  ;;  %14298 = vst [vmem:[#allocation30_spill] sm:$0xff] %v10184_v17  ;;  %3121 = vperm.xlu0 %7125, %v2250_v59   ;;  %v10194_v27 = vand.u32 2147483647, %v10164_v42  ;;  %v14302_v17 = vld [vmem:[#allocation32_spill] sm:$0xff]  ;;  %v14306_v59 = vld [vmem:[#allocation171_spill] sm:$0xff]  ;;  %v7321_v42 = vpop.eup %7320  ;;  %7342 = vpow2.f32 %v6563_v33  ;;  %v6390_v40 = vsel %vm6388_vm11, %v14312_v26, %v6387_v21 }
 0x3a4   : > { %v10197_v55 = vmul.f32 0.015625, %v14302_v17  ;;  %14305 = vst [vmem:[#allocation33_spill] sm:$0xff] %v10204_v46  ;;  %v2251_v5 = vmul.f32 %v9725_v28, %v14306_v59  ;;  %v7323_v59 = vpop.eup %7322  ;;  %v14310_v28 = vand.u32 2147483648, %v9988_v45  ;;  %v10222_v17 = vand.u32 2147483647, %v10187_v24  ;;  %v14320_v26 = vld [vmem:[#allocation175_spill] sm:$0xff] }
 0x3a5   : > { %14301 = vst [vmem:[#allocation299_spill] sm:$0xff] %v10194_v27  ;;  %v10217_v53 = vpop.permute.xlu1 %2932  ;;  %7344 = vlog2.f32 %v10194_v27  ;;  %v10241_v21 = vand.u32 2147483647, %v10204_v46  ;;  %v14321_v27 = vld [vmem:[#allocation176_spill] sm:$0xff]  ;;  %v6599_v11 = vmul.f32 0.33333334, %v7323_v59 }
 0x3a6   : > { %14303 = vst [vmem:[#allocation32_spill] sm:$0xff] %v10197_v55  ;;  %v10215_v34 = vpop.permute.xlu0 %2935  ;;  %14309 = vst [vmem:[#allocation301_spill] sm:$0xff] %v10217_v53  ;;  %v6403_v20 = vor.u32 %v7317_v25, %v14310_v28  ;;  %3124 = vperm.xlu1 %7126, %v2251_v5   ;;  %v10231_v53 = vand.u32 2147483647, %v10197_v55  ;;  %v14314_v28 = vld [vmem:[#allocation34_spill] sm:$0xff]  ;;  %v14316_v25 = vand.u32 2147483648, %v9961_v16  ;;  %v2254_v55 = vmul.f32 %v9743_v23, %v14321_v27 }
 0x3a7   : > { %14308 = vst [vmem:[#allocation300_spill] sm:$0xff] %v10215_v34  ;;  %14311 = vst [vmem:[#allocation302_spill] sm:$0xff] %v10222_v17  ;;  %3127 = vperm.xlu0 %7125, %v2252_v7   ;;  %v7325_v34 = vpop.eup %7324  ;;  %v10234_v33 = vmul.f32 0.015625, %v14314_v28  ;;  %v14318_v7 = vld [vmem:[#allocation35_spill] sm:$0xff]  ;;  %v2253_v28 = vmul.f32 %v9741_v13, %v14320_v26  ;;  %7346 = vpow2.f32 %v6545_v52  ;;  %v6391_v26 = vsel %vm6377_vm15, nan, %v6390_v40  ;;  %v14329_v27 = vld [vmem:[#allocation182_spill] sm:$0xff] }
 0x3a8   : > { %14313 = vst [vmem:[#allocation303_spill] sm:$0xff] %v10231_v53  ;;  %v6372_v2 = vsel %vm6370_vm12, %v14316_v25, %v6369_v35  ;;  %v7327_v24 = vpop.eup %7326  ;;  %14317 = vst [vmem:[#allocation304_spill] sm:$0xff] %v10241_v21  ;;  %v10244_v5 = vmul.f32 0.015625, %v14318_v7  ;;  %7348 = vlog2.f32 %v10222_v17  ;;  %v6405_v40 = vsel %vm6404_vm14, %v9988_v45, %v6403_v20 }
 0x3a9   : > { %14315 = vst [vmem:[#allocation34_spill] sm:$0xff] %v10234_v33  ;;  %v7329_v41 = vpop.eup %7328  ;;  %v10257_v46 = vpop.permute.xlu1 %2938  ;;  %v6373_v52 = vsel %vm6359_vm13, nan, %v6372_v2  ;;  %7350 = vlog2.f32 %v10231_v53  ;;  %v10267_v35 = vand.u32 2147483647, %v10234_v33  ;;  %v2256_v17 = vmul.f32 %v14111_v63, %v14329_v27 }
 0x3aa   : > { %14319 = vst [vmem:[#allocation35_spill] sm:$0xff] %v10244_v5  ;;  %v10255_v7 = vpop.permute.xlu0 %2941  ;;  %14323 = vst [vmem:[#allocation306_spill] sm:$0xff] %v10257_v46  ;;  %v7331_v47 = vpop.eup %7330  ;;  %3130 = vperm.xlu1 %7126, %v2253_v28   ;;  %7352 = vlog2.f32 %v10241_v21  ;;  %v10277_v2 = vand.u32 2147483647, %v10244_v5  ;;  %v14331_v23 = vand.u32 2147483648, %v10002_v8  ;;  %v14332_v21 = vand.u32 2147483648, %v10008_v37 }
 0x3ab   : > { %14322 = vst [vmem:[#allocation305_spill] sm:$0xff] %v10255_v7  ;;  %3133 = vperm.xlu0 %7125, %v2254_v55   ;;  %v7333_v25 = vpop.eup %7332  ;;  %14324 = vst [vmem:[#allocation307_spill] sm:$0xff] %v10267_v35  ;;  %v14325_v7 = vld [vmem:[#allocation36_spill] sm:$0xff]  ;;  %v14328_v55 = vld [vmem:[#allocation181_spill] sm:$0xff]  ;;  %7354 = vpow2.f32 %v6599_v11  ;;  %v6581_v27 = vmul.f32 0.33333334, %v7331_v47  ;;  %v6408_v47 = vsel %vm6406_vm5, %v14337_v12, %v6405_v40  ;;  %vm6422_vm15 = vweird.f32 %v10015_v0 }
 0x3ac   : > { %v10270_v59 = vmul.f32 0.015625, %v14325_v7  ;;  %v7335_v46 = vpop.eup %7334  ;;  %14327 = vst [vmem:[#allocation308_spill] sm:$0xff] %v10277_v2  ;;  %v2255_v28 = vmul.f32 %v14109_v50, %v14328_v55  ;;  %v14330_v7 = vand.u32 2147483648, %v9995_v32  ;;  %v10289_v20 = vor.u32 %v7321_v42, %v14331_v23 }
 0x3ad   : > { %v7337_v33 = vpop.eup %7336  ;;  %v6439_v13 = vor.u32 %v7325_v34, %v14332_v21  ;;  %v10297_v55 = vpop.permute.xlu1 %2944  ;;  %v6374_v42 = vsel %vm6358_vm1, 0.0, %v6373_v52  ;;  %v14335_v34 = vand.u32 2147483648, %v10018_v3  ;;  %7356 = vlog2.f32 %v10267_v35  ;;  %v14340_v52 = vld [vmem:[#allocation185_spill] sm:$0xff] }
 0x3ae   : > { %14326 = vst [vmem:[#allocation36_spill] sm:$0xff] %v10270_v59  ;;  %v10285_v53 = vor.u32 %v7319_v51, %v14330_v7  ;;  %v10295_v50 = vpop.permute.xlu0 %2947  ;;  %14334 = vst [vmem:[#allocation310_spill] sm:$0xff] %v10297_v55  ;;  %v7339_v63 = vpop.eup %7338  ;;  %v6392_v51 = vsel %vm6376_vm0, 0.0, %v6391_v26  ;;  %3136 = vperm.xlu1 %7126, %v2255_v28   ;;  %v10310_v11 = vand.u32 2147483647, %v10270_v59  ;;  %7358 = vlog2.f32 %v10277_v2  ;;  %v14341_v28 = vld [vmem:[#allocation186_spill] sm:$0xff] }
 0x3af   : > { %14333 = vst [vmem:[#allocation309_spill] sm:$0xff] %v10295_v50  ;;  %3139 = vperm.xlu0 %7125, %v2256_v17   ;;  %v7341_v23 = vpop.eup %7340  ;;  %v10306_v21 = vor.u32 %v7327_v24, %v14335_v34  ;;  %v14338_v17 = vld [vmem:[#allocation37_spill] sm:$0xff]  ;;  %v2257_v24 = vmul.f32 %v14115_v56, %v14340_v52  ;;  %v2258_v7 = vmul.f32 %v14117_v43, %v14341_v28  ;;  %v6635_v5 = vmul.f32 0.33333334, %v7333_v25  ;;  %v14428_v59 = vld [vmem:[#allocation211_spill] sm:$0xff] }
 0x3b0   : > { %14336 = vst [vmem:[#allocation311_spill] sm:$0xff] %v10310_v11  ;;  %v7343_v16 = vpop.eup %7342  ;;  %v10318_v26 = vmul.f32 0.015625, %v14338_v17  ;;  %v10326_v50 = vsel %vm6379_vm3, inf, %v6392_v51  ;;  %v10330_v40 = vsel %vm6361_vm2, inf, %v6374_v42  ;;  %v6441_v12 = vsel %vm6440_vm6, %v10008_v37, %v6439_v13  ;;  %v14347_v51 = vld [vmem:[#allocation38_spill] sm:$0xff]  ;;  %v14426_v35 = vld [vmem:[#allocation205_spill] sm:$0xff] }
 0x3b1   : > { %v7345_v34 = vpop.eup %7344  ;;  %14342 = vst [vmem:[#allocation312_spill] sm:$0xff] %v10326_v50  ;;  %14343 = vst [vmem:[#allocation313_spill] sm:$0xff] %v10330_v40  ;;  %v10338_v17 = vpop.permute.xlu1 %2950  ;;  %v14346_v43 = vand.u32 2147483648, %v10028_v14  ;;  %7360 = vpow2.f32 %v6581_v27  ;;  %v6617_v48 = vmul.f32 0.33333334, %v7339_v63  ;;  %v10345_v60 = vmul.f32 0.015625, %v14347_v51 }
 0x3b2   : > { %14339 = vst [vmem:[#allocation37_spill] sm:$0xff] %v10318_v26  ;;  %v10336_v56 = vpop.permute.xlu0 %2953  ;;  %14345 = vst [vmem:[#allocation315_spill] sm:$0xff] %v10338_v17  ;;  %3142 = vperm.xlu1 %7126, %v2257_v24   ;;  %v7347_v42 = vpop.eup %7346  ;;  %v6671_v55 = vmul.f32 0.33333334, %v7341_v23  ;;  %7362 = vlog2.f32 %v10310_v11  ;;  %v6409_v13 = vsel %vm6395_vm4, nan, %v6408_v47  ;;  %vm6442_vm11 = vcmp.eq.f32.partialorder %v10032_v9, 0.0 }
 0x3b3   : > { %14344 = vst [vmem:[#allocation314_spill] sm:$0xff] %v10336_v56  ;;  %v10342_v25 = vor.u32 %v7329_v41, %v14346_v43  ;;  %14348 = vst [vmem:[#allocation38_spill] sm:$0xff] %v10345_v60  ;;  %3145 = vperm.xlu0 %7125, %v2258_v7   ;;  %v7349_v41 = vpop.eup %7348  ;;  %v10353_v27 = vand.u32 2147483647, %v10318_v26  ;;  %v14350_v63 = vand.u32 2147483648, %v10008_v37  ;;  %v14351_v51 = vld [vmem:[#allocation191_spill] sm:$0xff]  ;;  %7364 = vpow2.f32 %v6635_v5 }
 0x3b4   : > { %v2259_v7 = vmul.f32 %v14121_v62, %v14351_v51  ;;  %v14352_v24 = vld [vmem:[#allocation192_spill] sm:$0xff]  ;;  %v7351_v56 = vpop.eup %7350  ;;  %v14353_v17 = vand.u32 2147483648, %v10043_v18  ;;  %v14354_v47 = vand.u32 2147483648, %v10054_v58  ;;  %v6653_v26 = vmul.f32 0.33333334, %v7345_v34 }
 0x3b5   : > { %14349 = vst [vmem:[#allocation316_spill] sm:$0xff] %v10353_v27  ;;  %v6444_v43 = vsel %vm6442_vm11, %v14350_v63, %v6441_v12  ;;  %v2260_v23 = vmul.f32 %v14123_v44, %v14352_v24  ;;  %v10371_v12 = vpop.permute.xlu1 %2956  ;;  %v7353_v63 = vpop.eup %7352  ;;  %7366 = vpow2.f32 %v6617_v48  ;;  %v10374_v62 = vand.u32 2147483647, %v10345_v60  ;;  %v14358_v44 = vld [vmem:[#allocation39_spill] sm:$0xff]  ;;  %v14360_v5 = vld [vmem:[#allocation40_spill] sm:$0xff] }
 0x3b6   : > { %v10363_v28 = vor.u32 %v7335_v46, %v14353_v17  ;;  %v10367_v52 = vor.u32 %v7337_v33, %v14354_v47  ;;  %v10369_v2 = vpop.permute.xlu0 %2959  ;;  %14356 = vst [vmem:[#allocation318_spill] sm:$0xff] %v10371_v12  ;;  %v10377_v24 = vmul.f32 0.015625, %v14358_v44  ;;  %v6410_v46 = vsel %vm6394_vm7, 0.0, %v6409_v13  ;;  %3148 = vperm.xlu1 %7126, %v2259_v7   ;;  %v7355_v48 = vpop.eup %7354  ;;  %v14362_v44 = vld [vmem:[#allocation195_spill] sm:$0xff]  ;;  %v14363_v13 = vld [vmem:[#allocation196_spill] sm:$0xff] }
 0x3b7   : > { %14355 = vst [vmem:[#allocation317_spill] sm:$0xff] %v10369_v2  ;;  %14357 = vst [vmem:[#allocation319_spill] sm:$0xff] %v10374_v62  ;;  %3151 = vperm.xlu0 %7125, %v2260_v23   ;;  %7368 = vpow2.f32 %v6671_v55  ;;  %v6707_v33 = vmul.f32 0.33333334, %v7349_v41  ;;  %v10382_v34 = vmul.f32 0.015625, %v14360_v5  ;;  %v6445_v17 = vsel %vm6431_vm9, nan, %v6444_v43  ;;  %v7357_v55 = vpop.eup %7356 }
 0x3b8   : > { %14359 = vst [vmem:[#allocation39_spill] sm:$0xff] %v10377_v24  ;;  %v6689_v47 = vmul.f32 0.33333334, %v7351_v56  ;;  %7370 = vlog2.f32 %v10353_v27  ;;  %vm6433_vm12 = vcmp.eq.f32.partialorder %v10032_v9, inf  ;;  %v2261_v45 = vmul.f32 %v14127_v1, %v14362_v44  ;;  %v7359_v51 = vpop.eup %7358  ;;  %v14369_v1 = vld [vmem:[#allocation41_spill] sm:$0xff]  ;;  %v14378_v44 = vld [vmem:[#allocation43_spill] sm:$0xff] }
 0x3b9   : > { %14361 = vst [vmem:[#allocation40_spill] sm:$0xff] %v10382_v34  ;;  %v2262_v7 = vmul.f32 %v14129_v31, %v14363_v13  ;;  %v14364_v41 = vand.u32 2147483648, %v10066_v29  ;;  %v14365_v5 = vand.u32 2147483648, %v10077_v6  ;;  %7372 = vpow2.f32 %v6653_v26  ;;  %v10402_v12 = vpop.permute.xlu1 %2962  ;;  %v14413_v27 = vld [vmem:[#allocation219_spill] sm:$0xff] }
 0x3ba   : > { %v6743_v56 = vmul.f32 0.33333334, %v7353_v63  ;;  %v10400_v2 = vpop.permute.xlu0 %2965  ;;  %14367 = vst [vmem:[#allocation321_spill] sm:$0xff] %v10402_v12  ;;  %7374 = vlog2.f32 %v10374_v62  ;;  %v10406_v31 = vand.u32 2147483647, %v10377_v24  ;;  %v10409_v13 = vmul.f32 0.015625, %v14369_v1  ;;  %3154 = vperm.xlu1 %7126, %v2261_v45  }
 0x3bb   : > { %v10394_v23 = vor.u32 %v7343_v16, %v14364_v41  ;;  %v10398_v43 = vor.u32 %v7347_v42, %v14365_v5  ;;  %14366 = vst [vmem:[#allocation320_spill] sm:$0xff] %v10400_v2  ;;  %v10413_v16 = vsel %vm6397_vm10, inf, %v6410_v46  ;;  %3157 = vperm.xlu0 %7125, %v2262_v7   ;;  %7376 = vpow2.f32 %v6707_v33  ;;  %v14373_v42 = vld [vmem:[#allocation42_spill] sm:$0xff]  ;;  %v7361_v5 = vpop.eup %7360  ;;  %v14375_v2 = vld [vmem:[#allocation200_spill] sm:$0xff]  ;;  %v14376_v46 = vld [vmem:[#allocation201_spill] sm:$0xff] }
 0x3bc   : > { %14368 = vst [vmem:[#allocation322_spill] sm:$0xff] %v10406_v31  ;;  %14370 = vst [vmem:[#allocation41_spill] sm:$0xff] %v10409_v13  ;;  %v10416_v26 = vand.u32 2147483647, %v10382_v34  ;;  %v10419_v63 = vmul.f32 0.015625, %v14373_v42  ;;  %v6446_v41 = vsel %vm6430_vm8, 0.0, %v6445_v17  ;;  %7378 = vpow2.f32 %v6689_v47  ;;  %v7363_v45 = vpop.eup %7362 }
 0x3bd   : > { %14371 = vst [vmem:[#allocation323_spill] sm:$0xff] %v10413_v16  ;;  %v6725_v1 = vmul.f32 0.33333334, %v7357_v55  ;;  %v2263_v4 = vmul.f32 %v14133_v36, %v14375_v2  ;;  %v2264_v7 = vmul.f32 %v14135_v39, %v14376_v46  ;;  %v14377_v33 = vand.u32 2147483648, %v10096_v38  ;;  %v10436_v17 = vpop.permute.xlu1 %2968  ;;  %v14383_v39 = vld [vmem:[#allocation44_spill] sm:$0xff] }
 0x3be   : > { %14372 = vst [vmem:[#allocation324_spill] sm:$0xff] %v10416_v26  ;;  %14374 = vst [vmem:[#allocation42_spill] sm:$0xff] %v10419_v63  ;;  %7380 = vpow2.f32 %v6743_v56  ;;  %v6779_v42 = vmul.f32 0.33333334, %v7359_v51  ;;  %v10432_v24 = vmul.f32 0.015625, %v14378_v44  ;;  %v10434_v37 = vpop.permute.xlu0 %2971  ;;  %v10443_v47 = vmul.f32 0.015625, %v14383_v39  ;;  %v7365_v51 = vpop.eup %7364 }
 0x3bf   : > { %v10429_v12 = vor.u32 %v7355_v48, %v14377_v33  ;;  %14380 = vst [vmem:[#allocation325_spill] sm:$0xff] %v10434_v37  ;;  %14381 = vst [vmem:[#allocation326_spill] sm:$0xff] %v10436_v17  ;;  %7382 = vlog2.f32 %v10406_v31  ;;  %v10440_v36 = vand.u32 2147483647, %v10409_v13  ;;  %3163 = vperm.xlu0 %7125, %v2264_v7   ;;  %3160 = vperm.xlu1 %7126, %v2263_v4   ;;  %v10448_v48 = vand.u32 2147483647, %v10419_v63  ;;  %v10455_v33 = vpop.eup %7366 }
 0x3c0   : > { %14379 = vst [vmem:[#allocation43_spill] sm:$0xff] %v10432_v24  ;;  %14384 = vst [vmem:[#allocation44_spill] sm:$0xff] %v10443_v47  ;;  %7384 = vlog2.f32 %v10416_v26  ;;  %v14386_v44 = vld [vmem:[#allocation45_spill] sm:$0xff]  ;;  %v6423_v56 = vsel %vm6422_vm15, %v9995_v32, %v10285_v53  ;;  %v6761_v39 = vmul.f32 0.33333334, %v7363_v45  ;;  %v14387_v37 = vld [vmem:[#allocation207_spill] sm:$0xff]  ;;  %vm6476_vm5 = vweird.f32 %v10051_v15 }
 0x3c1   : > { %14382 = vst [vmem:[#allocation327_spill] sm:$0xff] %v10440_v36  ;;  %14385 = vst [vmem:[#allocation328_spill] sm:$0xff] %v10448_v48  ;;  %v10451_v55 = vmul.f32 0.015625, %v14386_v44  ;;  %7386 = vpow2.f32 %v6725_v1  ;;  %v2265_v7 = vmul.f32 %v14138_v30, %v14387_v37  ;;  %v14388_v4 = vld [vmem:[#allocation208_spill] sm:$0xff]  ;;  %v10461_v46 = vpop.eup %7368  ;;  %v10464_v2 = vand.u32 2147483647, %v10432_v24  ;;  %v10475_v45 = vpop.permute.xlu1 %2974 }
 0x3c2   : > { %v2266_v17 = vmul.f32 %v14140_v57, %v14388_v4  ;;  %14389 = vst [vmem:[#allocation45_spill] sm:$0xff] %v10461_v46  ;;  %7388 = vpow2.f32 %v6779_v42  ;;  %v14391_v44 = vld [vmem:[#allocation46_spill] sm:$0xff]  ;;  %v10471_v53 = vsel %vm6433_vm12, inf, %v6446_v41  ;;  %v10473_v1 = vpop.permute.xlu0 %2977  ;;  %14394 = vst [vmem:[#allocation331_spill] sm:$0xff] %v10475_v45  ;;  %v7371_v30 = vpop.eup %7370  ;;  %v10479_v57 = vand.u32 2147483647, %v10443_v47 }
 0x3c3   : > { %14390 = vst [vmem:[#allocation329_spill] sm:$0xff] %v10464_v2  ;;  %v10467_v31 = vmul.f32 0.015625, %v14391_v44  ;;  %14392 = vst [vmem:[#allocation46_spill] sm:$0xff] %v10471_v53  ;;  %7390 = vlog2.f32 %v10440_v36  ;;  %v14396_v42 = vld [vmem:[#allocation47_spill] sm:$0xff]  ;;  %vm6412_vm13 = vcmp.eq.f32.partialorder %v9995_v32, 0.0  ;;  %vm6424_vm14 = vcmp.eq.f32.partialorder %v10015_v0, 0.0  ;;  %3166 = vperm.xlu1 %7126, %v2265_v7   ;;  %v10486_v9 = vpop.eup %7372 }
 0x3c4   : > { %14393 = vst [vmem:[#allocation330_spill] sm:$0xff] %v10473_v1  ;;  %14395 = vst [vmem:[#allocation332_spill] sm:$0xff] %v10479_v57  ;;  %v10482_v4 = vmul.f32 0.015625, %v14396_v42  ;;  %3169 = vperm.xlu0 %7125, %v2266_v17   ;;  %7392 = vlog2.f32 %v10448_v48  ;;  %v10490_v41 = vand.u32 2147483647, %v10451_v55  ;;  %vm6413_vm0 = vcmp.lt.f32.partialorder %v9995_v32, 0.0  ;;  %v7375_v42 = vpop.eup %7374 }
 0x3c5   : > { %v14398_v44 = vand.u32 2147483648, %v9995_v32  ;;  %7394 = vpow2.f32 %v6761_v39  ;;  %v14399_v45 = vld [vmem:[#allocation48_spill] sm:$0xff]  ;;  %v14400_v36 = vld [vmem:[#allocation213_spill] sm:$0xff]  ;;  %v14401_v7 = vld [vmem:[#allocation214_spill] sm:$0xff]  ;;  %v10502_v47 = vpop.eup %7376  ;;  %v14403_v48 = vand.u32 2147483648, %v10112_v54  ;;  %vm6415_vm1 = vcmp.eq.f32.partialorder %v10015_v0, inf }
 0x3c6   : > { %14397 = vst [vmem:[#allocation47_spill] sm:$0xff] %v10482_v4  ;;  %v10496_v37 = vmul.f32 0.015625, %v14399_v45  ;;  %v2267_v17 = vmul.f32 %v14143_v22, %v14400_v36  ;;  %v2268_v24 = vmul.f32 %v9272_v49, %v14401_v7  ;;  %14402 = vst [vmem:[#allocation48_spill] sm:$0xff] %v10502_v47  ;;  %7396 = vlog2.f32 %v10464_v2  ;;  %v14404_v39 = vld [vmem:[#allocation49_spill] sm:$0xff]  ;;  %v10516_v22 = vpop.permute.xlu0 %2983  ;;  %v10520_v49 = vpop.eup %7378 }
 0x3c7   : > { %v6426_v1 = vsel %vm6424_vm14, %v14398_v44, %v6423_v56  ;;  %v10506_v13 = vor.u32 %v7361_v5, %v14403_v48  ;;  %v10510_v56 = vand.u32 2147483647, %v10467_v31  ;;  %v10513_v45 = vmul.f32 0.015625, %v14404_v39  ;;  %14405 = vst [vmem:[#allocation49_spill] sm:$0xff] %v10516_v22  ;;  %v10518_v44 = vpop.permute.xlu1 %2980  ;;  %v14408_v48 = vld [vmem:[#allocation50_spill] sm:$0xff]  ;;  %v14425_v47 = vld [vmem:[#allocation225_spill] sm:$0xff] }
 0x3c8   : > { %14406 = vst [vmem:[#allocation333_spill] sm:$0xff] %v10518_v44  ;;  %7398 = vlog2.f32 %v10479_v57  ;;  %v10524_v5 = vand.u32 2147483647, %v10482_v4  ;;  %v10527_v7 = vmul.f32 0.015625, %v14408_v48  ;;  %3175 = vperm.xlu0 %7125, %v2268_v24   ;;  %3172 = vperm.xlu1 %7126, %v2267_v17   ;;  %v10530_v39 = vpop.eup %7380  ;;  %v6815_v36 = vmul.f32 0.33333334, %v7371_v30 }
 0x3c9   : > { %14409 = vst [vmem:[#allocation50_spill] sm:$0xff] %v10530_v39  ;;  %7400 = vlog2.f32 %v10490_v41  ;;  %v6427_v22 = vsel %vm6413_vm0, nan, %v6426_v1  ;;  %v6477_v44 = vsel %vm6476_vm5, %v10028_v14, %v10342_v25  ;;  %v7383_v2 = vpop.eup %7382  ;;  %v10538_v57 = vand.u32 2147483647, %v10496_v37  ;;  %v14410_v48 = vld [vmem:[#allocation51_spill] sm:$0xff]  ;;  %v14411_v24 = vld [vmem:[#allocation218_spill] sm:$0xff] }
 0x3ca   : > { %14407 = vst [vmem:[#allocation334_spill] sm:$0xff] %v10524_v5  ;;  %v10541_v63 = vmul.f32 0.015625, %v14410_v48  ;;  %v14412_v17 = vld [vmem:[#allocation184_spill] sm:$0xff]  ;;  %v14414_v30 = vld [vmem:[#allocation190_spill] sm:$0xff]  ;;  %v7385_v62 = vpop.eup %7384  ;;  %v14415_v39 = vand.u32 2147483648, %v10124_v61  ;;  %7402 = vlog2.f32 %v10510_v56  ;;  %vm6466_vm3 = vcmp.eq.f32.partialorder %v10028_v14, 0.0  ;;  %v10556_v48 = vpop.permute.xlu0 %2989 }
 0x3cb   : > { %v2269_v26 = vmul.f32 %v14412_v17, %v14411_v24  ;;  %v2270_v34 = vmul.f32 %v14414_v30, %v14413_v27  ;;  %v10553_v25 = vand.u32 2147483647, %v10513_v45  ;;  %14417 = vst [vmem:[#allocation184_spill] sm:$0xff] %v10556_v48  ;;  %v10558_v11 = vpop.permute.xlu1 %2986  ;;  %v10560_v17 = vpop.eup %7386  ;;  %7404 = vlog2.f32 %v10524_v5 }
 0x3cc   : > { %v10549_v1 = vor.u32 %v7365_v51, %v14415_v39  ;;  %14418 = vst [vmem:[#allocation190_spill] sm:$0xff] %v10558_v11  ;;  %14419 = vst [vmem:[#allocation335_spill] sm:$0xff] %v10560_v17  ;;  %v10564_v30 = vand.u32 2147483647, %v10527_v7  ;;  %v14421_v51 = vld [vmem:[#allocation52_spill] sm:$0xff]  ;;  %vm6478_vm2 = vcmp.eq.f32.partialorder %v10051_v15, 0.0  ;;  %v10570_v27 = vpop.eup %7388  ;;  %7406 = vpow2.f32 %v6815_v36 }
 0x3cd   : > { %14416 = vst [vmem:[#allocation51_spill] sm:$0xff] %v10553_v25  ;;  %v10567_v39 = vmul.f32 0.015625, %v14421_v51  ;;  %3181 = vperm.xlu0 %7125, %v2270_v34   ;;  %3178 = vperm.xlu1 %7126, %v2269_v26   ;;  %14422 = vst [vmem:[#allocation52_spill] sm:$0xff] %v10570_v27  ;;  %v6797_v48 = vmul.f32 0.33333334, %v7375_v42  ;;  %v6428_v11 = vsel %vm6412_vm13, 0.0, %v6427_v22  ;;  %v7391_v60 = vpop.eup %7390  ;;  %7408 = vlog2.f32 %v10538_v57 }
 0x3ce   : > { %14420 = vst [vmem:[#allocation336_spill] sm:$0xff] %v10564_v30  ;;  %v14423_v24 = vand.u32 2147483648, %v10028_v14  ;;  %v10578_v51 = vand.u32 2147483647, %v10541_v63  ;;  %v2271_v34 = vmul.f32 %v14426_v35, %v14425_v47  ;;  %v14427_v26 = vld [vmem:[#allocation226_spill] sm:$0xff]  ;;  %v7393_v36 = vpop.eup %7392  ;;  %v14429_v42 = vand.u32 2147483648, %v10139_v10 }
 0x3cf   : > { %v2272_v27 = vmul.f32 %v14428_v59, %v14427_v26  ;;  %v6851_v22 = vmul.f32 0.33333334, %v7383_v2  ;;  %7410 = vlog2.f32 %v10553_v25  ;;  %vm6467_vm6 = vcmp.lt.f32.partialorder %v10028_v14, 0.0  ;;  %v10595_v17 = vpop.eup %7394  ;;  %v14437_v25 = vld [vmem:[#allocation198_spill] sm:$0xff]  ;;  %v14443_v14 = vld [vmem:[#allocation241_spill] sm:$0xff] }
 0x3d0   : > { %v6480_v5 = vsel %vm6478_vm2, %v14423_v24, %v6477_v44  ;;  %14424 = vst [vmem:[#allocation337_spill] sm:$0xff] %v10578_v51  ;;  %v10587_v32 = vor.u32 %v10455_v33, %v14429_v42  ;;  %v10591_v44 = vpop.permute.xlu0 %2995  ;;  %v10593_v24 = vpop.permute.xlu1 %2992  ;;  %14432 = vst [vmem:[#allocation226_spill] sm:$0xff] %v10595_v17  ;;  %7412 = vlog2.f32 %v10564_v30  ;;  %v10599_v35 = vand.u32 2147483647, %v10567_v39  ;;  %v14439_v30 = vld [vmem:[#allocation217_spill] sm:$0xff] }
 0x3d1   : > { %14430 = vst [vmem:[#allocation225_spill] sm:$0xff] %v10591_v44  ;;  %14431 = vst [vmem:[#allocation205_spill] sm:$0xff] %v10593_v24  ;;  %v10603_v59 = vsel %vm6415_vm1, inf, %v6428_v11  ;;  %vm6469_vm4 = vcmp.eq.f32.partialorder %v10051_v15, inf  ;;  %3187 = vperm.xlu0 %7125, %v2272_v27   ;;  %3184 = vperm.xlu1 %7126, %v2271_v34   ;;  %v7397_v2 = vpop.eup %7396  ;;  %7414 = vpow2.f32 %v6797_v48  ;;  %v6833_v47 = vmul.f32 0.33333334, %v7385_v62 }
 0x3d2   : > { %14433 = vst [vmem:[#allocation211_spill] sm:$0xff] %v10599_v35  ;;  %14434 = vst [vmem:[#allocation338_spill] sm:$0xff] %v10603_v59  ;;  %v6481_v26 = vsel %vm6467_vm6, nan, %v6480_v5  ;;  %v7399_v42 = vpop.eup %7398  ;;  %7416 = vlog2.f32 %v10578_v51  ;;  %v14435_v44 = vld [vmem:[#allocation16_spill] sm:$0xff]  ;;  %v14436_v24 = vld [vmem:[#allocation234_spill] sm:$0xff]  ;;  %vm6448_vm9 = vcmp.eq.f32.partialorder %v10002_v8, 0.0 }
 0x3d3   : > { %vm6458_vm7 = vweird.f32 %v14435_v44  ;;  %v2273_v0 = vmul.f32 %v14437_v25, %v14436_v24  ;;  %v14438_v11 = vld [vmem:[#allocation235_spill] sm:$0xff]  ;;  %v7401_v46 = vpop.eup %7400  ;;  %7418 = vpow2.f32 %v6851_v22  ;;  %v6887_v27 = vmul.f32 0.33333334, %v7391_v60 }
 0x3d4   : > { %v2274_v17 = vmul.f32 %v14439_v30, %v14438_v11  ;;  %v6459_v62 = vsel %vm6458_vm7, %v10002_v8, %v10289_v20  ;;  %v10616_v5 = vpop.permute.xlu0 %3001  ;;  %v10618_v34 = vpop.permute.xlu1 %2998  ;;  %v6869_v33 = vmul.f32 0.33333334, %v7393_v36  ;;  %7420 = vlog2.f32 %v10599_v35  ;;  %v14476_v35 = vld [vmem:[#allocation18_spill] sm:$0xff] }
 0x3d5   : > { %14440 = vst [vmem:[#allocation16_spill] sm:$0xff] %v10616_v5  ;;  %14441 = vst [vmem:[#allocation234_spill] sm:$0xff] %v10618_v34  ;;  %v6482_v25 = vsel %vm6466_vm3, 0.0, %v6481_v26  ;;  %vm6449_vm10 = vcmp.lt.f32.partialorder %v10002_v8, 0.0  ;;  %3190 = vperm.xlu1 %7126, %v2273_v0   ;;  %v7403_v60 = vpop.eup %7402  ;;  %7422 = vpow2.f32 %v6833_v47  ;;  %v6923_v30 = vmul.f32 0.33333334, %v7397_v2 }
 0x3d6   : > { %3193 = vperm.xlu0 %7125, %v2274_v17   ;;  %vm6460_vm8 = vcmp.eq.f32.partialorder %v14435_v44, 0.0  ;;  %v7405_v22 = vpop.eup %7404  ;;  %v6905_v36 = vmul.f32 0.33333334, %v7399_v42  ;;  %v14442_v24 = vand.u32 2147483648, %v10002_v8  ;;  %v14444_v26 = vld [vmem:[#allocation203_spill] sm:$0xff]  ;;  %v14445_v5 = vld [vmem:[#allocation242_spill] sm:$0xff]  ;;  %7424 = vpow2.f32 %v6887_v27 }
 0x3d7   : > { %v2275_v48 = vmul.f32 %v14444_v26, %v14443_v14  ;;  %v14446_v34 = vld [vmem:[#allocation74_spill] sm:$0xff]  ;;  %v10633_v17 = vpop.eup %7406  ;;  %v6959_v47 = vmul.f32 0.33333334, %v7401_v46  ;;  %v10638_v0 = vsel %vm6469_vm4, inf, %v6482_v25  ;;  %7426 = vpow2.f32 %v6869_v33  ;;  %v14450_v33 = vld [vmem:[#allocation157_spill] sm:$0xff] }
 0x3d8   : > { %v6462_v11 = vsel %vm6460_vm8, %v14442_v24, %v6459_v62  ;;  %v2276_v51 = vmul.f32 %v14446_v34, %v14445_v5  ;;  %14447 = vst [vmem:[#allocation198_spill] sm:$0xff] %v10638_v0  ;;  %v10640_v42 = vpop.permute.xlu0 %3007  ;;  %v10642_v20 = vpop.permute.xlu1 %3004  ;;  %v6941_v24 = vmul.f32 0.33333334, %v7403_v60  ;;  %7428 = vpow2.f32 %v6923_v30  ;;  %v14451_v60 = vld [vmem:[#allocation245_spill] sm:$0xff]  ;;  %v14453_v5 = vld [vmem:[#allocation246_spill] sm:$0xff] }
 0x3d9   : > { %14448 = vst [vmem:[#allocation235_spill] sm:$0xff] %v10640_v42  ;;  %14449 = vst [vmem:[#allocation217_spill] sm:$0xff] %v10642_v20  ;;  %v7409_v62 = vpop.eup %7408  ;;  %3196 = vperm.xlu1 %7126, %v2275_v48   ;;  %v6995_v27 = vmul.f32 0.33333334, %v7405_v22  ;;  %v6463_v34 = vsel %vm6449_vm10, nan, %v6462_v11  ;;  %7430 = vpow2.f32 %v6905_v36  ;;  %vm6451_vm11 = vcmp.eq.f32.partialorder %v14435_v44, inf }
 0x3da   : > { %3199 = vperm.xlu0 %7125, %v2276_v51   ;;  %v7411_v46 = vpop.eup %7410  ;;  %vm6512_vm12 = vweird.f32 %v14450_v33  ;;  %v14452_v26 = vld [vmem:[#allocation209_spill] sm:$0xff]  ;;  %v14454_v51 = vld [vmem:[#allocation76_spill] sm:$0xff]  ;;  %7432 = vpow2.f32 %v6959_v47  ;;  %v6977_v30 = vmul.f32 0.33333334, %v7409_v62  ;;  %vm6502_vm15 = vcmp.eq.f32.partialorder %v10054_v58, 0.0 }
 0x3db   : > { %v7413_v25 = vpop.eup %7412  ;;  %v2277_v14 = vmul.f32 %v14452_v26, %v14451_v60  ;;  %v2278_v48 = vmul.f32 %v14454_v51, %v14453_v5  ;;  %v6513_v11 = vsel %vm6512_vm12, %v10054_v58, %v10367_v52  ;;  %7434 = vpow2.f32 %v6941_v24  ;;  %v14457_v60 = vld [vmem:[#allocation53_spill] sm:$0xff]  ;;  %v14458_v5 = vld [vmem:[#allocation54_spill] sm:$0xff] }
 0x3dc   : > { %v10655_v2 = vpop.eup %7414  ;;  %v10660_v36 = vpop.permute.xlu0 %3013  ;;  %v7031_v20 = vmul.f32 0.33333334, %v7411_v46  ;;  %v10666_v26 = vmul.f32 %v10326_v50, %v14457_v60  ;;  %v10670_v47 = vmul.f32 %v10330_v40, %v14458_v5  ;;  %7436 = vpow2.f32 %v6995_v27  ;;  %v14460_v22 = vld [vmem:[#allocation17_spill] sm:$0xff] }
 0x3dd   : > { %14455 = vst [vmem:[#allocation241_spill] sm:$0xff] %v10660_v36  ;;  %v10662_v15 = vpop.permute.xlu1 %3010  ;;  %v7417_v42 = vpop.eup %7416  ;;  %3202 = vperm.xlu1 %7126, %v2277_v14   ;;  %v7013_v62 = vmul.f32 0.33333334, %v7413_v25  ;;  %v6464_v24 = vsel %vm6448_vm9, 0.0, %v6463_v34  ;;  %vm6514_vm13 = vcmp.eq.f32.partialorder %v14450_v33, 0.0  ;;  %v14459_v51 = vand.u32 2147483648, %v10054_v58 }
 0x3de   : > { %14456 = vst [vmem:[#allocation203_spill] sm:$0xff] %v10662_v15  ;;  %3205 = vperm.xlu0 %7125, %v2278_v48   ;;  %v10673_v52 = vpop.eup %7418  ;;  %vm6494_vm14 = vweird.f32 %v14460_v22  ;;  %v14461_v5 = vld [vmem:[#allocation249_spill] sm:$0xff]  ;;  %v14462_v36 = vld [vmem:[#allocation216_spill] sm:$0xff]  ;;  %v14463_v48 = vld [vmem:[#allocation250_spill] sm:$0xff]  ;;  %7438 = vpow2.f32 %v6977_v30  ;;  %v7067_v27 = vmul.f32 0.33333334, %v7417_v42  ;;  %vm6530_vm6 = vweird.f32 %v14476_v35 }
 0x3df   : > { %v7421_v46 = vpop.eup %7420  ;;  %v6516_v60 = vsel %vm6514_vm13, %v14459_v51, %v6513_v11  ;;  %v2279_v15 = vmul.f32 %v14462_v36, %v14461_v5  ;;  %v14464_v14 = vld [vmem:[#allocation243_spill] sm:$0xff]  ;;  %v6495_v8 = vsel %vm6494_vm14, %v10018_v3, %v10306_v21  ;;  %7440 = vpow2.f32 %v7031_v20 }
 0x3e0   : > { %v2280_v50 = vmul.f32 %v14464_v14, %v14463_v48  ;;  %v10685_v40 = vpop.eup %7422  ;;  %v14465_v34 = vld [vmem:[#allocation159_spill] sm:$0xff]  ;;  %v10690_v25 = vpop.permute.xlu0 %3019  ;;  %vm6503_vm1 = vcmp.lt.f32.partialorder %v10054_v58, 0.0  ;;  %vm6505_vm5 = vcmp.eq.f32.partialorder %v14450_v33, inf  ;;  %7442 = vpow2.f32 %v7013_v62  ;;  %v14469_v48 = vld [vmem:[#allocation252_spill] sm:$0xff] }
 0x3e1   : > { %vm6548_vm0 = vweird.f32 %v14465_v34  ;;  %14466 = vst [vmem:[#allocation242_spill] sm:$0xff] %v10690_v25  ;;  %v10692_v11 = vpop.permute.xlu1 %3016  ;;  %3208 = vperm.xlu1 %7126, %v2279_v15   ;;  %v10698_v42 = vpop.eup %7424  ;;  %v7049_v21 = vmul.f32 0.33333334, %v7421_v46  ;;  %v6517_v30 = vsel %vm6503_vm1, nan, %v6516_v60  ;;  %vm6496_vm3 = vcmp.eq.f32.partialorder %v14460_v22, 0.0  ;;  %v14470_v14 = vld [vmem:[#allocation220_spill] sm:$0xff] }
 0x3e2   : > { %14467 = vst [vmem:[#allocation74_spill] sm:$0xff] %v10692_v11  ;;  %v6549_v36 = vsel %vm6548_vm0, %v10077_v6, %v10398_v43  ;;  %3211 = vperm.xlu0 %7125, %v2280_v50   ;;  %v10701_v51 = vpop.eup %7426  ;;  %v14468_v20 = vand.u32 2147483648, %v10018_v3  ;;  %vm6550_vm2 = vcmp.eq.f32.partialorder %v14465_v34, 0.0  ;;  %v2281_v25 = vmul.f32 %v14470_v14, %v14469_v48  ;;  %v14471_v43 = vld [vmem:[#allocation253_spill] sm:$0xff]  ;;  %v14472_v50 = vld [vmem:[#allocation272_spill] sm:$0xff]  ;;  %v14479_v14 = vld [vmem:[#allocation55_spill] sm:$0xff] }
 0x3e3   : > { %v2282_v15 = vmul.f32 %v14472_v50, %v14471_v43  ;;  %v10710_v11 = vpop.eup %7428  ;;  %7444 = vpow2.f32 %v7067_v27  ;;  %v10714_v62 = vsel %vm6451_vm11, inf, %v6464_v24  ;;  %v14475_v46 = vand.u32 2147483648, %v10077_v6  ;;  %v14480_v27 = vld [vmem:[#allocation56_spill] sm:$0xff] }
 0x3e4   : > { %v6498_v5 = vsel %vm6496_vm3, %v14468_v20, %v6495_v8  ;;  %14473 = vst [vmem:[#allocation157_spill] sm:$0xff] %v10710_v11  ;;  %14474 = vst [vmem:[#allocation245_spill] sm:$0xff] %v10714_v62  ;;  %v10719_v8 = vpop.permute.xlu0 %3025  ;;  %v10723_v48 = vpop.eup %7430  ;;  %v10727_v43 = vmul.f32 %v10413_v16, %v14479_v14  ;;  %v10731_v44 = vmul.f32 %v10471_v53, %v14480_v27  ;;  %vm6485_vm4 = vcmp.lt.f32.partialorder %v10018_v3, 0.0  ;;  %v14481_v27 = vld [vmem:[#allocation170_spill] sm:$0xff]  ;;  %v14483_v16 = vld [vmem:[#allocation255_spill] sm:$0xff] }
 0x3e5   : > { %v6552_v60 = vsel %vm6550_vm2, %v14475_v46, %v6549_v36  ;;  %14477 = vst [vmem:[#allocation209_spill] sm:$0xff] %v10719_v8  ;;  %v10721_v20 = vpop.permute.xlu1 %3022  ;;  %v6531_v24 = vsel %vm6530_vm6, %v10043_v18, %v10363_v28  ;;  %3214 = vperm.xlu1 %7126, %v2281_v25   ;;  %v7433_v36 = vpop.eup %7432  ;;  %7446 = vpow2.f32 %v7049_v21  ;;  %v6518_v50 = vsel %vm6502_vm15, 0.0, %v6517_v30  ;;  %v14484_v11 = vld [vmem:[#allocation273_spill] sm:$0xff] }
 0x3e6   : > { %14478 = vst [vmem:[#allocation246_spill] sm:$0xff] %v10721_v20  ;;  %3217 = vperm.xlu0 %7125, %v2282_v15   ;;  %v6499_v46 = vsel %vm6485_vm4, nan, %v6498_v5  ;;  %vm6539_vm7 = vcmp.lt.f32.partialorder %v10077_v6, 0.0  ;;  %v7435_v14 = vpop.eup %7434  ;;  %vm6532_vm9 = vcmp.eq.f32.partialorder %v14476_v35, 0.0  ;;  %v14482_v20 = vld [vmem:[#allocation79_spill] sm:$0xff]  ;;  %v2284_v28 = vmul.f32 %v14484_v11, %v14483_v16  ;;  %v14485_v25 = vld [vmem:[#allocation57_spill] sm:$0xff] }
 0x3e7   : > { %v6553_v8 = vsel %vm6539_vm7, nan, %v6552_v60  ;;  %v2283_v53 = vmul.f32 %v14482_v20, %v14481_v27  ;;  %v7437_v15 = vpop.eup %7436  ;;  %v10746_v21 = vmul.f32 %v10603_v59, %v14485_v25  ;;  %vm6484_vm10 = vcmp.eq.f32.partialorder %v10018_v3, 0.0  ;;  %v14489_v20 = vld [vmem:[#allocation58_spill] sm:$0xff]  ;;  %v14491_v25 = vld [vmem:[#allocation59_spill] sm:$0xff] }
 0x3e8   : > { %vm6487_vm8 = vcmp.eq.f32.partialorder %v14460_v22, inf  ;;  %v14486_v58 = vand.u32 2147483648, %v10043_v18  ;;  %v10752_v5 = vpop.permute.xlu0 %3031  ;;  %v10758_v27 = vmul.f32 %v10638_v0, %v14489_v20  ;;  %v10762_v16 = vsel %vm6505_vm5, inf, %v6518_v50  ;;  %v7439_v3 = vpop.eup %7438 }
 0x3e9   : > { %14487 = vst [vmem:[#allocation76_spill] sm:$0xff] %v10752_v5  ;;  %v10754_v60 = vpop.permute.xlu1 %3028  ;;  %14490 = vst [vmem:[#allocation54_spill] sm:$0xff] %v10762_v16  ;;  %v6500_v11 = vsel %vm6484_vm10, 0.0, %v6499_v46  ;;  %vm6538_vm11 = vcmp.eq.f32.partialorder %v10077_v6, 0.0  ;;  %3220 = vperm.xlu1 %7126, %v2283_v53   ;;  %vm6521_vm12 = vcmp.lt.f32.partialorder %v10043_v18, 0.0  ;;  %v7441_v33 = vpop.eup %7440  ;;  %vm6584_vm15 = vweird.f32 %v10135_v19  ;;  %v14493_v46 = vld [vmem:[#allocation257_spill] sm:$0xff] }
 0x3ea   : > { %v6534_v30 = vsel %vm6532_vm9, %v14486_v58, %v6531_v24  ;;  %14488 = vst [vmem:[#allocation53_spill] sm:$0xff] %v10754_v60  ;;  %3223 = vperm.xlu0 %7125, %v2284_v28   ;;  %v10767_v24 = vmul.f32 %v10714_v62, %v14491_v25  ;;  %v14492_v58 = vld [vmem:[#allocation60_spill] sm:$0xff]  ;;  %v6554_v20 = vsel %vm6538_vm11, 0.0, %v6553_v8  ;;  %v14494_v6 = vld [vmem:[#allocation229_spill] sm:$0xff]  ;;  %v14495_v53 = vld [vmem:[#allocation258_spill] sm:$0xff]  ;;  %v7443_v59 = vpop.eup %7442  ;;  %v14497_v25 = vand.u32 2147483648, %v10451_v55 }
 0x3eb   : > { %v10771_v5 = vmul.f32 %v10762_v16, %v14492_v58  ;;  %v6535_v50 = vsel %vm6521_vm12, nan, %v6534_v30  ;;  %v2285_v28 = vmul.f32 %v14494_v6, %v14493_v46  ;;  %v14496_v60 = vld [vmem:[#allocation232_spill] sm:$0xff]  ;;  %v14498_v58 = vand.u32 2147483648, %v10467_v31 }
 0x3ec   : > { %v2286_v0 = vmul.f32 %v14496_v60, %v14495_v53  ;;  %v10781_v62 = vor.u32 %v7433_v36, %v14497_v25  ;;  %v10789_v30 = vsel %vm6487_vm8, inf, %v6500_v11  ;;  %v6585_v16 = vsel %vm6584_vm15, %v10112_v54, %v10506_v13  ;;  %v10793_v46 = vpop.permute.xlu0 %3037  ;;  %v14503_v36 = vld [vmem:[#allocation61_spill] sm:$0xff] }
 0x3ed   : > { %v10785_v8 = vor.u32 %v7435_v14, %v14498_v58  ;;  %14499 = vst [vmem:[#allocation17_spill] sm:$0xff] %v10789_v30  ;;  %14500 = vst [vmem:[#allocation249_spill] sm:$0xff] %v10793_v46  ;;  %v10795_v6 = vpop.permute.xlu1 %3034  ;;  %v14502_v60 = vand.u32 2147483648, %v10482_v4  ;;  %v10803_v25 = vmul.f32 %v10789_v30, %v14503_v36  ;;  %vm6541_vm13 = vcmp.eq.f32.partialorder %v14465_v34, inf  ;;  %3226 = vperm.xlu1 %7126, %v2285_v28   ;;  %v7445_v22 = vpop.eup %7444  ;;  %v14507_v36 = vld [vmem:[#allocation20_spill] sm:$0xff]  ;;  %v14508_v34 = vld [vmem:[#allocation178_spill] sm:$0xff] }
 0x3ee   : > { %14501 = vst [vmem:[#allocation216_spill] sm:$0xff] %v10795_v6  ;;  %vm6520_vm14 = vcmp.eq.f32.partialorder %v10043_v18, 0.0  ;;  %3229 = vperm.xlu0 %7125, %v2286_v0   ;;  %v14504_v13 = vand.u32 2147483648, %v10496_v37  ;;  %v10811_v11 = vsel %vm6541_vm13, inf, %v6554_v20  ;;  %vm6586_vm0 = vcmp.eq.f32.partialorder %v10135_v19, 0.0  ;;  %v14509_v46 = vld [vmem:[#allocation82_spill] sm:$0xff] }
 0x3ef   : > { %v10799_v53 = vor.u32 %v7437_v15, %v14502_v60  ;;  %14505 = vst [vmem:[#allocation250_spill] sm:$0xff] %v10811_v11  ;;  %v6536_v58 = vsel %vm6520_vm14, 0.0, %v6535_v50  ;;  %v14506_v15 = vand.u32 2147483648, %v10112_v54  ;;  %vm6566_vm1 = vweird.f32 %v14507_v36  ;;  %v14510_v0 = vld [vmem:[#allocation260_spill] sm:$0xff]  ;;  %v14511_v28 = vld [vmem:[#allocation173_spill] sm:$0xff]  ;;  %v7447_v30 = vpop.eup %7446  ;;  %v14514_v4 = vld [vmem:[#allocation62_spill] sm:$0xff] }
 0x3f0   : > { %v10809_v14 = vor.u32 %v7439_v3, %v14504_v13  ;;  %v2287_v18 = vmul.f32 %v14509_v46, %v14508_v34  ;;  %v2288_v6 = vmul.f32 %v14511_v28, %v14510_v0  ;;  %v14512_v3 = vand.u32 2147483648, %v10513_v45  ;;  %v10835_v46 = vpop.permute.xlu0 %3043 }
 0x3f1   : > { %v6588_v60 = vsel %vm6586_vm0, %v14506_v15, %v6585_v16  ;;  %v14513_v20 = vand.u32 2147483648, %v10527_v7  ;;  %v10831_v16 = vmul.f32 %v10811_v11, %v14514_v4  ;;  %v6567_v15 = vsel %vm6566_vm1, %v10066_v29, %v10394_v23  ;;  %14515 = vst [vmem:[#allocation243_spill] sm:$0xff] %v10835_v46  ;;  %v10837_v34 = vpop.permute.xlu1 %3040  ;;  %v14519_v23 = vld [vmem:[#allocation27_spill] sm:$0xff]  ;;  %v14523_v46 = vld [vmem:[#allocation262_spill] sm:$0xff] }
 0x3f2   : > { %v10823_v13 = vor.u32 %v7441_v33, %v14512_v3  ;;  %14516 = vst [vmem:[#allocation159_spill] sm:$0xff] %v10837_v34  ;;  %v14517_v28 = vand.u32 2147483648, %v10541_v63  ;;  %vm6523_vm5 = vcmp.eq.f32.partialorder %v14476_v35, inf  ;;  %vm6574_vm3 = vcmp.eq.f32.partialorder %v10112_v54, 0.0  ;;  %3235 = vperm.xlu0 %7125, %v2288_v6   ;;  %3232 = vperm.xlu1 %7126, %v2287_v18   ;;  %v14521_v35 = vld [vmem:[#allocation261_spill] sm:$0xff]  ;;  %v14524_v34 = vld [vmem:[#allocation236_spill] sm:$0xff] }
 0x3f3   : > { %v10827_v50 = vor.u32 %v7443_v59, %v14513_v20  ;;  %vm6575_vm2 = vcmp.lt.f32.partialorder %v10112_v54, 0.0  ;;  %v10846_v4 = vsel %vm6523_vm5, inf, %v6536_v58  ;;  %vm6568_vm6 = vcmp.eq.f32.partialorder %v14507_v36, 0.0  ;;  %v14522_v20 = vld [vmem:[#allocation238_spill] sm:$0xff] }
 0x3f4   : > { %v10841_v0 = vor.u32 %v7445_v22, %v14517_v28  ;;  %14518 = vst [vmem:[#allocation252_spill] sm:$0xff] %v10846_v4  ;;  %v6589_v59 = vsel %vm6575_vm2, nan, %v6588_v60  ;;  %vm6620_vm4 = vweird.f32 %v14519_v23  ;;  %v14520_v33 = vand.u32 2147483648, %v10066_v29  ;;  %v14526_v60 = vld [vmem:[#allocation63_spill] sm:$0xff] }
 0x3f5   : > { %v6621_v22 = vsel %vm6620_vm4, %v10139_v10, %v10587_v32  ;;  %v2289_v28 = vmul.f32 %v14522_v20, %v14521_v35  ;;  %v2290_v6 = vmul.f32 %v14524_v34, %v14523_v46  ;;  %v14525_v58 = vand.u32 2147483648, %v10567_v39  ;;  %v10870_v32 = vpop.permute.xlu1 %3046  ;;  %v14534_v35 = vld [vmem:[#allocation266_spill] sm:$0xff] }
 0x3f6   : > { %v6570_v3 = vsel %vm6568_vm6, %v14520_v33, %v6567_v15  ;;  %v10864_v11 = vmul.f32 %v10846_v4, %v14526_v60  ;;  %vm6577_vm7 = vcmp.eq.f32.partialorder %v10135_v19, inf  ;;  %v14527_v15 = vld [vmem:[#allocation160_spill] sm:$0xff]  ;;  %v10868_v33 = vpop.permute.xlu0 %3049  ;;  %14529 = vst [vmem:[#allocation253_spill] sm:$0xff] %v10870_v32  ;;  %v6590_v20 = vsel %vm6574_vm3, 0.0, %v6589_v59 }
 0x3f7   : > { %v10860_v18 = vor.u32 %v7447_v30, %v14525_v58  ;;  %vm6602_vm9 = vweird.f32 %v14527_v15  ;;  %14528 = vst [vmem:[#allocation220_spill] sm:$0xff] %v10868_v33  ;;  %vm6557_vm10 = vcmp.lt.f32.partialorder %v10066_v29, 0.0  ;;  %vm6622_vm8 = vcmp.eq.f32.partialorder %v14519_v23, 0.0  ;;  %3241 = vperm.xlu0 %7125, %v2290_v6   ;;  %3238 = vperm.xlu1 %7126, %v2289_v28   ;;  %v14531_v33 = vld [vmem:[#allocation162_spill] sm:$0xff]  ;;  %v14532_v59 = vld [vmem:[#allocation180_spill] sm:$0xff] }
 0x3f8   : > { %v6603_v30 = vsel %vm6602_vm9, %v10096_v38, %v10429_v12  ;;  %v6571_v34 = vsel %vm6557_vm10, nan, %v6570_v3  ;;  %v14530_v58 = vand.u32 2147483648, %v10139_v10  ;;  %vm6604_vm11 = vcmp.eq.f32.partialorder %v14527_v15, 0.0  ;;  %v14533_v32 = vld [vmem:[#allocation264_spill] sm:$0xff] }
 0x3f9   : > { %vm6638_vm12 = vweird.f32 %v14531_v33  ;;  %vm6944_vm15 = vweird.f32 %v10510_v56  ;;  %v2291_v46 = vmul.f32 %v14533_v32, %v14532_v59  ;;  %v14535_v12 = vld [vmem:[#allocation228_spill] sm:$0xff]  ;;  %vm6556_vm13 = vcmp.eq.f32.partialorder %v10066_v29, 0.0 }
 0x3fa   : > { %v6624_v60 = vsel %vm6622_vm8, %v14530_v58, %v6621_v22  ;;  %v6639_v54 = vsel %vm6638_vm12, %v10124_v61, %v10549_v1  ;;  %v2292_v6 = vmul.f32 %v14535_v12, %v14534_v35  ;;  %vm6559_vm14 = vcmp.eq.f32.partialorder %v14507_v36, inf  ;;  %v10895_v58 = vpop.permute.xlu0 %3055  ;;  %v10897_v1 = vpop.permute.xlu1 %3052  ;;  %v14544_v35 = vld [vmem:[#allocation277_spill] sm:$0xff] }
 0x3fb   : > { %v14536_v3 = vand.u32 2147483648, %v10096_v38  ;;  %v6945_v28 = vsel %vm6944_vm15, %v10467_v31, %v10785_v8  ;;  %14537 = vst [vmem:[#allocation272_spill] sm:$0xff] %v10895_v58  ;;  %14538 = vst [vmem:[#allocation18_spill] sm:$0xff] %v10897_v1  ;;  %v10901_v32 = vsel %vm6577_vm7, inf, %v6590_v20  ;;  %v6572_v59 = vsel %vm6556_vm13, 0.0, %v6571_v34  ;;  %3244 = vperm.xlu1 %7126, %v2291_v46   ;;  %v14542_v34 = vld [vmem:[#allocation276_spill] sm:$0xff] }
 0x3fc   : > { %vm6611_vm0 = vcmp.lt.f32.partialorder %v10139_v10, 0.0  ;;  %vm6640_vm1 = vcmp.eq.f32.partialorder %v14531_v33, 0.0  ;;  %3247 = vperm.xlu0 %7125, %v2292_v6   ;;  %vm6593_vm5 = vcmp.lt.f32.partialorder %v10096_v38, 0.0  ;;  %v14539_v8 = vand.u32 2147483648, %v10124_v61  ;;  %v14543_v58 = vld [vmem:[#allocation267_spill] sm:$0xff]  ;;  %v14545_v6 = vld [vmem:[#allocation64_spill] sm:$0xff] }
 0x3fd   : > { %v6606_v22 = vsel %vm6604_vm11, %v14536_v3, %v6603_v30  ;;  %v6625_v29 = vsel %vm6611_vm0, nan, %v6624_v60  ;;  %vm6946_vm3 = vcmp.eq.f32.partialorder %v10510_v56, 0.0  ;;  %v14540_v19 = vand.u32 2147483648, %v10467_v31  ;;  %v14541_v3 = vld [vmem:[#allocation177_spill] sm:$0xff] }
 0x3fe   : > { %v6642_v30 = vsel %vm6640_vm1, %v14539_v8, %v6639_v54  ;;  %v6607_v12 = vsel %vm6593_vm5, nan, %v6606_v22  ;;  %v2293_v1 = vmul.f32 %v14542_v34, %v14541_v3  ;;  %v2294_v4 = vmul.f32 %v14544_v35, %v14543_v58  ;;  %v10925_v54 = vpop.permute.xlu0 %3061  ;;  %v10927_v22 = vpop.permute.xlu1 %3058  ;;  %v14548_v8 = vld [vmem:[#allocation65_spill] sm:$0xff] }
 0x3ff   : > { %v6948_v20 = vsel %vm6946_vm3, %v14540_v19, %v6945_v28  ;;  %v10917_v46 = vmul.f32 %v10901_v32, %v14545_v6  ;;  %v10921_v60 = vsel %vm6559_vm14, inf, %v6572_v59  ;;  %vm6610_vm2 = vcmp.eq.f32.partialorder %v10139_v10, 0.0  ;;  %14546 = vst [vmem:[#allocation55_spill] sm:$0xff] %v10925_v54  ;;  %14547 = vst [vmem:[#allocation56_spill] sm:$0xff] %v10927_v22  ;;  %v14566_v22 = vld [vmem:[#allocation163_spill] sm:$0xff] }
 0x400   : > { %vm6629_vm6 = vcmp.lt.f32.partialorder %v10124_v61, 0.0  ;;  %v6626_v28 = vsel %vm6610_vm2, 0.0, %v6625_v29  ;;  %vm6592_vm4 = vcmp.eq.f32.partialorder %v10096_v38, 0.0  ;;  %vm6935_vm7 = vcmp.lt.f32.partialorder %v10467_v31, 0.0  ;;  %3253 = vperm.xlu0 %7125, %v2294_v4   ;;  %3250 = vperm.xlu1 %7126, %v2293_v1   ;;  %v14549_v29 = vld [vmem:[#allocation165_spill] sm:$0xff]  ;;  %v14550_v38 = vld [vmem:[#allocation32_spill] sm:$0xff] }
 0x401   : > { %v6643_v35 = vsel %vm6629_vm6, nan, %v6642_v30  ;;  %v10933_v36 = vmul.f32 %v10921_v60, %v14548_v8  ;;  %vm6613_vm9 = vcmp.eq.f32.partialorder %v14519_v23, inf  ;;  %v6608_v10 = vsel %vm6592_vm4, 0.0, %v6607_v12  ;;  %v14560_v8 = vld [vmem:[#allocation299_spill] sm:$0xff] }
 0x402   : > { %v6949_v59 = vsel %vm6935_vm7, nan, %v6948_v20  ;;  %vm6628_vm10 = vcmp.eq.f32.partialorder %v10124_v61, 0.0  ;;  %vm6980_vm8 = vweird.f32 %v10538_v57  ;;  %v6652_v19 = vand.u32 2147483648, %v14549_v29  ;;  %v10945_v6 = vpop.permute.xlu0 %3067  ;;  %v10947_v23 = vpop.permute.xlu1 %3064 }
 0x403   : > { %v6688_v30 = vand.u32 2147483648, %v14550_v38  ;;  %v10940_v34 = vsel %vm6613_vm9, inf, %v6626_v28  ;;  %v6644_v4 = vsel %vm6628_vm10, 0.0, %v6643_v35  ;;  %vm6934_vm11 = vcmp.eq.f32.partialorder %v10467_v31, 0.0  ;;  %14552 = vst [vmem:[#allocation79_spill] sm:$0xff] %v10945_v6  ;;  %14553 = vst [vmem:[#allocation255_spill] sm:$0xff] %v10947_v23 }
 0x404   : > { %14551 = vst [vmem:[#allocation170_spill] sm:$0xff] %v10940_v34  ;;  %v6981_v1 = vsel %vm6980_vm8, %v10496_v37, %v10809_v14  ;;  %vm6595_vm12 = vcmp.eq.f32.partialorder %v14527_v15, inf  ;;  %v6950_v61 = vsel %vm6934_vm11, 0.0, %v6949_v59  ;;  %v6655_v12 = vor.u32 %v10486_v9, %v6652_v19  ;;  %3259 = vperm.xlu0 %7125, %v10666_v26   ;;  %3256 = vperm.xlu1 %7126, %v10670_v47   ;;  %v14554_v28 = vld [vmem:[#allocation66_spill] sm:$0xff]  ;;  %v14556_v15 = vld [vmem:[#allocation67_spill] sm:$0xff] }
 0x405   : > { %v6691_v20 = vor.u32 %v10520_v49, %v6688_v30  ;;  %v10956_v31 = vmul.f32 %v10940_v34, %v14554_v28  ;;  %v10958_v14 = vsel %vm6595_vm12, inf, %v6608_v10  ;;  %vm6631_vm15 = vcmp.eq.f32.partialorder %v14531_v33, inf  ;;  %v14561_v33 = vld [vmem:[#allocation303_spill] sm:$0xff] }
 0x406   : > { %14555 = vst [vmem:[#allocation273_spill] sm:$0xff] %v10958_v14  ;;  %vm6982_vm13 = vcmp.eq.f32.partialorder %v10538_v57, 0.0  ;;  %v10964_v35 = vmul.f32 %v10958_v14, %v14556_v15  ;;  %v10966_v9 = vsel %vm6631_vm15, inf, %v6644_v4  ;;  %vm6937_vm14 = vcmp.eq.f32.partialorder %v10510_v56, inf  ;;  %v10976_v10 = vpop.permute.xlu0 %3073  ;;  %v10978_v59 = vpop.permute.xlu1 %3070  ;;  %v14565_v15 = vld [vmem:[#allocation84_spill] sm:$0xff]  ;;  %v14572_v23 = vld [vmem:[#allocation335_spill] sm:$0xff] }
 0x407   : > { %14557 = vst [vmem:[#allocation57_spill] sm:$0xff] %v10966_v9  ;;  %v14558_v49 = vand.u32 2147483648, %v10496_v37  ;;  %v10971_v47 = vsel %vm6937_vm14, inf, %v6950_v61  ;;  %vm6962_vm0 = vweird.f32 %v10490_v41  ;;  %vm6656_vm1 = vweird.f32 %v14560_v8  ;;  %14562 = vst [vmem:[#allocation59_spill] sm:$0xff] %v10976_v10  ;;  %v14564_v61 = vld [vmem:[#allocation69_spill] sm:$0xff] }
 0x408   : > { %14559 = vst [vmem:[#allocation58_spill] sm:$0xff] %v10971_v47  ;;  %vm6692_vm5 = vweird.f32 %v14561_v33  ;;  %14563 = vst [vmem:[#allocation60_spill] sm:$0xff] %v10978_v59  ;;  %vm6971_vm3 = vcmp.lt.f32.partialorder %v10496_v37, 0.0  ;;  %v6963_v56 = vsel %vm6962_vm0, %v10451_v55, %v10781_v62  ;;  %v6657_v4 = vsel %vm6656_vm1, %v14549_v29, %v6655_v12  ;;  %3265 = vperm.xlu0 %7125, %v10746_v21   ;;  %v14567_v21 = vld [vmem:[#allocation34_spill] sm:$0xff] }
 0x409   : > { %v6984_v26 = vsel %vm6982_vm13, %v14558_v49, %v6981_v1  ;;  %v6693_v1 = vsel %vm6692_vm5, %v14550_v38, %v6691_v20  ;;  %3262 = vperm.xlu1 %7126, %v10727_v43   ;;  %v10989_v28 = vmul.f32 %v10966_v9, %v14564_v61  ;;  %v10993_v49 = vmul.f32 %v10971_v47, %v14565_v15  ;;  %v14569_v15 = vld [vmem:[#allocation45_spill] sm:$0xff] }
 0x40a   : > { %v10995_v54 = vsel %vm6971_vm3, nan, %v6984_v26  ;;  %v6670_v62 = vand.u32 2147483648, %v14566_v22  ;;  %vm6964_vm2 = vcmp.eq.f32.partialorder %v10490_v41, 0.0  ;;  %vm6658_vm6 = vcmp.eq.f32.partialorder %v14560_v8, 0.0  ;;  %v11007_v26 = vpop.permute.xlu0 %3079  ;;  %v11009_v59 = vpop.permute.xlu1 %3076 }
 0x40b   : > { %vm6694_vm4 = vcmp.eq.f32.partialorder %v14561_v33, 0.0  ;;  %v6724_v43 = vand.u32 2147483648, %v14567_v21  ;;  %v14568_v12 = vand.u32 2147483648, %v10451_v55  ;;  %v6660_v61 = vsel %vm6658_vm6, %v6652_v19, %v6657_v4  ;;  %14570 = vst [vmem:[#allocation257_spill] sm:$0xff] %v11007_v26  ;;  %14571 = vst [vmem:[#allocation229_spill] sm:$0xff] %v11009_v59  ;;  %v14573_v19 = vld [vmem:[#allocation31_spill] sm:$0xff] }
 0x40c   : > { %v6696_v10 = vsel %vm6694_vm4, %v6688_v30, %v6693_v1  ;;  %v6673_v6 = vor.u32 %v14569_v15, %v6670_v62  ;;  %vm6646_vm7 = vcmp.eq.f32.partialorder %v14549_v29, 0.0  ;;  %vm6647_vm9 = vcmp.lt.f32.partialorder %v14549_v29, 0.0  ;;  %3271 = vperm.xlu0 %7125, %v10767_v24   ;;  %v14574_v1 = vld [vmem:[#allocation28_spill] sm:$0xff] }
 0x40d   : > { %v11004_v20 = vsel %vm6964_vm2, %v14568_v12, %v6963_v56  ;;  %vm6649_vm10 = vcmp.eq.f32.partialorder %v14560_v8, inf  ;;  %v6727_v58 = vor.u32 %v14572_v23, %v6724_v43  ;;  %3268 = vperm.xlu1 %7126, %v10731_v44   ;;  %vm6682_vm8 = vcmp.eq.f32.partialorder %v14550_v38, 0.0  ;;  %v14575_v12 = vld [vmem:[#allocation36_spill] sm:$0xff]  ;;  %v14576_v23 = vld [vmem:[#allocation307_spill] sm:$0xff] }
 0x40e   : > { %vm6683_vm11 = vcmp.lt.f32.partialorder %v14550_v38, 0.0  ;;  %vm6685_vm12 = vcmp.eq.f32.partialorder %v14561_v33, inf  ;;  %v6706_v30 = vand.u32 2147483648, %v14573_v19  ;;  %v6661_v56 = vsel %vm6647_vm9, nan, %v6660_v61  ;;  %v14577_v44 = vld [vmem:[#allocation48_spill] sm:$0xff]  ;;  %v11027_v59 = vpop.permute.xlu0 %3085  ;;  %v11029_v3 = vpop.permute.xlu1 %3082  ;;  %v14580_v61 = vld [vmem:[#allocation226_spill] sm:$0xff] }
 0x40f   : > { %v6697_v4 = vsel %vm6683_vm11, nan, %v6696_v10  ;;  %vm6674_vm15 = vweird.f32 %v14574_v1  ;;  %v6760_v15 = vand.u32 2147483648, %v14575_v12  ;;  %vm6664_vm13 = vcmp.eq.f32.partialorder %v14566_v22, 0.0  ;;  %14578 = vst [vmem:[#allocation258_spill] sm:$0xff] %v11027_v59  ;;  %14579 = vst [vmem:[#allocation232_spill] sm:$0xff] %v11029_v3  ;;  %v14584_v38 = vld [vmem:[#allocation311_spill] sm:$0xff] }
 0x410   : > { %v6675_v24 = vsel %vm6674_vm15, %v14566_v22, %v6673_v6  ;;  %vm6728_vm14 = vweird.f32 %v14576_v23  ;;  %v6709_v26 = vor.u32 %v14577_v44, %v6706_v30  ;;  %vm6665_vm0 = vcmp.lt.f32.partialorder %v14566_v22, 0.0  ;;  %3277 = vperm.xlu0 %7125, %v10803_v25   ;;  %v14583_v25 = vld [vmem:[#allocation38_spill] sm:$0xff]  ;;  %v14590_v33 = vld [vmem:[#allocation319_spill] sm:$0xff] }
 0x411   : > { %vm6676_vm1 = vcmp.eq.f32.partialorder %v14574_v1, 0.0  ;;  %v6729_v10 = vsel %vm6728_vm14, %v14567_v21, %v6727_v58  ;;  %v6763_v47 = vor.u32 %v14580_v61, %v6760_v15  ;;  %3274 = vperm.xlu1 %7126, %v10758_v27   ;;  %v6662_v6 = vsel %vm6646_vm7, 0.0, %v6661_v56  ;;  %v14581_v58 = vld [vmem:[#allocation302_spill] sm:$0xff]  ;;  %v14582_v61 = vld [vmem:[#allocation33_spill] sm:$0xff] }
 0x412   : > { %v6698_v44 = vsel %vm6682_vm8, 0.0, %v6697_v4  ;;  %vm6718_vm5 = vcmp.eq.f32.partialorder %v14567_v21, 0.0  ;;  %vm6730_vm3 = vcmp.eq.f32.partialorder %v14576_v23, 0.0  ;;  %vm6667_vm2 = vcmp.eq.f32.partialorder %v14574_v1, inf  ;;  %v11050_v56 = vpop.permute.xlu0 %3091  ;;  %v11052_v4 = vpop.permute.xlu1 %3088 }
 0x413   : > { %v6678_v59 = vsel %vm6676_vm1, %v6670_v62, %v6675_v24  ;;  %vm6710_vm6 = vweird.f32 %v14581_v58  ;;  %v6742_v3 = vand.u32 2147483648, %v14582_v61  ;;  %v6796_v9 = vand.u32 2147483648, %v14583_v25  ;;  %14585 = vst [vmem:[#allocation61_spill] sm:$0xff] %v11050_v56  ;;  %14586 = vst [vmem:[#allocation20_spill] sm:$0xff] %v11052_v4  ;;  %v14587_v24 = vld [vmem:[#allocation50_spill] sm:$0xff]  ;;  %v14593_v56 = vld [vmem:[#allocation52_spill] sm:$0xff] }
 0x414   : > { %vm6719_vm4 = vcmp.lt.f32.partialorder %v14567_v21, 0.0  ;;  %v6732_v27 = vsel %vm6730_vm3, %v6724_v43, %v6729_v10  ;;  %v6711_v29 = vsel %vm6710_vm6, %v14573_v19, %v6709_v26  ;;  %vm6764_vm7 = vweird.f32 %v14584_v38  ;;  %3283 = vperm.xlu0 %7125, %v10864_v11   ;;  %v14588_v11 = vld [vmem:[#allocation35_spill] sm:$0xff] }
 0x415   : > { %vm6721_vm9 = vcmp.eq.f32.partialorder %v14576_v23, inf  ;;  %v6765_v62 = vsel %vm6764_vm7, %v14575_v12, %v6763_v47  ;;  %v6745_v14 = vor.u32 %v14587_v24, %v6742_v3  ;;  %v6799_v34 = vor.u32 %v10655_v2, %v6796_v9  ;;  %3280 = vperm.xlu1 %7126, %v10771_v5  }
 0x416   : > { %v11062_v43 = vsel %vm6649_vm10, inf, %v6662_v6  ;;  %v11066_v26 = vsel %vm6685_vm12, inf, %v6698_v44  ;;  %v6679_v10 = vsel %vm6665_vm0, nan, %v6678_v59  ;;  %vm6712_vm8 = vcmp.eq.f32.partialorder %v14581_v58, 0.0  ;;  %v14589_v6 = vld [vmem:[#allocation304_spill] sm:$0xff]  ;;  %v11078_v44 = vpop.permute.xlu0 %3097  ;;  %v11080_v59 = vpop.permute.xlu1 %3094 }
 0x417   : > { %vm6701_vm11 = vcmp.lt.f32.partialorder %v14573_v19, 0.0  ;;  %v6714_v2 = vsel %vm6712_vm8, %v6706_v30, %v6711_v29  ;;  %vm6766_vm15 = vcmp.eq.f32.partialorder %v14584_v38, 0.0  ;;  %v6778_v5 = vand.u32 2147483648, %v14588_v11  ;;  %14591 = vst [vmem:[#allocation82_spill] sm:$0xff] %v11078_v44  ;;  %14592 = vst [vmem:[#allocation173_spill] sm:$0xff] %v11080_v59 }
 0x418   : > { %v6733_v47 = vsel %vm6719_vm4, nan, %v6732_v27  ;;  %v6768_v8 = vsel %vm6766_vm15, %v6760_v15, %v6765_v62  ;;  %vm6746_vm10 = vweird.f32 %v14589_v6  ;;  %vm6800_vm12 = vweird.f32 %v14590_v33  ;;  %3289 = vperm.xlu0 %7125, %v10933_v36   ;;  %v14594_v27 = vld [vmem:[#allocation308_spill] sm:$0xff] }
 0x419   : > { %v6680_v24 = vsel %vm6664_vm13, 0.0, %v6679_v10  ;;  %v6747_v30 = vsel %vm6746_vm10, %v14582_v61, %v6745_v14  ;;  %v6801_v29 = vsel %vm6800_vm12, %v14583_v25, %v6799_v34  ;;  %v6781_v4 = vor.u32 %v14593_v56, %v6778_v5  ;;  %3286 = vperm.xlu1 %7126, %v10831_v16  }
 0x41a   : > { %vm6700_vm14 = vcmp.eq.f32.partialorder %v14573_v19, 0.0  ;;  %vm6703_vm0 = vcmp.eq.f32.partialorder %v14581_v58, inf  ;;  %v6715_v15 = vsel %vm6701_vm11, nan, %v6714_v2  ;;  %vm6755_vm1 = vcmp.lt.f32.partialorder %v14575_v12, 0.0  ;;  %v11103_v19 = vpop.permute.xlu0 %3103  ;;  %v11105_v56 = vpop.permute.xlu1 %3100 }
 0x41b   : > { %v6734_v22 = vsel %vm6718_vm5, 0.0, %v6733_v47  ;;  %v6769_v14 = vsel %vm6755_vm1, nan, %v6768_v8  ;;  %vm6748_vm13 = vcmp.eq.f32.partialorder %v14589_v6, 0.0  ;;  %vm6802_vm3 = vcmp.eq.f32.partialorder %v14590_v33, 0.0  ;;  %14595 = vst [vmem:[#allocation62_spill] sm:$0xff] %v11103_v19  ;;  %14596 = vst [vmem:[#allocation27_spill] sm:$0xff] %v11105_v56 }
 0x41c   : > { %v11100_v16 = vsel %vm6667_vm2, inf, %v6680_v24  ;;  %v6750_v36 = vsel %vm6748_vm13, %v6742_v3, %v6747_v30  ;;  %v6804_v34 = vsel %vm6802_vm3, %v6796_v9, %v6801_v29  ;;  %vm6782_vm6 = vweird.f32 %v14594_v27  ;;  %3295 = vperm.xlu0 %7125, %v10964_v35   ;;  %v14600_v47 = vld [vmem:[#allocation40_spill] sm:$0xff]  ;;  %v14601_v30 = vld [vmem:[#allocation187_spill] sm:$0xff] }
 0x41d   : > { %v6716_v62 = vsel %vm6700_vm14, 0.0, %v6715_v15  ;;  %vm6754_vm5 = vcmp.eq.f32.partialorder %v14575_v12, 0.0  ;;  %vm6757_vm4 = vcmp.eq.f32.partialorder %v14584_v38, inf  ;;  %v6783_v21 = vsel %vm6782_vm6, %v14588_v11, %v6781_v4  ;;  %3292 = vperm.xlu1 %7126, %v10917_v46   ;;  %v14597_v12 = vld [vmem:[#allocation37_spill] sm:$0xff]  ;;  %v14602_v29 = vld [vmem:[#allocation179_spill] sm:$0xff] }
 0x41e   : > { %v11114_v3 = vsel %vm6721_vm9, inf, %v6734_v22  ;;  %v6770_v9 = vsel %vm6754_vm5, 0.0, %v6769_v14  ;;  %vm6737_vm2 = vcmp.lt.f32.partialorder %v14582_v61, 0.0  ;;  %vm6791_vm7 = vcmp.lt.f32.partialorder %v14583_v25, 0.0  ;;  %v11126_v23 = vpop.permute.xlu0 %3109  ;;  %v11128_v4 = vpop.permute.xlu1 %3106 }
 0x41f   : > { %v6751_v1 = vsel %vm6737_vm2, nan, %v6750_v36  ;;  %v6805_v10 = vsel %vm6791_vm7, nan, %v6804_v34  ;;  %vm6784_vm8 = vcmp.eq.f32.partialorder %v14594_v27, 0.0  ;;  %v6814_v2 = vand.u32 2147483648, %v14597_v12  ;;  %14598 = vst [vmem:[#allocation238_spill] sm:$0xff] %v11126_v23  ;;  %14599 = vst [vmem:[#allocation236_spill] sm:$0xff] %v11128_v4 }
 0x420   : > { %v11122_v35 = vsel %vm6703_vm0, inf, %v6716_v62  ;;  %vm6736_vm11 = vcmp.eq.f32.partialorder %v14582_v61, 0.0  ;;  %vm6739_vm9 = vcmp.eq.f32.partialorder %v14589_v6, inf  ;;  %v6786_v46 = vsel %vm6784_vm8, %v6778_v5, %v6783_v21  ;;  %3301 = vperm.xlu0 %7125, %v10989_v28   ;;  %v14604_v28 = vld [vmem:[#allocation39_spill] sm:$0xff]  ;;  %v14607_v62 = vld [vmem:[#allocation324_spill] sm:$0xff] }
 0x421   : > { %vm6790_vm15 = vcmp.eq.f32.partialorder %v14583_v25, 0.0  ;;  %vm6793_vm10 = vcmp.eq.f32.partialorder %v14590_v33, inf  ;;  %v6832_v8 = vand.u32 2147483648, %v14600_v47  ;;  %v6817_v24 = vor.u32 %v10633_v17, %v6814_v2  ;;  %3298 = vperm.xlu1 %7126, %v10956_v31   ;;  %v14603_v31 = vld [vmem:[#allocation316_spill] sm:$0xff]  ;;  %v14609_v6 = vld [vmem:[#allocation183_spill] sm:$0xff] }
 0x422   : > { %v11138_v58 = vsel %vm6757_vm4, inf, %v6770_v9  ;;  %v6752_v61 = vsel %vm6736_vm11, 0.0, %v6751_v1  ;;  %v6806_v5 = vsel %vm6790_vm15, 0.0, %v6805_v10  ;;  %vm6773_vm12 = vcmp.lt.f32.partialorder %v14588_v11, 0.0  ;;  %v11150_v14 = vpop.permute.xlu0 %3115  ;;  %v11152_v36 = vpop.permute.xlu1 %3112  ;;  %v14608_v9 = vld [vmem:[#allocation42_spill] sm:$0xff]  ;;  %v14616_v4 = vld [vmem:[#allocation271_spill] sm:$0xff] }
 0x423   : > { %v2311_v25 = vmul.f32 %v11062_v43, %v14601_v30  ;;  %v2312_v15 = vmul.f32 %v11100_v16, %v14602_v29  ;;  %v6787_v22 = vsel %vm6773_vm12, nan, %v6786_v46  ;;  %v6835_v17 = vor.u32 %v10685_v40, %v6832_v8  ;;  %14605 = vst [vmem:[#allocation63_spill] sm:$0xff] %v11150_v14  ;;  %14606 = vst [vmem:[#allocation160_spill] sm:$0xff] %v11152_v36  ;;  %v14625_v14 = vld [vmem:[#allocation199_spill] sm:$0xff] }
 0x424   : > { %vm6772_vm14 = vcmp.eq.f32.partialorder %v14588_v11, 0.0  ;;  %vm6775_vm0 = vcmp.eq.f32.partialorder %v14594_v27, inf  ;;  %vm6818_vm1 = vweird.f32 %v14603_v31  ;;  %v6850_v38 = vand.u32 2147483648, %v14604_v28 }
 0x425   : > { %v11156_v34 = vsel %vm6739_vm9, inf, %v6752_v61  ;;  %vm6827_vm13 = vcmp.lt.f32.partialorder %v14600_v47, 0.0  ;;  %vm6836_vm3 = vweird.f32 %v14607_v62  ;;  %v6819_v40 = vsel %vm6818_vm1, %v14597_v12, %v6817_v24  ;;  %3307 = vperm.xlu0 %7125, %v2312_v15   ;;  %3304 = vperm.xlu1 %7126, %v2311_v25   ;;  %v14610_v61 = vld [vmem:[#allocation269_spill] sm:$0xff] }
 0x426   : > { %v11163_v11 = vsel %vm6793_vm10, inf, %v6806_v5  ;;  %v6788_v21 = vsel %vm6772_vm14, 0.0, %v6787_v22  ;;  %v6868_v1 = vand.u32 2147483648, %v14608_v9  ;;  %v6853_v10 = vor.u32 %v10673_v52, %v6850_v38  ;;  %v14611_v25 = vld [vmem:[#allocation41_spill] sm:$0xff]  ;;  %v11177_v52 = vpop.permute.xlu0 %3121  ;;  %v11179_v15 = vpop.permute.xlu1 %3118  ;;  %v14614_v22 = vld [vmem:[#allocation322_spill] sm:$0xff] }
 0x427   : > { %v2313_v46 = vmul.f32 %v11066_v26, %v14609_v6  ;;  %v2314_v30 = vmul.f32 %v11122_v35, %v14610_v61  ;;  %vm6826_vm6 = vcmp.eq.f32.partialorder %v14600_v47, 0.0  ;;  %v6837_v24 = vsel %vm6836_vm3, %v14600_v47, %v6835_v17  ;;  %14612 = vst [vmem:[#allocation162_spill] sm:$0xff] %v11177_v52  ;;  %14613 = vst [vmem:[#allocation264_spill] sm:$0xff] %v11179_v15  ;;  %v14615_v6 = vld [vmem:[#allocation197_spill] sm:$0xff]  ;;  %v14617_v15 = vld [vmem:[#allocation328_spill] sm:$0xff] }
 0x428   : > { %vm6820_vm5 = vcmp.eq.f32.partialorder %v14603_v31, 0.0  ;;  %vm6838_vm4 = vcmp.eq.f32.partialorder %v14607_v62, 0.0  ;;  %v6871_v5 = vor.u32 %v10701_v51, %v6868_v1  ;;  %v6886_v29 = vand.u32 2147483648, %v14611_v25 }
 0x429   : > { %v6822_v33 = vsel %vm6820_vm5, %v6814_v2, %v6819_v40  ;;  %vm6808_vm2 = vcmp.eq.f32.partialorder %v14597_v12, 0.0  ;;  %vm6809_vm7 = vcmp.lt.f32.partialorder %v14597_v12, 0.0  ;;  %vm6811_vm8 = vcmp.eq.f32.partialorder %v14603_v31, inf  ;;  %3313 = vperm.xlu0 %7125, %v2314_v30   ;;  %3310 = vperm.xlu1 %7126, %v2313_v46  }
 0x42a   : > { %vm6854_vm11 = vweird.f32 %v14614_v22  ;;  %v11187_v2 = vsel %vm6775_vm0, inf, %v6788_v21  ;;  %v6840_v51 = vsel %vm6838_vm4, %v6832_v8, %v6837_v24  ;;  %v6889_v40 = vor.u32 %v10698_v42, %v6886_v29  ;;  %v14618_v8 = vld [vmem:[#allocation44_spill] sm:$0xff]  ;;  %v11201_v42 = vpop.permute.xlu0 %3127  ;;  %v11203_v30 = vpop.permute.xlu1 %3124 }
 0x42b   : > { %v6855_v17 = vsel %vm6854_vm11, %v14604_v28, %v6853_v10  ;;  %v2315_v61 = vmul.f32 %v11114_v3, %v14615_v6  ;;  %v2316_v23 = vmul.f32 %v11156_v34, %v14616_v4  ;;  %v6823_v52 = vsel %vm6809_vm7, nan, %v6822_v33  ;;  %v14619_v10 = vld [vmem:[#allocation43_spill] sm:$0xff]  ;;  %14620 = vst [vmem:[#allocation228_spill] sm:$0xff] %v11201_v42  ;;  %14621 = vst [vmem:[#allocation276_spill] sm:$0xff] %v11203_v30  ;;  %v14623_v42 = vld [vmem:[#allocation157_spill] sm:$0xff] }
 0x42c   : > { %vm6872_vm9 = vweird.f32 %v14617_v15  ;;  %vm6829_vm15 = vcmp.eq.f32.partialorder %v14607_v62, inf  ;;  %vm6856_vm10 = vcmp.eq.f32.partialorder %v14614_v22, 0.0  ;;  %v6904_v21 = vand.u32 2147483648, %v14618_v8  ;;  %v14622_v33 = vld [vmem:[#allocation327_spill] sm:$0xff] }
 0x42d   : > { %v6873_v27 = vsel %vm6872_vm9, %v14608_v9, %v6871_v5  ;;  %v6922_v46 = vand.u32 2147483648, %v14619_v10  ;;  %v6841_v4 = vsel %vm6827_vm13, nan, %v6840_v51  ;;  %vm6874_vm12 = vcmp.eq.f32.partialorder %v14617_v15, 0.0  ;;  %3319 = vperm.xlu0 %7125, %v2316_v23   ;;  %3316 = vperm.xlu1 %7126, %v2315_v61   ;;  %v14624_v30 = vld [vmem:[#allocation239_spill] sm:$0xff] }
 0x42e   : > { %v6858_v24 = vsel %vm6856_vm10, %v6850_v38, %v6855_v17  ;;  %vm6890_vm14 = vweird.f32 %v14622_v33  ;;  %v6824_v5 = vsel %vm6808_vm2, 0.0, %v6823_v52  ;;  %v6907_v6 = vor.u32 %v10723_v48, %v6904_v21  ;;  %v11224_v23 = vpop.permute.xlu0 %3133  ;;  %v11226_v52 = vpop.permute.xlu1 %3130 }
 0x42f   : > { %v6891_v19 = vsel %vm6890_vm14, %v14611_v25, %v6889_v40  ;;  %v6925_v36 = vor.u32 %v14623_v42, %v6922_v46  ;;  %vm6953_vm0 = vcmp.lt.f32.partialorder %v10451_v55, 0.0  ;;  %v2317_v51 = vmul.f32 %v11138_v58, %v14624_v30  ;;  %14626 = vst [vmem:[#allocation277_spill] sm:$0xff] %v11224_v23  ;;  %14627 = vst [vmem:[#allocation64_spill] sm:$0xff] %v11226_v52  ;;  %v14628_v40 = vld [vmem:[#allocation332_spill] sm:$0xff]  ;;  %v14630_v30 = vld [vmem:[#allocation202_spill] sm:$0xff] }
 0x430   : > { %v2318_v38 = vmul.f32 %v11187_v2, %v14625_v14  ;;  %v6876_v17 = vsel %vm6874_vm12, %v6868_v1, %v6873_v27  ;;  %vm6845_vm1 = vcmp.lt.f32.partialorder %v14604_v28, 0.0  ;;  %v6842_v12 = vsel %vm6826_vm6, 0.0, %v6841_v4  ;;  %v14629_v1 = vld [vmem:[#allocation329_spill] sm:$0xff] }
 0x431   : > { %vm6863_vm13 = vcmp.lt.f32.partialorder %v14608_v9, 0.0  ;;  %v6859_v48 = vsel %vm6845_vm1, nan, %v6858_v24  ;;  %vm6892_vm3 = vcmp.eq.f32.partialorder %v14622_v33, 0.0  ;;  %vm6844_vm5 = vcmp.eq.f32.partialorder %v14604_v28, 0.0  ;;  %3322 = vperm.xlu1 %7126, %v2317_v51   ;;  %v14631_v4 = vld [vmem:[#allocation189_spill] sm:$0xff] }
 0x432   : > { %vm6908_vm4 = vweird.f32 %v14628_v40  ;;  %v6894_v14 = vsel %vm6892_vm3, %v6886_v29, %v6891_v19  ;;  %vm6926_vm2 = vweird.f32 %v14629_v1  ;;  %3325 = vperm.xlu0 %7125, %v2318_v38   ;;  %v11233_v47 = vsel %vm6811_vm8, inf, %v6824_v5  ;;  %v11246_v24 = vpop.permute.xlu0 %3139  ;;  %v14692_v23 = vld [vmem:[#allocation81_spill] sm:$0xff] }
 0x433   : > { %v6877_v61 = vsel %vm6863_vm13, nan, %v6876_v17  ;;  %v6909_v27 = vsel %vm6908_vm4, %v14618_v8, %v6907_v6  ;;  %v6927_v42 = vsel %vm6926_vm2, %v14619_v10, %v6925_v36  ;;  %vm6970_vm6 = vcmp.eq.f32.partialorder %v10496_v37, 0.0  ;;  %14632 = vst [vmem:[#allocation65_spill] sm:$0xff] %v11246_v24  ;;  %v11248_v36 = vpop.permute.xlu1 %3136  ;;  %v14634_v17 = vld [vmem:[#allocation174_spill] sm:$0xff]  ;;  %v14697_v52 = vld [vmem:[#allocation237_spill] sm:$0xff]  ;;  %v14854_v24 = vld [vmem:[#allocation208_spill] sm:$0xff] }
 0x434   : > { %v2319_v28 = vmul.f32 %v11163_v11, %v14630_v30  ;;  %v2320_v19 = vmul.f32 %v11233_v47, %v14631_v4  ;;  %v6860_v29 = vsel %vm6844_vm5, 0.0, %v6859_v48  ;;  %vm6881_vm7 = vcmp.lt.f32.partialorder %v14611_v25, 0.0  ;;  %14633 = vst [vmem:[#allocation165_spill] sm:$0xff] %v11248_v36  ;;  %v14640_v30 = vld [vmem:[#allocation47_spill] sm:$0xff]  ;;  %v14855_v36 = vld [vmem:[#allocation218_spill] sm:$0xff] }
 0x435   : > { %vm6862_vm11 = vcmp.eq.f32.partialorder %v14608_v9, 0.0  ;;  %vm6910_vm8 = vcmp.eq.f32.partialorder %v14628_v40, 0.0  ;;  %v6895_v31 = vsel %vm6881_vm7, nan, %v6894_v14  ;;  %vm6928_vm9 = vcmp.eq.f32.partialorder %v14629_v1, 0.0  ;;  %v14635_v14 = vld [vmem:[#allocation68_spill] sm:$0xff] }
 0x436   : > { %v11252_v5 = vsel %vm6829_vm15, inf, %v6842_v12  ;;  %vm6847_vm10 = vcmp.eq.f32.partialorder %v14614_v22, inf  ;;  %v6912_v6 = vsel %vm6910_vm8, %v6904_v21, %v6909_v27  ;;  %v6930_v51 = vsel %vm6928_vm9, %v6922_v46, %v6927_v42  ;;  %3331 = vperm.xlu0 %7125, %v2320_v19   ;;  %3328 = vperm.xlu1 %7126, %v2319_v28   ;;  %v14636_v21 = vld [vmem:[#allocation334_spill] sm:$0xff]  ;;  %v11268_v27 = vpop.permute.xlu0 %3145  ;;  %v14639_v42 = vld [vmem:[#allocation336_spill] sm:$0xff] }
 0x437   : > { %v6878_v9 = vsel %vm6862_vm11, 0.0, %v6877_v61  ;;  %v11255_v38 = vsel %vm6847_vm10, inf, %v6860_v29  ;;  %vm6899_vm12 = vcmp.lt.f32.partialorder %v14618_v8, 0.0  ;;  %vm6880_vm14 = vcmp.eq.f32.partialorder %v14611_v25, 0.0  ;;  %14637 = vst [vmem:[#allocation32_spill] sm:$0xff] %v11268_v27  ;;  %v11270_v25 = vpop.permute.xlu1 %3142  ;;  %v14641_v19 = vld [vmem:[#allocation206_spill] sm:$0xff] }
 0x438   : > { %v2321_v48 = vmul.f32 %v11252_v5, %v14634_v17  ;;  %v2322_v62 = vmul.f32 %v11255_v38, %v14635_v14  ;;  %v6896_v12 = vsel %vm6880_vm14, 0.0, %v6895_v31  ;;  %vm6917_vm15 = vcmp.lt.f32.partialorder %v14619_v10, 0.0  ;;  %14638 = vst [vmem:[#allocation66_spill] sm:$0xff] %v11270_v25  ;;  %v14642_v31 = vld [vmem:[#allocation194_spill] sm:$0xff]  ;;  %v14647_v14 = vld [vmem:[#allocation212_spill] sm:$0xff] }
 0x439   : > { %v6967_v22 = vsel %vm6953_vm0, nan, %v11004_v20  ;;  %vm6998_vm1 = vweird.f32 %v14636_v21  ;;  %v6913_v46 = vsel %vm6899_vm12, nan, %v6912_v6  ;;  %v6931_v61 = vsel %vm6917_vm15, nan, %v6930_v51 }
 0x43a   : > { %vm7016_vm13 = vweird.f32 %v14639_v42  ;;  %v6999_v28 = vsel %vm6998_vm1, %v14640_v30, %v10799_v53  ;;  %vm6865_vm3 = vcmp.eq.f32.partialorder %v14617_v15, inf  ;;  %vm6883_vm5 = vcmp.eq.f32.partialorder %v14622_v33, inf  ;;  %3337 = vperm.xlu0 %7125, %v2322_v62   ;;  %3334 = vperm.xlu1 %7126, %v2321_v48   ;;  %v14646_v48 = vld [vmem:[#allocation51_spill] sm:$0xff] }
 0x43b   : > { %v11277_v20 = vsel %vm6865_vm3, inf, %v6878_v9  ;;  %vm6898_vm0 = vcmp.eq.f32.partialorder %v14618_v8, 0.0  ;;  %v11280_v4 = vsel %vm6883_vm5, inf, %v6896_v12  ;;  %vm6916_vm4 = vcmp.eq.f32.partialorder %v14619_v10, 0.0  ;;  %v11297_v10 = vpop.permute.xlu0 %3151  ;;  %v11299_v51 = vpop.permute.xlu1 %3148 }
 0x43c   : > { %vm6973_vm2 = vcmp.eq.f32.partialorder %v10538_v57, inf  ;;  %v2323_v29 = vmul.f32 %v11277_v20, %v14641_v19  ;;  %v6914_v53 = vsel %vm6898_vm0, 0.0, %v6913_v46  ;;  %v2324_v15 = vmul.f32 %v11280_v4, %v14642_v31  ;;  %14643 = vst [vmem:[#allocation67_spill] sm:$0xff] %v11297_v10  ;;  %14644 = vst [vmem:[#allocation299_spill] sm:$0xff] %v11299_v51  ;;  %v14842_v10 = vld [vmem:[#allocation171_spill] sm:$0xff] }
 0x43d   : > { %v6932_v33 = vsel %vm6916_vm4, 0.0, %v6931_v61  ;;  %v6986_v6 = vsel %vm6970_vm6, 0.0, %v10995_v54  ;;  %vm6952_vm7 = vcmp.eq.f32.partialorder %v10451_v55, 0.0  ;;  %v7017_v8 = vsel %vm7016_vm13, %v10527_v7, %v10827_v50 }
 0x43e   : > { %vm7000_vm11 = vcmp.eq.f32.partialorder %v14636_v21, 0.0  ;;  %v14645_v9 = vand.u32 2147483648, %v14640_v30  ;;  %vm7034_vm8 = vweird.f32 %v14646_v48  ;;  %vm6901_vm6 = vcmp.eq.f32.partialorder %v14628_v40, inf  ;;  %3343 = vperm.xlu0 %7125, %v2324_v15   ;;  %3340 = vperm.xlu1 %7126, %v2323_v29   ;;  %v14648_v40 = vld [vmem:[#allocation70_spill] sm:$0xff] }
 0x43f   : > { %vm6919_vm9 = vcmp.eq.f32.partialorder %v14629_v1, inf  ;;  %v6968_v37 = vsel %vm6952_vm7, 0.0, %v6967_v22  ;;  %v7035_v55 = vsel %vm7034_vm8, %v10513_v45, %v10823_v13  ;;  %v11308_v50 = vsel %vm6901_vm6, inf, %v6914_v53  ;;  %v11322_v46 = vpop.permute.xlu0 %3157  ;;  %v11324_v61 = vpop.permute.xlu1 %3154  ;;  %v14654_v53 = vld [vmem:[#allocation337_spill] sm:$0xff] }
 0x440   : > { %v7002_v17 = vsel %vm7000_vm11, %v14645_v9, %v6999_v28  ;;  %v11310_v54 = vsel %vm6919_vm9, inf, %v6932_v33  ;;  %vm7018_vm10 = vcmp.eq.f32.partialorder %v14639_v42, 0.0  ;;  %vm6989_vm12 = vcmp.lt.f32.partialorder %v14640_v30, 0.0  ;;  %14650 = vst [vmem:[#allocation303_spill] sm:$0xff] %v11322_v46  ;;  %14651 = vst [vmem:[#allocation69_spill] sm:$0xff] %v11324_v61  ;;  %v14652_v28 = vld [vmem:[#allocation211_spill] sm:$0xff] }
 0x441   : > { %v2325_v62 = vmul.f32 %v11308_v50, %v14647_v14  ;;  %v2326_v1 = vmul.f32 %v11310_v54, %v14648_v40  ;;  %vm6955_vm14 = vcmp.eq.f32.partialorder %v10490_v41, inf  ;;  %v14649_v12 = vand.u32 2147483648, %v10527_v7  ;;  %v14655_v33 = vld [vmem:[#allocation87_spill] sm:$0xff]  ;;  %v14837_v46 = vld [vmem:[#allocation166_spill] sm:$0xff] }
 0x442   : > { %v7003_v13 = vsel %vm6989_vm12, nan, %v7002_v17  ;;  %vm7036_vm15 = vcmp.eq.f32.partialorder %v14646_v48, 0.0  ;;  %vm7007_vm1 = vcmp.lt.f32.partialorder %v10527_v7, 0.0  ;;  %vm7052_vm13 = vweird.f32 %v14652_v28 }
 0x443   : > { %v7020_v22 = vsel %vm7018_vm10, %v14649_v12, %v7017_v8  ;;  %v14653_v19 = vand.u32 2147483648, %v10513_v45  ;;  %vm7070_vm3 = vweird.f32 %v14654_v53  ;;  %3349 = vperm.xlu0 %7125, %v2326_v1   ;;  %3346 = vperm.xlu1 %7126, %v2325_v62   ;;  %v11331_v41 = vsel %vm6955_vm14, inf, %v6968_v37  ;;  %v11349_v37 = vpop.permute.xlu1 %3160  ;;  %v14660_v62 = vld [vmem:[#allocation86_spill] sm:$0xff] }
 0x444   : > { %vm6988_vm5 = vcmp.eq.f32.partialorder %v14640_v30, 0.0  ;;  %v7053_v31 = vsel %vm7052_vm13, %v10567_v39, %v10860_v18  ;;  %v7071_v15 = vsel %vm7070_vm3, %v10541_v63, %v10841_v0  ;;  %v2328_v8 = vmul.f32 %v11331_v41, %v14655_v33  ;;  %v11347_v18 = vpop.permute.xlu0 %3163  ;;  %14657 = vst [vmem:[#allocation163_spill] sm:$0xff] %v11349_v37 }
 0x445   : > { %v7038_v29 = vsel %vm7036_vm15, %v14653_v19, %v7035_v55  ;;  %v7021_v9 = vsel %vm7007_vm1, nan, %v7020_v22  ;;  %v7004_v17 = vsel %vm6988_vm5, 0.0, %v7003_v13  ;;  %vm7025_vm0 = vcmp.lt.f32.partialorder %v10513_v45, 0.0  ;;  %14656 = vst [vmem:[#allocation84_spill] sm:$0xff] %v11347_v18 }
 0x446   : > { %v11343_v55 = vsel %vm6973_vm2, inf, %v6986_v6  ;;  %vm7054_vm4 = vcmp.eq.f32.partialorder %v14652_v28, 0.0  ;;  %v7039_v30 = vsel %vm7025_vm0, nan, %v7038_v29  ;;  %vm7072_vm7 = vcmp.eq.f32.partialorder %v14654_v53, 0.0 }
 0x447   : > { %vm7006_vm11 = vcmp.eq.f32.partialorder %v10527_v7, 0.0  ;;  %vm6991_vm8 = vcmp.eq.f32.partialorder %v14636_v21, inf  ;;  %v14658_v0 = vand.u32 2147483648, %v10567_v39  ;;  %v14659_v57 = vand.u32 2147483648, %v10541_v63  ;;  %3355 = vperm.xlu0 %7125, %v2328_v8   ;;  %3352 = vperm.xlu1 %7126, %v10993_v49   ;;  %v14661_v7 = vld [vmem:[#allocation89_spill] sm:$0xff]  ;;  %v11369_v49 = vpop.permute.xlu1 %3166 }
 0x448   : > { %v2329_v40 = vmul.f32 %v11343_v55, %v14660_v62  ;;  %v7022_v1 = vsel %vm7006_vm11, 0.0, %v7021_v9  ;;  %v11360_v12 = vsel %vm6991_vm8, inf, %v7004_v17  ;;  %vm7024_vm2 = vcmp.eq.f32.partialorder %v10513_v45, 0.0  ;;  %v11367_v29 = vpop.permute.xlu0 %3169  ;;  %14663 = vst [vmem:[#allocation45_spill] sm:$0xff] %v11369_v49  ;;  %v14665_v9 = vld [vmem:[#allocation91_spill] sm:$0xff] }
 0x449   : > { %v7056_v14 = vsel %vm7054_vm4, %v14658_v0, %v7053_v31  ;;  %v7074_v6 = vsel %vm7072_vm7, %v14659_v57, %v7071_v15  ;;  %v2330_v21 = vmul.f32 %v11360_v12, %v14661_v7  ;;  %vm7043_vm6 = vcmp.lt.f32.partialorder %v10567_v39, 0.0  ;;  %14662 = vst [vmem:[#allocation34_spill] sm:$0xff] %v11367_v29  ;;  %v14664_v15 = vld [vmem:[#allocation88_spill] sm:$0xff]  ;;  %v14668_v0 = vld [vmem:[#allocation90_spill] sm:$0xff]  ;;  %v14669_v57 = vld [vmem:[#allocation93_spill] sm:$0xff] }
 0x44a   : > { %v7040_v22 = vsel %vm7024_vm2, 0.0, %v7039_v30  ;;  %vm7061_vm9 = vcmp.lt.f32.partialorder %v10541_v63, 0.0  ;;  %v7057_v13 = vsel %vm7043_vm6, nan, %v7056_v14  ;;  %vm7009_vm10 = vcmp.eq.f32.partialorder %v14639_v42, inf  ;;  %v14674_v7 = vld [vmem:[#allocation95_spill] sm:$0xff] }
 0x44b   : > { %v7075_v19 = vsel %vm7061_vm9, nan, %v7074_v6  ;;  %vm7027_vm12 = vcmp.eq.f32.partialorder %v14646_v48, inf  ;;  %3361 = vperm.xlu0 %7125, %v2330_v21   ;;  %3358 = vperm.xlu1 %7126, %v2329_v40   ;;  %v11373_v45 = vsel %vm7009_vm10, inf, %v7022_v1  ;;  %vm7042_vm14 = vcmp.eq.f32.partialorder %v10567_v39, 0.0  ;;  %v11385_v48 = vpop.permute.xlu1 %3172  ;;  %v14675_v21 = vld [vmem:[#allocation312_spill] sm:$0xff]  ;;  %v14701_v29 = vld [vmem:[#allocation227_spill] sm:$0xff] }
 0x44c   : > { %v11376_v31 = vsel %vm7027_vm12, inf, %v7040_v22  ;;  %vm7060_vm15 = vcmp.eq.f32.partialorder %v10541_v63, 0.0  ;;  %v2331_v33 = vmul.f32 %v11373_v45, %v14664_v15  ;;  %v7058_v8 = vsel %vm7042_vm14, 0.0, %v7057_v13  ;;  %v11383_v30 = vpop.permute.xlu0 %3175  ;;  %14667 = vst [vmem:[#allocation31_spill] sm:$0xff] %v11385_v48  ;;  %v14678_v15 = vld [vmem:[#allocation204_spill] sm:$0xff] }
 0x44d   : > { %v2332_v17 = vmul.f32 %v11376_v31, %v14665_v9  ;;  %v7076_v42 = vsel %vm7060_vm15, 0.0, %v7075_v19  ;;  %14666 = vst [vmem:[#allocation335_spill] sm:$0xff] %v11383_v30  ;;  %vm7045_vm1 = vcmp.eq.f32.partialorder %v14652_v28, inf  ;;  %vm7063_vm13 = vcmp.eq.f32.partialorder %v14654_v53, inf  ;;  %v14672_v28 = vld [vmem:[#allocation92_spill] sm:$0xff]  ;;  %v14673_v53 = vld [vmem:[#allocation313_spill] sm:$0xff] }
 0x44e   : > { %v11389_v39 = vsel %vm7045_vm1, inf, %v7058_v8  ;;  %v11391_v63 = vsel %vm7063_vm13, inf, %v7076_v42  ;;  %v2335_v1 = vmul.f32 %v14673_v53, %v14672_v28  ;;  %v2336_v22 = vmul.f32 %v14675_v21, %v14674_v7  ;;  %v14679_v8 = vld [vmem:[#allocation71_spill] sm:$0xff] }
 0x44f   : > { %3367 = vperm.xlu0 %7125, %v2332_v17   ;;  %3364 = vperm.xlu1 %7126, %v2331_v33   ;;  %v2333_v14 = vmul.f32 %v11389_v39, %v14668_v0  ;;  %v2334_v6 = vmul.f32 %v11391_v63, %v14669_v57  ;;  %v11399_v40 = vpop.permute.xlu1 %3178  ;;  %v2351_v33 = vmul.f32 %v11062_v43, %v14678_v15  ;;  %v14682_v0 = vld [vmem:[#allocation94_spill] sm:$0xff]  ;;  %vm13613_vm3 = vcmask 130112  }
 0x450   : > { %v11397_v62 = vpop.permute.xlu0 %3181  ;;  %14671 = vst [vmem:[#allocation36_spill] sm:$0xff] %v11399_v40  ;;  %v2352_v9 = vmul.f32 %v11100_v16, %v14679_v8  ;;  %v14688_v8 = vld [vmem:[#allocation134_spill] sm:$0xff]  ;;  %v2392_v30 = vmul.f32 %v11100_v16, %v14692_v23  ;;  %v2354_v48 = vmul.f32 %v11122_v35, %v14697_v52  ;;  %vm13612_vm5 = vcmask 195712  }
 0x451   : > { %14670 = vst [vmem:[#allocation28_spill] sm:$0xff] %v11397_v62  ;;  %v2376_v62 = vmul.f32 %v14675_v21, %v14688_v8  ;;  %v14696_v8 = vld [vmem:[#allocation338_spill] sm:$0xff]  ;;  %vm3760_vm0 = vcmask 261312   ;;  %vm3767_vm4 = vcmask 326912   ;;  %vm3774_vm7 = vcmask 392512  }
 0x452   : > { %vm3781_vm11 = vcmask 458112   ;;  %vm3788_vm8 = vcmask 523712   ;;  %vm13606_vm2 = vcmask 589312   ;;  %vm3802_vm6 = vcmask 654912  }
 0x453   : > { %3373 = vperm.xlu0 %7125, %v2334_v6   ;;  %3370 = vperm.xlu1 %7126, %v2333_v14   ;;  %v11407_v19 = vpop.permute.xlu1 %3184  ;;  %v14683_v14 = vld [vmem:[#allocation323_spill] sm:$0xff]  ;;  %v14684_v6 = vld [vmem:[#allocation72_spill] sm:$0xff]  ;;  %vm3809_vm9 = vcmask 720512   ;;  %vm3816_vm10 = vcmask 786112   ;;  %vm3823_vm12 = vcmask 851712   ;;  %vm3830_vm14 = vcmask 917312  }
 0x454   : > { %v11405_v13 = vpop.permute.xlu0 %3187  ;;  %14677 = vst [vmem:[#allocation48_spill] sm:$0xff] %v11407_v19  ;;  %v2337_v57 = vmul.f32 %v14683_v14, %v14682_v0  ;;  %v2353_v28 = vmul.f32 %v11066_v26, %v14684_v6  ;;  %v14691_v0 = vld [vmem:[#allocation221_spill] sm:$0xff]  ;;  %v11774_v19 = vmul.f32 %v10921_v60, %v14854_v24  ;;  %v14863_v24 = vld [vmem:[#allocation8_spill] sm:$0xff]  ;;  %vm13605_vm15 = vcmask 982912  }
 0x455   : > { %14676 = vst [vmem:[#allocation307_spill] sm:$0xff] %v11405_v13  ;;  %v2391_v6 = vmul.f32 %v11062_v43, %v14691_v0  ;;  %v14700_v0 = vld [vmem:[#allocation135_spill] sm:$0xff]  ;;  %vm13607_vm1 = vcmask 1048512   ;;  %vm13608_vm13 = vcmask 1041409  }
 0x456   : > { %v2377_v23 = vmul.f32 %v14683_v14, %v14700_v0  ;;  %v14708_v0 = vld [vmem:[#allocation248_spill] sm:$0xff] }
 0x457   : > { %3379 = vperm.xlu0 %7125, %v2336_v22   ;;  %3376 = vperm.xlu1 %7126, %v2335_v1   ;;  %v11415_v42 = vpop.permute.xlu1 %3190  ;;  %v14687_v22 = vld [vmem:[#allocation133_spill] sm:$0xff] }
 0x458   : > { %v11413_v17 = vpop.permute.xlu0 %3193  ;;  %14681 = vst [vmem:[#allocation302_spill] sm:$0xff] %v11415_v42  ;;  %v2375_v15 = vmul.f32 %v14673_v53, %v14687_v22  ;;  %v14695_v22 = vld [vmem:[#allocation97_spill] sm:$0xff] }
 0x459   : > { %14680 = vst [vmem:[#allocation226_spill] sm:$0xff] %v11413_v17  ;;  %v2338_v40 = vmul.f32 %v14696_v8, %v14695_v22  ;;  %v14704_v22 = vld [vmem:[#allocation181_spill] sm:$0xff]  ;;  %v14844_v17 = vld [vmem:[#allocation175_spill] sm:$0xff] }
 0x45a   : > { %v2415_v52 = vmul.f32 %v14673_v53, %v14704_v22  ;;  %v14712_v53 = vld [vmem:[#allocation96_spill] sm:$0xff]  ;;  %v14714_v22 = vld [vmem:[#allocation73_spill] sm:$0xff] }
 0x45b   : > { %3427 = vperm.xlu0 %7125, %v2352_v9   ;;  %3424 = vperm.xlu1 %7126, %v2351_v33   ;;  %v11423_v1 = vpop.permute.xlu1 %3196 }
 0x45c   : > { %v11421_v7 = vpop.permute.xlu0 %3199  ;;  %14686 = vst [vmem:[#allocation38_spill] sm:$0xff] %v11423_v1  ;;  %v14846_v1 = vld [vmem:[#allocation172_spill] sm:$0xff] }
 0x45d   : > { %14685 = vst [vmem:[#allocation33_spill] sm:$0xff] %v11421_v7  ;;  %v14838_v7 = vld [vmem:[#allocation167_spill] sm:$0xff] }
 0x45f   : > { %3430 = vperm.xlu0 %7125, %v2353_v28   ;;  %3382 = vperm.xlu1 %7126, %v2337_v57   ;;  %v11431_v33 = vpop.permute.xlu1 %3202 }
 0x460   : > { %v11429_v9 = vpop.permute.xlu0 %3205  ;;  %14690 = vst [vmem:[#allocation50_spill] sm:$0xff] %v11431_v33  ;;  %v14841_v33 = vld [vmem:[#allocation274_spill] sm:$0xff] }
 0x461   : > { %14689 = vst [vmem:[#allocation311_spill] sm:$0xff] %v11429_v9 }
 0x463   : > { %3499 = vperm.xlu0 %7125, %v2376_v62   ;;  %3496 = vperm.xlu1 %7126, %v2375_v15   ;;  %v11439_v57 = vpop.permute.xlu1 %3208 }
 0x464   : > { %v11437_v28 = vpop.permute.xlu0 %3211  ;;  %14694 = vst [vmem:[#allocation304_spill] sm:$0xff] %v11439_v57 }
 0x465   : > { %14693 = vst [vmem:[#allocation35_spill] sm:$0xff] %v11437_v28  ;;  %v2393_v28 = vmul.f32 %v11066_v26, %v14701_v29  ;;  %v2431_v29 = vmul.f32 %v11062_v43, %v14708_v0  ;;  %v14717_v43 = vld [vmem:[#allocation136_spill] sm:$0xff] }
 0x467   : > { %3547 = vperm.xlu0 %7125, %v2392_v30   ;;  %3544 = vperm.xlu1 %7126, %v2391_v6   ;;  %v11447_v15 = vpop.permute.xlu1 %3214 }
 0x468   : > { %v11445_v62 = vpop.permute.xlu0 %3217  ;;  %14699 = vst [vmem:[#allocation52_spill] sm:$0xff] %v11447_v15 }
 0x469   : > { %14698 = vst [vmem:[#allocation319_spill] sm:$0xff] %v11445_v62  ;;  %v14705_v62 = vld [vmem:[#allocation182_spill] sm:$0xff] }
 0x46a   : > { %v2416_v15 = vmul.f32 %v14675_v21, %v14705_v62  ;;  %v14713_v21 = vld [vmem:[#allocation46_spill] sm:$0xff] }
 0x46b   : > { %3433 = vperm.xlu0 %7125, %v2354_v48   ;;  %3385 = vperm.xlu1 %7126, %v2338_v40   ;;  %v11455_v6 = vpop.permute.xlu1 %3220  ;;  %v2339_v62 = vmul.f32 %v14713_v21, %v14712_v53  ;;  %v14721_v53 = vld [vmem:[#allocation185_spill] sm:$0xff] }
 0x46c   : > { %v11453_v30 = vpop.permute.xlu0 %3223  ;;  %14703 = vst [vmem:[#allocation37_spill] sm:$0xff] %v11455_v6 }
 0x46d   : > { %14702 = vst [vmem:[#allocation308_spill] sm:$0xff] %v11453_v30  ;;  %v14709_v30 = vld [vmem:[#allocation254_spill] sm:$0xff] }
 0x46e   : > { %v2432_v6 = vmul.f32 %v11100_v16, %v14709_v30  ;;  %v2378_v16 = vmul.f32 %v14696_v8, %v14717_v43  ;;  %v14718_v30 = vld [vmem:[#allocation83_spill] sm:$0xff] }
 0x46f   : > { %3550 = vperm.xlu0 %7125, %v2393_v28   ;;  %3502 = vperm.xlu1 %7126, %v2377_v23   ;;  %v11463_v40 = vpop.permute.xlu1 %3226  ;;  %v2394_v0 = vmul.f32 %v11122_v35, %v14718_v30  ;;  %v14725_v43 = vld [vmem:[#allocation99_spill] sm:$0xff]  ;;  %v14726_v30 = vld [vmem:[#allocation245_spill] sm:$0xff] }
 0x470   : > { %v11461_v48 = vpop.permute.xlu0 %3229  ;;  %14707 = vst [vmem:[#allocation187_spill] sm:$0xff] %v11463_v40  ;;  %v14722_v40 = vld [vmem:[#allocation259_spill] sm:$0xff] }
 0x471   : > { %14706 = vst [vmem:[#allocation40_spill] sm:$0xff] %v11461_v48  ;;  %v2355_v48 = vmul.f32 %v11114_v3, %v14714_v22  ;;  %v2417_v22 = vmul.f32 %v14683_v14, %v14721_v53  ;;  %v14730_v14 = vld [vmem:[#allocation137_spill] sm:$0xff] }
 0x473   : > { %3619 = vperm.xlu0 %7125, %v2416_v15   ;;  %3616 = vperm.xlu1 %7126, %v2415_v52   ;;  %v11471_v23 = vpop.permute.xlu1 %3232 }
 0x474   : > { %v11469_v28 = vpop.permute.xlu0 %3235  ;;  %14711 = vst [vmem:[#allocation316_spill] sm:$0xff] %v11471_v23 }
 0x475   : > { %14710 = vst [vmem:[#allocation179_spill] sm:$0xff] %v11469_v28  ;;  %v2340_v28 = vmul.f32 %v14726_v30, %v14725_v43  ;;  %v14734_v43 = vld [vmem:[#allocation186_spill] sm:$0xff] }
 0x477   : > { %3667 = vperm.xlu0 %7125, %v2432_v6   ;;  %3664 = vperm.xlu1 %7126, %v2431_v29   ;;  %v11479_v52 = vpop.permute.xlu1 %3238 }
 0x478   : > { %v11477_v15 = vpop.permute.xlu0 %3241  ;;  %14716 = vst [vmem:[#allocation324_spill] sm:$0xff] %v11479_v52 }
 0x479   : > { %14715 = vst [vmem:[#allocation39_spill] sm:$0xff] %v11477_v15  ;;  %v2433_v15 = vmul.f32 %v11066_v26, %v14722_v40  ;;  %v2379_v26 = vmul.f32 %v14713_v21, %v14730_v14  ;;  %v14731_v40 = vld [vmem:[#allocation224_spill] sm:$0xff]  ;;  %v14738_v14 = vld [vmem:[#allocation98_spill] sm:$0xff] }
 0x47a   : > { %v2395_v53 = vmul.f32 %v11114_v3, %v14731_v40  ;;  %v14739_v40 = vld [vmem:[#allocation198_spill] sm:$0xff] }
 0x47b   : > { %3436 = vperm.xlu0 %7125, %v2355_v48   ;;  %3388 = vperm.xlu1 %7126, %v2339_v62   ;;  %v11487_v29 = vpop.permute.xlu1 %3244 }
 0x47c   : > { %v11485_v6 = vpop.permute.xlu0 %3247  ;;  %14720 = vst [vmem:[#allocation183_spill] sm:$0xff] %v11487_v29 }
 0x47d   : > { %14719 = vst [vmem:[#allocation42_spill] sm:$0xff] %v11485_v6  ;;  %v14727_v6 = vld [vmem:[#allocation210_spill] sm:$0xff] }
 0x47e   : > { %v2356_v29 = vmul.f32 %v11156_v34, %v14727_v6  ;;  %v2418_v6 = vmul.f32 %v14696_v8, %v14734_v43  ;;  %v14743_v8 = vld [vmem:[#allocation138_spill] sm:$0xff] }
 0x47f   : > { %3553 = vperm.xlu0 %7125, %v2394_v0   ;;  %3505 = vperm.xlu1 %7126, %v2378_v16   ;;  %v11495_v62 = vpop.permute.xlu1 %3250 }
 0x480   : > { %v11493_v48 = vpop.permute.xlu0 %3253  ;;  %14724 = vst [vmem:[#allocation41_spill] sm:$0xff] %v11495_v62 }
 0x481   : > { %14723 = vst [vmem:[#allocation269_spill] sm:$0xff] %v11493_v48  ;;  %v2341_v48 = vmul.f32 %v14739_v40, %v14738_v14  ;;  %v14747_v14 = vld [vmem:[#allocation191_spill] sm:$0xff] }
 0x483   : > { %3670 = vperm.xlu0 %7125, %v2433_v15   ;;  %3622 = vperm.xlu1 %7126, %v2417_v22   ;;  %v11503_v16 = vpop.permute.xlu1 %3256 }
 0x484   : > { %v11501_v0 = vpop.permute.xlu0 %3259  ;;  %14729 = vst [vmem:[#allocation197_spill] sm:$0xff] %v11503_v16 }
 0x485   : > { %14728 = vst [vmem:[#allocation322_spill] sm:$0xff] %v11501_v0  ;;  %v14735_v0 = vld [vmem:[#allocation251_spill] sm:$0xff] }
 0x486   : > { %v2434_v16 = vmul.f32 %v11122_v35, %v14735_v0  ;;  %v2380_v35 = vmul.f32 %v14726_v30, %v14743_v8  ;;  %v14744_v0 = vld [vmem:[#allocation231_spill] sm:$0xff]  ;;  %v14751_v8 = vld [vmem:[#allocation101_spill] sm:$0xff] }
 0x487   : > { %3439 = vperm.xlu0 %7125, %v2356_v29   ;;  %3391 = vperm.xlu1 %7126, %v2340_v28   ;;  %v2396_v43 = vmul.f32 %v11156_v34, %v14744_v0  ;;  %v14752_v0 = vld [vmem:[#allocation17_spill] sm:$0xff] }
 0x488   : > { %v11509_v15 = vpop.permute.xlu0 %3265  ;;  %v11511_v22 = vpop.permute.xlu1 %3262 }
 0x489   : > { %14732 = vst [vmem:[#allocation271_spill] sm:$0xff] %v11509_v15  ;;  %14733 = vst [vmem:[#allocation328_spill] sm:$0xff] %v11511_v22  ;;  %v14740_v15 = vld [vmem:[#allocation75_spill] sm:$0xff] }
 0x48a   : > { %v2357_v22 = vmul.f32 %v11138_v58, %v14740_v15  ;;  %v2419_v15 = vmul.f32 %v14713_v21, %v14747_v14  ;;  %v14756_v21 = vld [vmem:[#allocation139_spill] sm:$0xff] }
 0x48b   : > { %3556 = vperm.xlu0 %7125, %v2395_v53   ;;  %3508 = vperm.xlu1 %7126, %v2379_v26  }
 0x48c   : > { %v11517_v29 = vpop.permute.xlu0 %3271  ;;  %v11519_v28 = vpop.permute.xlu1 %3268 }
 0x48d   : > { %14736 = vst [vmem:[#allocation44_spill] sm:$0xff] %v11517_v29  ;;  %14737 = vst [vmem:[#allocation43_spill] sm:$0xff] %v11519_v28 }
 0x48f   : > { %3673 = vperm.xlu0 %7125, %v2434_v16   ;;  %3625 = vperm.xlu1 %7126, %v2418_v6  }
 0x490   : > { %v11525_v53 = vpop.permute.xlu0 %3277  ;;  %v11527_v26 = vpop.permute.xlu1 %3274 }
 0x491   : > { %14741 = vst [vmem:[#allocation327_spill] sm:$0xff] %v11525_v53  ;;  %14742 = vst [vmem:[#allocation157_spill] sm:$0xff] %v11527_v26  ;;  %v14748_v53 = vld [vmem:[#allocation263_spill] sm:$0xff]  ;;  %v2342_v26 = vmul.f32 %v14752_v0, %v14751_v8  ;;  %v14760_v8 = vld [vmem:[#allocation192_spill] sm:$0xff] }
 0x492   : > { %v2435_v29 = vmul.f32 %v11114_v3, %v14748_v53  ;;  %v2381_v3 = vmul.f32 %v14739_v40, %v14756_v21  ;;  %v14757_v53 = vld [vmem:[#allocation222_spill] sm:$0xff]  ;;  %v14764_v21 = vld [vmem:[#allocation100_spill] sm:$0xff] }
 0x493   : > { %3442 = vperm.xlu0 %7125, %v2357_v22   ;;  %3394 = vperm.xlu1 %7126, %v2341_v48   ;;  %v2397_v14 = vmul.f32 %v11138_v58, %v14757_v53  ;;  %v14765_v53 = vld [vmem:[#allocation54_spill] sm:$0xff] }
 0x494   : > { %v11533_v16 = vpop.permute.xlu0 %3283  ;;  %v11535_v6 = vpop.permute.xlu1 %3280 }
 0x495   : > { %14745 = vst [vmem:[#allocation239_spill] sm:$0xff] %v11533_v16  ;;  %14746 = vst [vmem:[#allocation199_spill] sm:$0xff] %v11535_v6  ;;  %v14753_v16 = vld [vmem:[#allocation215_spill] sm:$0xff] }
 0x496   : > { %v2358_v6 = vmul.f32 %v11187_v2, %v14753_v16  ;;  %v2420_v16 = vmul.f32 %v14726_v30, %v14760_v8  ;;  %v14769_v30 = vld [vmem:[#allocation140_spill] sm:$0xff] }
 0x497   : > { %3559 = vperm.xlu0 %7125, %v2396_v43   ;;  %3511 = vperm.xlu1 %7126, %v2380_v35  }
 0x498   : > { %v11541_v22 = vpop.permute.xlu0 %3289  ;;  %v11543_v48 = vpop.permute.xlu1 %3286 }
 0x499   : > { %14749 = vst [vmem:[#allocation332_spill] sm:$0xff] %v11541_v22  ;;  %14750 = vst [vmem:[#allocation329_spill] sm:$0xff] %v11543_v48  ;;  %v14774_v48 = vld [vmem:[#allocation188_spill] sm:$0xff] }
 0x49b   : > { %3676 = vperm.xlu0 %7125, %v2435_v29   ;;  %3628 = vperm.xlu1 %7126, %v2419_v15  }
 0x49c   : > { %v11549_v43 = vpop.permute.xlu0 %3295  ;;  %v11551_v35 = vpop.permute.xlu1 %3292 }
 0x49d   : > { %14754 = vst [vmem:[#allocation202_spill] sm:$0xff] %v11549_v43  ;;  %14755 = vst [vmem:[#allocation189_spill] sm:$0xff] %v11551_v35  ;;  %v14761_v43 = vld [vmem:[#allocation256_spill] sm:$0xff]  ;;  %v2343_v35 = vmul.f32 %v14765_v53, %v14764_v21  ;;  %v14773_v21 = vld [vmem:[#allocation195_spill] sm:$0xff] }
 0x49e   : > { %v2436_v22 = vmul.f32 %v11156_v34, %v14761_v43  ;;  %v2382_v34 = vmul.f32 %v14752_v0, %v14769_v30  ;;  %v14770_v43 = vld [vmem:[#allocation85_spill] sm:$0xff]  ;;  %v14777_v30 = vld [vmem:[#allocation103_spill] sm:$0xff] }
 0x49f   : > { %3445 = vperm.xlu0 %7125, %v2358_v6   ;;  %3397 = vperm.xlu1 %7126, %v2342_v26   ;;  %v2398_v8 = vmul.f32 %v11187_v2, %v14770_v43  ;;  %v14778_v43 = vld [vmem:[#allocation252_spill] sm:$0xff] }
 0x4a0   : > { %v11557_v29 = vpop.permute.xlu0 %3301  ;;  %v11559_v15 = vpop.permute.xlu1 %3298 }
 0x4a1   : > { %14758 = vst [vmem:[#allocation174_spill] sm:$0xff] %v11557_v29  ;;  %14759 = vst [vmem:[#allocation68_spill] sm:$0xff] %v11559_v15  ;;  %v14766_v29 = vld [vmem:[#allocation11_spill] sm:$0xff] }
 0x4a2   : > { %v2359_v15 = vmul.f32 %v11163_v11, %v14766_v29  ;;  %v2421_v29 = vmul.f32 %v14739_v40, %v14773_v21  ;;  %v14782_v40 = vld [vmem:[#allocation141_spill] sm:$0xff] }
 0x4a3   : > { %3562 = vperm.xlu0 %7125, %v2397_v14   ;;  %3514 = vperm.xlu1 %7126, %v2381_v3  }
 0x4a4   : > { %v11565_v6 = vpop.permute.xlu0 %3307  ;;  %v11567_v26 = vpop.permute.xlu1 %3304 }
 0x4a5   : > { %14762 = vst [vmem:[#allocation334_spill] sm:$0xff] %v11565_v6  ;;  %14763 = vst [vmem:[#allocation336_spill] sm:$0xff] %v11567_v26  ;;  %v2344_v6 = vmul.f32 %v14778_v43, %v14777_v30  ;;  %v14786_v30 = vld [vmem:[#allocation196_spill] sm:$0xff] }
 0x4a7   : > { %3679 = vperm.xlu0 %7125, %v2436_v22   ;;  %3631 = vperm.xlu1 %7126, %v2420_v16  }
 0x4a8   : > { %v11573_v14 = vpop.permute.xlu0 %3313  ;;  %v11575_v3 = vpop.permute.xlu1 %3310 }
 0x4a9   : > { %14767 = vst [vmem:[#allocation47_spill] sm:$0xff] %v11573_v14  ;;  %14768 = vst [vmem:[#allocation206_spill] sm:$0xff] %v11575_v3  ;;  %v2437_v14 = vmul.f32 %v11138_v58, %v14774_v48  ;;  %v2383_v58 = vmul.f32 %v14765_v53, %v14782_v40  ;;  %v14783_v48 = vld [vmem:[#allocation265_spill] sm:$0xff]  ;;  %v14790_v40 = vld [vmem:[#allocation102_spill] sm:$0xff] }
 0x4aa   : > { %v2399_v21 = vmul.f32 %v11163_v11, %v14783_v48  ;;  %v14791_v48 = vld [vmem:[#allocation250_spill] sm:$0xff] }
 0x4ab   : > { %3448 = vperm.xlu0 %7125, %v2359_v15   ;;  %3400 = vperm.xlu1 %7126, %v2343_v35  }
 0x4ac   : > { %v11581_v22 = vpop.permute.xlu0 %3319  ;;  %v11583_v16 = vpop.permute.xlu1 %3316 }
 0x4ad   : > { %14771 = vst [vmem:[#allocation194_spill] sm:$0xff] %v11581_v22  ;;  %14772 = vst [vmem:[#allocation51_spill] sm:$0xff] %v11583_v16  ;;  %v14779_v22 = vld [vmem:[#allocation77_spill] sm:$0xff] }
 0x4ae   : > { %v2360_v16 = vmul.f32 %v11233_v47, %v14779_v22  ;;  %v2422_v22 = vmul.f32 %v14752_v0, %v14786_v30  ;;  %v14795_v0 = vld [vmem:[#allocation142_spill] sm:$0xff] }
 0x4af   : > { %3565 = vperm.xlu0 %7125, %v2398_v8   ;;  %3517 = vperm.xlu1 %7126, %v2382_v34  }
 0x4b0   : > { %v11591_v35 = vpop.permute.xlu1 %3322 }
 0x4b1   : > { %v11589_v15 = vpop.permute.xlu0 %3325  ;;  %14776 = vst [vmem:[#allocation70_spill] sm:$0xff] %v11591_v35  ;;  %v14816_v35 = vld [vmem:[#allocation127_spill] sm:$0xff] }
 0x4b2   : > { %14775 = vst [vmem:[#allocation212_spill] sm:$0xff] %v11589_v15 }
 0x4b3   : > { %3682 = vperm.xlu0 %7125, %v2437_v14   ;;  %3634 = vperm.xlu1 %7126, %v2421_v29  }
 0x4b5   : > { %v11597_v8 = vpop.permute.xlu0 %3331  ;;  %v11599_v34 = vpop.permute.xlu1 %3328 }
 0x4b6   : > { %14780 = vst [vmem:[#allocation211_spill] sm:$0xff] %v11597_v8  ;;  %14781 = vst [vmem:[#allocation337_spill] sm:$0xff] %v11599_v34  ;;  %v14787_v8 = vld [vmem:[#allocation143_spill] sm:$0xff]  ;;  %v2345_v34 = vmul.f32 %v14791_v48, %v14790_v40  ;;  %v14799_v40 = vld [vmem:[#allocation200_spill] sm:$0xff] }
 0x4b7   : > { %3451 = vperm.xlu0 %7125, %v2360_v16   ;;  %3403 = vperm.xlu1 %7126, %v2344_v6   ;;  %v2438_v15 = vmul.f32 %v11187_v2, %v14787_v8  ;;  %v2384_v2 = vmul.f32 %v14778_v43, %v14795_v0  ;;  %v14796_v8 = vld [vmem:[#allocation230_spill] sm:$0xff]  ;;  %v14803_v0 = vld [vmem:[#allocation105_spill] sm:$0xff] }
 0x4b8   : > { %v2400_v30 = vmul.f32 %v11233_v47, %v14796_v8  ;;  %v2346_v8 = vmul.f32 %v10921_v60, %v14803_v0 }
 0x4b9   : > { %v11605_v14 = vpop.permute.xlu0 %3337  ;;  %v11607_v29 = vpop.permute.xlu1 %3334 }
 0x4ba   : > { %14784 = vst [vmem:[#allocation87_spill] sm:$0xff] %v11605_v14  ;;  %14785 = vst [vmem:[#allocation86_spill] sm:$0xff] %v11607_v29  ;;  %v14792_v14 = vld [vmem:[#allocation240_spill] sm:$0xff] }
 0x4bb   : > { %3568 = vperm.xlu0 %7125, %v2399_v21   ;;  %3520 = vperm.xlu1 %7126, %v2383_v58   ;;  %v2361_v29 = vmul.f32 %v11252_v5, %v14792_v14  ;;  %v2423_v14 = vmul.f32 %v14765_v53, %v14799_v40  ;;  %v14807_v53 = vld [vmem:[#allocation104_spill] sm:$0xff] }
 0x4bc   : > { %v11651_v40 = vmul.f32 %v10901_v32, %v14807_v53  ;;  %v11669_v53 = vmul.f32 %v11343_v55, %v14816_v35  ;;  %v14824_v35 = vld [vmem:[#allocation132_spill] sm:$0xff] }
 0x4bd   : > { %v11613_v16 = vpop.permute.xlu0 %3343  ;;  %v11615_v6 = vpop.permute.xlu1 %3340  ;;  %v11691_v52 = vmul.f32 %v11391_v63, %v14824_v35  ;;  %v14832_v35 = vlaneseq }
 0x4be   : > { %14788 = vst [vmem:[#allocation89_spill] sm:$0xff] %v11613_v16  ;;  %14789 = vst [vmem:[#allocation88_spill] sm:$0xff] %v11615_v6 }
 0x4bf   : > { %3685 = vperm.xlu0 %7125, %v2438_v15   ;;  %3637 = vperm.xlu1 %7126, %v2422_v22   ;;  %14825 = vst [vmem:[#allocation323_spill] sm:$0xff] %v11691_v52  ;;  %v11712_v37 = vand.u32 127, %v14832_v35  ;;  %v14839_v35 = vld [vmem:[#allocation168_spill] sm:$0xff]  ;;  %v14876_v52 = vld [vmem:[#allocation10_spill] sm:$0xff] }
 0x4c1   : > { %v3741_v61 = vadd.s32 4294967288, %v11712_v37 }
 0x4c2   : > { %v11621_v21 = vpop.permute.xlu0 %3349  ;;  %v11623_v58 = vpop.permute.xlu1 %3346 }
 0x4c3   : > { %14793 = vst [vmem:[#allocation91_spill] sm:$0xff] %v11621_v21  ;;  %14794 = vst [vmem:[#allocation90_spill] sm:$0xff] %v11623_v58  ;;  %3454 = vperm.xlu0 %7125, %v2361_v29   ;;  %3406 = vperm.xlu1 %7126, %v2345_v34   ;;  %v14800_v21 = vld [vmem:[#allocation193_spill] sm:$0xff] }
 0x4c4   : > { %v2439_v16 = vmul.f32 %v11163_v11, %v14800_v21  ;;  %v14808_v11 = vld [vmem:[#allocation106_spill] sm:$0xff] }
 0x4c5   : > { %v14809_v21 = vld [vmem:[#allocation170_spill] sm:$0xff] }
 0x4c6   : > { %v11629_v15 = vpop.permute.xlu0 %3355  ;;  %v11631_v22 = vpop.permute.xlu1 %3352 }
 0x4c7   : > { %14797 = vst [vmem:[#allocation93_spill] sm:$0xff] %v11629_v15  ;;  %14798 = vst [vmem:[#allocation92_spill] sm:$0xff] %v11631_v22  ;;  %3571 = vperm.xlu0 %7125, %v2400_v30   ;;  %3523 = vperm.xlu1 %7126, %v2384_v2   ;;  %v14804_v15 = vld [vmem:[#allocation223_spill] sm:$0xff] }
 0x4c8   : > { %v2362_v22 = vmul.f32 %v11255_v38, %v14804_v15  ;;  %v14813_v15 = vld [vmem:[#allocation57_spill] sm:$0xff] }
 0x4ca   : > { %v11637_v29 = vpop.permute.xlu0 %3361  ;;  %v11639_v34 = vpop.permute.xlu1 %3358 }
 0x4cb   : > { %14801 = vst [vmem:[#allocation313_spill] sm:$0xff] %v11637_v29  ;;  %14802 = vst [vmem:[#allocation95_spill] sm:$0xff] %v11639_v34  ;;  %3688 = vperm.xlu0 %7125, %v2439_v16   ;;  %3640 = vperm.xlu1 %7126, %v2423_v14   ;;  %v11655_v16 = vmul.f32 %v14809_v21, %v14808_v11  ;;  %v14810_v14 = vld [vmem:[#allocation107_spill] sm:$0xff]  ;;  %v14811_v29 = vld [vmem:[#allocation273_spill] sm:$0xff] }
 0x4cc   : > { %v11659_v0 = vmul.f32 %v14811_v29, %v14810_v14  ;;  %v14812_v34 = vld [vmem:[#allocation109_spill] sm:$0xff]  ;;  %v14819_v14 = vld [vmem:[#allocation128_spill] sm:$0xff] }
 0x4cd   : > { %v11663_v58 = vmul.f32 %v14813_v15, %v14812_v34  ;;  %v14818_v11 = vld [vmem:[#allocation129_spill] sm:$0xff]  ;;  %v11679_v28 = vmul.f32 %v11360_v12, %v14819_v14  ;;  %v14820_v34 = vld [vmem:[#allocation131_spill] sm:$0xff]  ;;  %v14829_v14 = vld [vmem:[#allocation146_spill] sm:$0xff] }
 0x4ce   : > { %v11645_v30 = vpop.permute.xlu0 %3367  ;;  %v11647_v2 = vpop.permute.xlu1 %3364  ;;  %v11675_v3 = vmul.f32 %v11373_v45, %v14818_v11  ;;  %v11683_v26 = vmul.f32 %v11389_v39, %v14820_v34  ;;  %v11701_v18 = vmul.f32 %v10901_v32, %v14829_v14  ;;  %v14830_v34 = vld [vmem:[#allocation145_spill] sm:$0xff] }
 0x4cf   : > { %14805 = vst [vmem:[#allocation312_spill] sm:$0xff] %v11645_v30  ;;  %14806 = vst [vmem:[#allocation204_spill] sm:$0xff] %v11647_v2  ;;  %3457 = vperm.xlu0 %7125, %v2362_v22   ;;  %3409 = vperm.xlu1 %7126, %v2346_v8   ;;  %v14814_v30 = vld [vmem:[#allocation125_spill] sm:$0xff]  ;;  %v14815_v2 = vld [vmem:[#allocation58_spill] sm:$0xff]  ;;  %v11705_v9 = vmul.f32 %v10921_v60, %v14830_v34 }
 0x4d0   : > { %v2367_v6 = vmul.f32 %v14815_v2, %v14814_v30  ;;  %v14817_v22 = vld [vmem:[#allocation126_spill] sm:$0xff]  ;;  %14821 = vst [vmem:[#allocation71_spill] sm:$0xff] %v11683_v26  ;;  %v11724_v34 = vmul.f32 %v14815_v2, %v14837_v46  ;;  %v11743_v46 = vmul.f32 %v11373_v45, %v14842_v10  ;;  %v14851_v10 = vld [vmem:[#allocation207_spill] sm:$0xff]  ;;  %v14890_v26 = vld [vmem:[#allocation121_spill] sm:$0xff] }
 0x4d1   : > { %v2368_v8 = vmul.f32 %v11331_v41, %v14817_v22  ;;  %v14822_v30 = vld [vmem:[#allocation130_spill] sm:$0xff]  ;;  %v14826_v22 = vld [vmem:[#allocation144_spill] sm:$0xff]  ;;  %v11764_v13 = vmul.f32 %v14791_v48, %v14851_v10  ;;  %v14859_v10 = vld [vmem:[#allocation219_spill] sm:$0xff] }
 0x4d2   : > { %v11687_v62 = vmul.f32 %v11376_v31, %v14822_v30  ;;  %v2385_v11 = vmul.f32 %v14791_v48, %v14826_v22  ;;  %v11695_v23 = vpop.permute.xlu0 %3373  ;;  %v11697_v49 = vpop.permute.xlu1 %3370  ;;  %v14831_v30 = vld [vmem:[#allocation147_spill] sm:$0xff]  ;;  %v14833_v22 = vld [vmem:[#allocation148_spill] sm:$0xff]  ;;  %14843 = vst [vmem:[#allocation81_spill] sm:$0xff] %v11743_v46 }
 0x4d3   : > { %14827 = vst [vmem:[#allocation72_spill] sm:$0xff] %v11695_v23  ;;  %14828 = vst [vmem:[#allocation133_spill] sm:$0xff] %v11697_v49  ;;  %v11709_v57 = vmul.f32 %v14811_v29, %v14831_v30  ;;  %3475 = vperm.xlu0 %7125, %v2368_v8   ;;  %3472 = vperm.xlu1 %7126, %v2367_v6   ;;  %v11716_v23 = vmul.f32 %v14809_v21, %v14833_v22  ;;  %v14835_v49 = vld [vmem:[#allocation149_spill] sm:$0xff] }
 0x4d4   : > { %14823 = vst [vmem:[#allocation94_spill] sm:$0xff] %v11687_v62  ;;  %v11720_v14 = vmul.f32 %v14813_v15, %v14835_v49  ;;  %v11728_v30 = vmul.f32 %v11331_v41, %v14838_v7  ;;  %v11732_v8 = vmul.f32 %v11343_v55, %v14839_v35  ;;  %v14840_v6 = vld [vmem:[#allocation169_spill] sm:$0xff]  ;;  %v2401_v49 = vmul.f32 %v11252_v5, %v14841_v33  ;;  %v14849_v33 = vld [vmem:[#allocation176_spill] sm:$0xff] }
 0x4d5   : > { %14834 = vst [vmem:[#allocation134_spill] sm:$0xff] %v11716_v23  ;;  %v11736_v22 = vmul.f32 %v11360_v12, %v14840_v6  ;;  %v11747_v7 = vmul.f32 %v11389_v39, %v14844_v17  ;;  %v11751_v35 = vmul.f32 %v11376_v31, %v14846_v1  ;;  %v3748_v6 = vadd.s32 4294967280, %v11712_v37  ;;  %v14852_v17 = vld [vmem:[#allocation201_spill] sm:$0xff] }
 0x4d6   : > { %14836 = vst [vmem:[#allocation221_spill] sm:$0xff] %v11720_v14  ;;  %v11754_v51 = vpop.permute.xlu0 %3379  ;;  %v11756_v27 = vpop.permute.xlu1 %3376  ;;  %v11760_v56 = vmul.f32 %v11391_v63, %v14849_v33  ;;  %v2424_v42 = vmul.f32 %v14778_v43, %v14852_v17  ;;  %v14853_v1 = vld [vmem:[#allocation213_spill] sm:$0xff]  ;;  %v11778_v33 = vmul.f32 %v14809_v21, %v14855_v36  ;;  %v11786_v43 = vmul.f32 %v14813_v15, %v14859_v10  ;;  %v14864_v36 = vld [vmem:[#allocation260_spill] sm:$0xff]  ;;  %v14889_v14 = vld [vmem:[#allocation275_spill] sm:$0xff] }
 0x4d7   : > { %14845 = vst [vmem:[#allocation97_spill] sm:$0xff] %v11747_v7  ;;  %14847 = vst [vmem:[#allocation338_spill] sm:$0xff] %v11751_v35  ;;  %3574 = vperm.xlu0 %7125, %v2401_v49   ;;  %3526 = vperm.xlu1 %7126, %v2385_v11   ;;  %v11770_v25 = vmul.f32 %v10901_v32, %v14853_v1  ;;  %v14861_v11 = vld [vmem:[#allocation178_spill] sm:$0xff]  ;;  %v14862_v49 = vld [vmem:[#allocation268_spill] sm:$0xff]  ;;  %v11795_v17 = vsub.s32 %v3741_v61, %v14863_v24  ;;  %v3762_v15 = vadd.s32 4294967264, %v11712_v37 }
 0x4d8   : > { %14848 = vst [vmem:[#allocation237_spill] sm:$0xff] %v11754_v51  ;;  %14850 = vst [vmem:[#allocation135_spill] sm:$0xff] %v11760_v56  ;;  %v14857_v56 = vld [vmem:[#allocation214_spill] sm:$0xff]  ;;  %v11790_v32 = vmul.f32 %v14815_v2, %v14861_v11  ;;  %v2440_v60 = vmul.f32 %v11233_v47, %v14862_v49  ;;  %v11799_v21 = vmul.f32 %v11331_v41, %v14864_v36  ;;  %v14865_v10 = vld [vmem:[#allocation261_spill] sm:$0xff] }
 0x4d9   : > { %14856 = vst [vmem:[#allocation227_spill] sm:$0xff] %v11778_v33  ;;  %v11782_v48 = vmul.f32 %v14811_v29, %v14857_v56  ;;  %14860 = vst [vmem:[#allocation182_spill] sm:$0xff] %v11786_v43  ;;  %v3755_v56 = vadd.s32 4294967272, %v11712_v37  ;;  %v11803_v29 = vsub.s32 %v3748_v6, %v14863_v24  ;;  %v11812_v47 = vmul.f32 %v11343_v55, %v14865_v10  ;;  %v14866_v61 = vld [vmem:[#allocation262_spill] sm:$0xff]  ;;  %v14868_v49 = vld [vmem:[#allocation180_spill] sm:$0xff] }
 0x4da   : > { %v11806_v1 = vpop.permute.xlu0 %3427  ;;  %v11808_v2 = vpop.permute.xlu1 %3424  ;;  %v11816_v11 = vmul.f32 %v11360_v12, %v14866_v61  ;;  %v11820_v41 = vsub.s32 %v11712_v37, %v14863_v24  ;;  %v3769_v6 = vadd.s32 4294967256, %v11712_v37  ;;  %v11825_v36 = vmul.f32 %v11373_v45, %v14868_v49  ;;  %v14870_v43 = vld [vmem:[#allocation177_spill] sm:$0xff]  ;;  %v14872_v10 = vld [vmem:[#allocation266_spill] sm:$0xff]  ;;  %v14874_v61 = vld [vmem:[#allocation267_spill] sm:$0xff] }
 0x4db   : > { %14858 = vst [vmem:[#allocation181_spill] sm:$0xff] %v11782_v48  ;;  %3691 = vperm.xlu0 %7125, %v2440_v60   ;;  %3643 = vperm.xlu1 %7126, %v2424_v42   ;;  %v11829_v55 = vmul.f32 %v11389_v39, %v14870_v43  ;;  %v11833_v12 = vmul.f32 %v11376_v31, %v14872_v10  ;;  %v14877_v42 = vld [vmem:[#allocation114_spill] sm:$0xff]  ;;  %v3783_v49 = vadd.s32 4294967240, %v11712_v37  ;;  %v14878_v43 = vld [vmem:[#allocation117_spill] sm:$0xff]  ;;  %v3839_v48 = vadd.s32 4294967176, %v11712_v37 }
 0x4dc   : > { %14867 = vst [vmem:[#allocation248_spill] sm:$0xff] %v11816_v11  ;;  %14869 = vst [vmem:[#allocation254_spill] sm:$0xff] %v11825_v36  ;;  %v11837_v44 = vmul.f32 %v11391_v63, %v14874_v61  ;;  %v2363_v60 = vmul.f32 %v11277_v20, %v14876_v52  ;;  %v3745_v45 = vrot.slane %v14877_v42, %v11795_v17  ;;  %v3776_v63 = vadd.s32 4294967248, %v11712_v37  ;;  %v14882_v36 = vld [vmem:[#allocation286_spill] sm:$0xff] }
 0x4dd   : > { %14871 = vst [vmem:[#allocation96_spill] sm:$0xff] %v11829_v55  ;;  %14873 = vst [vmem:[#allocation46_spill] sm:$0xff] %v11833_v12  ;;  %v11845_v39 = vsub.s32 %v3755_v56, %v14863_v24  ;;  %v3752_v31 = vrot.slane %v14878_v43, %v11803_v29  ;;  %v11850_v10 = vsub.s32 %v3762_v15, %v14863_v24  ;;  %v14880_v55 = vld [vmem:[#allocation115_spill] sm:$0xff]  ;;  %v3797_v56 = vadd.s32 4294967224, %v11712_v37 }
 0x4de   : > { %14875 = vst [vmem:[#allocation73_spill] sm:$0xff] %v11837_v44  ;;  %v11853_v61 = vpop.permute.xlu0 %3430  ;;  %v11855_v52 = vpop.permute.xlu1 %3382  ;;  %v3740_v42 = vrot.slane %v14880_v55, %v11820_v41  ;;  %v11860_v44 = vsub.s32 %v3769_v6, %v14863_v24  ;;  %v3790_v15 = vadd.s32 4294967232, %v11712_v37  ;;  %v3811_v43 = vadd.s32 4294967208, %v11712_v37  ;;  %v14881_v55 = vld [vmem:[#allocation119_spill] sm:$0xff] }
 0x4df   : > { %14879 = vst [vmem:[#allocation136_spill] sm:$0xff] %v11855_v52  ;;  %3460 = vperm.xlu0 %7125, %v2363_v60   ;;  %3412 = vperm.xlu1 %7126, %v11651_v40   ;;  %v11868_v7 = vsub.s32 %v3783_v49, %v14863_v24  ;;  %v3766_v60 = vrot.slane %v14881_v55, %v11850_v10  ;;  %v3804_v55 = vadd.s32 4294967216, %v11712_v37 }
 0x4e0   : > { %v3747_v12 = vsel %vm13613_vm3, %v3745_v45, %v3740_v42  ;;  %v11874_v40 = vsub.s32 %v3776_v63, %v14863_v24  ;;  %v3849_v59 = vrot.slane %v14882_v36, %v11820_v41  ;;  %v14885_v45 = vld [vmem:[#allocation116_spill] sm:$0xff]  ;;  %v11885_v42 = vsub.s32 %v3797_v56, %v14863_v24 }
 0x4e1   : > { %v3754_v6 = vsel %vm13612_vm5, %v3752_v31, %v3747_v12  ;;  %v3759_v49 = vrot.slane %v14885_v45, %v11845_v39  ;;  %v14886_v12 = vld [vmem:[#allocation288_spill] sm:$0xff]  ;;  %v11892_v36 = vsub.s32 %v3790_v15, %v14863_v24  ;;  %v11895_v63 = vsub.s32 %v3811_v43, %v14863_v24  ;;  %v14888_v45 = vld [vmem:[#allocation285_spill] sm:$0xff] }
 0x4e2   : > { %v11878_v35 = vpop.permute.xlu0 %3499  ;;  %v11880_v33 = vpop.permute.xlu1 %3496  ;;  %v3858_v31 = vrot.slane %v14886_v12, %v11803_v29  ;;  %v3853_v56 = vrot.slane %v14888_v45, %v11795_v17  ;;  %v2402_v11 = vmul.f32 %v11255_v38, %v14889_v14  ;;  %v3780_v43 = vrot.slane %v14890_v26, %v11874_v40  ;;  %v14893_v14 = vld [vmem:[#allocation118_spill] sm:$0xff]  ;;  %v14895_v26 = vld [vmem:[#allocation287_spill] sm:$0xff] }
 0x4e3   : > { %14883 = vst [vmem:[#allocation83_spill] sm:$0xff] %v11878_v35  ;;  %14884 = vst [vmem:[#allocation185_spill] sm:$0xff] %v11880_v33  ;;  %3529 = vperm.xlu0 %7125, %v11705_v9   ;;  %3478 = vperm.xlu1 %7126, %v11669_v53   ;;  %v3761_v12 = vsel %vm3760_vm0, %v3759_v49, %v3754_v6  ;;  %v3825_v9 = vadd.s32 4294967192, %v11712_v37  ;;  %v3818_v53 = vadd.s32 4294967200, %v11712_v37  ;;  %v14894_v33 = vld [vmem:[#allocation290_spill] sm:$0xff] }
 0x4e4   : > { %14887 = vst [vmem:[#allocation259_spill] sm:$0xff] %v11895_v63  ;;  %v3768_v15 = vsel %vm3767_vm4, %v3766_v60, %v3761_v12  ;;  %v3854_v46 = vsel %vm13613_vm3, %v3853_v56, %v3849_v59  ;;  %v3773_v6 = vrot.slane %v14893_v14, %v11860_v44  ;;  %v3868_v60 = vrot.slane %v14894_v33, %v11850_v10 }
 0x4e5   : > { %v3859_v49 = vsel %vm13612_vm5, %v3858_v31, %v3854_v46  ;;  %v3832_v59 = vadd.s32 4294967184, %v11712_v37  ;;  %v3863_v56 = vrot.slane %v14895_v26, %v11845_v39  ;;  %v11925_v14 = vsub.s32 %v3804_v55, %v14863_v24 }
 0x4e6   : > { %v11910_v35 = vpop.permute.xlu0 %3547  ;;  %v11912_v45 = vpop.permute.xlu1 %3544  ;;  %v3775_v12 = vsel %vm3774_vm7, %v3773_v6, %v3768_v15  ;;  %v11928_v46 = vsub.s32 %v3825_v9, %v14863_v24  ;;  %v11931_v33 = vsub.s32 %v3818_v53, %v14863_v24  ;;  %v11937_v37 = vsub.s32 %v3839_v48, %v14863_v24  ;;  %v14899_v9 = vld [vmem:[#allocation120_spill] sm:$0xff]  ;;  %v14901_v48 = vld [vmem:[#allocation247_spill] sm:$0xff] }
 0x4e7   : > { %14891 = vst [vmem:[#allocation99_spill] sm:$0xff] %v11910_v35  ;;  %14892 = vst [vmem:[#allocation245_spill] sm:$0xff] %v11912_v45  ;;  %3592 = vperm.xlu0 %7125, %v11724_v34   ;;  %3577 = vperm.xlu1 %7126, %v2402_v11   ;;  %v3782_v34 = vsel %vm3781_vm11, %v3780_v43, %v3775_v12  ;;  %v14896_v11 = vld [vmem:[#allocation123_spill] sm:$0xff]  ;;  %v3864_v26 = vsel %vm3760_vm0, %v3863_v56, %v3859_v49  ;;  %v14900_v43 = vld [vmem:[#allocation292_spill] sm:$0xff] }
 0x4e8   : > { %v3794_v31 = vrot.slane %v14896_v11, %v11892_v36  ;;  %v3787_v6 = vrot.slane %v14899_v9, %v11868_v7  ;;  %v3869_v53 = vsel %vm3767_vm4, %v3868_v60, %v3864_v26  ;;  %v3878_v12 = vrot.slane %v14900_v43, %v11874_v40  ;;  %v14902_v56 = vld [vmem:[#allocation78_spill] sm:$0xff]  ;;  %v14903_v9 = vld [vmem:[#allocation289_spill] sm:$0xff]  ;;  %v14904_v26 = vld [vmem:[#allocation80_spill] sm:$0xff] }
 0x4e9   : > { %v11953_v49 = vmul.f32 %v11308_v50, %v14901_v48  ;;  %v2364_v11 = vmul.f32 %v11280_v4, %v14902_v56  ;;  %v3873_v60 = vrot.slane %v14903_v9, %v11860_v44  ;;  %v11964_v43 = vmul.f32 %v11310_v54, %v14904_v26  ;;  %v14906_v35 = vld [vmem:[#allocation108_spill] sm:$0xff]  ;;  %v14907_v56 = vld [vmem:[#allocation122_spill] sm:$0xff] }
 0x4ea   : > { %v11940_v15 = vpop.permute.xlu0 %3433  ;;  %v11942_v55 = vpop.permute.xlu1 %3385  ;;  %v2441_v48 = vmul.f32 %v11252_v5, %v14906_v35  ;;  %v3801_v45 = vrot.slane %v14907_v56, %v11885_v42  ;;  %v14911_v5 = vld [vmem:[#allocation294_spill] sm:$0xff]  ;;  %v14916_v56 = vld [vmem:[#allocation291_spill] sm:$0xff] }
 0x4eb   : > { %14897 = vst [vmem:[#allocation210_spill] sm:$0xff] %v11940_v15  ;;  %14898 = vst [vmem:[#allocation137_spill] sm:$0xff] %v11942_v55  ;;  %3646 = vperm.xlu0 %7125, %v11764_v13   ;;  %3595 = vperm.xlu1 %7126, %v11728_v30   ;;  %v11958_v55 = vsub.s32 %v3832_v59, %v14863_v24  ;;  %v14905_v13 = vld [vmem:[#allocation278_spill] sm:$0xff]  ;;  %v3789_v15 = vsel %vm3788_vm8, %v3787_v6, %v3782_v34  ;;  %v14908_v59 = vld [vmem:[#allocation280_spill] sm:$0xff] }
 0x4ec   : > { %v2403_v30 = vmul.f32 %v11277_v20, %v14905_v13  ;;  %v3796_v24 = vsel %vm13606_vm2, %v3794_v31, %v3789_v15  ;;  %v3808_v9 = vrot.slane %v14908_v59, %v11925_v14  ;;  %v3874_v51 = vsel %vm3774_vm7, %v3873_v60, %v3869_v53  ;;  %v14912_v34 = vld [vmem:[#allocation156_spill] sm:$0xff]  ;;  %v14913_v31 = vld [vmem:[#allocation233_spill] sm:$0xff]  ;;  %v14915_v53 = vld [vmem:[#allocation279_spill] sm:$0xff] }
 0x4ed   : > { %v3879_v13 = vsel %vm3781_vm11, %v3878_v12, %v3874_v51  ;;  %v3888_v35 = vrot.slane %v14911_v5, %v11892_v36  ;;  %v3967_v6 = vrot.slane %v14912_v34, %v11820_v41  ;;  %v11989_v15 = vmul.f32 %v11308_v50, %v14913_v31  ;;  %v14917_v12 = vld [vmem:[#allocation158_spill] sm:$0xff]  ;;  %v14918_v5 = vld [vmem:[#allocation244_spill] sm:$0xff] }
 0x4ee   : > { %v11977_v26 = vpop.permute.xlu0 %3550  ;;  %v11979_v62 = vpop.permute.xlu1 %3502  ;;  %v11993_v60 = vmul.f32 %v11280_v4, %v14915_v53  ;;  %v3883_v51 = vrot.slane %v14916_v56, %v11868_v7  ;;  %v3976_v59 = vrot.slane %v14917_v12, %v11803_v29  ;;  %v12001_v34 = vmul.f32 %v11310_v54, %v14918_v5  ;;  %v14923_v12 = vld [vmem:[#allocation282_spill] sm:$0xff] }
 0x4ef   : > { %14909 = vst [vmem:[#allocation224_spill] sm:$0xff] %v11977_v26  ;;  %14910 = vst [vmem:[#allocation186_spill] sm:$0xff] %v11979_v62  ;;  %3415 = vperm.xlu0 %7125, %v11659_v0   ;;  %3694 = vperm.xlu1 %7126, %v2441_v48   ;;  %v14920_v0 = vld [vmem:[#allocation270_spill] sm:$0xff]  ;;  %v3803_v31 = vsel %vm3802_vm6, %v3801_v45, %v3796_v24  ;;  %v14921_v62 = vld [vmem:[#allocation19_spill] sm:$0xff]  ;;  %v3822_v23 = vrot.slane %v14923_v12, %v11931_v33 }
 0x4f0   : > { %14914 = vst [vmem:[#allocation251_spill] sm:$0xff] %v11989_v15  ;;  %14919 = vst [vmem:[#allocation98_spill] sm:$0xff] %v12001_v34  ;;  %v12005_v48 = vmul.f32 %v11255_v38, %v14920_v0  ;;  %v3971_v53 = vrot.slane %v14921_v62, %v11795_v17  ;;  %v14922_v15 = vld [vmem:[#allocation124_spill] sm:$0xff]  ;;  %v3810_v56 = vsel %vm3809_vm9, %v3808_v9, %v3803_v31  ;;  %v14927_v9 = vld [vmem:[#allocation110_spill] sm:$0xff] }
 0x4f1   : > { %v3815_v26 = vrot.slane %v14922_v15, %v11895_v63  ;;  %v3884_v5 = vsel %vm3788_vm8, %v3883_v51, %v3879_v13  ;;  %v14926_v45 = vld [vmem:[#allocation296_spill] sm:$0xff]  ;;  %v12027_v15 = vmul.f32 %v11277_v20, %v14927_v9  ;;  %v14928_v13 = vld [vmem:[#allocation293_spill] sm:$0xff]  ;;  %v14929_v31 = vld [vmem:[#allocation23_spill] sm:$0xff] }
 0x4f2   : > { %v12016_v34 = vpop.permute.xlu0 %3619  ;;  %v12018_v52 = vpop.permute.xlu1 %3616  ;;  %v3889_v38 = vsel %vm13606_vm2, %v3888_v35, %v3884_v5  ;;  %v3898_v62 = vrot.slane %v14926_v45, %v11925_v14  ;;  %v3972_v24 = vsel %vm13613_vm3, %v3971_v53, %v3967_v6  ;;  %v3893_v51 = vrot.slane %v14928_v13, %v11885_v42  ;;  %v14930_v12 = vld [vmem:[#allocation112_spill] sm:$0xff]  ;;  %v14932_v6 = vld [vmem:[#allocation111_spill] sm:$0xff]  ;;  %v14934_v20 = vld [vmem:[#allocation21_spill] sm:$0xff] }
 0x4f3   : > { %14924 = vst [vmem:[#allocation198_spill] sm:$0xff] %v12016_v34  ;;  %14925 = vst [vmem:[#allocation75_spill] sm:$0xff] %v12018_v52  ;;  %3481 = vperm.xlu0 %7125, %v11679_v28   ;;  %3463 = vperm.xlu1 %7126, %v2364_v11   ;;  %v3977_v0 = vsel %vm13612_vm5, %v3976_v59, %v3972_v24  ;;  %v3986_v35 = vrot.slane %v14929_v31, %v11850_v10  ;;  %v14935_v45 = vld [vmem:[#allocation113_spill] sm:$0xff] }
 0x4f4   : > { %v12036_v5 = vmul.f32 %v11308_v50, %v14930_v12  ;;  %v12040_v28 = vmul.f32 %v11280_v4, %v14932_v6  ;;  %v3817_v11 = vsel %vm3816_vm10, %v3815_v26, %v3810_v56  ;;  %v3981_v53 = vrot.slane %v14934_v20, %v11845_v39  ;;  %v14937_v59 = vld [vmem:[#allocation281_spill] sm:$0xff]  ;;  %v14938_v56 = vld [vmem:[#allocation298_spill] sm:$0xff] }
 0x4f5   : > { %v12047_v9 = vmul.f32 %v11310_v54, %v14935_v45  ;;  %v3829_v24 = vrot.slane %v14937_v59, %v11928_v46  ;;  %v3824_v13 = vsel %vm3823_vm12, %v3822_v23, %v3817_v11  ;;  %v3894_v50 = vsel %vm3802_vm6, %v3893_v51, %v3889_v38  ;;  %v14939_v54 = vld [vmem:[#allocation295_spill] sm:$0xff]  ;;  %v14940_v38 = vld [vmem:[#allocation24_spill] sm:$0xff]  ;;  %v14941_v11 = vld [vmem:[#allocation310_spill] sm:$0xff] }
 0x4f6   : > { %14931 = vst [vmem:[#allocation138_spill] sm:$0xff] %v12036_v5  ;;  %14933 = vst [vmem:[#allocation231_spill] sm:$0xff] %v12040_v28  ;;  %v12053_v31 = vpop.permute.xlu0 %3667  ;;  %v12055_v4 = vpop.permute.xlu1 %3664  ;;  %v3899_v26 = vsel %vm3809_vm9, %v3898_v62, %v3894_v50  ;;  %v3908_v12 = vrot.slane %v14938_v56, %v11931_v33  ;;  %v3982_v6 = vsel %vm3760_vm0, %v3981_v53, %v3977_v0  ;;  %v14942_v62 = vld [vmem:[#allocation283_spill] sm:$0xff]  ;;  %v14945_v56 = vld [vmem:[#allocation284_spill] sm:$0xff] }
 0x4f7   : > { %14936 = vst [vmem:[#allocation191_spill] sm:$0xff] %v12047_v9  ;;  %3580 = vperm.xlu0 %7125, %v2403_v30   ;;  %3532 = vperm.xlu1 %7126, %v11701_v18   ;;  %v3903_v20 = vrot.slane %v14939_v54, %v11895_v63  ;;  %v3987_v23 = vsel %vm3767_vm4, %v3986_v35, %v3982_v6  ;;  %v14943_v30 = vld [vmem:[#allocation22_spill] sm:$0xff]  ;;  %v14944_v18 = vld [vmem:[#allocation315_spill] sm:$0xff]  ;;  %v14946_v6 = vld [vmem:[#allocation297_spill] sm:$0xff] }
 0x4f8   : > { %v3996_v51 = vrot.slane %v14940_v38, %v11874_v40  ;;  %v4046_v45 = vrot.slane %v14941_v11, %v11820_v41  ;;  %v3831_v50 = vsel %vm3830_vm14, %v3829_v24, %v3824_v13  ;;  %v3991_v0 = vrot.slane %v14943_v30, %v11860_v44  ;;  %v14947_v11 = vld [vmem:[#allocation309_spill] sm:$0xff]  ;;  %v14949_v30 = vld [vmem:[#allocation151_spill] sm:$0xff] }
 0x4f9   : > { %v4055_v53 = vrot.slane %v14944_v18, %v11803_v29  ;;  %v3836_v35 = vrot.slane %v14945_v56, %v11958_v55  ;;  %v3913_v54 = vrot.slane %v14946_v6, %v11928_v46  ;;  %v3904_v38 = vsel %vm3816_vm10, %v3903_v20, %v3899_v26  ;;  %v14950_v26 = vld [vmem:[#allocation152_spill] sm:$0xff] }
 0x4fa   : > { %v4050_v9 = vrot.slane %v14947_v11, %v11795_v17  ;;  %v12083_v59 = vpop.permute.xlu0 %3436  ;;  %v12085_v24 = vpop.permute.xlu1 %3388  ;;  %v3909_v13 = vsel %vm3823_vm12, %v3908_v12, %v3904_v38  ;;  %v3928_v18 = vrot.slane %v14949_v30, %v11820_v41  ;;  %v3992_v56 = vsel %vm3774_vm7, %v3991_v0, %v3987_v23  ;;  %v14951_v11 = vld [vmem:[#allocation164_spill] sm:$0xff]  ;;  %v14952_v12 = vld [vmem:[#allocation150_spill] sm:$0xff]  ;;  %v14953_v30 = vld [vmem:[#allocation161_spill] sm:$0xff] }
 0x4fb   : > { %14948 = vst [vmem:[#allocation263_spill] sm:$0xff] %v12085_v24  ;;  %3649 = vperm.xlu0 %7125, %v11774_v19   ;;  %3598 = vperm.xlu1 %7126, %v11732_v8   ;;  %v3937_v20 = vrot.slane %v14950_v26, %v11803_v29  ;;  %v3997_v6 = vsel %vm3781_vm11, %v3996_v51, %v3992_v56  ;;  %v14954_v8 = vld [vmem:[#allocation318_spill] sm:$0xff]  ;;  %v14955_v51 = vld [vmem:[#allocation12_spill] sm:$0xff] }
 0x4fc   : > { %v4006_v5 = vrot.slane %v14951_v11, %v11892_v36  ;;  %v4051_v34 = vsel %vm13613_vm3, %v4050_v9, %v4046_v45  ;;  %v3932_v38 = vrot.slane %v14952_v12, %v11795_v17  ;;  %v4001_v23 = vrot.slane %v14953_v30, %v11868_v7  ;;  %v14956_v9 = vld [vmem:[#allocation314_spill] sm:$0xff] }
 0x4fd   : > { %v4056_v19 = vsel %vm13612_vm5, %v4055_v53, %v4051_v34  ;;  %v4065_v0 = vrot.slane %v14954_v8, %v11850_v10  ;;  %v12107_v26 = vsel %vm13605_vm15, %v3836_v35, %v3831_v50  ;;  %v3914_v11 = vsel %vm3830_vm14, %v3913_v54, %v3909_v13  ;;  %v14958_v53 = vld [vmem:[#allocation15_spill] sm:$0xff]  ;;  %v14959_v54 = vld [vmem:[#allocation14_spill] sm:$0xff] }
 0x4fe   : > { %v4060_v45 = vrot.slane %v14956_v9, %v11845_v39  ;;  %v12114_v12 = vpop.permute.xlu0 %3553  ;;  %v12116_v52 = vpop.permute.xlu1 %3505  ;;  %v3933_v34 = vsel %vm13613_vm3, %v3932_v38, %v3928_v18  ;;  %v3942_v30 = vrot.slane %v14958_v53, %v11845_v39  ;;  %v4002_v50 = vsel %vm3788_vm8, %v4001_v23, %v3997_v6  ;;  %v14960_v18 = vld [vmem:[#allocation30_spill] sm:$0xff]  ;;  %v14961_v6 = vld [vmem:[#allocation321_spill] sm:$0xff] }
 0x4ff   : > { %14957 = vst [vmem:[#allocation101_spill] sm:$0xff] %v12116_v52  ;;  %3712 = vperm.xlu0 %7125, %v11790_v32   ;;  %3697 = vperm.xlu1 %7126, %v12005_v48   ;;  %v3938_v35 = vsel %vm13612_vm5, %v3937_v20, %v3933_v34  ;;  %v3947_v13 = vrot.slane %v14959_v54, %v11850_v10  ;;  %v14962_v32 = vld [vmem:[#allocation74_spill] sm:$0xff]  ;;  %v14963_v20 = vld [vmem:[#allocation13_spill] sm:$0xff] }
 0x500   : > { %v4007_v8 = vsel %vm13606_vm2, %v4006_v5, %v4002_v50  ;;  %v4061_v9 = vsel %vm3760_vm0, %v4060_v45, %v4056_v19  ;;  %v4016_v38 = vrot.slane %v14960_v18, %v11925_v14  ;;  %v4075_v23 = vrot.slane %v14961_v6, %v11874_v40  ;;  %v14964_v54 = vld [vmem:[#allocation25_spill] sm:$0xff]  ;;  %v14966_v45 = vld [vmem:[#allocation246_spill] sm:$0xff] }
 0x501   : > { %v4066_v53 = vsel %vm3767_vm4, %v4065_v0, %v4061_v9  ;;  %v4164_v48 = vrot.slane %v14962_v32, %v11820_v41  ;;  %v3918_v34 = vrot.slane %v14963_v20, %v11958_v55  ;;  %v4011_v56 = vrot.slane %v14964_v54, %v11885_v42  ;;  %v14965_v5 = vld [vmem:[#allocation317_spill] sm:$0xff]  ;;  %v14969_v20 = vld [vmem:[#allocation242_spill] sm:$0xff] }
 0x502   : > { %v4070_v19 = vrot.slane %v14965_v5, %v11860_v44  ;;  %v4173_v50 = vrot.slane %v14966_v45, %v11803_v29  ;;  %v12144_v18 = vpop.permute.xlu0 %3670  ;;  %v12146_v0 = vpop.permute.xlu1 %3622  ;;  %v14968_v9 = vld [vmem:[#allocation153_spill] sm:$0xff]  ;;  %v3943_v32 = vsel %vm3760_vm0, %v3942_v30, %v3938_v35  ;;  %v4168_v52 = vrot.slane %v14969_v20, %v11795_v17  ;;  %v14970_v5 = vld [vmem:[#allocation155_spill] sm:$0xff]  ;;  %v14971_v35 = vld [vmem:[#allocation326_spill] sm:$0xff] }
 0x503   : > { %14967 = vst [vmem:[#allocation17_spill] sm:$0xff] %v12146_v0  ;;  %v3952_v6 = vrot.slane %v14968_v9, %v11860_v44  ;;  %3418 = vperm.xlu0 %7125, %v11655_v16   ;;  %3715 = vperm.xlu1 %7126, %v11799_v21   ;;  %v3948_v54 = vsel %vm3767_vm4, %v3947_v13, %v3943_v32  ;;  %v14972_v21 = vld [vmem:[#allocation301_spill] sm:$0xff]  ;;  %v14973_v13 = vld [vmem:[#allocation320_spill] sm:$0xff] }
 0x504   : > { %v3957_v45 = vrot.slane %v14970_v5, %v11874_v40  ;;  %v4012_v24 = vsel %vm3802_vm6, %v4011_v56, %v4007_v8  ;;  %v4071_v0 = vsel %vm3774_vm7, %v4070_v19, %v4066_v53  ;;  %v4085_v20 = vrot.slane %v14971_v35, %v11892_v36  ;;  %v14974_v56 = vld [vmem:[#allocation53_spill] sm:$0xff] }
 0x505   : > { %v4017_v9 = vsel %vm3809_vm9, %v4016_v38, %v4012_v24  ;;  %v4076_v30 = vsel %vm3781_vm11, %v4075_v23, %v4071_v0  ;;  %v4169_v16 = vsel %vm13613_vm3, %v4168_v52, %v4164_v48  ;;  %v4026_v28 = vrot.slane %v14972_v21, %v11931_v33  ;;  %v14975_v52 = vld [vmem:[#allocation29_spill] sm:$0xff]  ;;  %v14977_v0 = vld [vmem:[#allocation154_spill] sm:$0xff] }
 0x506   : > { %v4080_v32 = vrot.slane %v14973_v13, %v11868_v7  ;;  %v4174_v5 = vsel %vm13612_vm5, %v4173_v50, %v4169_v16  ;;  %v4183_v8 = vrot.slane %v14974_v56, %v11850_v10  ;;  %v12172_v53 = vpop.permute.xlu0 %3439  ;;  %v12174_v24 = vpop.permute.xlu1 %3391  ;;  %v3953_v38 = vsel %vm3774_vm7, %v3952_v6, %v3948_v54  ;;  %v14976_v48 = vld [vmem:[#allocation209_spill] sm:$0xff]  ;;  %v14978_v13 = vld [vmem:[#allocation331_spill] sm:$0xff] }
 0x507   : > { %v4021_v23 = vrot.slane %v14975_v52, %v11895_v63  ;;  %v4178_v19 = vrot.slane %v14976_v48, %v11845_v39  ;;  %3484 = vperm.xlu0 %7125, %v11675_v3   ;;  %3466 = vperm.xlu1 %7126, %v11953_v49   ;;  %v3919_v50 = vsel %vm13605_vm15, %v3918_v34, %v3914_v11  ;;  %v14979_v11 = vld [vmem:[#allocation325_spill] sm:$0xff] }
 0x508   : > { %v3962_v35 = vrot.slane %v14977_v0, %v11868_v7  ;;  %v3958_v16 = vsel %vm3781_vm11, %v3957_v45, %v3953_v38  ;;  %v4081_v21 = vsel %vm3788_vm8, %v4080_v32, %v4076_v30  ;;  %v4095_v56 = vrot.slane %v14978_v13, %v11925_v14  ;;  %v14980_v45 = vld [vmem:[#allocation216_spill] sm:$0xff] }
 0x509   : > { %v4022_v6 = vsel %vm3816_vm10, %v4021_v23, %v4017_v9  ;;  %v4086_v54 = vsel %vm13606_vm2, %v4085_v20, %v4081_v21  ;;  %v4179_v3 = vsel %vm3760_vm0, %v4178_v19, %v4174_v5  ;;  %v4090_v34 = vrot.slane %v14979_v11, %v11885_v42  ;;  %v14981_v20 = vld [vmem:[#allocation300_spill] sm:$0xff]  ;;  %v14982_v23 = vld [vmem:[#allocation306_spill] sm:$0xff]  ;;  %v14989_v11 = vld [vmem:[#allocation305_spill] sm:$0xff] }
 0x50a   : > { %v4027_v49 = vsel %vm3823_vm12, %v4026_v28, %v4022_v6  ;;  %v4184_v52 = vsel %vm3767_vm4, %v4183_v8, %v4179_v3  ;;  %v4193_v38 = vrot.slane %v14980_v45, %v11874_v40  ;;  %v12199_v30 = vpop.permute.xlu0 %3556  ;;  %v12201_v9 = vpop.permute.xlu1 %3508  ;;  %v4031_v32 = vrot.slane %v14981_v20, %v11928_v46  ;;  %v14983_v28 = vld [vmem:[#allocation76_spill] sm:$0xff]  ;;  %v14992_v20 = vld [vmem:[#allocation205_spill] sm:$0xff] }
 0x50b   : > { %v4036_v5 = vrot.slane %v14982_v23, %v11958_v55  ;;  %v4188_v48 = vrot.slane %v14983_v28, %v11860_v44  ;;  %3583 = vperm.xlu0 %7125, %v11993_v60   ;;  %3535 = vperm.xlu1 %7126, %v11709_v57   ;;  %v14984_v8 = vrot.slane %v14942_v62, %v11937_v37  ;;  %v14988_v62 = vld [vmem:[#allocation333_spill] sm:$0xff] }
 0x50c   : > { %v14986_v0 = vrot.slane %v14955_v51, %v11937_v37  ;;  %v12225_v6 = vsel %vm3788_vm8, %v3962_v35, %v3958_v16  ;;  %v4091_v60 = vsel %vm3802_vm6, %v4090_v34, %v4086_v54  ;;  %v4032_v57 = vsel %vm3830_vm14, %v4031_v32, %v4027_v49  ;;  %v14991_v16 = vld [vmem:[#allocation159_spill] sm:$0xff]  ;;  %v14993_v32 = vld [vmem:[#allocation249_spill] sm:$0xff] }
 0x50d   : > { %v12216_v19 = vsel %vm13607_vm1, %v14984_v8, %v12107_v26  ;;  %14987 = vst [vmem:[#allocation139_spill] sm:$0xff] %v12225_v6  ;;  %v4096_v13 = vsel %vm3809_vm9, %v4095_v56, %v4091_v60  ;;  %v4105_v3 = vrot.slane %v14988_v62, %v11931_v33  ;;  %v4189_v26 = vsel %vm3774_vm7, %v4188_v48, %v4184_v52  ;;  %v14995_v8 = vld [vmem:[#allocation234_spill] sm:$0xff]  ;;  %v14997_v62 = vld [vmem:[#allocation225_spill] sm:$0xff]  ;;  %v15024_v6 = vld [vmem:[#allocation224_spill] sm:$0xff] }
 0x50e   : > { %14985 = vst [vmem:[#allocation215_spill] sm:$0xff] %v12216_v19  ;;  %v12222_v21 = vsel %vm13607_vm1, %v14986_v0, %v3919_v50  ;;  %v4041_v51 = vrot.slane %v14989_v11, %v11937_v37  ;;  %v14990_v50 = vld [vmem:[#allocation330_spill] sm:$0xff]  ;;  %v4194_v35 = vsel %vm3781_vm11, %v4193_v38, %v4189_v26  ;;  %v4203_v54 = vrot.slane %v14991_v16, %v11892_v36  ;;  %v12240_v34 = vpop.permute.xlu0 %3673  ;;  %v12242_v49 = vpop.permute.xlu1 %3625  ;;  %v14994_v38 = vld [vmem:[#allocation49_spill] sm:$0xff] }
 0x50f   : > { %v4100_v45 = vrot.slane %v14990_v50, %v11895_v63  ;;  %v4037_v56 = vsel %vm13605_vm15, %v4036_v5, %v4032_v57  ;;  %v4125_v52 = vrot.slane %v14992_v20, %v11820_v41  ;;  %v4198_v23 = vrot.slane %v14993_v32, %v11868_v7  ;;  %3652 = vperm.xlu0 %7125, %v11770_v25   ;;  %v14996_v5 = vld [vmem:[#allocation255_spill] sm:$0xff]  ;;  %v14999_v50 = vld [vmem:[#allocation190_spill] sm:$0xff] }
 0x510   : > { %3601 = vperm.xlu1 %7126, %v11736_v22   ;;  %v4110_v28 = vrot.slane %v14994_v38, %v11928_v46  ;;  %v4134_v0 = vrot.slane %v14995_v8, %v11803_v29  ;;  %v4243_v60 = vrot.slane %v14996_v5, %v11820_v41  ;;  %v4129_v26 = vrot.slane %v14997_v62, %v11795_v17  ;;  %v14998_v22 = vld [vmem:[#allocation60_spill] sm:$0xff]  ;;  %v15001_v32 = vld [vmem:[#allocation79_spill] sm:$0xff] }
 0x511   : > { %v4101_v48 = vsel %vm3816_vm10, %v4100_v45, %v4096_v13  ;;  %v4199_v25 = vsel %vm3788_vm8, %v4198_v23, %v4194_v35  ;;  %v4252_v11 = vrot.slane %v14998_v22, %v11803_v29  ;;  %v4115_v16 = vrot.slane %v14999_v50, %v11958_v55  ;;  %v15000_v45 = vld [vmem:[#allocation253_spill] sm:$0xff]  ;;  %v15003_v8 = vld [vmem:[#allocation243_spill] sm:$0xff] }
 0x512   : > { %v4106_v57 = vsel %vm3823_vm12, %v4105_v3, %v4101_v48  ;;  %v4204_v13 = vsel %vm13606_vm2, %v4203_v54, %v4199_v25  ;;  %v4213_v20 = vrot.slane %v15000_v45, %v11925_v14  ;;  %v4247_v38 = vrot.slane %v15001_v32, %v11795_v17  ;;  %v12271_v3 = vpop.permute.xlu0 %3442  ;;  %v12273_v48 = vpop.permute.xlu1 %3394  ;;  %v15004_v25 = vld [vmem:[#allocation217_spill] sm:$0xff] }
 0x513   : > { %v12276_v35 = vsel %vm13607_vm1, %v4041_v51, %v4037_v56  ;;  %v4130_v23 = vsel %vm13613_vm3, %v4129_v26, %v4125_v52  ;;  %v4208_v5 = vrot.slane %v15003_v8, %v11885_v42  ;;  %3718 = vperm.xlu0 %7125, %v11812_v47   ;;  %v4111_v54 = vsel %vm3830_vm14, %v4110_v28, %v4106_v57  ;;  %v15005_v51 = vld [vmem:[#allocation16_spill] sm:$0xff]  ;;  %v15006_v47 = vld [vmem:[#allocation229_spill] sm:$0xff] }
 0x514   : > { %15002 = vst [vmem:[#allocation222_spill] sm:$0xff] %v12276_v35  ;;  %3700 = vperm.xlu1 %7126, %v12027_v15   ;;  %v4135_v62 = vsel %vm13612_vm5, %v4134_v0, %v4130_v23  ;;  %v4144_v22 = vrot.slane %v15004_v25, %v11850_v10  ;;  %v4248_v50 = vsel %vm13613_vm3, %v4247_v38, %v4243_v60  ;;  %v15007_v15 = vld [vmem:[#allocation184_spill] sm:$0xff]  ;;  %v15008_v60 = vld [vmem:[#allocation59_spill] sm:$0xff]  ;;  %v15021_v28 = vld [vmem:[#allocation245_spill] sm:$0xff] }
 0x515   : > { %v4139_v56 = vrot.slane %v15005_v51, %v11845_v39  ;;  %v4209_v52 = vsel %vm3802_vm6, %v4208_v5, %v4204_v13  ;;  %v4253_v26 = vsel %vm13612_vm5, %v4252_v11, %v4248_v50  ;;  %v4262_v45 = vrot.slane %v15006_v47, %v11850_v10  ;;  %v15009_v13 = vld [vmem:[#allocation220_spill] sm:$0xff]  ;;  %v15011_v25 = vld [vmem:[#allocation203_spill] sm:$0xff]  ;;  %v15014_v47 = vld [vmem:[#allocation257_spill] sm:$0xff] }
 0x516   : > { %v12297_v0 = vsel %vm13605_vm15, %v4115_v16, %v4111_v54  ;;  %v4214_v57 = vsel %vm3809_vm9, %v4213_v20, %v4209_v52  ;;  %v4257_v32 = vrot.slane %v15008_v60, %v11845_v39  ;;  %v12302_v38 = vpop.permute.xlu0 %3559  ;;  %v12304_v23 = vpop.permute.xlu1 %3511  ;;  %v4218_v8 = vrot.slane %v15009_v13, %v11895_v63  ;;  %v15010_v16 = vld [vmem:[#allocation235_spill] sm:$0xff]  ;;  %v15013_v52 = vld [vmem:[#allocation272_spill] sm:$0xff]  ;;  %v15020_v50 = vld [vmem:[#allocation237_spill] sm:$0xff] }
 0x517   : > { %v4140_v11 = vsel %vm3760_vm0, %v4139_v56, %v4135_v62  ;;  %v4834_v5 = vrot.slane %v11808_v2, %v11820_v41  ;;  %3469 = vperm.xlu0 %7125, %v11964_v43   ;;  %v15012_v43 = vld [vmem:[#allocation232_spill] sm:$0xff]  ;;  %v4267_v60 = vrot.slane %v15014_v47, %v11860_v44  ;;  %v15018_v47 = vld [vmem:[#allocation94_spill] sm:$0xff]  ;;  %v4759_v20 = vrot.slane %v15020_v50, %v11795_v17  ;;  %v15025_v50 = vld [vmem:[#allocation99_spill] sm:$0xff] }
 0x518   : > { %3421 = vperm.xlu1 %7126, %v11663_v58   ;;  %v12316_v54 = vsel %vm3767_vm4, %v4144_v22, %v4140_v11  ;;  %v4258_v62 = vsel %vm3760_vm0, %v4257_v32, %v4253_v26  ;;  %v12322_v51 = vsel %vm3816_vm10, %v4218_v8, %v4214_v57  ;;  %v4272_v56 = vrot.slane %v15012_v43, %v11874_v40  ;;  %v15015_v11 = vld [vmem:[#allocation18_spill] sm:$0xff]  ;;  %v15016_v8 = vld [vmem:[#allocation136_spill] sm:$0xff] }
 0x519   : > { %v4263_v2 = vsel %vm3767_vm4, %v4262_v45, %v4258_v62  ;;  %v4838_v58 = vrot.slane %v11806_v1, %v11795_v17  ;;  %v4755_v26 = vrot.slane %v11756_v27, %v11820_v41  ;;  %v4843_v57 = vrot.slane %v11853_v61, %v11803_v29  ;;  %v15017_v43 = vld [vmem:[#allocation134_spill] sm:$0xff] }
 0x51a   : > { %v12337_v32 = vpop.permute.xlu0 %3676  ;;  %v12339_v45 = vpop.permute.xlu1 %3628  ;;  %v4764_v62 = vrot.slane %v15016_v8, %v11803_v29  ;;  %v15019_v27 = vld [vmem:[#allocation258_spill] sm:$0xff]  ;;  %v4268_v61 = vsel %vm3774_vm7, %v4267_v60, %v4263_v2  ;;  %v5031_v13 = vrot.slane %v15021_v28, %v11820_v41  ;;  %v5040_v22 = vrot.slane %v15024_v6, %v11803_v29 }
 0x51b   : > { %v4839_v1 = vsel %vm13613_vm3, %v4838_v58, %v4834_v5  ;;  %3538 = vperm.xlu0 %7125, %v15017_v43   ;;  %v12356_v5 = vsel %vm3781_vm11, %v4272_v56, %v4268_v61  ;;  %v15022_v58 = vld [vmem:[#allocation185_spill] sm:$0xff]  ;;  %v15023_v43 = vld [vmem:[#allocation210_spill] sm:$0xff]  ;;  %v4760_v2 = vsel %vm13613_vm3, %v4759_v20, %v4755_v26  ;;  %v5035_v35 = vrot.slane %v15025_v50, %v11795_v17  ;;  %v15028_v26 = vld [vmem:[#allocation251_spill] sm:$0xff] }
 0x51c   : > { %3487 = vperm.xlu1 %7126, %v15018_v47   ;;  %v4952_v8 = vrot.slane %v15022_v58, %v11820_v41  ;;  %v4848_v47 = vrot.slane %v15023_v43, %v11845_v39  ;;  %v4844_v60 = vsel %vm13612_vm5, %v4843_v57, %v4839_v1  ;;  %v5045_v28 = vrot.slane %v12114_v12, %v11845_v39  ;;  %v15026_v43 = vld [vmem:[#allocation83_spill] sm:$0xff]  ;;  %v15027_v20 = vld [vmem:[#allocation81_spill] sm:$0xff]  ;;  %v15030_v50 = vld [vmem:[#allocation186_spill] sm:$0xff] }
 0x51d   : > { %v4765_v58 = vsel %vm13612_vm5, %v4764_v62, %v4760_v2  ;;  %v4956_v19 = vrot.slane %v15026_v43, %v11795_v17  ;;  %v5050_v6 = vrot.slane %v12199_v30, %v11850_v10  ;;  %v5036_v57 = vsel %vm13613_vm3, %v5035_v35, %v5031_v13  ;;  %v15029_v12 = vld [vmem:[#allocation137_spill] sm:$0xff] }
 0x51e   : > { %v12370_v56 = vpop.permute.xlu0 %3445  ;;  %v12372_v61 = vpop.permute.xlu1 %3397  ;;  %v4769_v1 = vrot.slane %v15029_v12, %v11845_v39  ;;  %v4961_v63 = vrot.slane %v15030_v50, %v11803_v29  ;;  %v5055_v62 = vrot.slane %v12302_v38, %v11860_v44  ;;  %v4849_v43 = vsel %vm3760_vm0, %v4848_v47, %v4844_v60  ;;  %v15031_v47 = vld [vmem:[#allocation231_spill] sm:$0xff] }
 0x51f   : > { %3604 = vperm.xlu0 %7125, %v15027_v20   ;;  %v4957_v2 = vsel %vm13613_vm3, %v4956_v19, %v4952_v8  ;;  %v5041_v30 = vsel %vm13612_vm5, %v5040_v22, %v5036_v57  ;;  %v5228_v20 = vrot.slane %v12055_v4, %v11820_v41  ;;  %v5232_v35 = vrot.slane %v12053_v31, %v11795_v17  ;;  %v15032_v31 = vld [vmem:[#allocation181_spill] sm:$0xff]  ;;  %v15033_v57 = vld [vmem:[#allocation263_spill] sm:$0xff] }
 0x520   : > { %3586 = vperm.xlu1 %7126, %v15028_v26   ;;  %v4853_v13 = vrot.slane %v12083_v59, %v11850_v10  ;;  %v5046_v26 = vsel %vm3760_vm0, %v5045_v28, %v5041_v30  ;;  %v5237_v38 = vrot.slane %v12144_v18, %v11803_v29  ;;  %v5242_v22 = vrot.slane %v12240_v34, %v11845_v39 }
 0x521   : > { %v5051_v8 = vsel %vm3767_vm4, %v5050_v6, %v5046_v26  ;;  %v4770_v59 = vsel %vm3760_vm0, %v4769_v1, %v4765_v58  ;;  %v4962_v60 = vsel %vm13612_vm5, %v4961_v63, %v4957_v2  ;;  %v5247_v28 = vrot.slane %v12337_v32, %v11850_v10 }
 0x522   : > { %v3563_v12 = vpop.permute.xlu0 %3562  ;;  %v12400_v19 = vpop.permute.xlu1 %3514  ;;  %v5056_v18 = vsel %vm3774_vm7, %v5055_v62, %v5051_v8  ;;  %v5233_v6 = vsel %vm13613_vm3, %v5232_v35, %v5228_v20  ;;  %v4774_v34 = vrot.slane %v15033_v57, %v11850_v10  ;;  %v4858_v50 = vrot.slane %v12172_v53, %v11860_v44  ;;  %v15034_v35 = vld [vmem:[#allocation71_spill] sm:$0xff] }
 0x523   : > { %v5060_v4 = vrot.slane %v3563_v12, %v11874_v40  ;;  %3703 = vperm.xlu0 %7125, %v15031_v47   ;;  %v4854_v26 = vsel %vm3767_vm4, %v4853_v13, %v4849_v43  ;;  %v5238_v58 = vsel %vm13612_vm5, %v5237_v38, %v5233_v6  ;;  %v4779_v63 = vrot.slane %v12174_v24, %v11860_v44  ;;  %v15035_v43 = vld [vmem:[#allocation248_spill] sm:$0xff]  ;;  %v15036_v13 = vld [vmem:[#allocation101_spill] sm:$0xff]  ;;  %v15037_v47 = vld [vmem:[#allocation75_spill] sm:$0xff] }
 0x524   : > { %3655 = vperm.xlu1 %7126, %v15032_v31   ;;  %v4863_v32 = vrot.slane %v12271_v3, %v11874_v40  ;;  %v5243_v2 = vsel %vm3760_vm0, %v5242_v22, %v5238_v58  ;;  %v4784_v53 = vrot.slane %v12273_v48, %v11874_v40  ;;  %v4966_v24 = vrot.slane %v15036_v13, %v11845_v39 }
 0x525   : > { %v5061_v30 = vsel %vm3781_vm11, %v5060_v4, %v5056_v18  ;;  %v5248_v38 = vsel %vm3767_vm4, %v5247_v28, %v5243_v2  ;;  %v4868_v3 = vrot.slane %v12370_v56, %v11868_v7  ;;  %v4789_v12 = vrot.slane %v12372_v61, %v11868_v7 }
 0x526   : > { %v3680_v1 = vpop.permute.xlu0 %3679  ;;  %v12425_v62 = vpop.permute.xlu1 %3631  ;;  %v4775_v8 = vsel %vm3767_vm4, %v4774_v34, %v4770_v59  ;;  %v4859_v48 = vsel %vm3774_vm7, %v4858_v50, %v4854_v26  ;;  %v4971_v22 = vrot.slane %v12201_v9, %v11850_v10  ;;  %v5149_v31 = vrot.slane %v15037_v47, %v11820_v41  ;;  %v15038_v34 = vld [vmem:[#allocation98_spill] sm:$0xff]  ;;  %v15039_v50 = vld [vmem:[#allocation221_spill] sm:$0xff] }
 0x527   : > { %v5252_v20 = vrot.slane %v3680_v1, %v11860_v44  ;;  %3490 = vperm.xlu0 %7125, %v15034_v35   ;;  %v4780_v18 = vsel %vm3774_vm7, %v4779_v63, %v4775_v8  ;;  %v4864_v28 = vsel %vm3781_vm11, %v4863_v32, %v4859_v48  ;;  %v4976_v56 = vrot.slane %v12304_v23, %v11860_v44  ;;  %v15040_v32 = vld [vmem:[#allocation17_spill] sm:$0xff]  ;;  %v15041_v35 = vld [vmem:[#allocation20_spill] sm:$0xff]  ;;  %v15043_v48 = vld [vmem:[#allocation227_spill] sm:$0xff] }
 0x528   : > { %3721 = vperm.xlu1 %7126, %v15035_v43   ;;  %v4785_v59 = vsel %vm3781_vm11, %v4784_v53, %v4780_v18  ;;  %v4967_v26 = vsel %vm3760_vm0, %v4966_v24, %v4962_v60  ;;  %v4869_v58 = vsel %vm3788_vm8, %v4868_v3, %v4864_v28  ;;  %v4981_v23 = vrot.slane %v12400_v19, %v11874_v40  ;;  %v15042_v60 = vld [vmem:[#allocation198_spill] sm:$0xff] }
 0x529   : > { %v5253_v4 = vsel %vm3774_vm7, %v5252_v20, %v5248_v38  ;;  %v4790_v63 = vsel %vm3788_vm8, %v4789_v12, %v4785_v59  ;;  %v5158_v1 = vrot.slane %v15040_v32, %v11803_v29  ;;  %v4972_v2 = vsel %vm3767_vm4, %v4971_v22, %v4967_v26  ;;  %v15044_v47 = vld [vmem:[#allocation338_spill] sm:$0xff] }
 0x52a   : > { %v3449_v61 = vpop.permute.xlu0 %3448  ;;  %v3401_v6 = vpop.permute.xlu1 %3400  ;;  %v4282_v43 = vrot.slane %v15041_v35, %v11892_v36  ;;  %v5153_v13 = vrot.slane %v15042_v60, %v11795_v17  ;;  %v5163_v24 = vrot.slane %v12242_v49, %v11845_v39  ;;  %v4977_v19 = vsel %vm3774_vm7, %v4976_v56, %v4972_v2 }
 0x52b   : > { %v4873_v57 = vrot.slane %v3449_v61, %v11892_v36  ;;  %3589 = vperm.xlu0 %7125, %v15038_v34   ;;  %v4794_v9 = vrot.slane %v3401_v6, %v11892_v36  ;;  %v5168_v12 = vrot.slane %v12339_v45, %v11850_v10  ;;  %v15045_v18 = vrot.slane %v15015_v11, %v11931_v33 }
 0x52c   : > { %3541 = vperm.xlu1 %7126, %v15039_v50   ;;  %v5154_v28 = vsel %vm13613_vm3, %v5153_v13, %v5149_v31  ;;  %v4982_v56 = vsel %vm3781_vm11, %v4981_v23, %v4977_v19  ;;  %v5173_v45 = vrot.slane %v12425_v62, %v11860_v44  ;;  %v15046_v61 = vrot.slane %v15019_v27, %v11868_v7  ;;  %v15050_v23 = vld [vmem:[#allocation138_spill] sm:$0xff] }
 0x52d   : > { %v4874_v53 = vsel %vm13606_vm2, %v4873_v57, %v4869_v58  ;;  %v4795_v20 = vsel %vm13606_vm2, %v4794_v9, %v4790_v63  ;;  %v4224_v49 = vsel %vm3823_vm12, %v15045_v18, %v12322_v51  ;;  %v5159_v59 = vsel %vm13612_vm5, %v5158_v1, %v5154_v28  ;;  %v15047_v51 = vld [vmem:[#allocation56_spill] sm:$0xff]  ;;  %v15048_v9 = vld [vmem:[#allocation173_spill] sm:$0xff]  ;;  %v15049_v63 = vld [vmem:[#allocation254_spill] sm:$0xff] }
 0x52e   : > { %v3566_v38 = vpop.permute.xlu0 %3565  ;;  %v3518_v3 = vpop.permute.xlu1 %3517  ;;  %v4278_v6 = vsel %vm3788_vm8, %v15046_v61, %v12356_v5  ;;  %v4233_v31 = vrot.slane %v15047_v51, %v11958_v55  ;;  %v4292_v62 = vrot.slane %v15048_v9, %v11925_v14  ;;  %v5164_v50 = vsel %vm3760_vm0, %v5163_v24, %v5159_v59  ;;  %v15059_v28 = vld [vmem:[#allocation323_spill] sm:$0xff]  ;;  %v15062_v51 = vld [vmem:[#allocation165_spill] sm:$0xff]  ;;  %v15063_v9 = vld [vmem:[#allocation48_spill] sm:$0xff] }
 0x52f   : > { %v5065_v8 = vrot.slane %v3566_v38, %v11868_v7  ;;  %3658 = vperm.xlu0 %7125, %v15043_v48   ;;  %v4986_v22 = vrot.slane %v3518_v3, %v11868_v7  ;;  %v4283_v34 = vsel %vm13606_vm2, %v4282_v43, %v4278_v6  ;;  %v5169_v5 = vsel %vm3767_vm4, %v5168_v12, %v5164_v50  ;;  %v15053_v43 = vld [vmem:[#allocation61_spill] sm:$0xff]  ;;  %v15057_v12 = vld [vmem:[#allocation55_spill] sm:$0xff]  ;;  %v15061_v6 = vld [vmem:[#allocation82_spill] sm:$0xff] }
 0x530   : > { %3607 = vperm.xlu1 %7126, %v15044_v47   ;;  %v15051_v32 = vrot.slane %v15007_v15, %v11937_v37  ;;  %v15052_v2 = vrot.slane %v15010_v16, %v11860_v44  ;;  %v4287_v60 = vrot.slane %v15053_v43, %v11885_v42  ;;  %v5174_v13 = vsel %vm3774_vm7, %v5173_v45, %v5169_v5  ;;  %v15060_v61 = vld [vmem:[#allocation259_spill] sm:$0xff] }
 0x531   : > { %v5066_v57 = vsel %vm3788_vm8, %v5065_v8, %v5061_v30  ;;  %v4987_v11 = vsel %vm3788_vm8, %v4986_v22, %v4982_v56  ;;  %v15054_v24 = vrot.slane %v15011_v25, %v11874_v40  ;;  %v15055_v15 = vrot.slane %v15013_v52, %v11928_v46  ;;  %v15068_v43 = vld [vmem:[#allocation191_spill] sm:$0xff] }
 0x532   : > { %v3683_v26 = vpop.permute.xlu0 %3682  ;;  %v3635_v27 = vpop.permute.xlu1 %3634  ;;  %v4121_v1 = vsel %vm13607_vm1, %v15051_v32, %v12297_v0  ;;  %v4150_v35 = vsel %vm3774_vm7, %v15052_v2, %v12316_v54  ;;  %v15056_v54 = vld [vmem:[#allocation241_spill] sm:$0xff]  ;;  %v4238_v8 = vrot.slane %v15057_v12, %v11937_v37  ;;  %v4288_v25 = vsel %vm3802_vm6, %v4287_v60, %v4283_v34  ;;  %v15067_v2 = vld [vmem:[#allocation307_spill] sm:$0xff]  ;;  %v15069_v60 = vld [vmem:[#allocation182_spill] sm:$0xff] }
 0x533   : > { %v5257_v58 = vrot.slane %v3683_v26, %v11874_v40  ;;  %3724 = vperm.xlu0 %7125, %v15049_v63   ;;  %v5178_v30 = vrot.slane %v3635_v27, %v11874_v40  ;;  %v4155_v19 = vsel %vm3781_vm11, %v15054_v24, %v4150_v35  ;;  %v4229_v0 = vsel %vm3830_vm14, %v15055_v15, %v4224_v49  ;;  %v15064_v27 = vld [vmem:[#allocation65_spill] sm:$0xff]  ;;  %v15073_v12 = vld [vmem:[#allocation32_spill] sm:$0xff] }
 0x534   : > { %3706 = vperm.xlu1 %7126, %v15050_v23   ;;  %v4159_v3 = vrot.slane %v15056_v54, %v11868_v7  ;;  %v4234_v48 = vsel %vm13605_vm15, %v4233_v31, %v4229_v0  ;;  %v4293_v52 = vsel %vm3809_vm9, %v4292_v62, %v4288_v25  ;;  %v12543_v56 = vsel %vm13608_vm13, %v4121_v1, %v12222_v21  ;;  %v15072_v0 = vld [vmem:[#allocation160_spill] sm:$0xff] }
 0x535   : > { %v5258_v38 = vsel %vm3781_vm11, %v5257_v58, %v5253_v4  ;;  %v5179_v16 = vsel %vm3781_vm11, %v5178_v30, %v5174_v13  ;;  %v15058_v4 = vld [vmem:[#allocation97_spill] sm:$0xff]  ;;  %v4297_v59 = vrot.slane %v15061_v6, %v15060_v61  ;;  %v4361_v31 = vrot.slane %v15062_v51, %v11820_v41  ;;  %v15065_v58 = vld [vmem:[#allocation66_spill] sm:$0xff]  ;;  %v15070_v13 = vld [vmem:[#allocation27_spill] sm:$0xff] }
 0x536   : > { %v3452_v22 = vpop.permute.xlu0 %3451  ;;  %v3404_v47 = vpop.permute.xlu1 %3403  ;;  %v12546_v45 = vsel %vm3788_vm8, %v4159_v3, %v4155_v19  ;;  %v12553_v34 = vsel %vm13607_vm1, %v4238_v8, %v4234_v48  ;;  %v4440_v62 = vrot.slane %v15063_v9, %v11820_v41  ;;  %v4365_v5 = vrot.slane %v15064_v27, %v11795_v17  ;;  %v15066_v30 = vld [vmem:[#allocation302_spill] sm:$0xff]  ;;  %v15071_v19 = vld [vmem:[#allocation63_spill] sm:$0xff] }
 0x537   : > { %v4878_v18 = vrot.slane %v3452_v22, %v11885_v42  ;;  %3610 = vperm.xlu0 %7125, %v15058_v4   ;;  %v4799_v49 = vrot.slane %v3404_v47, %v11885_v42  ;;  %v4298_v26 = vsel %vm3816_vm10, %v4297_v59, %v4293_v52  ;;  %v4370_v63 = vrot.slane %v15065_v58, %v11803_v29  ;;  %v15074_v52 = vld [vmem:[#allocation299_spill] sm:$0xff]  ;;  %v15076_v51 = vld [vmem:[#allocation226_spill] sm:$0xff] }
 0x538   : > { %3493 = vperm.xlu1 %7126, %v15059_v28   ;;  %v4449_v23 = vrot.slane %v15066_v30, %v11803_v29  ;;  %v4444_v35 = vrot.slane %v15067_v2, %v11795_v17  ;;  %v4302_v24 = vrot.slane %v15070_v13, %v11931_v33  ;;  %v4326_v15 = vrot.slane %v15071_v19, %v11795_v17  ;;  %v15079_v27 = vld [vmem:[#allocation62_spill] sm:$0xff]  ;;  %v15080_v30 = vld [vmem:[#allocation264_spill] sm:$0xff] }
 0x539   : > { %v4879_v50 = vsel %vm3802_vm6, %v4878_v18, %v4874_v53  ;;  %v4800_v21 = vsel %vm3802_vm6, %v4799_v49, %v4795_v20  ;;  %v4322_v54 = vrot.slane %v15072_v0, %v11820_v41  ;;  %v4366_v3 = vsel %vm13613_vm3, %v4365_v5, %v4361_v31  ;;  %v15075_v49 = vld [vmem:[#allocation38_spill] sm:$0xff] }
 0x53a   : > { %v3569_v32 = vpop.permute.xlu0 %3568  ;;  %v3521_v1 = vpop.permute.xlu1 %3520  ;;  %v4375_v8 = vrot.slane %v15073_v12, %v11845_v39  ;;  %v4445_v48 = vsel %vm13613_vm3, %v4444_v35, %v4440_v62  ;;  %v4371_v47 = vsel %vm13612_vm5, %v4370_v63, %v4366_v3  ;;  %v4380_v18 = vrot.slane %v15074_v52, %v11850_v10  ;;  %v15078_v62 = vld [vmem:[#allocation46_spill] sm:$0xff]  ;;  %v15085_v3 = vld [vmem:[#allocation96_spill] sm:$0xff]  ;;  %v15087_v52 = vld [vmem:[#allocation33_spill] sm:$0xff] }
 0x53b   : > { %v5070_v53 = vrot.slane %v3569_v32, %v11892_v36  ;;  %3709 = vperm.xlu0 %7125, %v15068_v43   ;;  %v4991_v20 = vrot.slane %v3521_v1, %v11892_v36  ;;  %v4450_v4 = vsel %vm13612_vm5, %v4449_v23, %v4445_v48  ;;  %v4459_v28 = vrot.slane %v15075_v49, %v11850_v10 }
 0x53c   : > { %3661 = vperm.xlu1 %7126, %v15069_v60   ;;  %v4454_v31 = vrot.slane %v15076_v51, %v11845_v39  ;;  %v4307_v5 = vrot.slane %v15079_v27, %v11928_v46  ;;  %v4303_v58 = vsel %vm3823_vm12, %v4302_v24, %v4298_v26  ;;  %v4327_v63 = vsel %vm13613_vm3, %v4326_v15, %v4322_v54  ;;  %v15082_v26 = vld [vmem:[#allocation69_spill] sm:$0xff]  ;;  %v15083_v15 = vld [vmem:[#allocation50_spill] sm:$0xff]  ;;  %v15089_v51 = vld [vmem:[#allocation303_spill] sm:$0xff] }
 0x53d   : > { %v5071_v25 = vsel %vm13606_vm2, %v5070_v53, %v5066_v57  ;;  %v4992_v22 = vsel %vm13606_vm2, %v4991_v20, %v4987_v11  ;;  %v15077_v57 = vld [vmem:[#allocation135_spill] sm:$0xff]  ;;  %v4331_v23 = vrot.slane %v15080_v30, %v11803_v29  ;;  %v4376_v32 = vsel %vm3760_vm0, %v4375_v8, %v4371_v47  ;;  %v15086_v8 = vld [vmem:[#allocation162_spill] sm:$0xff] }
 0x53e   : > { %v3686_v6 = vpop.permute.xlu0 %3685  ;;  %v3638_v59 = vpop.permute.xlu1 %3637  ;;  %v4455_v1 = vsel %vm3760_vm0, %v4454_v31, %v4450_v4  ;;  %v15081_v53 = vld [vmem:[#allocation67_spill] sm:$0xff]  ;;  %v4381_v20 = vsel %vm3767_vm4, %v4380_v18, %v4376_v32  ;;  %v4390_v60 = vrot.slane %v15082_v26, %v11874_v40  ;;  %v4469_v0 = vrot.slane %v15083_v15, %v11874_v40  ;;  %v15088_v4 = vld [vmem:[#allocation276_spill] sm:$0xff] }
 0x53f   : > { %v5262_v9 = vrot.slane %v3686_v6, %v11868_v7  ;;  %3613 = vperm.xlu0 %7125, %v15077_v57   ;;  %v5183_v11 = vrot.slane %v3638_v59, %v11868_v7  ;;  %v4385_v43 = vrot.slane %v15081_v53, %v11860_v44  ;;  %v4460_v13 = vsel %vm3767_vm4, %v4459_v28, %v4455_v1  ;;  %v15090_v57 = vld [vmem:[#allocation163_spill] sm:$0xff]  ;;  %v15093_v1 = vld [vmem:[#allocation236_spill] sm:$0xff] }
 0x540   : > { %3727 = vperm.xlu1 %7126, %v15078_v62   ;;  %v4308_v12 = vsel %vm3830_vm14, %v4307_v5, %v4303_v58  ;;  %v4336_v48 = vrot.slane %v15086_v8, %v11845_v39  ;;  %v4332_v47 = vsel %vm13612_vm5, %v4331_v23, %v4327_v63  ;;  %v4464_v18 = vrot.slane %v15087_v52, %v11860_v44  ;;  %v15091_v63 = vld [vmem:[#allocation304_spill] sm:$0xff]  ;;  %v15092_v23 = vld [vmem:[#allocation238_spill] sm:$0xff] }
 0x541   : > { %v5263_v2 = vsel %vm3788_vm8, %v5262_v9, %v5258_v38  ;;  %v5184_v35 = vsel %vm3788_vm8, %v5183_v11, %v5179_v16  ;;  %v15084_v38 = vld [vmem:[#allocation73_spill] sm:$0xff]  ;;  %v4341_v49 = vrot.slane %v15088_v4, %v11850_v10  ;;  %v4386_v28 = vsel %vm3774_vm7, %v4385_v43, %v4381_v20  ;;  %v15094_v20 = vld [vmem:[#allocation311_spill] sm:$0xff]  ;;  %v15095_v15 = vld [vmem:[#allocation84_spill] sm:$0xff] }
 0x542   : > { %v3455_v24 = vpop.permute.xlu0 %3454  ;;  %v3407_v19 = vpop.permute.xlu1 %3406  ;;  %v4395_v31 = vrot.slane %v15089_v51, %v11868_v7  ;;  %v4391_v9 = vsel %vm3781_vm11, %v4390_v60, %v4386_v28  ;;  %v4400_v11 = vrot.slane %v15090_v57, %v11892_v36  ;;  %v4465_v62 = vsel %vm3774_vm7, %v4464_v18, %v4460_v13  ;;  %v15099_v51 = vld [vmem:[#allocation35_spill] sm:$0xff] }
 0x543   : > { %v4883_v54 = vrot.slane %v3455_v24, %v11925_v14  ;;  %3733 = vperm.xlu0 %7125, %v15084_v38   ;;  %v4804_v16 = vrot.slane %v3407_v19, %v11925_v14  ;;  %v4470_v58 = vsel %vm3781_vm11, %v4469_v0, %v4465_v62  ;;  %v4479_v30 = vrot.slane %v15091_v63, %v11892_v36  ;;  %v15096_v38 = vld [vmem:[#allocation45_spill] sm:$0xff]  ;;  %v15101_v62 = vld [vmem:[#allocation324_spill] sm:$0xff] }
 0x544   : > { %3730 = vperm.xlu1 %7126, %v15085_v3   ;;  %v4317_v32 = vrot.slane %v15092_v23, %v11937_v37  ;;  %v4312_v53 = vrot.slane %v15093_v1, %v11958_v55  ;;  %v4337_v43 = vsel %vm3760_vm0, %v4336_v48, %v4332_v47  ;;  %v4474_v26 = vrot.slane %v15094_v20, %v11868_v7  ;;  %v15103_v20 = vld [vmem:[#allocation37_spill] sm:$0xff] }
 0x545   : > { %v4884_v6 = vsel %vm3809_vm9, %v4883_v54, %v4879_v50  ;;  %v4805_v59 = vsel %vm3809_vm9, %v4804_v16, %v4800_v21  ;;  %v4342_v60 = vsel %vm3767_vm4, %v4341_v49, %v4337_v43  ;;  %v4396_v13 = vsel %vm3788_vm8, %v4395_v31, %v4391_v9  ;;  %v15098_v49 = vld [vmem:[#allocation228_spill] sm:$0xff]  ;;  %v15116_v23 = vld [vmem:[#allocation277_spill] sm:$0xff] }
 0x546   : > { %v3572_v27 = vpop.permute.xlu0 %3571  ;;  %v3524_v5 = vpop.permute.xlu1 %3523  ;;  %v4405_v0 = vrot.slane %v15095_v15, %v11885_v42  ;;  %v4401_v54 = vsel %vm13606_vm2, %v4400_v11, %v4396_v13  ;;  %v4410_v16 = vrot.slane %v15096_v38, %v11925_v14  ;;  %v4475_v3 = vsel %vm3788_vm8, %v4474_v26, %v4470_v58  ;;  %v15100_v9 = vld [vmem:[#allocation316_spill] sm:$0xff]  ;;  %v15105_v15 = vld [vmem:[#allocation31_spill] sm:$0xff] }
 0x547   : > { %v5075_v50 = vrot.slane %v3572_v27, %v11885_v42  ;;  %v4996_v21 = vrot.slane %v3524_v5, %v11885_v42  ;;  %v4480_v47 = vsel %vm13606_vm2, %v4479_v30, %v4475_v3  ;;  %v4313_v4 = vsel %vm13605_vm15, %v4312_v53, %v4308_v12 }
 0x548   : > { %v4346_v28 = vrot.slane %v15098_v49, %v11860_v44  ;;  %v4484_v31 = vrot.slane %v15099_v51, %v11885_v42  ;;  %v4519_v57 = vrot.slane %v15100_v9, %v11820_v41  ;;  %v4406_v11 = vsel %vm3802_vm6, %v4405_v0, %v4401_v54  ;;  %v15106_v54 = vld [vmem:[#allocation319_spill] sm:$0xff] }
 0x549   : > { %v12650_v24 = vsel %vm3802_vm6, %v5075_v50, %v5071_v25  ;;  %v12653_v19 = vsel %vm3802_vm6, %v4996_v21, %v4992_v22  ;;  %v15097_v25 = vld [vmem:[#allocation52_spill] sm:$0xff]  ;;  %v4528_v27 = vrot.slane %v15101_v62, %v11803_v29  ;;  %v4411_v63 = vsel %vm3809_vm9, %v4410_v16, %v4406_v11  ;;  %v15102_v50 = vld [vmem:[#allocation179_spill] sm:$0xff] }
 0x54a   : > { %v3689_v8 = vpop.permute.xlu0 %3688  ;;  %v3641_v48 = vpop.permute.xlu1 %3640  ;;  %v4489_v52 = vrot.slane %v15097_v25, %v11925_v14  ;;  %v4347_v12 = vsel %vm3774_vm7, %v4346_v28, %v4342_v60  ;;  %v4485_v30 = vsel %vm3802_vm6, %v4484_v31, %v4480_v47  ;;  %v4523_v21 = vrot.slane %v15102_v50, %v11795_v17  ;;  %v15104_v60 = vld [vmem:[#allocation34_spill] sm:$0xff]  ;;  %v15109_v28 = vld [vmem:[#allocation39_spill] sm:$0xff]  ;;  %v15112_v50 = vld [vmem:[#allocation308_spill] sm:$0xff] }
 0x54b   : > { %v5267_v22 = vrot.slane %v3689_v8, %v11892_v36  ;;  %v5188_v18 = vrot.slane %v3641_v48, %v11892_v36  ;;  %v4415_v13 = vrot.slane %v15104_v60, %v15060_v61  ;;  %v4420_v0 = vrot.slane %v15105_v15, %v11931_v33  ;;  %v15107_v8 = vld [vmem:[#allocation183_spill] sm:$0xff] }
 0x54c   : > { %v4490_v43 = vsel %vm3809_vm9, %v4489_v52, %v4485_v30  ;;  %v4494_v38 = vrot.slane %v15106_v54, %v15060_v61  ;;  %v4524_v16 = vsel %vm13613_vm3, %v4523_v21, %v4519_v57  ;;  %v4538_v48 = vrot.slane %v15107_v8, %v11850_v10  ;;  %v15108_v52 = vld [vmem:[#allocation64_spill] sm:$0xff] }
 0x54d   : > { %v12677_v5 = vsel %vm13606_vm2, %v5267_v22, %v5263_v2  ;;  %v12680_v58 = vsel %vm13606_vm2, %v5188_v18, %v5184_v35  ;;  %v4499_v2 = vrot.slane %v15103_v20, %v11931_v33  ;;  %v4529_v3 = vsel %vm13612_vm5, %v4528_v27, %v4524_v16 }
 0x54e   : > { %v3458_v1 = vpop.permute.xlu0 %3457  ;;  %v3410_v53 = vpop.permute.xlu1 %3409  ;;  %v4351_v22 = vrot.slane %v15108_v52, %v11874_v40  ;;  %v4416_v18 = vsel %vm3816_vm10, %v4415_v13, %v4411_v63  ;;  %v4495_v49 = vsel %vm3816_vm10, %v4494_v38, %v4490_v43  ;;  %v4533_v51 = vrot.slane %v15109_v28, %v11845_v39  ;;  %v15111_v63 = vld [vmem:[#allocation36_spill] sm:$0xff] }
 0x54f   : > { %v4888_v26 = vrot.slane %v3458_v1, %v15060_v61  ;;  %v4809_v35 = vrot.slane %v3410_v53, %v15060_v61  ;;  %v4500_v57 = vsel %vm3823_vm12, %v4499_v2, %v4495_v49  ;;  %v4421_v27 = vsel %vm3823_vm12, %v4420_v0, %v4416_v18  ;;  %v15113_v53 = vld [vmem:[#allocation335_spill] sm:$0xff]  ;;  %v15114_v2 = vld [vmem:[#allocation41_spill] sm:$0xff]  ;;  %v15115_v0 = vld [vmem:[#allocation42_spill] sm:$0xff] }
 0x550   : > { %v4430_v30 = vrot.slane %v15111_v63, %v11958_v55  ;;  %v4504_v21 = vrot.slane %v15112_v50, %v11928_v46  ;;  %v4534_v1 = vsel %vm3760_vm0, %v4533_v51, %v4529_v3  ;;  %v4425_v43 = vrot.slane %v15113_v53, %v11928_v46  ;;  %v15118_v49 = vld [vmem:[#allocation28_spill] sm:$0xff] }
 0x551   : > { %v12703_v47 = vsel %vm3816_vm10, %v4888_v26, %v4884_v6  ;;  %v12706_v25 = vsel %vm3816_vm10, %v4809_v35, %v4805_v59  ;;  %v15110_v6 = vld [vmem:[#allocation187_spill] sm:$0xff]  ;;  %v4539_v20 = vsel %vm3767_vm4, %v4538_v48, %v4534_v1  ;;  %v4548_v26 = vrot.slane %v15114_v2, %v11874_v40 }
 0x552   : > { %v3476_v31 = vpop.permute.xlu0 %3475  ;;  %v3473_v9 = vpop.permute.xlu1 %3472  ;;  %v4509_v11 = vrot.slane %v15110_v6, %v11958_v55  ;;  %v4318_v60 = vsel %vm13607_vm1, %v4317_v32, %v4313_v4  ;;  %v4352_v13 = vsel %vm3781_vm11, %v4351_v22, %v4347_v12  ;;  %v4505_v15 = vsel %vm3830_vm14, %v4504_v21, %v4500_v57  ;;  %v15117_v12 = vld [vmem:[#allocation40_spill] sm:$0xff]  ;;  %v15121_v21 = vld [vmem:[#allocation222_spill] sm:$0xff] }
 0x553   : > { %v4917_v59 = vrot.slane %v3476_v31, %v11795_v17  ;;  %v4913_v62 = vrot.slane %v3473_v9, %v11820_v41  ;;  %v4543_v54 = vrot.slane %v15115_v0, %v11860_v44  ;;  %v4426_v3 = vsel %vm3830_vm14, %v4425_v43, %v4421_v27  ;;  %v15122_v43 = vld [vmem:[#allocation139_spill] sm:$0xff] }
 0x554   : > { %v4510_v8 = vsel %vm13605_vm15, %v4509_v11, %v4505_v15  ;;  %v4356_v32 = vrot.slane %v15116_v23, %v11868_v7  ;;  %v4431_v4 = vsel %vm13605_vm15, %v4430_v30, %v4426_v3  ;;  %v4514_v22 = vrot.slane %v15117_v12, %v11937_v37  ;;  %v15119_v11 = vld [vmem:[#allocation269_spill] sm:$0xff] }
 0x555   : > { %v4918_v35 = vsel %vm13613_vm3, %v4917_v59, %v4913_v62  ;;  %v4544_v18 = vsel %vm3774_vm7, %v4543_v54, %v4539_v20  ;;  %v4435_v28 = vrot.slane %v15118_v49, %v11937_v37  ;;  %v4553_v59 = vrot.slane %v15119_v11, %v11868_v7 }
 0x556   : > { %v3575_v38 = vpop.permute.xlu0 %3574  ;;  %v3527_v16 = vpop.permute.xlu1 %3526  ;;  %v4549_v51 = vsel %vm3781_vm11, %v4548_v26, %v4544_v18  ;;  %v4357_v57 = vsel %vm3788_vm8, %v4356_v32, %v4352_v13  ;;  %v4515_v6 = vsel %vm13607_vm1, %v4514_v22, %v4510_v8  ;;  %vm5345_vm15 = vcmask 1042434  }
 0x557   : > { %v5080_v48 = vrot.slane %v3575_v38, %v11925_v14  ;;  %v5001_v52 = vrot.slane %v3527_v16, %v11925_v14  ;;  %v4436_v63 = vsel %vm13607_vm1, %v4435_v28, %v4431_v4  ;;  %vm13611_vm2 = vcmask 1043459  }
 0x558   : > { %v4554_v1 = vsel %vm3788_vm8, %v4553_v59, %v4549_v51  ;;  %v5350_v53 = vsel %vm5345_vm15, %v4318_v60, %v12543_v56  ;;  %v5352_v20 = vsel %vm13608_vm13, %v12546_v45, %v15122_v43  ;;  %vm13610_vm1 = vcmask 1043456  }
 0x559   : > { %v5081_v31 = vsel %vm3809_vm9, %v5080_v48, %v12650_v24  ;;  %v5002_v9 = vsel %vm3809_vm9, %v5001_v52, %v12653_v19  ;;  %v15120_v24 = vld [vmem:[#allocation215_spill] sm:$0xff]  ;;  %v5351_v15 = vsel %vm13611_vm2, %v4515_v6, %v5350_v53  ;;  %v5353_v56 = vsel %vm5345_vm15, %v4357_v57, %v5352_v20 }
 0x55a   : > { %v3692_v62 = vpop.permute.xlu0 %3691  ;;  %v3644_v27 = vpop.permute.xlu1 %3643  ;;  %v5344_v19 = vsel %vm13608_vm13, %v15121_v21, %v15120_v24  ;;  %vm13609_vm13 = vcmask 519168  }
 0x55b   : > { %v5272_v30 = vrot.slane %v3692_v62, %v11885_v42  ;;  %v5193_v50 = vrot.slane %v3644_v27, %v11885_v42  ;;  %v5346_v13 = vsel %vm5345_vm15, %v12553_v34, %v5344_v19 }
 0x55c   : > { %v5348_v38 = vsel %vm13611_vm2, %v4436_v63, %v5346_v13 }
 0x55d   : > { %v5273_v2 = vsel %vm3802_vm6, %v5272_v30, %v12677_v5  ;;  %v5194_v26 = vsel %vm3802_vm6, %v5193_v50, %v12680_v58  ;;  %v5354_v5 = vsel %vm13611_vm2, %v4554_v1, %v5353_v56  ;;  %v5372_v58 = vsel %vm13610_vm1, %v5351_v15, 0.0 }
 0x55e   : > { %v3461_v0 = vpop.permute.xlu0 %3460  ;;  %v3413_v54 = vpop.permute.xlu1 %3412  ;;  %v5371_v48 = vsel %vm13610_vm1, %v5348_v38, 0.0  ;;  %v5375_v52 = vsel %vm13609_vm13, %v5354_v5, 0.0  ;;  %vm15139_vm13 = vcmask 589312   ;;  %vm15164_vm1 = vcmask 1048512  }
 0x55f   : > { %v4893_v45 = vrot.slane %v3461_v0, %v11931_v33  ;;  %v4814_v60 = vrot.slane %v3413_v54, %v11931_v33  ;;  %v5373_v4 = vadd.f32 %v5372_v58, %v5371_v48  ;;  %vm15165_vm2 = vmmov %vm15164_vm1 }
 0x561   : > { %v4894_v34 = vsel %vm3823_vm12, %v4893_v45, %v12703_v47  ;;  %v4815_v16 = vsel %vm3823_vm12, %v4814_v60, %v12706_v25  ;;  %v5376_v18 = vadd.f32 %v5375_v52, %v5373_v4  ;;  %v15123_v52 = vld [vmem:[#allocation197_spill] sm:$0xff] }
 0x562   : > { %v3530_v3 = vpop.permute.xlu0 %3529  ;;  %v3479_v8 = vpop.permute.xlu1 %3478 }
 0x563   : > { %v5006_v23 = vrot.slane %v3530_v3, %v15060_v61  ;;  %v4922_v32 = vrot.slane %v3479_v8, %v11803_v29 }
 0x565   : > { %v5007_v12 = vsel %vm3816_vm10, %v5006_v23, %v5002_v9  ;;  %v4923_v22 = vsel %vm13612_vm5, %v4922_v32, %v4918_v35  ;;  %v4558_v23 = vrot.slane %v15123_v52, %v11820_v41  ;;  %v15124_v32 = vld [vmem:[#allocation328_spill] sm:$0xff] }
 0x566   : > { %v3593_v47 = vpop.permute.xlu0 %3592  ;;  %v3578_v49 = vpop.permute.xlu1 %3577  ;;  %v4567_v4 = vrot.slane %v15124_v32, %v11803_v29 }
 0x567   : > { %v5085_v25 = vrot.slane %v3578_v49, %v15060_v61  ;;  %v5110_v6 = vrot.slane %v3593_v47, %v11820_v41 }
 0x568   : > { %5377 = vadd.xlane.f32.xlu1 %v5376_v18 }
 0x569   : > { %v5086_v28 = vsel %vm3816_vm10, %v5085_v25, %v5081_v31  ;;  %v15126_v25 = vld [vmem:[#allocation336_spill] sm:$0xff] }
 0x56a   : > { %v3647_v51 = vpop.permute.xlu0 %3646  ;;  %v3596_v57 = vpop.permute.xlu1 %3595 }
 0x56b   : > { %v5198_v11 = vrot.slane %v3647_v51, %v11925_v14  ;;  %v5114_v59 = vrot.slane %v3596_v57, %v11795_v17  ;;  %v15127_v57 = vld [vmem:[#allocation43_spill] sm:$0xff] }
 0x56d   : > { %v5199_v9 = vsel %vm3809_vm9, %v5198_v11, %v5194_v26  ;;  %v5115_v35 = vsel %vm13613_vm3, %v5114_v59, %v5110_v6  ;;  %v4577_v6 = vrot.slane %v15127_v57, %v11850_v10  ;;  %v15128_v11 = vld [vmem:[#allocation206_spill] sm:$0xff]  ;;  %v15137_v57 = vld [vmem:[#allocation327_spill] sm:$0xff] }
 0x56e   : > { %v3416_v62 = vpop.permute.xlu0 %3415  ;;  %v3695_v27 = vpop.permute.xlu1 %3694  ;;  %v4646_v59 = vrot.slane %v15128_v11, %v11803_v29  ;;  %v15138_v11 = vld [vmem:[#allocation194_spill] sm:$0xff] }
 0x56f   : > { %v4819_v63 = vrot.slane %v3416_v62, %v11928_v46  ;;  %v5277_v30 = vrot.slane %v3695_v27, %v11925_v14  ;;  %v15130_v62 = vld [vmem:[#allocation334_spill] sm:$0xff] }
 0x570   : > { %v4641_v27 = vrot.slane %v15130_v62, %v11795_v17 }
 0x571   : > { %v12805_v31 = vsel %vm3830_vm14, %v4819_v63, %v4815_v16  ;;  %v12808_v50 = vsel %vm3809_vm9, %v5277_v30, %v5273_v2 }
 0x572   : > { %v3482_v24 = vpop.permute.xlu0 %3481  ;;  %v3464_v21 = vpop.permute.xlu1 %3463 }
 0x573   : > { %v4927_v19 = vrot.slane %v3482_v24, %v11845_v39  ;;  %v4898_v1 = vrot.slane %v3464_v21, %v11928_v46 }
 0x575   : > { %v12813_v53 = vsel %vm3760_vm0, %v4927_v19, %v4923_v22  ;;  %v12816_v43 = vsel %vm3830_vm14, %v4898_v1, %v4894_v34  ;;  %v15131_v1 = vld [vmem:[#allocation157_spill] sm:$0xff] }
 0x576   : > { %v3581_v20 = vpop.permute.xlu0 %3580  ;;  %v3533_v26 = vpop.permute.xlu1 %3532 }
 0x577   : > { %v5090_v13 = vrot.slane %v3581_v20, %v11931_v33  ;;  %v5011_v15 = vrot.slane %v3533_v26, %v11931_v33  ;;  %v4587_v20 = vrot.slane %v15131_v1, %v11874_v40 }
 0x579   : > { %v12821_v2 = vsel %vm3823_vm12, %v5090_v13, %v5086_v28  ;;  %v12824_v0 = vsel %vm3823_vm12, %v5011_v15, %v5007_v12  ;;  %v15125_v12 = vld [vmem:[#allocation322_spill] sm:$0xff]  ;;  %v4637_v28 = vrot.slane %v15126_v25, %v11820_v41  ;;  %v15132_v13 = vld [vmem:[#allocation51_spill] sm:$0xff] }
 0x57a   : > { %v3650_v54 = vpop.permute.xlu0 %3649  ;;  %v3599_v38 = vpop.permute.xlu1 %3598  ;;  %v4562_v22 = vrot.slane %v15125_v12, %v11795_v17  ;;  %v4656_v15 = vrot.slane %v15132_v13, %v11850_v10  ;;  %v15142_v13 = vld [vmem:[#allocation239_spill] sm:$0xff] }
 0x57b   : > { %v5203_v56 = vrot.slane %v3650_v54, %v15060_v61  ;;  %v5119_v45 = vrot.slane %v3599_v38, %v11803_v29  ;;  %v4642_v21 = vsel %vm13613_vm3, %v4641_v27, %v4637_v28  ;;  %v15133_v54 = vld [vmem:[#allocation44_spill] sm:$0xff]  ;;  %v15136_v28 = vld [vmem:[#allocation70_spill] sm:$0xff] }
 0x57c   : > { %v4563_v49 = vsel %vm13613_vm3, %v4562_v22, %v4558_v23  ;;  %v4647_v26 = vsel %vm13612_vm5, %v4646_v59, %v4642_v21  ;;  %v4582_v38 = vrot.slane %v15133_v54, %v11860_v44  ;;  %v15135_v22 = vld [vmem:[#allocation199_spill] sm:$0xff]  ;;  %v4661_v59 = vrot.slane %v15138_v11, %v11860_v44  ;;  %v15140_v21 = vld [vmem:[#allocation329_spill] sm:$0xff]  ;;  %v15143_v54 = vld [vmem:[#allocation212_spill] sm:$0xff] }
 0x57d   : > { %v12829_v60 = vsel %vm3816_vm10, %v5203_v56, %v5199_v9  ;;  %v12832_v5 = vsel %vm13612_vm5, %v5119_v45, %v5115_v35  ;;  %v4568_v51 = vsel %vm13612_vm5, %v4567_v4, %v4563_v49  ;;  %v15129_v9 = vld [vmem:[#allocation271_spill] sm:$0xff]  ;;  %v4597_v49 = vrot.slane %v15135_v22, %v11892_v36  ;;  %v15144_v22 = vld [vmem:[#allocation189_spill] sm:$0xff] }
 0x57e   : > { %v12834_v58 = vpop.permute.xlu0 %3712  ;;  %v12836_v34 = vpop.permute.xlu1 %3697  ;;  %v4572_v35 = vrot.slane %v15129_v9, %v11845_v39  ;;  %v15134_v56 = vld [vmem:[#allocation47_spill] sm:$0xff] }
 0x57f   : > { %v4651_v45 = vrot.slane %v15134_v56, %v11845_v39 }
 0x580   : > { %v4573_v24 = vsel %vm3760_vm0, %v4572_v35, %v4568_v51  ;;  %v4666_v51 = vrot.slane %v15136_v28, %v11874_v40 }
 0x581   : > { %v4578_v19 = vsel %vm3767_vm4, %v4577_v6, %v4573_v24  ;;  %v4652_v4 = vsel %vm3760_vm0, %v4651_v45, %v4647_v26  ;;  %v4592_v6 = vrot.slane %v15137_v57, %v11868_v7 }
 0x582   : > { %v12838_v16 = vpop.permute.xlu0 %3418  ;;  %v12840_v3 = vpop.permute.xlu1 %3715  ;;  %v4583_v32 = vsel %vm3774_vm7, %v4582_v38, %v4578_v19  ;;  %v4657_v25 = vsel %vm3767_vm4, %v4656_v15, %v4652_v4  ;;  %v4607_v19 = vrot.slane %v15140_v21, %v11925_v14  ;;  %v4602_v15 = vrot.slane %v15142_v13, %v11885_v42  ;;  %v15150_v13 = vld [vmem:[#allocation202_spill] sm:$0xff] }
 0x583   : > { %v4588_v12 = vsel %vm3781_vm11, %v4587_v20, %v4583_v32  ;;  %v4662_v27 = vsel %vm3774_vm7, %v4661_v59, %v4657_v25  ;;  %v15141_v20 = vld [vmem:[#allocation337_spill] sm:$0xff]  ;;  %v4671_v38 = vrot.slane %v15143_v54, %v11868_v7  ;;  %v15145_v25 = vld [vmem:[#allocation86_spill] sm:$0xff] }
 0x584   : > { %v4593_v62 = vsel %vm3788_vm8, %v4592_v6, %v4588_v12  ;;  %v4667_v1 = vsel %vm3781_vm11, %v4666_v51, %v4662_v27  ;;  %v4676_v26 = vrot.slane %v15141_v20, %v11892_v36  ;;  %v4686_v28 = vrot.slane %v15145_v25, %v11925_v14  ;;  %v15146_v51 = vld [vmem:[#allocation332_spill] sm:$0xff]  ;;  %v15147_v6 = vld [vmem:[#allocation211_spill] sm:$0xff] }
 0x585   : > { %v4598_v24 = vsel %vm15139_vm13, %v4597_v49, %v4593_v62  ;;  %v4672_v4 = vsel %vm3788_vm8, %v4671_v38, %v4667_v1  ;;  %v4617_v49 = vrot.slane %v15144_v22, %v11931_v33  ;;  %v4612_v57 = vrot.slane %v15146_v51, %v15060_v61  ;;  %v15149_v20 = vld [vmem:[#allocation88_spill] sm:$0xff]  ;;  %v15152_v22 = vld [vmem:[#allocation174_spill] sm:$0xff] }
 0x586   : > { %v12842_v8 = vpop.permute.xlu0 %3484  ;;  %v12844_v48 = vpop.permute.xlu1 %3466  ;;  %v4603_v32 = vsel %vm3802_vm6, %v4602_v15, %v4598_v24  ;;  %v4677_v36 = vsel %vm15139_vm13, %v4676_v26, %v4672_v4  ;;  %v4681_v11 = vrot.slane %v15147_v6, %v11885_v42  ;;  %v4696_v26 = vrot.slane %v15149_v20, %v11931_v33  ;;  %v15151_v15 = vld [vmem:[#allocation87_spill] sm:$0xff] }
 0x587   : > { %v4608_v12 = vsel %vm3809_vm9, %v4607_v19, %v4603_v32  ;;  %v15148_v19 = vld [vmem:[#allocation68_spill] sm:$0xff]  ;;  %v4622_v42 = vrot.slane %v15150_v13, %v11928_v46  ;;  %v4691_v54 = vrot.slane %v15151_v15, %v15060_v61 }
 0x588   : > { %v4613_v27 = vsel %vm3816_vm10, %v4612_v57, %v4608_v12  ;;  %v4682_v24 = vsel %vm3802_vm6, %v4681_v11, %v4677_v36  ;;  %v4627_v1 = vrot.slane %v15148_v19, %v11958_v55  ;;  %vm15153_vm6 = vcmask 982912   ;;  %v15155_v57 = vld [vmem:[#allocation92_spill] sm:$0xff]  ;;  %v15157_v19 = vld [vmem:[#allocation95_spill] sm:$0xff] }
 0x589   : > { %v4618_v21 = vsel %vm3823_vm12, %v4617_v49, %v4613_v27  ;;  %v4687_v14 = vsel %vm3809_vm9, %v4686_v28, %v4682_v24  ;;  %v4632_v49 = vrot.slane %v15152_v22, %v11937_v37  ;;  %v15154_v28 = vld [vmem:[#allocation90_spill] sm:$0xff]  ;;  %v4716_v6 = vrot.slane %v15155_v57, %v11820_v41  ;;  %v15156_v24 = vld [vmem:[#allocation89_spill] sm:$0xff]  ;;  %vm15161_vm13 = vmmov %vm15153_vm6 }
 0x58a   : > { %v12852_v18 = vpop.permute.xlu0 %3583  ;;  %v12854_v47 = vpop.permute.xlu1 %3535  ;;  %v4623_v4 = vsel %vm3830_vm14, %v4622_v42, %v4618_v21  ;;  %v4692_v12 = vsel %vm3816_vm10, %v4691_v54, %v4687_v14  ;;  %v4706_v51 = vrot.slane %v15154_v28, %v11958_v55  ;;  %v4824_v11 = vrot.slane %v12838_v16, %v11958_v55  ;;  %v15163_v57 = vld [vmem:[#allocation204_spill] sm:$0xff] }
 0x58b   : > { %v4628_v36 = vsel %vm15153_vm6, %v4627_v1, %v4623_v4  ;;  %v4697_v25 = vsel %vm3823_vm12, %v4696_v26, %v4692_v12  ;;  %v4903_v27 = vrot.slane %v12844_v48, %v11958_v55  ;;  %v4701_v21 = vrot.slane %v15156_v24, %v11928_v46  ;;  %v15159_v48 = vld [vmem:[#allocation93_spill] sm:$0xff] }
 0x58c   : > { %v4725_v1 = vrot.slane %v15157_v19, %v11803_v29  ;;  %vm15158_vm9 = vcmask 1048512   ;;  %v4720_v42 = vrot.slane %v15159_v48, %v11795_v17  ;;  %v5095_v15 = vrot.slane %v12852_v18, %v11928_v46 }
 0x58d   : > { %v4633_v16 = vsel %vm15158_vm9, %v4632_v49, %v4628_v36  ;;  %v5016_v54 = vrot.slane %v12854_v47, %v11928_v46  ;;  %v4825_v18 = vsel %vm15153_vm6, %v4824_v11, %v12805_v31  ;;  %vm15162_vm9 = vmmov %vm15153_vm6 }
 0x58e   : > { %v12868_v63 = vpop.permute.xlu0 %3652  ;;  %v4721_v36 = vsel %vm13613_vm3, %v4720_v42, %v4716_v6  ;;  %v4904_v47 = vsel %vm15162_vm9, %v4903_v27, %v12816_v43  ;;  %v15167_v27 = vld [vmem:[#allocation313_spill] sm:$0xff] }
 0x58f   : > { %v12870_v30 = vpop.permute.xlu1 %3601  ;;  %v4726_v28 = vsel %vm13612_vm5, %v4725_v1, %v4721_v36  ;;  %v5017_v31 = vsel %vm3830_vm14, %v5016_v54, %v12824_v0  ;;  %v4730_v19 = vrot.slane %v15167_v27, %v11845_v39 }
 0x591   : > { %v4731_v42 = vsel %vm3760_vm0, %v4730_v19, %v4726_v28 }
 0x592   : > { %v12884_v52 = vpop.permute.xlu0 %3718 }
 0x593   : > { %v12886_v23 = vpop.permute.xlu1 %3700 }
 0x596   : > { %v12900_v9 = vpop.permute.xlu0 %3469 }
 0x597   : > { %v12902_v35 = vpop.permute.xlu1 %3421  ;;  %v4908_v14 = vrot.slane %v12900_v9, %v11937_v37  ;;  %v15160_v9 = vld [vmem:[#allocation91_spill] sm:$0xff] }
 0x598   : > { %v4829_v20 = vrot.slane %v12902_v35, %v11937_v37  ;;  %v4711_v4 = vrot.slane %v15160_v9, %v11937_v37  ;;  %v4702_v35 = vsel %vm3830_vm14, %v4701_v21, %v4697_v25  ;;  %v4735_v25 = vrot.slane %v15163_v57, %v11850_v10 }
 0x599   : > { %v4707_v49 = vsel %vm15161_vm13, %v4706_v51, %v4702_v35  ;;  %v4909_v24 = vsel %vm15164_vm1, %v4908_v14, %v4904_v47  ;;  %v5096_v51 = vsel %vm3830_vm14, %v5095_v15, %v12821_v2  ;;  %vm15166_vm13 = vmmov %vm15164_vm1  ;;  %v5282_v57 = vrot.slane %v12836_v34, %v15060_v61 }
 0x59a   : > { %v12916_v56 = vpop.permute.xlu0 %3538  ;;  %v4712_v11 = vsel %vm15166_vm13, %v4711_v4, %v4707_v49  ;;  %vm15168_vm1 = vmmov %vm15153_vm6  ;;  %vm15170_vm6 = vcmask 1041409   ;;  %v4736_v35 = vsel %vm3767_vm4, %v4735_v25, %v4731_v42  ;;  %v15175_v49 = vld [vmem:[#allocation312_spill] sm:$0xff]  ;;  %v4932_v25 = vrot.slane %v12842_v8, %v11850_v10 }
 0x59b   : > { %v12918_v45 = vpop.permute.xlu1 %3487  ;;  %v5021_v12 = vrot.slane %v12916_v56, %v11958_v55  ;;  %v4830_v56 = vsel %vm15165_vm2, %v4829_v20, %v4825_v18  ;;  %vm15169_vm2 = vmmov %vm15168_vm1  ;;  %v5358_v20 = vsel %vm15170_vm6, %v4909_v24, %v4712_v11  ;;  %v15176_v24 = vld [vmem:[#allocation72_spill] sm:$0xff]  ;;  %v5287_v61 = vrot.slane %v12886_v23, %v11931_v33 }
 0x59c   : > { %vm15171_vm9 = vmmov %vm15170_vm6  ;;  %v4937_v34 = vrot.slane %v12918_v45, %v11860_v44  ;;  %v5283_v8 = vsel %vm3816_vm10, %v5282_v57, %v12808_v50  ;;  %vm15185_vm6 = vcmask 130112  }
 0x59d   : > { %v5022_v1 = vsel %vm15168_vm1, %v5021_v12, %v5017_v31  ;;  %v5355_v2 = vsel %vm15171_vm9, %v4830_v56, %v4633_v16  ;;  %vm15172_vm5 = vmmov %vm15166_vm13  ;;  %v15174_v12 = vld [vmem:[#allocation133_spill] sm:$0xff]  ;;  %v4740_v16 = vrot.slane %v15175_v49, %v11860_v44  ;;  %v4750_v56 = vrot.slane %v15176_v24, %v11868_v7 }
 0x59e   : > { %v12932_v59 = vpop.permute.xlu0 %3604  ;;  %vm15173_vm3 = vmmov %vm15172_vm5  ;;  %v5307_v31 = vrot.slane %v12834_v58, %v11820_v41  ;;  %vm15186_vm9 = vcmask 195712  }
 0x59f   : > { %v3587_v62 = vpop.permute.xlu1 %3586  ;;  %v4741_v36 = vsel %vm3774_vm7, %v4740_v16, %v4736_v35  ;;  %v5129_v23 = vrot.slane %v12932_v59, %v11850_v10  ;;  %vm15179_vm10 = vmmov %vm15166_vm13 }
 0x5a0   : > { %v5100_v22 = vrot.slane %v3587_v62, %v11958_v55 }
 0x5a2   : > { %v12946_v38 = vpop.permute.xlu0 %3703  ;;  %v5101_v14 = vsel %vm15169_vm2, %v5100_v22, %v5096_v51  ;;  %v4745_v22 = vrot.slane %v15174_v12, %v11874_v40 }
 0x5a3   : > { %v12948_v32 = vpop.permute.xlu1 %3655 }
 0x5a4   : > { %v4746_v28 = vsel %vm3781_vm11, %v4745_v22, %v4741_v36  ;;  %v5213_v58 = vrot.slane %v12948_v32, %v11928_v46 }
 0x5a5   : > { %v4751_v51 = vsel %vm3788_vm8, %v4750_v56, %v4746_v28 }
 0x5a6   : > { %v12972_v26 = vpop.permute.xlu0 %3490 }
 0x5a7   : > { %v12974_v13 = vpop.permute.xlu1 %3721 }
 0x5aa   : > { %v3590_v62 = vpop.permute.xlu0 %3589 }
 0x5ab   : > { %v3542_v21 = vpop.permute.xlu1 %3541  ;;  %v5105_v6 = vrot.slane %v3590_v62, %v11937_v37  ;;  %v5208_v62 = vrot.slane %v12868_v63, %v11931_v33  ;;  %v5311_v63 = vrot.slane %v12840_v3, %v11795_v17  ;;  %v4933_v33 = vsel %vm3767_vm4, %v4932_v25, %v12813_v53 }
 0x5ac   : > { %v5026_v43 = vrot.slane %v3542_v21, %v11937_v37  ;;  %v5124_v21 = vrot.slane %v12870_v30, %v11845_v39  ;;  %v5292_v30 = vrot.slane %v12946_v38, %v11928_v46  ;;  %v5316_v3 = vrot.slane %v12884_v52, %v11803_v29 }
 0x5ad   : > { %v5106_v48 = vsel %vm15172_vm5, %v5105_v6, %v5101_v14  ;;  %v5209_v50 = vsel %vm3823_vm12, %v5208_v62, %v12829_v60  ;;  %v4942_v46 = vrot.slane %v12972_v26, %v11874_v40  ;;  %v5288_v53 = vsel %vm3823_vm12, %v5287_v61, %v5283_v8  ;;  %vm15178_vm5 = vmmov %vm15168_vm1 }
 0x5ae   : > { %v5027_v0 = vsel %vm15173_vm3, %v5026_v43, %v5022_v1  ;;  %v5359_v15 = vsel %vm5345_vm15, %v5106_v48, %v5358_v20  ;;  %v3659_v9 = vpop.permute.xlu0 %3658  ;;  %v5125_v17 = vsel %vm3760_vm0, %v5124_v21, %v12832_v5  ;;  %v4938_v59 = vsel %vm3774_vm7, %v4937_v34, %v4933_v33  ;;  %vm15177_vm3 = vmmov %vm15168_vm1 }
 0x5af   : > { %v5356_v54 = vsel %vm5345_vm15, %v5027_v0, %v5355_v2  ;;  %v3608_v4 = vpop.permute.xlu1 %3607  ;;  %v5218_v45 = vrot.slane %v3659_v9, %v11958_v55  ;;  %v5293_v60 = vsel %vm3830_vm14, %v5292_v30, %v5288_v53  ;;  %v5214_v5 = vsel %vm3830_vm14, %v5213_v58, %v5209_v50  ;;  %vm15180_vm12 = vmmov %vm15179_vm10  ;;  %v15192_v53 = vld [vmem:[#allocation26_spill] sm:$0xff] }
 0x5b0   : > { %v5134_v38 = vrot.slane %v3608_v4, %v11860_v44  ;;  %v5130_v52 = vsel %vm3767_vm4, %v5129_v23, %v5125_v17  ;;  %v4943_v20 = vsel %vm3781_vm11, %v4942_v46, %v4938_v59  ;;  %v5321_v2 = vrot.slane %v12974_v13, %v11845_v39 }
 0x5b1   : > { %v5219_v26 = vsel %vm15177_vm3, %v5218_v45, %v5214_v5  ;;  %vm15181_vm14 = vcmask 1043459   ;;  %vm15183_vm1 = vcmask 1043456   ;;  %v5312_v16 = vsel %vm15185_vm6, %v5311_v63, %v5307_v31 }
 0x5b2   : > { %v13024_v18 = vpop.permute.xlu0 %3724  ;;  %v5135_v42 = vsel %vm3774_vm7, %v5134_v38, %v5130_v52  ;;  %vm15182_vm13 = vmmov %vm15181_vm14  ;;  %vm15187_vm3 = vcmask 1041409  }
 0x5b3   : > { %v3707_v47 = vpop.permute.xlu1 %3706  ;;  %v5326_v22 = vrot.slane %v13024_v18, %v11850_v10  ;;  %vm15184_vm2 = vmmov %vm15183_vm1 }
 0x5b4   : > { %v5297_v11 = vrot.slane %v3707_v47, %v11958_v55 }
 0x5b6   : > { %v3611_v6 = vpop.permute.xlu0 %3610  ;;  %v5298_v1 = vsel %vm15178_vm5, %v5297_v11, %v5293_v60  ;;  %vm15188_vm5 = vmmov %vm15182_vm13 }
 0x5b7   : > { %v3494_v43 = vpop.permute.xlu1 %3493  ;;  %v5139_v14 = vrot.slane %v3611_v6, %v11874_v40 }
 0x5b8   : > { %v4947_v55 = vrot.slane %v3494_v43, %v11868_v7  ;;  %v5631_v43 = vld [vmem:[%s13213_s2] ss:$0 sm:$0xff] }
 0x5b9   : > { %v5140_v36 = vsel %vm3781_vm11, %v5139_v14, %v5135_v42 }
 0x5ba   : > { %v3710_v32 = vpop.permute.xlu0 %3709 }
 0x5bb   : > { %v3662_v27 = vpop.permute.xlu1 %3661  ;;  %v5302_v19 = vrot.slane %v3710_v32, %v11937_v37 }
 0x5bc   : > { %v5223_v29 = vrot.slane %v3662_v27, %v11937_v37  ;;  %v4948_v37 = vsel %vm3788_vm8, %v4947_v55, %v4943_v20 }
 0x5bd   : > { %v5303_v48 = vsel %vm15179_vm10, %v5302_v19, %v5298_v1  ;;  %v5361_v28 = vsel %vm15187_vm3, %v4948_v37, %v4751_v51  ;;  %vm15189_vm10 = vcmask 519168  }
 0x5be   : > { %v5224_v0 = vsel %vm15180_vm12, %v5223_v29, %v5219_v26  ;;  %v5360_v9 = vsel %vm15181_vm14, %v5303_v48, %v5359_v15  ;;  %v3614_v35 = vpop.permute.xlu0 %3613 }
 0x5bf   : > { %v5357_v4 = vsel %vm15182_vm13, %v5224_v0, %v5356_v54  ;;  %v3728_v12 = vpop.permute.xlu1 %3727  ;;  %v5144_v49 = vrot.slane %v3614_v35, %v11868_v7  ;;  %v5380_v13 = vsel %vm15184_vm2, %v5360_v9, 0.0  ;;  %v5317_v54 = vsel %vm15186_vm9, %v5316_v3, %v5312_v16  ;;  %v15191_v3 = vld [vmem:[#allocation9_spill] sm:$0xff]  ;;  %v5417_v35 = vld [vmem:[%s254_s7] sm:$0x3] }
 0x5c0   : > { %v5379_v39 = vsel %vm15183_vm1, %v5357_v4, 0.0  ;;  %v5331_v47 = vrot.slane %v3728_v12, %v11860_v44  ;;  %v5322_v10 = vsel %vm3760_vm0, %v5321_v2, %v5317_v54  ;;  %vm5415_vm0 = vcmask 25600  }
 0x5c1   : > { %v5381_v15 = vadd.f32 %v5380_v13, %v5379_v39  ;;  %v5145_v57 = vsel %vm3788_vm8, %v5144_v49, %v5140_v36  ;;  %v5327_v25 = vsel %vm3767_vm4, %v5326_v22, %v5322_v10  ;;  %vm15190_vm4 = vmmov %vm15187_vm3 }
 0x5c2   : > { %v5362_v18 = vsel %vm5345_vm15, %v5145_v57, %v5361_v28  ;;  %v3734_v24 = vpop.permute.xlu0 %3733  ;;  %v5332_v21 = vsel %vm3774_vm7, %v5331_v47, %v5327_v25  ;;  %vm15193_vm7 = vmmov %vm15187_vm3 }
 0x5c3   : > { %v3731_v56 = vpop.permute.xlu1 %3730  ;;  %v5341_v44 = vrot.slane %v3734_v24, %v11868_v7 }
 0x5c4   : > { %v5336_v62 = vrot.slane %v3731_v56, %v11874_v40 }
 0x5c6   : > { %v5337_v31 = vsel %vm3781_vm11, %v5336_v62, %v5332_v21  ;;  %vm15194_vm11 = vmmov %vm15187_vm3 }
 0x5c7   : > { %v5342_v51 = vsel %vm3788_vm8, %v5341_v44, %v5337_v31 }
 0x5c8   : > { %v5363_v61 = vsel %vm15188_vm5, %v5342_v51, %v5362_v18 }
 0x5c9   : > { %v5382_v34 = vsel %vm15189_vm10, %v5363_v61, 0.0 }
 0x5ca   : > { %v5383_v6 = vadd.f32 %v5382_v34, %v5381_v15 }
 0x5cc   : > { %5384 = vadd.xlane.f32.xlu0 %v5383_v6 }
 0x5e2   : > { %5392 = vbcast.lane.b32.xlu0 %v5631_v43, 256 }
 0x5f5   : > { %v5378_v8 = vpop.xlane.xlu1 %5377 }
 0x659   : > { %v5385_v40 = vpop.xlane.xlu0 %5384 }
 0x65d   : > { %v5393_v63 = vpop.permute.xlu0 %5392 }
 0x65e   : > { %v5395_v7 = vadd.f32 %v5393_v63, %v5378_v8  ;;  %v5396_v30 = vadd.f32 %v5393_v63, %v5385_v40 }
 0x660   : > { %5400 = vperm.xlu1 %7126, %v5395_v7  }
 0x664   : > { %5403 = vperm.xlu1 %7126, %v5396_v30  }
 0x6df   : > { %v5401_v58 = vpop.permute.xlu1 %5400 }
 0x6e0   : > { %v5408_v23 = vrot.slane %v5401_v58, %v11820_v41 }
 0x6e3   : > { %v5404_v33 = vpop.permute.xlu1 %5403 }
 0x6e4   : > { %v5412_v45 = vrot.slane %v5404_v33, %v11820_v41 }
 0x6e6   : > { %v5413_v11 = vsel %vm15190_vm4, %v5412_v45, %v5408_v23 }
 0x6e7   : > { %v5418_v50 = vsel %vm5415_vm0, %v5413_v11, -inf  ;;  %5416 = vst.msk [vmem:[%s13119_s23] sm:$0x3] %vm5415_vm0, %v5413_v11 }
 0x6e8   : > { %5419 = vmax.xlane.f32.xlu0 %v5418_v50 }
 0x775   : > { %v5420_v17 = vpop.xlane.xlu0 %5419 }
 0x776   : > { %v5425_v46 = vrot.slane %v5420_v17, %v15191_v3  ;;  %v5429_v59 = vrot.slane %v5420_v17, %v15192_v53 }
 0x778   : > { %v5432_v38 = vsub.f32 %v5395_v7, %v5425_v46  ;;  %v5433_v55 = vsub.f32 %v5396_v30, %v5429_v59 }
 0x77a   : > { %v5434_v32 = vmul.f32 1.442695, %v5432_v38  ;;  %5464 = vperm.xlu0 %7125, %v5432_v38   ;;  %v5436_v27 = vmul.f32 1.442695, %v5433_v55 }
 0x77c   : > { %7448 = vpow2.f32 %v5434_v32 }
 0x77d   : > { %7450 = vpow2.f32 %v5436_v27 }
 0x786   : > { %v7449_v60 = vpop.eup %7448 }
 0x787   : > { %5441 = vperm.xlu1 %7126, %v7449_v60   ;;  %v7451_v5 = vpop.eup %7450 }
 0x78b   : > { %5444 = vperm.xlu1 %7126, %v7451_v5  }
 0x7f9   : > { %v5465_v48 = vpop.permute.xlu0 %5464 }
 0x7fa   : > { %v5472_v37 = vrot.slane %v5465_v48, %v11820_v41 }
 0x806   : > { %v5442_v19 = vpop.permute.xlu1 %5441 }
 0x807   : > { %v5449_v52 = vrot.slane %v5442_v19, %v11820_v41 }
 0x80a   : > { %v5445_v29 = vpop.permute.xlu1 %5444 }
 0x80b   : > { %v5453_v26 = vrot.slane %v5445_v29, %v11820_v41 }
 0x80d   : > { %v5454_v1 = vsel %vm15193_vm7, %v5453_v26, %v5449_v52 }
 0x80e   : > { %v5456_v14 = vsel %vm5415_vm0, %v5454_v1, 0.0 }
 0x80f   : > { %5457 = vadd.xlane.f32.xlu1 %v5456_v14 }
 0x820   : > { %5467 = vperm.xlu1 %7126, %v5433_v55  }
 0x89c   : > { %v5458_v20 = vpop.xlane.xlu1 %5457 }
 0x89d   : > { %7452 = vlog2.f32 %v5458_v20 }
 0x8a0   : > { %v5468_v2 = vpop.permute.xlu1 %5467 }
 0x8a1   : > { %v5476_v0 = vrot.slane %v5468_v2, %v11820_v41 }
 0x8a3   : > { %v5477_v4 = vsel %vm15194_vm11, %v5476_v0, %v5472_v37 }
 0x8a7   : > { %v7453_v42 = vpop.eup %7452 }
 0x8a8   : > { %v5460_v9 = vmul.f32 0.6931472, %v7453_v42 }
 0x8aa   : > { %v5479_v12 = vsub.f32 %v5460_v9, %v5477_v4 }
 0x8ac   : > { %v5480_v22 = vmul.f32 %v5479_v12, %v5417_v35 }
 0x8ae   : > { %v5481_v49 = vsel %vm5415_vm0, %v5480_v22, 0.0 }
 0x8af   : > { %5482 = vadd.xlane.f32.xlu0 %v5481_v49 }
 0x8b0   : > { %7467 = shalt.err (!%p7464_p4)
}
 0x8b1   : > { %s7468_s23 = scalar_lea.hbm %s13142_s11, 32  ;;  %s7472_s6 = scalar_lea.hbm %s13215_s4, 64 }
 0x8b2   : > { %p7469_p7 = scmp.ne.s32.totalorder %s13142_s11, %s7468_s23  ;;  %p7473_p10 = scmp.lt.u32.totalorder %s13142_s11, %s13215_s4 }
 0x8b3   : > { %p7474_p11 = scmp.lt.u32.totalorder %s7472_s6, %s7468_s23  ;;  %p7476_p13 = scmp.lt.u32.totalorder %s7468_s23, %s13142_s11 }
 0x8b4   : > { %p7470_p8 = pnand %p7469_p7, %p7621_p5 }
 0x8b5   : > { %p7475_p12 = por %p7474_p11, %p7473_p10 }
 0x8b6   : > { %p7471_p9 = pneg %p7470_p8 }
 0x8b7   : > { %p7477_p0 = por %p7476_p13, %p7475_p12 }
 0x8b9   : > { %p7478_p1 = pnand %p7477_p0, %p7471_p9 }
 0x8bb   : > { %7481 = shalt.err (!%p7478_p1)
}
 0x8bc   : > { %7080 = dma.vmem_to_hbm [thread:$0]  (%p7621_p5), %s5512_s12, 32, %s13142_s11, %s5494_s13  }
 0x8bd   : > { %s243_s9 = scalar_lea.vmem [#allocation4], %s13116_s16  ;;  %s5634_s14 = sshll.u32 %s7604_s22, 4 }
 0x8be   : > { %s5524_s10 = sshll.u32 %s243_s9, 4  ;;  %s13170_s13 = scalar_lea.hbm %s13216_s5, %s5634_s14  ;;  %s13165_s10 = int_to_ptr.vmem [resolvable:$true] %s5524_s10 }
 0x8bf   : > { %s5499_s17 = scalar_lea.sflag [#allocation5], %s13116_s16  ;;  %s7482_s25 = scalar_lea.vmem %s13165_s10, 16 }
 0x8c0   : > { %p7483_p2 = scmp.ne.s32.totalorder %s13165_s10, %s7482_s25  ;;  %s7552_s22 = smov [#allocation4]  }
 0x8c1   : > { %s7486_s23 = sshll.u32 %s7552_s22, 4  ;;  %s7487_s23 = int_to_ptr.vmem [resolvable:$false] %s7486_s23 }
 0x8c2   : > { %p7484_p3 = pnand %p7483_p2, %p7621_p5  ;;  %s7488_s26 = scalar_lea.vmem %s7487_s23, 32 }
 0x8c3   : > { %p7489_p7 = scmp.lt.s32.totalorder %s13165_s10, %s7487_s23  ;;  %p7490_p8 = scmp.lt.s32.totalorder %s7488_s26, %s7482_s25 }
 0x8c4   : > { %p7485_p4 = pneg %p7484_p3 }
 0x8c5   : > { %p7491_p9 = por %p7490_p8, %p7489_p7 }
 0x8c7   : > { %p7492_p10 = pnand %p7491_p9, %p7485_p4 }
 0x93c   : > { %v5483_v41 = vpop.xlane.xlu0 %5482 }
 0x93d   : > { %v5484_v39 = vrot.slane %v5483_v41, 4 }
 0x93f   : > { %v5485_v13 = vadd.f32 %v5484_v39, %v5483_v41 }
 0x941   : > { %v5486_v16 = vrot.slane %v5485_v13, 2 }
 0x943   : > { %v5487_v36 = vadd.f32 %v5486_v16, %v5485_v13 }
 0x945   : > { %v5488_v47 = vrot.slane %v5487_v36, 1 }
 0x947   : > { %v5489_v15 = vadd.f32 %v5488_v47, %v5487_v36 }
 0x949   : > { %7078 = vpush %v5489_v15 }
 0x97a   : > { %s7079_s15 = spop %7078 }
 0x97b   : > { %v5491_v54 = vstv %s7079_s15 }
 0x97c   : > { %5492 = vst [vmem:[%s243_s9] sm:$0x1] %v5491_v54 }
 0x97d   : > { %7495 = shalt.err (!%p7492_p10)
}
 0x97e   : > { %s7496_s16 = scalar_lea.hbm %s13170_s13, 16  ;;  %s7500_s7 = scalar_lea.hbm %s13216_s5, 32 }
 0x97f   : > { %p7497_p11 = scmp.ne.s32.totalorder %s13170_s13, %s7496_s16  ;;  %p7501_p0 = scmp.lt.u32.totalorder %s13170_s13, %s13216_s5 }
 0x980   : > { %p7502_p1 = scmp.lt.u32.totalorder %s7500_s7, %s7496_s16  ;;  %p7504_p3 = scmp.lt.u32.totalorder %s7496_s16, %s13170_s13 }
 0x981   : > { %p7498_p12 = pnand %p7497_p11, %p7621_p5 }
 0x982   : > { %p7503_p2 = por %p7502_p1, %p7501_p0 }
 0x983   : > { %p7499_p13 = pneg %p7498_p12 }
 0x984   : > { %p7505_p4 = por %p7504_p3, %p7503_p2 }
 0x986   : > { %p7506_p7 = pnand %p7505_p4, %p7499_p13 }
 0x988   : > { %7509 = shalt.err (!%p7506_p7)
}
 0x989   : > { %7081 = dma.vmem_to_hbm [thread:$0]  (%p7621_p5), %s13165_s10, 16, %s13170_s13, %s5499_s17  }
 0x98a PF: > { %p7091_p8 = scmp.ge.s32.totalorder %s7548_s21, 2  ;;  %s5536_s14 = sand.u32 1, %s7536_s18  }
 0x98b   : > { %s5537_s15 = scalar_lea.sflag [#allocation3], %s5536_s14 }
 0x98c   : > { %p7085_p9 = pnand %p7091_p8, %p7625_p6 }
 0x98e   : > { %7527 = dma.done.wait (!%p7085_p9), %s5537_s15, 32  }
 0x98f   : > { %7529 = vsyncadd (!%p7085_p9), %s5537_s15, 4294967264  ;;  %s5546_s11 = scalar_lea.sflag [#allocation5], %s5536_s14 }
 0x990   : > { %7531 = dma.done.wait (!%p7085_p9), %s5546_s11, 16  }
 0x991   : > { %7533 = vsyncadd (!%p7085_p9), %s5546_s11, 4294967280  ;;  %p19_p5 = scmp.ge.s32.totalorder %s7608_s24, 4   ;;  %s15195_s18 = smov %s7540_s19 }
 0x992   : > { %s15196_s19 = smov %s7544_s20  ;;  %s15197_s20 = smov %s7619_s27 }
 0x993   : > { %s15198_s21 = smov %s7608_s24  ;;  %21 = sbr.rel (!%p19_p5) target bundleno = 5 (0x5), region = 91 }
 0x99a   :  { %5550 = vsyncpa [#allocation3], 1 }
 0x99b   :  { %5552 = vsyncpa [#allocation3 + $0x1], 1 }
 0x99c   :  { %5553 = vsyncpa [#allocation5], 1 }
 0x99d   :  { %5555 = vsyncpa [#allocation5 + $0x1], 1 }

</bundles_post_ra>
